<compile_context>
chip_gen: v6e
topology: v6e:2x2x1
jax: 0.10.0
libtpu: 0.0.40
codegen_flags: <defaults>
</compile_context>

<pallas_src>
import jax
import jax.numpy as jnp
from jax.experimental import pallas as pl
from jax.experimental.pallas import tpu as pltpu

# ---- model dims (module defaults, small batch/seq/vocab for the demo) ----
VOCAB = 128
EMB = 128       # embedding_dim
HID = 256       # GRU hidden size (fixed in the module)
LAT = 64        # latent_dim
BATCH = 2
SEQ = 8
BPAD = 8        # batch padded to the f32 sublane tile


def _gru_step_pre(gi, h, whh_bf16, bhh_n, H):
    """PyTorch GRUCell (gate order [r, z, n]) with the input-side projection `gi` precomputed.
    `gi` (f32) already contains b_ih for all gates and b_hh folded in for r/z; b_hh for the n
    gate is added inside the r* term (matching PyTorch).  h stays f32; only the MXU operand is
    cast to bf16 (native bf16 x bf16 -> f32 MXU mode), gate math stays f32 on VPU/EUP."""
    gh = jnp.dot(h.astype(jnp.bfloat16), whh_bf16, preferred_element_type=jnp.float32)
    r = jax.nn.sigmoid(gi[:, 0:H] + gh[:, 0:H])
    z = jax.nn.sigmoid(gi[:, H:2 * H] + gh[:, H:2 * H])
    n = jnp.tanh(gi[:, 2 * H:3 * H] + r * (gh[:, 2 * H:3 * H] + bhh_n))
    return (1.0 - z) * n + z * h


def vae_kernel(
    embx_ref,        # (T*BP, E) bf16  time-major flattened encoder embeddings (batch padded)
    eps_ref,         # (BP, L)   f32   reparameterization noise (padded rows zero)
    emb0_ref,        # (BP, E)   bf16  token-0 embedding broadcast over the padded batch
    enc_wih_ref, enc_whh_ref, enc_bi_ref, enc_bhhn_ref,   # encoder GRU (bf16 W, f32 folded biases)
    wmulv_ref, bmulv_ref,                                 # fused fc_mu | fc_logvar
    wdin_ref, bdin_ref,                                   # decoder_input linear
    dec_wih_ref, dec_whh_ref, dec_bi_ref, dec_bhhn_ref,   # decoder GRU
    wout_ref, bout_ref,                                   # fc_out
    logits_ref,      # (T*BP, V)  f32 out
    mulv_ref,        # (BP, 2L)   f32 out: [mu | logvar]
):
    TB, E = embx_ref.shape
    BP, L = eps_ref.shape
    T = TB // BP
    H = enc_whh_ref.shape[0]

    # Weights stay bf16 — no f32 shadow copies, single-pass MXU.
    enc_wih = enc_wih_ref[...]
    enc_whh = enc_whh_ref[...]
    dec_wih = dec_wih_ref[...]
    dec_whh = dec_whh_ref[...]
    wmulv = wmulv_ref[...]
    wdin = wdin_ref[...]
    wout = wout_ref[...]

    # Hoist loop-carried bias broadcasts out of the recurrences (JAX doesn't CSE broadcast_in_dim).
    enc_bhhn = jnp.broadcast_to(enc_bhhn_ref[...], (BP, H))
    dec_bhhn = jnp.broadcast_to(dec_bhhn_ref[...], (BP, H))

    # ---------------- encoder GRU ----------------
    # All T input-side projections in one MXU call: (T*BP, E) @ (E, 3H).
    gi_all = (jnp.dot(embx_ref[...], enc_wih, preferred_element_type=jnp.float32)
              + enc_bi_ref[...])                                            # (T*BP, 3H) f32

    h = jnp.zeros((BP, H), jnp.float32)
    for t in range(T):                                     # static unroll (T is compile-time 8)
        h = _gru_step_pre(gi_all[t * BP:(t + 1) * BP, :], h, enc_whh, enc_bhhn, H)

    # ---------------- mu / logvar / reparameterize (fused, lane-dense) ----------------
    mulv = (jnp.dot(h.astype(jnp.bfloat16), wmulv, preferred_element_type=jnp.float32)
            + bmulv_ref[...])                                               # (BP, 2L)
    mulv_ref[...] = mulv
    mu = mulv[:, 0:L]
    logvar = mulv[:, L:2 * L]
    z = mu + eps_ref[...] * jnp.exp(0.5 * logvar)

    # ---------------- decoder ----------------
    h = (jnp.dot(z.astype(jnp.bfloat16), wdin, preferred_element_type=jnp.float32)
         + bdin_ref[...])                                                   # (BP, H)

    # Decoder consumes the token-0 embedding every step (fidelity note), so its input-side
    # projection is loop-invariant: one MXU call outside the recurrence.
    gi_dec = (jnp.dot(emb0_ref[...], dec_wih, preferred_element_type=jnp.float32)
              + dec_bi_ref[...])                                            # (BP, 3H)

    hs = []
    for t in range(T):                                     # static unroll (T=8)
        h = _gru_step_pre(gi_dec, h, dec_whh, dec_bhhn, H)
        hs.append(h)                                       # stays in vregs — no VMEM round trip

    # Tile-aligned concat (8-row f32 pieces), single cast, single vocab matmul over all steps,
    # one unmasked lane-dense (T*BP, V) store.
    hs_all = jnp.concatenate(hs, axis=0).astype(jnp.bfloat16)               # (T*BP, H)
    logits_ref[...] = (
        jnp.dot(hs_all, wout, preferred_element_type=jnp.float32) + bout_ref[...]
    )


def init_params(key):
    """Deterministic synthetic parameters (shapes from VocabVAE.__init__)."""
    ks = jax.random.split(key, 16)
    s = 0.05

    def rnd(k, shape):
        return (s * jax.random.normal(k, shape)).astype(jnp.float32)

    p = {
        "embedding": rnd(ks[0], (VOCAB, EMB)),
        # GRU weights stored transposed: (in, 3H); gate order [r, z, n]
        "enc_wih": rnd(ks[1], (EMB, 3 * HID)),
        "enc_whh": rnd(ks[2], (HID, 3 * HID)),
        "enc_bih": rnd(ks[3], (1, 3 * HID)),
        "enc_bhh": rnd(ks[4], (1, 3 * HID)),
        "wmu": rnd(ks[5], (HID, LAT)),
        "bmu": rnd(ks[6], (1, LAT)),
        "wlv": rnd(ks[7], (HID, LAT)),
        "blv": rnd(ks[8], (1, LAT)),
        "wdin": rnd(ks[9], (LAT, HID)),
        "bdin": rnd(ks[10], (1, HID)),
        "dec_wih": rnd(ks[11], (EMB, 3 * HID)),
        "dec_whh": rnd(ks[12], (HID, 3 * HID)),
        "dec_bih": rnd(ks[13], (1, 3 * HID)),
        "dec_bhh": rnd(ks[14], (1, 3 * HID)),
        "wout": rnd(ks[15], (HID, VOCAB)),
        "bout": jnp.zeros((1, VOCAB), jnp.float32),
    }
    return p


def _fold_gru_bias(bih, bhh, H):
    """Fold b_hh into b_ih for the r/z gates; return (folded (1,3H), b_hh_n (1,H))."""
    folded = jnp.concatenate([bih[:, :2 * H] + bhh[:, :2 * H], bih[:, 2 * H:]], axis=1)
    return folded, bhh[:, 2 * H:]


def vocab_vae_forward(params, x_tokens, eps):
    """x_tokens: (B, T) int32 token ids; eps: (B, L) reparam noise.
    Returns (logits (B, T, VOCAB), mu (B, L), logvar (B, L))."""
    B, T = x_tokens.shape
    BP = BPAD
    assert B <= BP

    # glue: embedding gather + time-major + pad batch to the (8,128) sublane tile
    emb_x = jnp.take(params["embedding"], x_tokens, axis=0)               # (B, T, E)
    emb_x = jnp.transpose(emb_x, (1, 0, 2))                               # (T, B, E)
    emb_x = jnp.pad(emb_x, ((0, 0), (0, BP - B), (0, 0)))                 # (T, BP, E)
    emb_x = emb_x.reshape(T * BP, EMB).astype(jnp.bfloat16)
    eps_p = jnp.pad(eps.astype(jnp.float32), ((0, BP - B), (0, 0)))       # (BP, L)
    emb0 = jnp.broadcast_to(params["embedding"][0:1, :], (BP, EMB)).astype(jnp.bfloat16)

    # bias folding + mu/logvar fusion (layout plumbing, outside the kernel)
    enc_bi, enc_bhhn = _fold_gru_bias(params["enc_bih"], params["enc_bhh"], HID)
    dec_bi, dec_bhhn = _fold_gru_bias(params["dec_bih"], params["dec_bhh"], HID)
    wmulv = jnp.concatenate([params["wmu"], params["wlv"]], axis=1)        # (HID, 2*LAT)
    bmulv = jnp.concatenate([params["bmu"], params["blv"]], axis=1)        # (1, 2*LAT)

    bf16 = lambda w: w.astype(jnp.bfloat16)   # halve weight DMA; MXU-native bf16, f32 accumulate

    vmem = pl.BlockSpec(memory_space=pltpu.MemorySpace.VMEM)
    inputs = (
        emb_x, eps_p, emb0,
        bf16(params["enc_wih"]), bf16(params["enc_whh"]), enc_bi, enc_bhhn,
        bf16(wmulv), bmulv,
        bf16(params["wdin"]), params["bdin"],
        bf16(params["dec_wih"]), bf16(params["dec_whh"]), dec_bi, dec_bhhn,
        bf16(params["wout"]), params["bout"],
    )

    logits_flat, mulv = pl.pallas_call(
        vae_kernel,
        out_shape=(
            jax.ShapeDtypeStruct((T * BP, VOCAB), jnp.float32),   # lane-dense (64, 128)
            jax.ShapeDtypeStruct((BP, 2 * LAT), jnp.float32),     # lane-dense (8, 128)
        ),
        in_specs=[vmem] * len(inputs),
        out_specs=(vmem, vmem),
        compiler_params=pltpu.CompilerParams(vmem_limit_bytes=16 << 20),
    )(*inputs)

    # strip batch padding
    logits = jnp.transpose(logits_flat.reshape(T, BP, VOCAB)[:, :B, :], (1, 0, 2))  # (B, T, V)
    mu = mulv[:B, :LAT]
    logvar = mulv[:B, LAT:]
    return logits, mu, logvar


if __name__ == "__main__":
    key = jax.random.PRNGKey(0)
    k_param, k_x, k_eps = jax.random.split(key, 3)

    params = init_params(k_param)
    x = jax.random.randint(k_x, (BATCH, SEQ), 0, VOCAB, dtype=jnp.int32)
    eps = jax.random.normal(k_eps, (BATCH, LAT), dtype=jnp.float32)

    logits, mu, logvar = jax.jit(vocab_vae_forward)(params, x, eps)
    jax.block_until_ready((logits, mu, logvar))

    assert logits.shape == (BATCH, SEQ, VOCAB)
    assert mu.shape == (BATCH, LAT) and logvar.shape == (BATCH, LAT)
    assert bool(jnp.all(jnp.isfinite(logits))) and bool(jnp.all(jnp.isfinite(mu)))
    assert bool(jnp.all(jnp.isfinite(logvar)))
    print("KERNEL_OK")
</pallas_src>

<mosaic_0001>
module attributes {stable_mosaic.version = 11 : i64} {
  func.func @vae_kernel(%arg0: memref<64x128xbf16, #tpu.memory_space<vmem>>, %arg1: memref<8x64xf32, #tpu.memory_space<vmem>>, %arg2: memref<8x128xbf16, #tpu.memory_space<vmem>>, %arg3: memref<128x768xbf16, #tpu.memory_space<vmem>>, %arg4: memref<256x768xbf16, #tpu.memory_space<vmem>>, %arg5: memref<1x768xf32, #tpu.memory_space<vmem>>, %arg6: memref<1x256xf32, #tpu.memory_space<vmem>>, %arg7: memref<256x128xbf16, #tpu.memory_space<vmem>>, %arg8: memref<1x128xf32, #tpu.memory_space<vmem>>, %arg9: memref<64x256xbf16, #tpu.memory_space<vmem>>, %arg10: memref<1x256xf32, #tpu.memory_space<vmem>>, %arg11: memref<128x768xbf16, #tpu.memory_space<vmem>>, %arg12: memref<256x768xbf16, #tpu.memory_space<vmem>>, %arg13: memref<1x768xf32, #tpu.memory_space<vmem>>, %arg14: memref<1x256xf32, #tpu.memory_space<vmem>>, %arg15: memref<256x128xbf16, #tpu.memory_space<vmem>>, %arg16: memref<1x128xf32, #tpu.memory_space<vmem>>, %arg17: memref<64x128xf32, #tpu.memory_space<vmem>>, %arg18: memref<8x128xf32, #tpu.memory_space<vmem>>) attributes {dimension_semantics = [], scalar_prefetch = 0 : i64, scratch_operands = 0 : i64, tpu.core_type = #tpu.core_type<tc>} {
    %c0 = arith.constant 0 : index
    %c0_0 = arith.constant 0 : index
    %0 = vector.load %arg3[%c0, %c0_0] : memref<128x768xbf16, #tpu.memory_space<vmem>>, vector<128x768xbf16>
    %c0_1 = arith.constant 0 : index
    %c0_2 = arith.constant 0 : index
    %1 = vector.load %arg4[%c0_1, %c0_2] : memref<256x768xbf16, #tpu.memory_space<vmem>>, vector<256x768xbf16>
    %c0_3 = arith.constant 0 : index
    %c0_4 = arith.constant 0 : index
    %2 = vector.load %arg11[%c0_3, %c0_4] : memref<128x768xbf16, #tpu.memory_space<vmem>>, vector<128x768xbf16>
    %c0_5 = arith.constant 0 : index
    %c0_6 = arith.constant 0 : index
    %3 = vector.load %arg12[%c0_5, %c0_6] : memref<256x768xbf16, #tpu.memory_space<vmem>>, vector<256x768xbf16>
    %c0_7 = arith.constant 0 : index
    %c0_8 = arith.constant 0 : index
    %4 = vector.load %arg7[%c0_7, %c0_8] : memref<256x128xbf16, #tpu.memory_space<vmem>>, vector<256x128xbf16>
    %c0_9 = arith.constant 0 : index
    %c0_10 = arith.constant 0 : index
    %5 = vector.load %arg9[%c0_9, %c0_10] : memref<64x256xbf16, #tpu.memory_space<vmem>>, vector<64x256xbf16>
    %c0_11 = arith.constant 0 : index
    %c0_12 = arith.constant 0 : index
    %6 = vector.load %arg15[%c0_11, %c0_12] : memref<256x128xbf16, #tpu.memory_space<vmem>>, vector<256x128xbf16>
    %c0_13 = arith.constant 0 : index
    %c0_14 = arith.constant 0 : index
    %7 = vector.load %arg6[%c0_13, %c0_14] : memref<1x256xf32, #tpu.memory_space<vmem>>, vector<1x256xf32>
    %8 = vector.shape_cast %7 : vector<1x256xf32> to vector<1x256xf32>
    %9 = vector.broadcast %8 : vector<1x256xf32> to vector<8x256xf32>
    %c0_15 = arith.constant 0 : index
    %c0_16 = arith.constant 0 : index
    %10 = vector.load %arg14[%c0_15, %c0_16] : memref<1x256xf32, #tpu.memory_space<vmem>>, vector<1x256xf32>
    %11 = vector.shape_cast %10 : vector<1x256xf32> to vector<1x256xf32>
    %12 = vector.broadcast %11 : vector<1x256xf32> to vector<8x256xf32>
    %c0_17 = arith.constant 0 : index
    %c0_18 = arith.constant 0 : index
    %13 = vector.load %arg0[%c0_17, %c0_18] : memref<64x128xbf16, #tpu.memory_space<vmem>>, vector<64x128xbf16>
    %cst = arith.constant dense<0.000000e+00> : vector<64x768xf32>
    %14 = tpu.matmul %13, %0, %cst {dimension_numbers = #tpu.dot_dimension_numbers<[1], [0], [0], [1], [0, 0, 1, 1], [], []>} : vector<64x128xbf16>, vector<128x768xbf16>, vector<64x768xf32> -> vector<64x768xf32>
    %c0_19 = arith.constant 0 : index
    %c0_20 = arith.constant 0 : index
    %15 = vector.load %arg5[%c0_19, %c0_20] : memref<1x768xf32, #tpu.memory_space<vmem>>, vector<1x768xf32>
    %16 = vector.broadcast %15 : vector<1x768xf32> to vector<64x768xf32>
    %17 = arith.addf %14, %16 : vector<64x768xf32>
    %cst_21 = arith.constant 0.000000e+00 : f32
    %18 = vector.broadcast %cst_21 : f32 to vector<8x256xf32>
    %19 = vector.extract_strided_slice %17 {offsets = [0, 0], sizes = [8, 768], strides = [1, 1]} : vector<64x768xf32> to vector<8x768xf32>
    %20 = arith.truncf %18 : vector<8x256xf32> to vector<8x256xbf16>
    %cst_22 = arith.constant dense<0.000000e+00> : vector<8x768xf32>
    %21 = tpu.matmul %20, %1, %cst_22 {dimension_numbers = #tpu.dot_dimension_numbers<[1], [0], [0], [1], [0, 0, 1, 1], [], []>} : vector<8x256xbf16>, vector<256x768xbf16>, vector<8x768xf32> -> vector<8x768xf32>
    %22 = vector.extract_strided_slice %19 {offsets = [0, 0], sizes = [8, 256], strides = [1, 1]} : vector<8x768xf32> to vector<8x256xf32>
    %23 = vector.extract_strided_slice %21 {offsets = [0, 0], sizes = [8, 256], strides = [1, 1]} : vector<8x768xf32> to vector<8x256xf32>
    %24 = arith.addf %22, %23 : vector<8x256xf32>
    %25 = arith.negf %24 : vector<8x256xf32>
    %26 = math.exp %25 : vector<8x256xf32>
    %cst_23 = arith.constant 1.000000e+00 : f32
    %27 = vector.broadcast %cst_23 : f32 to vector<8x256xf32>
    %28 = arith.addf %27, %26 : vector<8x256xf32>
    %29 = arith.divf %27, %28 : vector<8x256xf32>
    %30 = vector.extract_strided_slice %19 {offsets = [0, 256], sizes = [8, 256], strides = [1, 1]} : vector<8x768xf32> to vector<8x256xf32>
    %31 = vector.extract_strided_slice %21 {offsets = [0, 256], sizes = [8, 256], strides = [1, 1]} : vector<8x768xf32> to vector<8x256xf32>
    %32 = arith.addf %30, %31 : vector<8x256xf32>
    %33 = arith.negf %32 : vector<8x256xf32>
    %34 = math.exp %33 : vector<8x256xf32>
    %cst_24 = arith.constant 1.000000e+00 : f32
    %35 = vector.broadcast %cst_24 : f32 to vector<8x256xf32>
    %36 = arith.addf %35, %34 : vector<8x256xf32>
    %37 = arith.divf %35, %36 : vector<8x256xf32>
    %38 = vector.extract_strided_slice %19 {offsets = [0, 512], sizes = [8, 256], strides = [1, 1]} : vector<8x768xf32> to vector<8x256xf32>
    %39 = vector.extract_strided_slice %21 {offsets = [0, 512], sizes = [8, 256], strides = [1, 1]} : vector<8x768xf32> to vector<8x256xf32>
    %40 = arith.addf %39, %9 : vector<8x256xf32>
    %41 = arith.mulf %29, %40 : vector<8x256xf32>
    %42 = arith.addf %38, %41 : vector<8x256xf32>
    %43 = math.tanh %42 : vector<8x256xf32>
    %cst_25 = arith.constant 1.000000e+00 : f32
    %44 = vector.broadcast %cst_25 : f32 to vector<8x256xf32>
    %45 = arith.subf %44, %37 : vector<8x256xf32>
    %46 = arith.mulf %45, %43 : vector<8x256xf32>
    %47 = arith.mulf %37, %18 : vector<8x256xf32>
    %48 = arith.addf %46, %47 : vector<8x256xf32>
    %49 = vector.extract_strided_slice %17 {offsets = [8, 0], sizes = [8, 768], strides = [1, 1]} : vector<64x768xf32> to vector<8x768xf32>
    %50 = arith.truncf %48 : vector<8x256xf32> to vector<8x256xbf16>
    %cst_26 = arith.constant dense<0.000000e+00> : vector<8x768xf32>
    %51 = tpu.matmul %50, %1, %cst_26 {dimension_numbers = #tpu.dot_dimension_numbers<[1], [0], [0], [1], [0, 0, 1, 1], [], []>} : vector<8x256xbf16>, vector<256x768xbf16>, vector<8x768xf32> -> vector<8x768xf32>
    %52 = vector.extract_strided_slice %49 {offsets = [0, 0], sizes = [8, 256], strides = [1, 1]} : vector<8x768xf32> to vector<8x256xf32>
    %53 = vector.extract_strided_slice %51 {offsets = [0, 0], sizes = [8, 256], strides = [1, 1]} : vector<8x768xf32> to vector<8x256xf32>
    %54 = arith.addf %52, %53 : vector<8x256xf32>
    %55 = arith.negf %54 : vector<8x256xf32>
    %56 = math.exp %55 : vector<8x256xf32>
    %cst_27 = arith.constant 1.000000e+00 : f32
    %57 = vector.broadcast %cst_27 : f32 to vector<8x256xf32>
    %58 = arith.addf %57, %56 : vector<8x256xf32>
    %59 = arith.divf %57, %58 : vector<8x256xf32>
    %60 = vector.extract_strided_slice %49 {offsets = [0, 256], sizes = [8, 256], strides = [1, 1]} : vector<8x768xf32> to vector<8x256xf32>
    %61 = vector.extract_strided_slice %51 {offsets = [0, 256], sizes = [8, 256], strides = [1, 1]} : vector<8x768xf32> to vector<8x256xf32>
    %62 = arith.addf %60, %61 : vector<8x256xf32>
    %63 = arith.negf %62 : vector<8x256xf32>
    %64 = math.exp %63 : vector<8x256xf32>
    %cst_28 = arith.constant 1.000000e+00 : f32
    %65 = vector.broadcast %cst_28 : f32 to vector<8x256xf32>
    %66 = arith.addf %65, %64 : vector<8x256xf32>
    %67 = arith.divf %65, %66 : vector<8x256xf32>
    %68 = vector.extract_strided_slice %49 {offsets = [0, 512], sizes = [8, 256], strides = [1, 1]} : vector<8x768xf32> to vector<8x256xf32>
    %69 = vector.extract_strided_slice %51 {offsets = [0, 512], sizes = [8, 256], strides = [1, 1]} : vector<8x768xf32> to vector<8x256xf32>
    %70 = arith.addf %69, %9 : vector<8x256xf32>
    %71 = arith.mulf %59, %70 : vector<8x256xf32>
    %72 = arith.addf %68, %71 : vector<8x256xf32>
    %73 = math.tanh %72 : vector<8x256xf32>
    %cst_29 = arith.constant 1.000000e+00 : f32
    %74 = vector.broadcast %cst_29 : f32 to vector<8x256xf32>
    %75 = arith.subf %74, %67 : vector<8x256xf32>
    %76 = arith.mulf %75, %73 : vector<8x256xf32>
    %77 = arith.mulf %67, %48 : vector<8x256xf32>
    %78 = arith.addf %76, %77 : vector<8x256xf32>
    %79 = vector.extract_strided_slice %17 {offsets = [16, 0], sizes = [8, 768], strides = [1, 1]} : vector<64x768xf32> to vector<8x768xf32>
    %80 = arith.truncf %78 : vector<8x256xf32> to vector<8x256xbf16>
    %cst_30 = arith.constant dense<0.000000e+00> : vector<8x768xf32>
    %81 = tpu.matmul %80, %1, %cst_30 {dimension_numbers = #tpu.dot_dimension_numbers<[1], [0], [0], [1], [0, 0, 1, 1], [], []>} : vector<8x256xbf16>, vector<256x768xbf16>, vector<8x768xf32> -> vector<8x768xf32>
    %82 = vector.extract_strided_slice %79 {offsets = [0, 0], sizes = [8, 256], strides = [1, 1]} : vector<8x768xf32> to vector<8x256xf32>
    %83 = vector.extract_strided_slice %81 {offsets = [0, 0], sizes = [8, 256], strides = [1, 1]} : vector<8x768xf32> to vector<8x256xf32>
    %84 = arith.addf %82, %83 : vector<8x256xf32>
    %85 = arith.negf %84 : vector<8x256xf32>
    %86 = math.exp %85 : vector<8x256xf32>
    %cst_31 = arith.constant 1.000000e+00 : f32
    %87 = vector.broadcast %cst_31 : f32 to vector<8x256xf32>
    %88 = arith.addf %87, %86 : vector<8x256xf32>
    %89 = arith.divf %87, %88 : vector<8x256xf32>
    %90 = vector.extract_strided_slice %79 {offsets = [0, 256], sizes = [8, 256], strides = [1, 1]} : vector<8x768xf32> to vector<8x256xf32>
    %91 = vector.extract_strided_slice %81 {offsets = [0, 256], sizes = [8, 256], strides = [1, 1]} : vector<8x768xf32> to vector<8x256xf32>
    %92 = arith.addf %90, %91 : vector<8x256xf32>
    %93 = arith.negf %92 : vector<8x256xf32>
    %94 = math.exp %93 : vector<8x256xf32>
    %cst_32 = arith.constant 1.000000e+00 : f32
    %95 = vector.broadcast %cst_32 : f32 to vector<8x256xf32>
    %96 = arith.addf %95, %94 : vector<8x256xf32>
    %97 = arith.divf %95, %96 : vector<8x256xf32>
    %98 = vector.extract_strided_slice %79 {offsets = [0, 512], sizes = [8, 256], strides = [1, 1]} : vector<8x768xf32> to vector<8x256xf32>
    %99 = vector.extract_strided_slice %81 {offsets = [0, 512], sizes = [8, 256], strides = [1, 1]} : vector<8x768xf32> to vector<8x256xf32>
    %100 = arith.addf %99, %9 : vector<8x256xf32>
    %101 = arith.mulf %89, %100 : vector<8x256xf32>
    %102 = arith.addf %98, %101 : vector<8x256xf32>
    %103 = math.tanh %102 : vector<8x256xf32>
    %cst_33 = arith.constant 1.000000e+00 : f32
    %104 = vector.broadcast %cst_33 : f32 to vector<8x256xf32>
    %105 = arith.subf %104, %97 : vector<8x256xf32>
    %106 = arith.mulf %105, %103 : vector<8x256xf32>
    %107 = arith.mulf %97, %78 : vector<8x256xf32>
    %108 = arith.addf %106, %107 : vector<8x256xf32>
    %109 = vector.extract_strided_slice %17 {offsets = [24, 0], sizes = [8, 768], strides = [1, 1]} : vector<64x768xf32> to vector<8x768xf32>
    %110 = arith.truncf %108 : vector<8x256xf32> to vector<8x256xbf16>
    %cst_34 = arith.constant dense<0.000000e+00> : vector<8x768xf32>
    %111 = tpu.matmul %110, %1, %cst_34 {dimension_numbers = #tpu.dot_dimension_numbers<[1], [0], [0], [1], [0, 0, 1, 1], [], []>} : vector<8x256xbf16>, vector<256x768xbf16>, vector<8x768xf32> -> vector<8x768xf32>
    %112 = vector.extract_strided_slice %109 {offsets = [0, 0], sizes = [8, 256], strides = [1, 1]} : vector<8x768xf32> to vector<8x256xf32>
    %113 = vector.extract_strided_slice %111 {offsets = [0, 0], sizes = [8, 256], strides = [1, 1]} : vector<8x768xf32> to vector<8x256xf32>
    %114 = arith.addf %112, %113 : vector<8x256xf32>
    %115 = arith.negf %114 : vector<8x256xf32>
    %116 = math.exp %115 : vector<8x256xf32>
    %cst_35 = arith.constant 1.000000e+00 : f32
    %117 = vector.broadcast %cst_35 : f32 to vector<8x256xf32>
    %118 = arith.addf %117, %116 : vector<8x256xf32>
    %119 = arith.divf %117, %118 : vector<8x256xf32>
    %120 = vector.extract_strided_slice %109 {offsets = [0, 256], sizes = [8, 256], strides = [1, 1]} : vector<8x768xf32> to vector<8x256xf32>
    %121 = vector.extract_strided_slice %111 {offsets = [0, 256], sizes = [8, 256], strides = [1, 1]} : vector<8x768xf32> to vector<8x256xf32>
    %122 = arith.addf %120, %121 : vector<8x256xf32>
    %123 = arith.negf %122 : vector<8x256xf32>
    %124 = math.exp %123 : vector<8x256xf32>
    %cst_36 = arith.constant 1.000000e+00 : f32
    %125 = vector.broadcast %cst_36 : f32 to vector<8x256xf32>
    %126 = arith.addf %125, %124 : vector<8x256xf32>
    %127 = arith.divf %125, %126 : vector<8x256xf32>
    %128 = vector.extract_strided_slice %109 {offsets = [0, 512], sizes = [8, 256], strides = [1, 1]} : vector<8x768xf32> to vector<8x256xf32>
    %129 = vector.extract_strided_slice %111 {offsets = [0, 512], sizes = [8, 256], strides = [1, 1]} : vector<8x768xf32> to vector<8x256xf32>
    %130 = arith.addf %129, %9 : vector<8x256xf32>
    %131 = arith.mulf %119, %130 : vector<8x256xf32>
    %132 = arith.addf %128, %131 : vector<8x256xf32>
    %133 = math.tanh %132 : vector<8x256xf32>
    %cst_37 = arith.constant 1.000000e+00 : f32
    %134 = vector.broadcast %cst_37 : f32 to vector<8x256xf32>
    %135 = arith.subf %134, %127 : vector<8x256xf32>
    %136 = arith.mulf %135, %133 : vector<8x256xf32>
    %137 = arith.mulf %127, %108 : vector<8x256xf32>
    %138 = arith.addf %136, %137 : vector<8x256xf32>
    %139 = vector.extract_strided_slice %17 {offsets = [32, 0], sizes = [8, 768], strides = [1, 1]} : vector<64x768xf32> to vector<8x768xf32>
    %140 = arith.truncf %138 : vector<8x256xf32> to vector<8x256xbf16>
    %cst_38 = arith.constant dense<0.000000e+00> : vector<8x768xf32>
    %141 = tpu.matmul %140, %1, %cst_38 {dimension_numbers = #tpu.dot_dimension_numbers<[1], [0], [0], [1], [0, 0, 1, 1], [], []>} : vector<8x256xbf16>, vector<256x768xbf16>, vector<8x768xf32> -> vector<8x768xf32>
    %142 = vector.extract_strided_slice %139 {offsets = [0, 0], sizes = [8, 256], strides = [1, 1]} : vector<8x768xf32> to vector<8x256xf32>
    %143 = vector.extract_strided_slice %141 {offsets = [0, 0], sizes = [8, 256], strides = [1, 1]} : vector<8x768xf32> to vector<8x256xf32>
    %144 = arith.addf %142, %143 : vector<8x256xf32>
    %145 = arith.negf %144 : vector<8x256xf32>
    %146 = math.exp %145 : vector<8x256xf32>
    %cst_39 = arith.constant 1.000000e+00 : f32
    %147 = vector.broadcast %cst_39 : f32 to vector<8x256xf32>
    %148 = arith.addf %147, %146 : vector<8x256xf32>
    %149 = arith.divf %147, %148 : vector<8x256xf32>
    %150 = vector.extract_strided_slice %139 {offsets = [0, 256], sizes = [8, 256], strides = [1, 1]} : vector<8x768xf32> to vector<8x256xf32>
    %151 = vector.extract_strided_slice %141 {offsets = [0, 256], sizes = [8, 256], strides = [1, 1]} : vector<8x768xf32> to vector<8x256xf32>
    %152 = arith.addf %150, %151 : vector<8x256xf32>
    %153 = arith.negf %152 : vector<8x256xf32>
    %154 = math.exp %153 : vector<8x256xf32>
    %cst_40 = arith.constant 1.000000e+00 : f32
    %155 = vector.broadcast %cst_40 : f32 to vector<8x256xf32>
    %156 = arith.addf %155, %154 : vector<8x256xf32>
    %157 = arith.divf %155, %156 : vector<8x256xf32>
    %158 = vector.extract_strided_slice %139 {offsets = [0, 512], sizes = [8, 256], strides = [1, 1]} : vector<8x768xf32> to vector<8x256xf32>
    %159 = vector.extract_strided_slice %141 {offsets = [0, 512], sizes = [8, 256], strides = [1, 1]} : vector<8x768xf32> to vector<8x256xf32>
    %160 = arith.addf %159, %9 : vector<8x256xf32>
    %161 = arith.mulf %149, %160 : vector<8x256xf32>
    %162 = arith.addf %158, %161 : vector<8x256xf32>
    %163 = math.tanh %162 : vector<8x256xf32>
    %cst_41 = arith.constant 1.000000e+00 : f32
    %164 = vector.broadcast %cst_41 : f32 to vector<8x256xf32>
    %165 = arith.subf %164, %157 : vector<8x256xf32>
    %166 = arith.mulf %165, %163 : vector<8x256xf32>
    %167 = arith.mulf %157, %138 : vector<8x256xf32>
    %168 = arith.addf %166, %167 : vector<8x256xf32>
    %169 = vector.extract_strided_slice %17 {offsets = [40, 0], sizes = [8, 768], strides = [1, 1]} : vector<64x768xf32> to vector<8x768xf32>
    %170 = arith.truncf %168 : vector<8x256xf32> to vector<8x256xbf16>
    %cst_42 = arith.constant dense<0.000000e+00> : vector<8x768xf32>
    %171 = tpu.matmul %170, %1, %cst_42 {dimension_numbers = #tpu.dot_dimension_numbers<[1], [0], [0], [1], [0, 0, 1, 1], [], []>} : vector<8x256xbf16>, vector<256x768xbf16>, vector<8x768xf32> -> vector<8x768xf32>
    %172 = vector.extract_strided_slice %169 {offsets = [0, 0], sizes = [8, 256], strides = [1, 1]} : vector<8x768xf32> to vector<8x256xf32>
    %173 = vector.extract_strided_slice %171 {offsets = [0, 0], sizes = [8, 256], strides = [1, 1]} : vector<8x768xf32> to vector<8x256xf32>
    %174 = arith.addf %172, %173 : vector<8x256xf32>
    %175 = arith.negf %174 : vector<8x256xf32>
    %176 = math.exp %175 : vector<8x256xf32>
    %cst_43 = arith.constant 1.000000e+00 : f32
    %177 = vector.broadcast %cst_43 : f32 to vector<8x256xf32>
    %178 = arith.addf %177, %176 : vector<8x256xf32>
    %179 = arith.divf %177, %178 : vector<8x256xf32>
    %180 = vector.extract_strided_slice %169 {offsets = [0, 256], sizes = [8, 256], strides = [1, 1]} : vector<8x768xf32> to vector<8x256xf32>
    %181 = vector.extract_strided_slice %171 {offsets = [0, 256], sizes = [8, 256], strides = [1, 1]} : vector<8x768xf32> to vector<8x256xf32>
    %182 = arith.addf %180, %181 : vector<8x256xf32>
    %183 = arith.negf %182 : vector<8x256xf32>
    %184 = math.exp %183 : vector<8x256xf32>
    %cst_44 = arith.constant 1.000000e+00 : f32
    %185 = vector.broadcast %cst_44 : f32 to vector<8x256xf32>
    %186 = arith.addf %185, %184 : vector<8x256xf32>
    %187 = arith.divf %185, %186 : vector<8x256xf32>
    %188 = vector.extract_strided_slice %169 {offsets = [0, 512], sizes = [8, 256], strides = [1, 1]} : vector<8x768xf32> to vector<8x256xf32>
    %189 = vector.extract_strided_slice %171 {offsets = [0, 512], sizes = [8, 256], strides = [1, 1]} : vector<8x768xf32> to vector<8x256xf32>
    %190 = arith.addf %189, %9 : vector<8x256xf32>
    %191 = arith.mulf %179, %190 : vector<8x256xf32>
    %192 = arith.addf %188, %191 : vector<8x256xf32>
    %193 = math.tanh %192 : vector<8x256xf32>
    %cst_45 = arith.constant 1.000000e+00 : f32
    %194 = vector.broadcast %cst_45 : f32 to vector<8x256xf32>
    %195 = arith.subf %194, %187 : vector<8x256xf32>
    %196 = arith.mulf %195, %193 : vector<8x256xf32>
    %197 = arith.mulf %187, %168 : vector<8x256xf32>
    %198 = arith.addf %196, %197 : vector<8x256xf32>
    %199 = vector.extract_strided_slice %17 {offsets = [48, 0], sizes = [8, 768], strides = [1, 1]} : vector<64x768xf32> to vector<8x768xf32>
    %200 = arith.truncf %198 : vector<8x256xf32> to vector<8x256xbf16>
    %cst_46 = arith.constant dense<0.000000e+00> : vector<8x768xf32>
    %201 = tpu.matmul %200, %1, %cst_46 {dimension_numbers = #tpu.dot_dimension_numbers<[1], [0], [0], [1], [0, 0, 1, 1], [], []>} : vector<8x256xbf16>, vector<256x768xbf16>, vector<8x768xf32> -> vector<8x768xf32>
    %202 = vector.extract_strided_slice %199 {offsets = [0, 0], sizes = [8, 256], strides = [1, 1]} : vector<8x768xf32> to vector<8x256xf32>
    %203 = vector.extract_strided_slice %201 {offsets = [0, 0], sizes = [8, 256], strides = [1, 1]} : vector<8x768xf32> to vector<8x256xf32>
    %204 = arith.addf %202, %203 : vector<8x256xf32>
    %205 = arith.negf %204 : vector<8x256xf32>
    %206 = math.exp %205 : vector<8x256xf32>
    %cst_47 = arith.constant 1.000000e+00 : f32
    %207 = vector.broadcast %cst_47 : f32 to vector<8x256xf32>
    %208 = arith.addf %207, %206 : vector<8x256xf32>
    %209 = arith.divf %207, %208 : vector<8x256xf32>
    %210 = vector.extract_strided_slice %199 {offsets = [0, 256], sizes = [8, 256], strides = [1, 1]} : vector<8x768xf32> to vector<8x256xf32>
    %211 = vector.extract_strided_slice %201 {offsets = [0, 256], sizes = [8, 256], strides = [1, 1]} : vector<8x768xf32> to vector<8x256xf32>
    %212 = arith.addf %210, %211 : vector<8x256xf32>
    %213 = arith.negf %212 : vector<8x256xf32>
    %214 = math.exp %213 : vector<8x256xf32>
    %cst_48 = arith.constant 1.000000e+00 : f32
    %215 = vector.broadcast %cst_48 : f32 to vector<8x256xf32>
    %216 = arith.addf %215, %214 : vector<8x256xf32>
    %217 = arith.divf %215, %216 : vector<8x256xf32>
    %218 = vector.extract_strided_slice %199 {offsets = [0, 512], sizes = [8, 256], strides = [1, 1]} : vector<8x768xf32> to vector<8x256xf32>
    %219 = vector.extract_strided_slice %201 {offsets = [0, 512], sizes = [8, 256], strides = [1, 1]} : vector<8x768xf32> to vector<8x256xf32>
    %220 = arith.addf %219, %9 : vector<8x256xf32>
    %221 = arith.mulf %209, %220 : vector<8x256xf32>
    %222 = arith.addf %218, %221 : vector<8x256xf32>
    %223 = math.tanh %222 : vector<8x256xf32>
    %cst_49 = arith.constant 1.000000e+00 : f32
    %224 = vector.broadcast %cst_49 : f32 to vector<8x256xf32>
    %225 = arith.subf %224, %217 : vector<8x256xf32>
    %226 = arith.mulf %225, %223 : vector<8x256xf32>
    %227 = arith.mulf %217, %198 : vector<8x256xf32>
    %228 = arith.addf %226, %227 : vector<8x256xf32>
    %229 = vector.extract_strided_slice %17 {offsets = [56, 0], sizes = [8, 768], strides = [1, 1]} : vector<64x768xf32> to vector<8x768xf32>
    %230 = arith.truncf %228 : vector<8x256xf32> to vector<8x256xbf16>
    %cst_50 = arith.constant dense<0.000000e+00> : vector<8x768xf32>
    %231 = tpu.matmul %230, %1, %cst_50 {dimension_numbers = #tpu.dot_dimension_numbers<[1], [0], [0], [1], [0, 0, 1, 1], [], []>} : vector<8x256xbf16>, vector<256x768xbf16>, vector<8x768xf32> -> vector<8x768xf32>
    %232 = vector.extract_strided_slice %229 {offsets = [0, 0], sizes = [8, 256], strides = [1, 1]} : vector<8x768xf32> to vector<8x256xf32>
    %233 = vector.extract_strided_slice %231 {offsets = [0, 0], sizes = [8, 256], strides = [1, 1]} : vector<8x768xf32> to vector<8x256xf32>
    %234 = arith.addf %232, %233 : vector<8x256xf32>
    %235 = arith.negf %234 : vector<8x256xf32>
    %236 = math.exp %235 : vector<8x256xf32>
    %cst_51 = arith.constant 1.000000e+00 : f32
    %237 = vector.broadcast %cst_51 : f32 to vector<8x256xf32>
    %238 = arith.addf %237, %236 : vector<8x256xf32>
    %239 = arith.divf %237, %238 : vector<8x256xf32>
    %240 = vector.extract_strided_slice %229 {offsets = [0, 256], sizes = [8, 256], strides = [1, 1]} : vector<8x768xf32> to vector<8x256xf32>
    %241 = vector.extract_strided_slice %231 {offsets = [0, 256], sizes = [8, 256], strides = [1, 1]} : vector<8x768xf32> to vector<8x256xf32>
    %242 = arith.addf %240, %241 : vector<8x256xf32>
    %243 = arith.negf %242 : vector<8x256xf32>
    %244 = math.exp %243 : vector<8x256xf32>
    %cst_52 = arith.constant 1.000000e+00 : f32
    %245 = vector.broadcast %cst_52 : f32 to vector<8x256xf32>
    %246 = arith.addf %245, %244 : vector<8x256xf32>
    %247 = arith.divf %245, %246 : vector<8x256xf32>
    %248 = vector.extract_strided_slice %229 {offsets = [0, 512], sizes = [8, 256], strides = [1, 1]} : vector<8x768xf32> to vector<8x256xf32>
    %249 = vector.extract_strided_slice %231 {offsets = [0, 512], sizes = [8, 256], strides = [1, 1]} : vector<8x768xf32> to vector<8x256xf32>
    %250 = arith.addf %249, %9 : vector<8x256xf32>
    %251 = arith.mulf %239, %250 : vector<8x256xf32>
    %252 = arith.addf %248, %251 : vector<8x256xf32>
    %253 = math.tanh %252 : vector<8x256xf32>
    %cst_53 = arith.constant 1.000000e+00 : f32
    %254 = vector.broadcast %cst_53 : f32 to vector<8x256xf32>
    %255 = arith.subf %254, %247 : vector<8x256xf32>
    %256 = arith.mulf %255, %253 : vector<8x256xf32>
    %257 = arith.mulf %247, %228 : vector<8x256xf32>
    %258 = arith.addf %256, %257 : vector<8x256xf32>
    %259 = arith.truncf %258 : vector<8x256xf32> to vector<8x256xbf16>
    %cst_54 = arith.constant dense<0.000000e+00> : vector<8x128xf32>
    %260 = tpu.matmul %259, %4, %cst_54 {dimension_numbers = #tpu.dot_dimension_numbers<[1], [0], [0], [1], [0, 0, 1, 1], [], []>} : vector<8x256xbf16>, vector<256x128xbf16>, vector<8x128xf32> -> vector<8x128xf32>
    %c0_55 = arith.constant 0 : index
    %c0_56 = arith.constant 0 : index
    %261 = vector.load %arg8[%c0_55, %c0_56] : memref<1x128xf32, #tpu.memory_space<vmem>>, vector<1x128xf32>
    %262 = vector.broadcast %261 : vector<1x128xf32> to vector<8x128xf32>
    %263 = arith.addf %260, %262 : vector<8x128xf32>
    %c0_57 = arith.constant 0 : index
    %c0_58 = arith.constant 0 : index
    %264 = vector.load %arg18[%c0_57, %c0_58] : memref<8x128xf32, #tpu.memory_space<vmem>>, vector<8x128xf32>
    tpu.vector_store %arg18[%c0_57, %c0_58], %263 {strides = array<i32>} : memref<8x128xf32, #tpu.memory_space<vmem>>, vector<8x128xf32>,
    %265 = vector.extract_strided_slice %263 {offsets = [0, 0], sizes = [8, 64], strides = [1, 1]} : vector<8x128xf32> to vector<8x64xf32>
    %266 = vector.extract_strided_slice %263 {offsets = [0, 64], sizes = [8, 64], strides = [1, 1]} : vector<8x128xf32> to vector<8x64xf32>
    %c0_59 = arith.constant 0 : index
    %c0_60 = arith.constant 0 : index
    %267 = vector.load %arg1[%c0_59, %c0_60] : memref<8x64xf32, #tpu.memory_space<vmem>>, vector<8x64xf32>
    %cst_61 = arith.constant 5.000000e-01 : f32
    %268 = vector.broadcast %cst_61 : f32 to vector<8x64xf32>
    %269 = arith.mulf %268, %266 : vector<8x64xf32>
    %270 = math.exp %269 : vector<8x64xf32>
    %271 = arith.mulf %267, %270 : vector<8x64xf32>
    %272 = arith.addf %265, %271 : vector<8x64xf32>
    %273 = arith.truncf %272 : vector<8x64xf32> to vector<8x64xbf16>
    %cst_62 = arith.constant dense<0.000000e+00> : vector<8x256xf32>
    %274 = tpu.matmul %273, %5, %cst_62 {dimension_numbers = #tpu.dot_dimension_numbers<[1], [0], [0], [1], [0, 0, 1, 1], [], []>} : vector<8x64xbf16>, vector<64x256xbf16>, vector<8x256xf32> -> vector<8x256xf32>
    %c0_63 = arith.constant 0 : index
    %c0_64 = arith.constant 0 : index
    %275 = vector.load %arg10[%c0_63, %c0_64] : memref<1x256xf32, #tpu.memory_space<vmem>>, vector<1x256xf32>
    %276 = vector.broadcast %275 : vector<1x256xf32> to vector<8x256xf32>
    %277 = arith.addf %274, %276 : vector<8x256xf32>
    %c0_65 = arith.constant 0 : index
    %c0_66 = arith.constant 0 : index
    %278 = vector.load %arg2[%c0_65, %c0_66] : memref<8x128xbf16, #tpu.memory_space<vmem>>, vector<8x128xbf16>
    %cst_67 = arith.constant dense<0.000000e+00> : vector<8x768xf32>
    %279 = tpu.matmul %278, %2, %cst_67 {dimension_numbers = #tpu.dot_dimension_numbers<[1], [0], [0], [1], [0, 0, 1, 1], [], []>} : vector<8x128xbf16>, vector<128x768xbf16>, vector<8x768xf32> -> vector<8x768xf32>
    %c0_68 = arith.constant 0 : index
    %c0_69 = arith.constant 0 : index
    %280 = vector.load %arg13[%c0_68, %c0_69] : memref<1x768xf32, #tpu.memory_space<vmem>>, vector<1x768xf32>
    %281 = vector.broadcast %280 : vector<1x768xf32> to vector<8x768xf32>
    %282 = arith.addf %279, %281 : vector<8x768xf32>
    %283 = arith.truncf %277 : vector<8x256xf32> to vector<8x256xbf16>
    %cst_70 = arith.constant dense<0.000000e+00> : vector<8x768xf32>
    %284 = tpu.matmul %283, %3, %cst_70 {dimension_numbers = #tpu.dot_dimension_numbers<[1], [0], [0], [1], [0, 0, 1, 1], [], []>} : vector<8x256xbf16>, vector<256x768xbf16>, vector<8x768xf32> -> vector<8x768xf32>
    %285 = vector.extract_strided_slice %282 {offsets = [0, 0], sizes = [8, 256], strides = [1, 1]} : vector<8x768xf32> to vector<8x256xf32>
    %286 = vector.extract_strided_slice %284 {offsets = [0, 0], sizes = [8, 256], strides = [1, 1]} : vector<8x768xf32> to vector<8x256xf32>
    %287 = arith.addf %285, %286 : vector<8x256xf32>
    %288 = arith.negf %287 : vector<8x256xf32>
    %289 = math.exp %288 : vector<8x256xf32>
    %cst_71 = arith.constant 1.000000e+00 : f32
    %290 = vector.broadcast %cst_71 : f32 to vector<8x256xf32>
    %291 = arith.addf %290, %289 : vector<8x256xf32>
    %292 = arith.divf %290, %291 : vector<8x256xf32>
    %293 = vector.extract_strided_slice %282 {offsets = [0, 256], sizes = [8, 256], strides = [1, 1]} : vector<8x768xf32> to vector<8x256xf32>
    %294 = vector.extract_strided_slice %284 {offsets = [0, 256], sizes = [8, 256], strides = [1, 1]} : vector<8x768xf32> to vector<8x256xf32>
    %295 = arith.addf %293, %294 : vector<8x256xf32>
    %296 = arith.negf %295 : vector<8x256xf32>
    %297 = math.exp %296 : vector<8x256xf32>
    %cst_72 = arith.constant 1.000000e+00 : f32
    %298 = vector.broadcast %cst_72 : f32 to vector<8x256xf32>
    %299 = arith.addf %298, %297 : vector<8x256xf32>
    %300 = arith.divf %298, %299 : vector<8x256xf32>
    %301 = vector.extract_strided_slice %282 {offsets = [0, 512], sizes = [8, 256], strides = [1, 1]} : vector<8x768xf32> to vector<8x256xf32>
    %302 = vector.extract_strided_slice %284 {offsets = [0, 512], sizes = [8, 256], strides = [1, 1]} : vector<8x768xf32> to vector<8x256xf32>
    %303 = arith.addf %302, %12 : vector<8x256xf32>
    %304 = arith.mulf %292, %303 : vector<8x256xf32>
    %305 = arith.addf %301, %304 : vector<8x256xf32>
    %306 = math.tanh %305 : vector<8x256xf32>
    %cst_73 = arith.constant 1.000000e+00 : f32
    %307 = vector.broadcast %cst_73 : f32 to vector<8x256xf32>
    %308 = arith.subf %307, %300 : vector<8x256xf32>
    %309 = arith.mulf %308, %306 : vector<8x256xf32>
    %310 = arith.mulf %300, %277 : vector<8x256xf32>
    %311 = arith.addf %309, %310 : vector<8x256xf32>
    %312 = arith.truncf %311 : vector<8x256xf32> to vector<8x256xbf16>
    %cst_74 = arith.constant dense<0.000000e+00> : vector<8x768xf32>
    %313 = tpu.matmul %312, %3, %cst_74 {dimension_numbers = #tpu.dot_dimension_numbers<[1], [0], [0], [1], [0, 0, 1, 1], [], []>} : vector<8x256xbf16>, vector<256x768xbf16>, vector<8x768xf32> -> vector<8x768xf32>
    %314 = vector.extract_strided_slice %282 {offsets = [0, 0], sizes = [8, 256], strides = [1, 1]} : vector<8x768xf32> to vector<8x256xf32>
    %315 = vector.extract_strided_slice %313 {offsets = [0, 0], sizes = [8, 256], strides = [1, 1]} : vector<8x768xf32> to vector<8x256xf32>
    %316 = arith.addf %314, %315 : vector<8x256xf32>
    %317 = arith.negf %316 : vector<8x256xf32>
    %318 = math.exp %317 : vector<8x256xf32>
    %cst_75 = arith.constant 1.000000e+00 : f32
    %319 = vector.broadcast %cst_75 : f32 to vector<8x256xf32>
    %320 = arith.addf %319, %318 : vector<8x256xf32>
    %321 = arith.divf %319, %320 : vector<8x256xf32>
    %322 = vector.extract_strided_slice %282 {offsets = [0, 256], sizes = [8, 256], strides = [1, 1]} : vector<8x768xf32> to vector<8x256xf32>
    %323 = vector.extract_strided_slice %313 {offsets = [0, 256], sizes = [8, 256], strides = [1, 1]} : vector<8x768xf32> to vector<8x256xf32>
    %324 = arith.addf %322, %323 : vector<8x256xf32>
    %325 = arith.negf %324 : vector<8x256xf32>
    %326 = math.exp %325 : vector<8x256xf32>
    %cst_76 = arith.constant 1.000000e+00 : f32
    %327 = vector.broadcast %cst_76 : f32 to vector<8x256xf32>
    %328 = arith.addf %327, %326 : vector<8x256xf32>
    %329 = arith.divf %327, %328 : vector<8x256xf32>
    %330 = vector.extract_strided_slice %282 {offsets = [0, 512], sizes = [8, 256], strides = [1, 1]} : vector<8x768xf32> to vector<8x256xf32>
    %331 = vector.extract_strided_slice %313 {offsets = [0, 512], sizes = [8, 256], strides = [1, 1]} : vector<8x768xf32> to vector<8x256xf32>
    %332 = arith.addf %331, %12 : vector<8x256xf32>
    %333 = arith.mulf %321, %332 : vector<8x256xf32>
    %334 = arith.addf %330, %333 : vector<8x256xf32>
    %335 = math.tanh %334 : vector<8x256xf32>
    %cst_77 = arith.constant 1.000000e+00 : f32
    %336 = vector.broadcast %cst_77 : f32 to vector<8x256xf32>
    %337 = arith.subf %336, %329 : vector<8x256xf32>
    %338 = arith.mulf %337, %335 : vector<8x256xf32>
    %339 = arith.mulf %329, %311 : vector<8x256xf32>
    %340 = arith.addf %338, %339 : vector<8x256xf32>
    %341 = arith.truncf %340 : vector<8x256xf32> to vector<8x256xbf16>
    %cst_78 = arith.constant dense<0.000000e+00> : vector<8x768xf32>
    %342 = tpu.matmul %341, %3, %cst_78 {dimension_numbers = #tpu.dot_dimension_numbers<[1], [0], [0], [1], [0, 0, 1, 1], [], []>} : vector<8x256xbf16>, vector<256x768xbf16>, vector<8x768xf32> -> vector<8x768xf32>
    %343 = vector.extract_strided_slice %282 {offsets = [0, 0], sizes = [8, 256], strides = [1, 1]} : vector<8x768xf32> to vector<8x256xf32>
    %344 = vector.extract_strided_slice %342 {offsets = [0, 0], sizes = [8, 256], strides = [1, 1]} : vector<8x768xf32> to vector<8x256xf32>
    %345 = arith.addf %343, %344 : vector<8x256xf32>
    %346 = arith.negf %345 : vector<8x256xf32>
    %347 = math.exp %346 : vector<8x256xf32>
    %cst_79 = arith.constant 1.000000e+00 : f32
    %348 = vector.broadcast %cst_79 : f32 to vector<8x256xf32>
    %349 = arith.addf %348, %347 : vector<8x256xf32>
    %350 = arith.divf %348, %349 : vector<8x256xf32>
    %351 = vector.extract_strided_slice %282 {offsets = [0, 256], sizes = [8, 256], strides = [1, 1]} : vector<8x768xf32> to vector<8x256xf32>
    %352 = vector.extract_strided_slice %342 {offsets = [0, 256], sizes = [8, 256], strides = [1, 1]} : vector<8x768xf32> to vector<8x256xf32>
    %353 = arith.addf %351, %352 : vector<8x256xf32>
    %354 = arith.negf %353 : vector<8x256xf32>
    %355 = math.exp %354 : vector<8x256xf32>
    %cst_80 = arith.constant 1.000000e+00 : f32
    %356 = vector.broadcast %cst_80 : f32 to vector<8x256xf32>
    %357 = arith.addf %356, %355 : vector<8x256xf32>
    %358 = arith.divf %356, %357 : vector<8x256xf32>
    %359 = vector.extract_strided_slice %282 {offsets = [0, 512], sizes = [8, 256], strides = [1, 1]} : vector<8x768xf32> to vector<8x256xf32>
    %360 = vector.extract_strided_slice %342 {offsets = [0, 512], sizes = [8, 256], strides = [1, 1]} : vector<8x768xf32> to vector<8x256xf32>
    %361 = arith.addf %360, %12 : vector<8x256xf32>
    %362 = arith.mulf %350, %361 : vector<8x256xf32>
    %363 = arith.addf %359, %362 : vector<8x256xf32>
    %364 = math.tanh %363 : vector<8x256xf32>
    %cst_81 = arith.constant 1.000000e+00 : f32
    %365 = vector.broadcast %cst_81 : f32 to vector<8x256xf32>
    %366 = arith.subf %365, %358 : vector<8x256xf32>
    %367 = arith.mulf %366, %364 : vector<8x256xf32>
    %368 = arith.mulf %358, %340 : vector<8x256xf32>
    %369 = arith.addf %367, %368 : vector<8x256xf32>
    %370 = arith.truncf %369 : vector<8x256xf32> to vector<8x256xbf16>
    %cst_82 = arith.constant dense<0.000000e+00> : vector<8x768xf32>
    %371 = tpu.matmul %370, %3, %cst_82 {dimension_numbers = #tpu.dot_dimension_numbers<[1], [0], [0], [1], [0, 0, 1, 1], [], []>} : vector<8x256xbf16>, vector<256x768xbf16>, vector<8x768xf32> -> vector<8x768xf32>
    %372 = vector.extract_strided_slice %282 {offsets = [0, 0], sizes = [8, 256], strides = [1, 1]} : vector<8x768xf32> to vector<8x256xf32>
    %373 = vector.extract_strided_slice %371 {offsets = [0, 0], sizes = [8, 256], strides = [1, 1]} : vector<8x768xf32> to vector<8x256xf32>
    %374 = arith.addf %372, %373 : vector<8x256xf32>
    %375 = arith.negf %374 : vector<8x256xf32>
    %376 = math.exp %375 : vector<8x256xf32>
    %cst_83 = arith.constant 1.000000e+00 : f32
    %377 = vector.broadcast %cst_83 : f32 to vector<8x256xf32>
    %378 = arith.addf %377, %376 : vector<8x256xf32>
    %379 = arith.divf %377, %378 : vector<8x256xf32>
    %380 = vector.extract_strided_slice %282 {offsets = [0, 256], sizes = [8, 256], strides = [1, 1]} : vector<8x768xf32> to vector<8x256xf32>
    %381 = vector.extract_strided_slice %371 {offsets = [0, 256], sizes = [8, 256], strides = [1, 1]} : vector<8x768xf32> to vector<8x256xf32>
    %382 = arith.addf %380, %381 : vector<8x256xf32>
    %383 = arith.negf %382 : vector<8x256xf32>
    %384 = math.exp %383 : vector<8x256xf32>
    %cst_84 = arith.constant 1.000000e+00 : f32
    %385 = vector.broadcast %cst_84 : f32 to vector<8x256xf32>
    %386 = arith.addf %385, %384 : vector<8x256xf32>
    %387 = arith.divf %385, %386 : vector<8x256xf32>
    %388 = vector.extract_strided_slice %282 {offsets = [0, 512], sizes = [8, 256], strides = [1, 1]} : vector<8x768xf32> to vector<8x256xf32>
    %389 = vector.extract_strided_slice %371 {offsets = [0, 512], sizes = [8, 256], strides = [1, 1]} : vector<8x768xf32> to vector<8x256xf32>
    %390 = arith.addf %389, %12 : vector<8x256xf32>
    %391 = arith.mulf %379, %390 : vector<8x256xf32>
    %392 = arith.addf %388, %391 : vector<8x256xf32>
    %393 = math.tanh %392 : vector<8x256xf32>
    %cst_85 = arith.constant 1.000000e+00 : f32
    %394 = vector.broadcast %cst_85 : f32 to vector<8x256xf32>
    %395 = arith.subf %394, %387 : vector<8x256xf32>
    %396 = arith.mulf %395, %393 : vector<8x256xf32>
    %397 = arith.mulf %387, %369 : vector<8x256xf32>
    %398 = arith.addf %396, %397 : vector<8x256xf32>
    %399 = arith.truncf %398 : vector<8x256xf32> to vector<8x256xbf16>
    %cst_86 = arith.constant dense<0.000000e+00> : vector<8x768xf32>
    %400 = tpu.matmul %399, %3, %cst_86 {dimension_numbers = #tpu.dot_dimension_numbers<[1], [0], [0], [1], [0, 0, 1, 1], [], []>} : vector<8x256xbf16>, vector<256x768xbf16>, vector<8x768xf32> -> vector<8x768xf32>
    %401 = vector.extract_strided_slice %282 {offsets = [0, 0], sizes = [8, 256], strides = [1, 1]} : vector<8x768xf32> to vector<8x256xf32>
    %402 = vector.extract_strided_slice %400 {offsets = [0, 0], sizes = [8, 256], strides = [1, 1]} : vector<8x768xf32> to vector<8x256xf32>
    %403 = arith.addf %401, %402 : vector<8x256xf32>
    %404 = arith.negf %403 : vector<8x256xf32>
    %405 = math.exp %404 : vector<8x256xf32>
    %cst_87 = arith.constant 1.000000e+00 : f32
    %406 = vector.broadcast %cst_87 : f32 to vector<8x256xf32>
    %407 = arith.addf %406, %405 : vector<8x256xf32>
    %408 = arith.divf %406, %407 : vector<8x256xf32>
    %409 = vector.extract_strided_slice %282 {offsets = [0, 256], sizes = [8, 256], strides = [1, 1]} : vector<8x768xf32> to vector<8x256xf32>
    %410 = vector.extract_strided_slice %400 {offsets = [0, 256], sizes = [8, 256], strides = [1, 1]} : vector<8x768xf32> to vector<8x256xf32>
    %411 = arith.addf %409, %410 : vector<8x256xf32>
    %412 = arith.negf %411 : vector<8x256xf32>
    %413 = math.exp %412 : vector<8x256xf32>
    %cst_88 = arith.constant 1.000000e+00 : f32
    %414 = vector.broadcast %cst_88 : f32 to vector<8x256xf32>
    %415 = arith.addf %414, %413 : vector<8x256xf32>
    %416 = arith.divf %414, %415 : vector<8x256xf32>
    %417 = vector.extract_strided_slice %282 {offsets = [0, 512], sizes = [8, 256], strides = [1, 1]} : vector<8x768xf32> to vector<8x256xf32>
    %418 = vector.extract_strided_slice %400 {offsets = [0, 512], sizes = [8, 256], strides = [1, 1]} : vector<8x768xf32> to vector<8x256xf32>
    %419 = arith.addf %418, %12 : vector<8x256xf32>
    %420 = arith.mulf %408, %419 : vector<8x256xf32>
    %421 = arith.addf %417, %420 : vector<8x256xf32>
    %422 = math.tanh %421 : vector<8x256xf32>
    %cst_89 = arith.constant 1.000000e+00 : f32
    %423 = vector.broadcast %cst_89 : f32 to vector<8x256xf32>
    %424 = arith.subf %423, %416 : vector<8x256xf32>
    %425 = arith.mulf %424, %422 : vector<8x256xf32>
    %426 = arith.mulf %416, %398 : vector<8x256xf32>
    %427 = arith.addf %425, %426 : vector<8x256xf32>
    %428 = arith.truncf %427 : vector<8x256xf32> to vector<8x256xbf16>
    %cst_90 = arith.constant dense<0.000000e+00> : vector<8x768xf32>
    %429 = tpu.matmul %428, %3, %cst_90 {dimension_numbers = #tpu.dot_dimension_numbers<[1], [0], [0], [1], [0, 0, 1, 1], [], []>} : vector<8x256xbf16>, vector<256x768xbf16>, vector<8x768xf32> -> vector<8x768xf32>
    %430 = vector.extract_strided_slice %282 {offsets = [0, 0], sizes = [8, 256], strides = [1, 1]} : vector<8x768xf32> to vector<8x256xf32>
    %431 = vector.extract_strided_slice %429 {offsets = [0, 0], sizes = [8, 256], strides = [1, 1]} : vector<8x768xf32> to vector<8x256xf32>
    %432 = arith.addf %430, %431 : vector<8x256xf32>
    %433 = arith.negf %432 : vector<8x256xf32>
    %434 = math.exp %433 : vector<8x256xf32>
    %cst_91 = arith.constant 1.000000e+00 : f32
    %435 = vector.broadcast %cst_91 : f32 to vector<8x256xf32>
    %436 = arith.addf %435, %434 : vector<8x256xf32>
    %437 = arith.divf %435, %436 : vector<8x256xf32>
    %438 = vector.extract_strided_slice %282 {offsets = [0, 256], sizes = [8, 256], strides = [1, 1]} : vector<8x768xf32> to vector<8x256xf32>
    %439 = vector.extract_strided_slice %429 {offsets = [0, 256], sizes = [8, 256], strides = [1, 1]} : vector<8x768xf32> to vector<8x256xf32>
    %440 = arith.addf %438, %439 : vector<8x256xf32>
    %441 = arith.negf %440 : vector<8x256xf32>
    %442 = math.exp %441 : vector<8x256xf32>
    %cst_92 = arith.constant 1.000000e+00 : f32
    %443 = vector.broadcast %cst_92 : f32 to vector<8x256xf32>
    %444 = arith.addf %443, %442 : vector<8x256xf32>
    %445 = arith.divf %443, %444 : vector<8x256xf32>
    %446 = vector.extract_strided_slice %282 {offsets = [0, 512], sizes = [8, 256], strides = [1, 1]} : vector<8x768xf32> to vector<8x256xf32>
    %447 = vector.extract_strided_slice %429 {offsets = [0, 512], sizes = [8, 256], strides = [1, 1]} : vector<8x768xf32> to vector<8x256xf32>
    %448 = arith.addf %447, %12 : vector<8x256xf32>
    %449 = arith.mulf %437, %448 : vector<8x256xf32>
    %450 = arith.addf %446, %449 : vector<8x256xf32>
    %451 = math.tanh %450 : vector<8x256xf32>
    %cst_93 = arith.constant 1.000000e+00 : f32
    %452 = vector.broadcast %cst_93 : f32 to vector<8x256xf32>
    %453 = arith.subf %452, %445 : vector<8x256xf32>
    %454 = arith.mulf %453, %451 : vector<8x256xf32>
    %455 = arith.mulf %445, %427 : vector<8x256xf32>
    %456 = arith.addf %454, %455 : vector<8x256xf32>
    %457 = arith.truncf %456 : vector<8x256xf32> to vector<8x256xbf16>
    %cst_94 = arith.constant dense<0.000000e+00> : vector<8x768xf32>
    %458 = tpu.matmul %457, %3, %cst_94 {dimension_numbers = #tpu.dot_dimension_numbers<[1], [0], [0], [1], [0, 0, 1, 1], [], []>} : vector<8x256xbf16>, vector<256x768xbf16>, vector<8x768xf32> -> vector<8x768xf32>
    %459 = vector.extract_strided_slice %282 {offsets = [0, 0], sizes = [8, 256], strides = [1, 1]} : vector<8x768xf32> to vector<8x256xf32>
    %460 = vector.extract_strided_slice %458 {offsets = [0, 0], sizes = [8, 256], strides = [1, 1]} : vector<8x768xf32> to vector<8x256xf32>
    %461 = arith.addf %459, %460 : vector<8x256xf32>
    %462 = arith.negf %461 : vector<8x256xf32>
    %463 = math.exp %462 : vector<8x256xf32>
    %cst_95 = arith.constant 1.000000e+00 : f32
    %464 = vector.broadcast %cst_95 : f32 to vector<8x256xf32>
    %465 = arith.addf %464, %463 : vector<8x256xf32>
    %466 = arith.divf %464, %465 : vector<8x256xf32>
    %467 = vector.extract_strided_slice %282 {offsets = [0, 256], sizes = [8, 256], strides = [1, 1]} : vector<8x768xf32> to vector<8x256xf32>
    %468 = vector.extract_strided_slice %458 {offsets = [0, 256], sizes = [8, 256], strides = [1, 1]} : vector<8x768xf32> to vector<8x256xf32>
    %469 = arith.addf %467, %468 : vector<8x256xf32>
    %470 = arith.negf %469 : vector<8x256xf32>
    %471 = math.exp %470 : vector<8x256xf32>
    %cst_96 = arith.constant 1.000000e+00 : f32
    %472 = vector.broadcast %cst_96 : f32 to vector<8x256xf32>
    %473 = arith.addf %472, %471 : vector<8x256xf32>
    %474 = arith.divf %472, %473 : vector<8x256xf32>
    %475 = vector.extract_strided_slice %282 {offsets = [0, 512], sizes = [8, 256], strides = [1, 1]} : vector<8x768xf32> to vector<8x256xf32>
    %476 = vector.extract_strided_slice %458 {offsets = [0, 512], sizes = [8, 256], strides = [1, 1]} : vector<8x768xf32> to vector<8x256xf32>
    %477 = arith.addf %476, %12 : vector<8x256xf32>
    %478 = arith.mulf %466, %477 : vector<8x256xf32>
    %479 = arith.addf %475, %478 : vector<8x256xf32>
    %480 = math.tanh %479 : vector<8x256xf32>
    %cst_97 = arith.constant 1.000000e+00 : f32
    %481 = vector.broadcast %cst_97 : f32 to vector<8x256xf32>
    %482 = arith.subf %481, %474 : vector<8x256xf32>
    %483 = arith.mulf %482, %480 : vector<8x256xf32>
    %484 = arith.mulf %474, %456 : vector<8x256xf32>
    %485 = arith.addf %483, %484 : vector<8x256xf32>
    %486 = arith.truncf %485 : vector<8x256xf32> to vector<8x256xbf16>
    %cst_98 = arith.constant dense<0.000000e+00> : vector<8x768xf32>
    %487 = tpu.matmul %486, %3, %cst_98 {dimension_numbers = #tpu.dot_dimension_numbers<[1], [0], [0], [1], [0, 0, 1, 1], [], []>} : vector<8x256xbf16>, vector<256x768xbf16>, vector<8x768xf32> -> vector<8x768xf32>
    %488 = vector.extract_strided_slice %282 {offsets = [0, 0], sizes = [8, 256], strides = [1, 1]} : vector<8x768xf32> to vector<8x256xf32>
    %489 = vector.extract_strided_slice %487 {offsets = [0, 0], sizes = [8, 256], strides = [1, 1]} : vector<8x768xf32> to vector<8x256xf32>
    %490 = arith.addf %488, %489 : vector<8x256xf32>
    %491 = arith.negf %490 : vector<8x256xf32>
    %492 = math.exp %491 : vector<8x256xf32>
    %cst_99 = arith.constant 1.000000e+00 : f32
    %493 = vector.broadcast %cst_99 : f32 to vector<8x256xf32>
    %494 = arith.addf %493, %492 : vector<8x256xf32>
    %495 = arith.divf %493, %494 : vector<8x256xf32>
    %496 = vector.extract_strided_slice %282 {offsets = [0, 256], sizes = [8, 256], strides = [1, 1]} : vector<8x768xf32> to vector<8x256xf32>
    %497 = vector.extract_strided_slice %487 {offsets = [0, 256], sizes = [8, 256], strides = [1, 1]} : vector<8x768xf32> to vector<8x256xf32>
    %498 = arith.addf %496, %497 : vector<8x256xf32>
    %499 = arith.negf %498 : vector<8x256xf32>
    %500 = math.exp %499 : vector<8x256xf32>
    %cst_100 = arith.constant 1.000000e+00 : f32
    %501 = vector.broadcast %cst_100 : f32 to vector<8x256xf32>
    %502 = arith.addf %501, %500 : vector<8x256xf32>
    %503 = arith.divf %501, %502 : vector<8x256xf32>
    %504 = vector.extract_strided_slice %282 {offsets = [0, 512], sizes = [8, 256], strides = [1, 1]} : vector<8x768xf32> to vector<8x256xf32>
    %505 = vector.extract_strided_slice %487 {offsets = [0, 512], sizes = [8, 256], strides = [1, 1]} : vector<8x768xf32> to vector<8x256xf32>
    %506 = arith.addf %505, %12 : vector<8x256xf32>
    %507 = arith.mulf %495, %506 : vector<8x256xf32>
    %508 = arith.addf %504, %507 : vector<8x256xf32>
    %509 = math.tanh %508 : vector<8x256xf32>
    %cst_101 = arith.constant 1.000000e+00 : f32
    %510 = vector.broadcast %cst_101 : f32 to vector<8x256xf32>
    %511 = arith.subf %510, %503 : vector<8x256xf32>
    %512 = arith.mulf %511, %509 : vector<8x256xf32>
    %513 = arith.mulf %503, %485 : vector<8x256xf32>
    %514 = arith.addf %512, %513 : vector<8x256xf32>
    %515 = tpu.concatenate %311, %340, %369, %398, %427, %456, %485, %514 in 0 : vector<8x256xf32>, vector<8x256xf32>, vector<8x256xf32>, vector<8x256xf32>, vector<8x256xf32>, vector<8x256xf32>, vector<8x256xf32>, vector<8x256xf32> -> vector<64x256xf32>
    %516 = arith.truncf %515 : vector<64x256xf32> to vector<64x256xbf16>
    %cst_102 = arith.constant dense<0.000000e+00> : vector<64x128xf32>
    %517 = tpu.matmul %516, %6, %cst_102 {dimension_numbers = #tpu.dot_dimension_numbers<[1], [0], [0], [1], [0, 0, 1, 1], [], []>} : vector<64x256xbf16>, vector<256x128xbf16>, vector<64x128xf32> -> vector<64x128xf32>
    %c0_103 = arith.constant 0 : index
    %c0_104 = arith.constant 0 : index
    %518 = vector.load %arg16[%c0_103, %c0_104] : memref<1x128xf32, #tpu.memory_space<vmem>>, vector<1x128xf32>
    %519 = vector.broadcast %518 : vector<1x128xf32> to vector<64x128xf32>
    %520 = arith.addf %517, %519 : vector<64x128xf32>
    %c0_105 = arith.constant 0 : index
    %c0_106 = arith.constant 0 : index
    %521 = vector.load %arg17[%c0_105, %c0_106] : memref<64x128xf32, #tpu.memory_space<vmem>>, vector<64x128xf32>
    tpu.vector_store %arg17[%c0_105, %c0_106], %520 {strides = array<i32>} : memref<64x128xf32, #tpu.memory_space<vmem>>, vector<64x128xf32>,
    return
  }
}

</mosaic_0001>

<bundles_post_ra>
// kernel: vocab_vae_forward.1
= control target key start
LH: loop header
LB: loop body
LE: loop exit
PB: predicated region body
PF: predicated region fallthrough
CT: control target
= control target key end

     0   :  { %v12263_v1 = vmov 0   ;;  %vm3005_vm0 = vcmask 523264   ;;  %s12241_s3 = inlined_call_operand.vmem [shape: bf16[128,768], index: 3, kind: input, shape index: {}]   ;;  %s12242_s0 = inlined_call_operand.vmem [shape: bf16[64,128], index: 0, kind: input, shape index: {}]   ;;  %s12243_s4 = inlined_call_operand.vmem [shape: bf16[256,768], index: 4, kind: input, shape index: {}]   ;;  %s12244_s5 = inlined_call_operand.vmem [shape: f32[1,768], index: 5, kind: input, shape index: {}]   ;;  %s12245_s6 = inlined_call_operand.vmem [shape: f32[1,256], index: 6, kind: input, shape index: {}]   ;;  %s12246_s7 = inlined_call_operand.vmem [shape: bf16[256,128], index: 7, kind: input, shape index: {}]   ;;  %s12247_s9 = inlined_call_operand.vmem [shape: bf16[64,256], index: 9, kind: input, shape index: {}]   ;;  %s12248_s8 = inlined_call_operand.vmem [shape: f32[1,128], index: 8, kind: input, shape index: {}]   ;;  %s12249_s18 = inlined_call_operand.vmem [shape: f32[8,128], index: 18, kind: output, shape index: {1}]   ;;  %s12250_s11 = inlined_call_operand.vmem [shape: bf16[128,768], index: 11, kind: input, shape index: {}]   ;;  %s12251_s2 = inlined_call_operand.vmem [shape: bf16[8,128], index: 2, kind: input, shape index: {}]   ;;  %s12252_s12 = inlined_call_operand.vmem [shape: bf16[256,768], index: 12, kind: input, shape index: {}]   ;;  %s12253_s1 = inlined_call_operand.vmem [shape: f32[8,64], index: 1, kind: input, shape index: {}]   ;;  %s12254_s10 = inlined_call_operand.vmem [shape: f32[1,256], index: 10, kind: input, shape index: {}]   ;;  %s12255_s13 = inlined_call_operand.vmem [shape: f32[1,768], index: 13, kind: input, shape index: {}]   ;;  %s12256_s14 = inlined_call_operand.vmem [shape: f32[1,256], index: 14, kind: input, shape index: {}]   ;;  %s12257_s15 = inlined_call_operand.vmem [shape: bf16[256,128], index: 15, kind: input, shape index: {}]   ;;  %s12258_s16 = inlined_call_operand.vmem [shape: f32[1,128], index: 16, kind: input, shape index: {}]   ;;  %s12259_s17 = inlined_call_operand.vmem [shape: f32[64,128], index: 17, kind: output, shape index: {0}]  }
   0x1   :  { %12698 = sst [smem:[#allocation97_spill]] %s12241_s3  ;;  %852 = vmatprep.mubr.bf16.mxu1 %v12263_v1  ;;  %779 = vmatprep.mubr.bf16.mxu0 %v12263_v1 }
   0x2   :  { %12699 = sst [smem:[#allocation98_spill]] %s12242_s0 }
   0x3   :  { %12700 = sst [smem:[#allocation99_spill]] %s12243_s4 }
   0x4   :  { %s12701_s29 = sld [smem:[#allocation97_spill]] }
   0x5   :  { %s12702_s25 = sld [smem:[#allocation99_spill]] }
   0x6   :  { %s12703_s28 = sld [smem:[#allocation98_spill]] }
   0xa   :  { %v5933_v0 = vld [vmem:[%s12701_s29 + $0x154] ss:$24 sps:$4 sm:$0xff]   ;;  %v5937_v3 = vld [vmem:[%s12701_s29 + $0x150] ss:$24 sps:$4 sm:$0xff]   ;;  %v5939_v5 = vld [vmem:[%s12701_s29 + $0x124] ss:$24 sps:$4 sm:$0xff]  }
   0xb   :  { %v5935_v2 = vld [vmem:[%s12701_s29 + $0x15c] ss:$24 sps:$4 sm:$0xff]   ;;  %747 = vmatprep.subr.bf16.mxu0 %v5933_v0  ;;  %v5938_v4 = vld [vmem:[%s12701_s29 + $0x158] ss:$24 sps:$4 sm:$0xff]   ;;  %v5941_v6 = vld [vmem:[%s12701_s29 + $0x12c] ss:$24 sps:$4 sm:$0xff]  }
   0xc   :  { %820 = vmatprep.subr.bf16.mxu1 %v5935_v2  ;;  %748 = vmatpush1.bf16.msra.mxu0 %v5937_v3  ;;  %v5943_v7 = vld [vmem:[%s12701_s29 + $0x120] ss:$24 sps:$4 sm:$0xff]   ;;  %v5945_v9 = vld [vmem:[%s12701_s29 + $0xf4] ss:$24 sps:$4 sm:$0xff]   ;;  %v5949_v11 = vld [vmem:[%s12701_s29 + $0xf0] ss:$24 sps:$4 sm:$0xff]  }
   0xd   :  { %821 = vmatpush1.bf16.msra.mxu1 %v5938_v4  ;;  %749 = vmatprep.subr.bf16.mxu0 %v5939_v5  ;;  %v5944_v8 = vld [vmem:[%s12701_s29 + $0x128] ss:$24 sps:$4 sm:$0xff]   ;;  %v5947_v10 = vld [vmem:[%s12701_s29 + $0xfc] ss:$24 sps:$4 sm:$0xff]   ;;  %v5950_v12 = vld [vmem:[%s12701_s29 + $0xf8] ss:$24 sps:$4 sm:$0xff]  }
   0xe   :  { %822 = vmatprep.subr.bf16.mxu1 %v5941_v6  ;;  %v5951_v13 = vld [vmem:[%s12701_s29 + $0xc4] ss:$24 sps:$4 sm:$0xff]   ;;  %v5955_v15 = vld [vmem:[%s12701_s29 + $0xc0] ss:$24 sps:$4 sm:$0xff]   ;;  %v5957_v17 = vld [vmem:[%s12701_s29 + $0x94] ss:$24 sps:$4 sm:$0xff]  }
   0xf   :  { %v5953_v14 = vld [vmem:[%s12701_s29 + $0xcc] ss:$24 sps:$4 sm:$0xff]   ;;  %v5956_v16 = vld [vmem:[%s12701_s29 + $0xc8] ss:$24 sps:$4 sm:$0xff]   ;;  %v5959_v18 = vld [vmem:[%s12701_s29 + $0x9c] ss:$24 sps:$4 sm:$0xff]  }
  0x10   :  { %750 = vmatpush1.bf16.msra.mxu0 %v5943_v7  ;;  %v5961_v19 = vld [vmem:[%s12701_s29 + $0x90] ss:$24 sps:$4 sm:$0xff]   ;;  %v5963_v21 = vld [vmem:[%s12701_s29 + $0x64] ss:$24 sps:$4 sm:$0xff]   ;;  %v5967_v23 = vld [vmem:[%s12701_s29 + $0x60] ss:$24 sps:$4 sm:$0xff]  }
  0x11   :  { %823 = vmatpush1.bf16.msra.mxu1 %v5944_v8  ;;  %751 = vmatprep.subr.bf16.mxu0 %v5945_v9  ;;  %v5962_v20 = vld [vmem:[%s12701_s29 + $0x98] ss:$24 sps:$4 sm:$0xff]   ;;  %v5965_v22 = vld [vmem:[%s12701_s29 + $0x6c] ss:$24 sps:$4 sm:$0xff]   ;;  %v5968_v24 = vld [vmem:[%s12701_s29 + $0x68] ss:$24 sps:$4 sm:$0xff]  }
  0x12   :  { %824 = vmatprep.subr.bf16.mxu1 %v5947_v10  ;;  %v5969_v25 = vld [vmem:[%s12701_s29 + $0x34] ss:$24 sps:$4 sm:$0xff]   ;;  %v5973_v27 = vld [vmem:[%s12701_s29 + $0x30] ss:$24 sps:$4 sm:$0xff]   ;;  %v5975_v29 = vld [vmem:[%s12701_s29 + $0x4] ss:$24 sps:$4 sm:$0xff]  }
  0x13   :  { %v5971_v26 = vld [vmem:[%s12701_s29 + $0x3c] ss:$24 sps:$4 sm:$0xff]   ;;  %v5974_v28 = vld [vmem:[%s12701_s29 + $0x38] ss:$24 sps:$4 sm:$0xff]   ;;  %v5977_v30 = vld [vmem:[%s12701_s29 + $0xc] ss:$24 sps:$4 sm:$0xff]  }
  0x14   :  { %752 = vmatpush1.bf16.msra.mxu0 %v5949_v11  ;;  %v5979_v31 = vld [vmem:[%s12701_s29] ss:$24 sps:$4 sm:$0xff]   ;;  %v5984_v33 = vld [vmem:[%s12701_s29 + $0x164] ss:$24 sps:$4 sm:$0xff]   ;;  %v7309_v34 = vld [vmem:[%s12702_s25 + $0x154] ss:$24 sps:$4 sm:$0xff]  }
  0x15   :  { %825 = vmatpush1.bf16.msra.mxu1 %v5950_v12  ;;  %753 = vmatprep.subr.bf16.mxu0 %v5951_v13  ;;  %v5980_v32 = vld [vmem:[%s12701_s29 + $0x8] ss:$24 sps:$4 sm:$0xff]   ;;  %v5990_v38 = vld [vmem:[%s12701_s29 + $0x134] ss:$24 sps:$4 sm:$0xff]   ;;  %v7331_v39 = vld [vmem:[%s12702_s25 + $0x124] ss:$24 sps:$4 sm:$0xff]  }
  0x16   :  { %826 = vmatprep.subr.bf16.mxu1 %v5953_v14  ;;  %v7314_v35 = vld [vmem:[%s12703_s28] sm:$0xff]   ;;  %v7322_v37 = vld [vmem:[%s12702_s25 + $0x150] ss:$24 sps:$4 sm:$0xff]   ;;  %v7351_v43 = vld [vmem:[%s12702_s25 + $0xf4] ss:$24 sps:$4 sm:$0xff]  }
  0x17   :  { %v5982_v36 = vld [vmem:[%s12701_s29 + $0x160] ss:$24 sps:$4 sm:$0xff]   ;;  %v5988_v40 = vld [vmem:[%s12701_s29 + $0x130] ss:$24 sps:$4 sm:$0xff]   ;;  %v5996_v42 = vld [vmem:[%s12701_s29 + $0x104] ss:$24 sps:$4 sm:$0xff]  }
  0x18   :  { %754 = vmatpush1.bf16.msra.mxu0 %v5955_v15  ;;  %v7342_v41 = vld [vmem:[%s12702_s25 + $0x120] ss:$24 sps:$4 sm:$0xff]   ;;  %v7361_v45 = vld [vmem:[%s12703_s28 + $0x8] sm:$0xff]   ;;  %v7376_v48 = vld [vmem:[%s12702_s25 + $0xc4] ss:$24 sps:$4 sm:$0xff]  }
  0x19   :  { %827 = vmatpush1.bf16.msra.mxu1 %v5956_v16  ;;  %755 = vmatprep.subr.bf16.mxu0 %v5957_v17  ;;  %v5994_v44 = vld [vmem:[%s12701_s29 + $0x100] ss:$24 sps:$4 sm:$0xff]   ;;  %v7367_v46 = vld [vmem:[%s12702_s25 + $0xf0] ss:$24 sps:$4 sm:$0xff]   ;;  %v6003_v47 = vld [vmem:[%s12701_s29 + $0xd4] ss:$24 sps:$4 sm:$0xff]  }
  0x1a   :  { %828 = vmatprep.subr.bf16.mxu1 %v5959_v18  ;;  %v6001_v49 = vld [vmem:[%s12701_s29 + $0xd0] ss:$24 sps:$4 sm:$0xff]   ;;  %v7385_v50 = vld [vmem:[%s12702_s25 + $0xc0] ss:$24 sps:$4 sm:$0xff]   ;;  %v6009_v51 = vld [vmem:[%s12701_s29 + $0xa4] ss:$24 sps:$4 sm:$0xff]  }
  0x1b   :  { %v7396_v52 = vld [vmem:[%s12702_s25 + $0x94] ss:$24 sps:$4 sm:$0xff]   ;;  %v6007_v53 = vld [vmem:[%s12701_s29 + $0xa0] ss:$24 sps:$4 sm:$0xff]   ;;  %v7412_v55 = vld [vmem:[%s12702_s25 + $0x90] ss:$24 sps:$4 sm:$0xff]  }
  0x1c   :  { %756 = vmatpush1.bf16.msra.mxu0 %v5961_v19  ;;  %v7406_v54 = vld [vmem:[%s12703_s28 + $0x10] sm:$0xff]   ;;  %v7421_v57 = vld [vmem:[%s12702_s25 + $0x64] ss:$24 sps:$4 sm:$0xff]   ;;  %v7430_v59 = vld [vmem:[%s12702_s25 + $0x60] ss:$24 sps:$4 sm:$0xff]  }
  0x1d   :  { %829 = vmatpush1.bf16.msra.mxu1 %v5962_v20  ;;  %757 = vmatprep.subr.bf16.mxu0 %v5963_v21  ;;  %v6016_v56 = vld [vmem:[%s12701_s29 + $0x74] ss:$24 sps:$4 sm:$0xff]   ;;  %v6014_v58 = vld [vmem:[%s12701_s29 + $0x70] ss:$24 sps:$4 sm:$0xff]   ;;  %v6022_v60 = vld [vmem:[%s12701_s29 + $0x44] ss:$24 sps:$4 sm:$0xff]  }
  0x1e   :  { %830 = vmatprep.subr.bf16.mxu1 %v5965_v22  ;;  %v7441_v61 = vld [vmem:[%s12702_s25 + $0x34] ss:$24 sps:$4 sm:$0xff]   ;;  %v6020_v62 = vld [vmem:[%s12701_s29 + $0x40] ss:$24 sps:$4 sm:$0xff]   ;;  %v7457_v0 = vld [vmem:[%s12702_s25 + $0x30] ss:$24 sps:$4 sm:$0xff]  }
  0x1f   :  { %v7451_v63 = vld [vmem:[%s12703_s28 + $0x18] sm:$0xff]   ;;  %v6029_v2 = vld [vmem:[%s12701_s29 + $0x14] ss:$24 sps:$4 sm:$0xff]   ;;  %v6027_v4 = vld [vmem:[%s12701_s29 + $0x10] ss:$24 sps:$4 sm:$0xff]  }
  0x20   :  { %758 = vmatpush1.bf16.msra.mxu0 %v5967_v23  ;;  %v7466_v3 = vld [vmem:[%s12702_s25 + $0x4] ss:$24 sps:$4 sm:$0xff]   ;;  %v7475_v5 = vld [vmem:[%s12702_s25] ss:$24 sps:$4 sm:$0xff]   ;;  %v7482_v6 = vld [vmem:[%s12702_s25 + $0x2d4] ss:$24 sps:$4 sm:$0xff]  }
  0x21   :  { %831 = vmatpush1.bf16.msra.mxu1 %v5968_v24  ;;  %759 = vmatprep.subr.bf16.mxu0 %v5969_v25  ;;  %v7488_v7 = vld [vmem:[%s12702_s25 + $0x15c] ss:$24 sps:$4 sm:$0xff]   ;;  %v7495_v8 = vld [vmem:[%s12702_s25 + $0x2d0] ss:$24 sps:$4 sm:$0xff]   ;;  %v7513_v11 = vld [vmem:[%s12702_s25 + $0x12c] ss:$24 sps:$4 sm:$0xff]  }
  0x22   :  { %832 = vmatprep.subr.bf16.mxu1 %v5971_v26  ;;  %v7501_v9 = vld [vmem:[%s12702_s25 + $0x158] ss:$24 sps:$4 sm:$0xff]   ;;  %v7506_v10 = vld [vmem:[%s12702_s25 + $0x2a4] ss:$24 sps:$4 sm:$0xff]   ;;  %v7524_v13 = vld [vmem:[%s12702_s25 + $0x128] ss:$24 sps:$4 sm:$0xff]  }
  0x23   :  { %v7519_v12 = vld [vmem:[%s12702_s25 + $0x2a0] ss:$24 sps:$4 sm:$0xff]   ;;  %v7531_v14 = vld [vmem:[%s12702_s25 + $0x274] ss:$24 sps:$4 sm:$0xff]   ;;  %v7544_v16 = vld [vmem:[%s12702_s25 + $0x270] ss:$24 sps:$4 sm:$0xff]  }
  0x24   :  { %760 = vmatpush1.bf16.msra.mxu0 %v5973_v27  ;;  %v7538_v15 = vld [vmem:[%s12702_s25 + $0xfc] ss:$24 sps:$4 sm:$0xff]   ;;  %v7551_v17 = vld [vmem:[%s12702_s25 + $0xf8] ss:$24 sps:$4 sm:$0xff]   ;;  %v7563_v19 = vld [vmem:[%s12702_s25 + $0xcc] ss:$24 sps:$4 sm:$0xff]  }
  0x25   :  { %833 = vmatpush1.bf16.msra.mxu1 %v5974_v28  ;;  %761 = vmatprep.subr.bf16.mxu0 %v5975_v29  ;;  %v7556_v18 = vld [vmem:[%s12702_s25 + $0x244] ss:$24 sps:$4 sm:$0xff]   ;;  %v7568_v20 = vld [vmem:[%s12702_s25 + $0x240] ss:$24 sps:$4 sm:$0xff]   ;;  %v7581_v22 = vld [vmem:[%s12702_s25 + $0x214] ss:$24 sps:$4 sm:$0xff]  }
  0x26   :  { %834 = vmatprep.subr.bf16.mxu1 %v5977_v30  ;;  %v7573_v21 = vld [vmem:[%s12702_s25 + $0xc8] ss:$24 sps:$4 sm:$0xff]   ;;  %v7588_v23 = vld [vmem:[%s12702_s25 + $0x9c] ss:$24 sps:$4 sm:$0xff]   ;;  %v7601_v25 = vld [vmem:[%s12702_s25 + $0x98] ss:$24 sps:$4 sm:$0xff]  }
  0x27   :  { %12704 = vst [vmem:[#allocation2_spill] sm:$0xff] %v7573_v21  ;;  %12705 = vst [vmem:[#allocation3_spill] sm:$0xff] %v7588_v23  ;;  %v7594_v24 = vld [vmem:[%s12702_s25 + $0x210] ss:$24 sps:$4 sm:$0xff]   ;;  %v7606_v26 = vld [vmem:[%s12702_s25 + $0x1e4] ss:$24 sps:$4 sm:$0xff]  }
  0x28   :  { %762 = vmatpush1.bf16.msra.mxu0 %v5979_v31  ;;  %12706 = vst [vmem:[#allocation4_spill] sm:$0xff] %v7601_v25  ;;  %v7613_v27 = vld [vmem:[%s12702_s25 + $0x6c] ss:$24 sps:$4 sm:$0xff]   ;;  %v7618_v28 = vld [vmem:[%s12702_s25 + $0x1e0] ss:$24 sps:$4 sm:$0xff]  }
  0x29   :  { %835 = vmatpush1.bf16.msra.mxu1 %v5980_v32  ;;  %893 = vmatprep.subr.bf16.mxu0 %v5984_v33  ;;  %12707 = vst [vmem:[#allocation5_spill] sm:$0xff] %v7613_v27  ;;  %v7623_v29 = vld [vmem:[%s12702_s25 + $0x68] ss:$24 sps:$4 sm:$0xff]   ;;  %v7631_v30 = vld [vmem:[%s12702_s25 + $0x1b4] ss:$24 sps:$4 sm:$0xff]  }
  0x2a   :  { %1446 = vmatprep.subr.bf16.mxu1 %v7309_v34  ;;  %12708 = vst [vmem:[#allocation6_spill] sm:$0xff] %v7623_v29  ;;  %v7638_v31 = vld [vmem:[%s12702_s25 + $0x3c] ss:$24 sps:$4 sm:$0xff]   ;;  %v7644_v32 = vld [vmem:[%s12702_s25 + $0x1b0] ss:$24 sps:$4 sm:$0xff]  }
  0x2b   :  { %780 = vmatmul.mubr.bf16.vlgmr.msra.gmra.mxu0 %v7314_v35  ;;  %12709 = vst [vmem:[#allocation7_spill] sm:$0xff] %v7638_v31  ;;  %v7651_v33 = vld [vmem:[%s12702_s25 + $0x38] ss:$24 sps:$4 sm:$0xff]  }
  0x2c   :  { %853 = vmatmul.mubr.bf16.vlgmr.msra.gmra.mxu1 %v7314_v35  ;;  %894 = vmatpush1.bf16.msra.mxu0 %v5982_v36  ;;  %12710 = vst [vmem:[#allocation8_spill] sm:$0xff] %v7651_v33  ;;  %v7663_v36 = vld [vmem:[%s12702_s25 + $0xc] ss:$24 sps:$4 sm:$0xff]  }
  0x2d   :  { %1447 = vmatpush1.bf16.msra.mxu1 %v7322_v37  ;;  %895 = vmatprep.subr.bf16.mxu0 %v5990_v38  ;;  %12711 = vst [vmem:[#allocation9_spill] sm:$0xff] %v7663_v36  ;;  %v7668_v38 = vld [vmem:[%s12702_s25 + $0x180] ss:$24 sps:$4 sm:$0xff]  }
  0x2e   :  { %1448 = vmatprep.subr.bf16.mxu1 %v7331_v39  ;;  %789 = vmatprep.mubr.bf16.mxu0 %v12263_v1 }
  0x2f   :  { %862 = vmatprep.mubr.bf16.mxu1 %v12263_v1 }
  0x30   :  { %896 = vmatpush1.bf16.msra.mxu0 %v5988_v40  ;;  %v7673_v40 = vld [vmem:[%s12702_s25 + $0x8] ss:$24 sps:$4 sm:$0xff]  }
  0x31   :  { %1449 = vmatpush1.bf16.msra.mxu1 %v7342_v41  ;;  %897 = vmatprep.subr.bf16.mxu0 %v5996_v42  ;;  %12712 = vst [vmem:[#allocation10_spill] sm:$0xff] %v7673_v40  ;;  %v7681_v42 = vld [vmem:[%s12702_s25 + $0x2dc] ss:$24 sps:$4 sm:$0xff]  }
  0x32   :  { %1450 = vmatprep.subr.bf16.mxu1 %v7351_v43  ;;  %12713 = vst [vmem:[#allocation11_spill] sm:$0xff] %v7681_v42 }
  0x33   :  { %790 = vmatmul.mubr.bf16.gmra.mxu0 %v7361_v45 }
  0x34   :  { %863 = vmatmul.mubr.bf16.gmra.mxu1 %v7361_v45  ;;  %898 = vmatpush1.bf16.msra.mxu0 %v5994_v44  ;;  %v7688_v44 = vld [vmem:[%s12702_s25 + $0x164] ss:$24 sps:$4 sm:$0xff]  }
  0x35   :  { %1451 = vmatpush1.bf16.msra.mxu1 %v7367_v46  ;;  %899 = vmatprep.subr.bf16.mxu0 %v6003_v47  ;;  %v7699_v47 = vld [vmem:[%s12702_s25 + $0x160] ss:$24 sps:$4 sm:$0xff]  }
  0x36   :  { %1452 = vmatprep.subr.bf16.mxu1 %v7376_v48  ;;  %799 = vmatprep.mubr.bf16.mxu0 %v12263_v1  ;;  %12715 = vst [vmem:[#allocation13_spill] sm:$0xff] %v7699_v47 }
  0x37   :  { %872 = vmatprep.mubr.bf16.mxu1 %v12263_v1 }
  0x38   :  { %900 = vmatpush1.bf16.msra.mxu0 %v6001_v49  ;;  %v7706_v49 = vld [vmem:[%s12702_s25 + $0x2ac] ss:$24 sps:$4 sm:$0xff]  }
  0x39   :  { %1453 = vmatpush1.bf16.msra.mxu1 %v7385_v50  ;;  %901 = vmatprep.subr.bf16.mxu0 %v6009_v51  ;;  %12716 = vst [vmem:[#allocation14_spill] sm:$0xff] %v7706_v49  ;;  %v7713_v51 = vld [vmem:[%s12702_s25 + $0x134] ss:$24 sps:$4 sm:$0xff]  }
  0x3a   :  { %1454 = vmatprep.subr.bf16.mxu1 %v7396_v52  ;;  %12717 = vst [vmem:[#allocation15_spill] sm:$0xff] %v7713_v51 }
  0x3b   :  { %800 = vmatmul.mubr.bf16.gmra.mxu0 %v7406_v54 }
  0x3c   :  { %873 = vmatmul.mubr.bf16.gmra.mxu1 %v7406_v54  ;;  %902 = vmatpush1.bf16.msra.mxu0 %v6007_v53  ;;  %v7721_v53 = vld [vmem:[%s12702_s25 + $0x2a8] ss:$24 sps:$4 sm:$0xff]  }
  0x3d   :  { %1455 = vmatpush1.bf16.msra.mxu1 %v7412_v55  ;;  %903 = vmatprep.subr.bf16.mxu0 %v6016_v56  ;;  %12718 = vst [vmem:[#allocation16_spill] sm:$0xff] %v7721_v53  ;;  %v7733_v56 = vld [vmem:[%s12702_s25 + $0x27c] ss:$24 sps:$4 sm:$0xff]  }
  0x3e   :  { %1456 = vmatprep.subr.bf16.mxu1 %v7421_v57  ;;  %809 = vmatprep.mubr.bf16.mxu0 %v12263_v1  ;;  %12720 = vst [vmem:[#allocation18_spill] sm:$0xff] %v7733_v56 }
  0x3f   :  { %882 = vmatprep.mubr.bf16.mxu1 %v12263_v1 }
  0x40   :  { %904 = vmatpush1.bf16.msra.mxu0 %v6014_v58  ;;  %v7738_v58 = vld [vmem:[%s12702_s25 + $0x104] ss:$24 sps:$4 sm:$0xff]  }
  0x41   :  { %1457 = vmatpush1.bf16.msra.mxu1 %v7430_v59  ;;  %905 = vmatprep.subr.bf16.mxu0 %v6022_v60  ;;  %12721 = vst [vmem:[#allocation19_spill] sm:$0xff] %v7738_v58  ;;  %v7746_v60 = vld [vmem:[%s12702_s25 + $0x278] ss:$24 sps:$4 sm:$0xff]  }
  0x42   :  { %1458 = vmatprep.subr.bf16.mxu1 %v7441_v61  ;;  %12722 = vst [vmem:[#allocation20_spill] sm:$0xff] %v7746_v60 }
  0x43   :  { %810 = vmatmul.mubr.bf16.gmra.mxu0 %v7451_v63 }
  0x44   :  { %883 = vmatmul.mubr.bf16.gmra.mxu1 %v7451_v63  ;;  %906 = vmatpush1.bf16.msra.mxu0 %v6020_v62  ;;  %v7751_v62 = vld [vmem:[%s12702_s25 + $0x100] ss:$24 sps:$4 sm:$0xff]  }
  0x45   :  { %1459 = vmatpush1.bf16.msra.mxu1 %v7457_v0  ;;  %907 = vmatprep.subr.bf16.mxu0 %v6029_v2  ;;  %12723 = vst [vmem:[#allocation21_spill] sm:$0xff] %v7751_v62  ;;  %v7763_v2 = vld [vmem:[%s12702_s25 + $0xd4] ss:$24 sps:$4 sm:$0xff]  }
  0x46   :  { %1460 = vmatprep.subr.bf16.mxu1 %v7466_v3  ;;  %925 = vmatprep.mubr.bf16.mxu0 %v12263_v1  ;;  %12725 = vst [vmem:[#allocation23_spill] sm:$0xff] %v7763_v2 }
  0x47   :  { %1478 = vmatprep.mubr.bf16.mxu1 %v12263_v1 }
  0x48   :  { %908 = vmatpush1.bf16.msra.mxu0 %v6027_v4  ;;  %v7770_v4 = vld [vmem:[%s12702_s25 + $0x248] ss:$24 sps:$4 sm:$0xff]  }
  0x49   :  { %1461 = vmatpush1.bf16.msra.mxu1 %v7475_v5  ;;  %1487 = vmatprep.subr.bf16.mxu0 %v7488_v7  ;;  %12726 = vst [vmem:[#allocation24_spill] sm:$0xff] %v7770_v4 }
  0x4a   :  { %1462 = vmatprep.subr.bf16.mxu1 %v7482_v6 }
  0x4b   :  { %926 = vmatmul.mubr.bf16.vlgmr.msra.gmra.mxu0 %v7314_v35  ;;  %v7656_v35 = vld [vmem:[%s12702_s25 + $0x184] ss:$24 sps:$4 sm:$0xff]  }
  0x4c   :  { %1488 = vmatpush1.bf16.msra.mxu0 %v7501_v9  ;;  %935 = vmatprep.mubr.bf16.mxu0 %v12263_v1 }
  0x4d   :  { %1463 = vmatpush2.bf16.msra.mxu1 %v7495_v8  ;;  %1489 = vmatprep.subr.bf16.mxu0 %v7513_v11 }
  0x4e   :  { %1464 = vmatprep.subr.bf16.mxu1 %v7506_v10 }
  0x50   :  { %1490 = vmatpush1.bf16.msra.mxu0 %v7524_v13 }
  0x51   :  { %1465 = vmatpush2.bf16.msra.mxu1 %v7519_v12  ;;  %1491 = vmatprep.subr.bf16.mxu0 %v7538_v15 }
  0x52   :  { %1466 = vmatprep.subr.bf16.mxu1 %v7531_v14 }
  0x53   :  { %936 = vmatmul.mubr.bf16.gmra.mxu0 %v7361_v45  ;;  %v7694_v45 = vld [vmem:[%s12702_s25 + $0x2d8] ss:$24 sps:$4 sm:$0xff]  }
  0x54   :  { %1492 = vmatpush1.bf16.msra.mxu0 %v7551_v17  ;;  %945 = vmatprep.mubr.bf16.mxu0 %v12263_v1  ;;  %12714 = vst [vmem:[#allocation12_spill] sm:$0xff] %v7694_v45 }
  0x55   :  { %1467 = vmatpush2.bf16.msra.mxu1 %v7544_v16  ;;  %1493 = vmatprep.subr.bf16.mxu0 %v7563_v19 }
  0x56   :  { %1468 = vmatprep.subr.bf16.mxu1 %v7556_v18 }
  0x58   :  { %1494 = vmatpush1.bf16.msra.mxu0 %v7573_v21 }
  0x59   :  { %1469 = vmatpush2.bf16.msra.mxu1 %v7568_v20  ;;  %1495 = vmatprep.subr.bf16.mxu0 %v7588_v23 }
  0x5a   :  { %1470 = vmatprep.subr.bf16.mxu1 %v7581_v22 }
  0x5b   :  { %946 = vmatmul.mubr.bf16.gmra.mxu0 %v7406_v54  ;;  %v7726_v54 = vld [vmem:[%s12702_s25 + $0x130] ss:$24 sps:$4 sm:$0xff]  }
  0x5c   :  { %1496 = vmatpush1.bf16.msra.mxu0 %v7601_v25  ;;  %955 = vmatprep.mubr.bf16.mxu0 %v12263_v1  ;;  %12719 = vst [vmem:[#allocation17_spill] sm:$0xff] %v7726_v54 }
  0x5d   :  { %1471 = vmatpush2.bf16.msra.mxu1 %v7594_v24  ;;  %1497 = vmatprep.subr.bf16.mxu0 %v7613_v27 }
  0x5e   :  { %1472 = vmatprep.subr.bf16.mxu1 %v7606_v26 }
  0x60   :  { %1498 = vmatpush1.bf16.msra.mxu0 %v7623_v29 }
  0x61   :  { %1473 = vmatpush2.bf16.msra.mxu1 %v7618_v28  ;;  %1499 = vmatprep.subr.bf16.mxu0 %v7638_v31 }
  0x62   :  { %1474 = vmatprep.subr.bf16.mxu1 %v7631_v30 }
  0x63   :  { %956 = vmatmul.mubr.bf16.gmra.mxu0 %v7451_v63  ;;  %v7758_v63 = vld [vmem:[%s12702_s25 + $0x24c] ss:$24 sps:$4 sm:$0xff]  }
  0x64   :  { %1500 = vmatpush1.bf16.msra.mxu0 %v7651_v33  ;;  %1519 = vmatprep.mubr.bf16.mxu0 %v12263_v1  ;;  %12724 = vst [vmem:[#allocation22_spill] sm:$0xff] %v7758_v63 }
  0x65   :  { %1475 = vmatpush2.bf16.msra.mxu1 %v7644_v32  ;;  %1501 = vmatprep.subr.bf16.mxu0 %v7663_v36 }
  0x66   :  { %1476 = vmatprep.subr.bf16.mxu1 %v7656_v35 }
  0x68   :  { %1502 = vmatpush1.bf16.msra.mxu0 %v7673_v40 }
  0x69   :  { %1477 = vmatpush2.bf16.msra.mxu1 %v7668_v38  ;;  %1503 = vmatprep.subr.bf16.mxu0 %v7681_v42 }
  0x6a   :  { %1528 = vmatprep.subr.bf16.mxu1 %v7688_v44 }
  0x6c   :  { %1479 = vmatmul.mubr.bf16.vlgmr.msra.gmra.mxu1 %v12263_v1  ;;  %1504 = vmatpush2.bf16.msra.mxu0 %v7694_v45 }
  0x6d   :  { %1529 = vmatpush1.bf16.msra.mxu1 %v7699_v47  ;;  %1505 = vmatprep.subr.bf16.mxu0 %v7706_v49  ;;  %v7818_v47 = vld [vmem:[%s12702_s25 + $0x1e8] ss:$24 sps:$4 sm:$0xff]  }
  0x6e   :  { %1530 = vmatprep.subr.bf16.mxu1 %v7713_v51  ;;  %1560 = vmatprep.mubr.bf16.mxu1 %v12263_v1  ;;  %v7775_v1 = vld [vmem:[%s12702_s25 + $0xd0] ss:$24 sps:$4 sm:$0xff]   ;;  %v7806_v51 = vld [vmem:[%s12702_s25 + $0x1ec] ss:$24 sps:$4 sm:$0xff]   ;;  %12734 = vst [vmem:[#allocation32_spill] sm:$0xff] %v7818_v47 }
  0x6f   :  { %12727 = vst [vmem:[#allocation25_spill] sm:$0xff] %v7775_v1  ;;  %12732 = vst [vmem:[#allocation30_spill] sm:$0xff] %v7806_v51 }
  0x70   :  { %1506 = vmatpush2.bf16.msra.mxu0 %v7721_v53 }
  0x71   :  { %1531 = vmatpush1.bf16.msra.mxu1 %v7726_v54  ;;  %1507 = vmatprep.subr.bf16.mxu0 %v7733_v56  ;;  %v7794_v54 = vld [vmem:[%s12702_s25 + $0x218] ss:$24 sps:$4 sm:$0xff]  }
  0x72   :  { %1532 = vmatprep.subr.bf16.mxu1 %v7738_v58  ;;  %v7782_v58 = vld [vmem:[%s12702_s25 + $0x21c] ss:$24 sps:$4 sm:$0xff]   ;;  %12730 = vst [vmem:[#allocation28_spill] sm:$0xff] %v7794_v54 }
  0x73   :  { %12728 = vst [vmem:[#allocation26_spill] sm:$0xff] %v7782_v58 }
  0x74   :  { %1508 = vmatpush2.bf16.msra.mxu0 %v7746_v60 }
  0x75   :  { %1533 = vmatpush1.bf16.msra.mxu1 %v7751_v62  ;;  %1509 = vmatprep.subr.bf16.mxu0 %v7758_v63  ;;  %v7787_v62 = vld [vmem:[%s12702_s25 + $0xa4] ss:$24 sps:$4 sm:$0xff]  }
  0x76   :  { %1534 = vmatprep.subr.bf16.mxu1 %v7763_v2  ;;  %12729 = vst [vmem:[#allocation27_spill] sm:$0xff] %v7787_v62  ;;  %v7799_v2 = vld [vmem:[%s12702_s25 + $0xa0] ss:$24 sps:$4 sm:$0xff]  }
  0x77   :  { %12731 = vst [vmem:[#allocation29_spill] sm:$0xff] %v7799_v2 }
  0x78   :  { %1510 = vmatpush2.bf16.msra.mxu0 %v7770_v4 }
  0x79   :  { %1535 = vmatpush1.bf16.msra.mxu1 %v7775_v1  ;;  %1511 = vmatprep.subr.bf16.mxu0 %v7782_v58  ;;  %v7811_v1 = vld [vmem:[%s12702_s25 + $0x74] ss:$24 sps:$4 sm:$0xff]  }
  0x7a   :  { %1536 = vmatprep.subr.bf16.mxu1 %v7787_v62  ;;  %12733 = vst [vmem:[#allocation31_spill] sm:$0xff] %v7811_v1  ;;  %v7823_v62 = vld [vmem:[%s12702_s25 + $0x70] ss:$24 sps:$4 sm:$0xff]  }
  0x7b   :  { %12735 = vst [vmem:[#allocation33_spill] sm:$0xff] %v7823_v62 }
  0x7c   :  { %1512 = vmatpush2.bf16.msra.mxu0 %v7794_v54  ;;  %v7830_v54 = vld [vmem:[%s12702_s25 + $0x1bc] ss:$24 sps:$4 sm:$0xff]  }
  0x7d   :  { %1537 = vmatpush1.bf16.msra.mxu1 %v7799_v2  ;;  %1513 = vmatprep.subr.bf16.mxu0 %v7806_v51  ;;  %12736 = vst [vmem:[#allocation34_spill] sm:$0xff] %v7830_v54  ;;  %v7835_v2 = vld [vmem:[%s12702_s25 + $0x44] ss:$24 sps:$4 sm:$0xff]   ;;  %v7842_v51 = vld [vmem:[%s12702_s25 + $0x1b8] ss:$24 sps:$4 sm:$0xff]  }
  0x7e   :  { %1538 = vmatprep.subr.bf16.mxu1 %v7811_v1  ;;  %12737 = vst [vmem:[#allocation35_spill] sm:$0xff] %v7835_v2  ;;  %12738 = vst [vmem:[#allocation36_spill] sm:$0xff] %v7842_v51  ;;  %v7847_v1 = vld [vmem:[%s12702_s25 + $0x40] ss:$24 sps:$4 sm:$0xff]  }
  0x7f   :  { %12739 = vst [vmem:[#allocation37_spill] sm:$0xff] %v7847_v1 }
  0x80   :  { %1514 = vmatpush2.bf16.msra.mxu0 %v7818_v47  ;;  %v7854_v47 = vld [vmem:[%s12702_s25 + $0x18c] ss:$24 sps:$4 sm:$0xff]  }
  0x81   :  { %1539 = vmatpush1.bf16.msra.mxu1 %v7823_v62  ;;  %1515 = vmatprep.subr.bf16.mxu0 %v7830_v54  ;;  %12740 = vst [vmem:[#allocation38_spill] sm:$0xff] %v7854_v47  ;;  %v7859_v62 = vld [vmem:[%s12702_s25 + $0x14] ss:$24 sps:$4 sm:$0xff]   ;;  %v7866_v54 = vld [vmem:[%s12702_s25 + $0x188] ss:$24 sps:$4 sm:$0xff]  }
  0x82   :  { %1540 = vmatprep.subr.bf16.mxu1 %v7835_v2  ;;  %12741 = vst [vmem:[#allocation39_spill] sm:$0xff] %v7859_v62  ;;  %12742 = vst [vmem:[#allocation40_spill] sm:$0xff] %v7866_v54  ;;  %v7871_v2 = vld [vmem:[%s12702_s25 + $0x10] ss:$24 sps:$4 sm:$0xff]  }
  0x83   :  { %12743 = vst [vmem:[#allocation41_spill] sm:$0xff] %v7871_v2 }
  0x84   :  { %1516 = vmatpush2.bf16.msra.mxu0 %v7842_v51  ;;  %v7878_v51 = vld [vmem:[%s12702_s25 + $0x2e4] ss:$24 sps:$4 sm:$0xff]  }
  0x85   :  { %1541 = vmatpush1.bf16.msra.mxu1 %v7847_v1  ;;  %1517 = vmatprep.subr.bf16.mxu0 %v7854_v47  ;;  %12744 = vst [vmem:[#allocation42_spill] sm:$0xff] %v7878_v51  ;;  %v7885_v1 = vld [vmem:[%s12702_s25 + $0x2e0] ss:$24 sps:$4 sm:$0xff]   ;;  %v12746_v47 = vmov 0  }
  0x86   :  { %1542 = vmatprep.subr.bf16.mxu1 %v7859_v62  ;;  %12745 = vst [vmem:[#allocation43_spill] sm:$0xff] %v7885_v1  ;;  %v7891_v62 = vld [vmem:[%s12702_s25 + $0x2b4] ss:$24 sps:$4 sm:$0xff]  }
  0x88   :  { %1518 = vmatpush2.bf16.msra.mxu0 %v7866_v54 }
  0x89   :  { %1543 = vmatpush1.bf16.msra.mxu1 %v7871_v2  ;;  %1615 = vmatprep.subr.bf16.mxu0 %v7309_v34  ;;  %v7899_v2 = vld [vmem:[%s12702_s25 + $0x2b0] ss:$24 sps:$4 sm:$0xff]  }
  0x8a   :  { %1544 = vmatprep.subr.bf16.mxu1 %v7878_v51  ;;  %v7906_v51 = vld [vmem:[%s12702_s25 + $0x284] ss:$24 sps:$4 sm:$0xff]  }
  0x8b   :  { %1520 = vmatmul.mubr.bf16.vlgmr.msra.gmra.mxu0 %v12746_v47 }
  0x8c   :  { %1616 = vmatpush1.bf16.msra.mxu0 %v7322_v37  ;;  %v7920_v37 = vld [vmem:[%s12702_s25 + $0x254] ss:$24 sps:$4 sm:$0xff]  }
  0x8d   :  { %1545 = vmatpush2.bf16.msra.mxu1 %v7885_v1  ;;  %1617 = vmatprep.subr.bf16.mxu0 %v7331_v39  ;;  %v7913_v1 = vld [vmem:[%s12702_s25 + $0x280] ss:$24 sps:$4 sm:$0xff]   ;;  %v7927_v39 = vld [vmem:[%s12702_s25 + $0x250] ss:$24 sps:$4 sm:$0xff]  }
  0x8e   :  { %1546 = vmatprep.subr.bf16.mxu1 %v7891_v62 }
  0x90   :  { %1618 = vmatpush1.bf16.msra.mxu0 %v7342_v41  ;;  %v7934_v41 = vld [vmem:[%s12702_s25 + $0x224] ss:$24 sps:$4 sm:$0xff]  }
  0x91   :  { %1547 = vmatpush2.bf16.msra.mxu1 %v7899_v2  ;;  %1619 = vmatprep.subr.bf16.mxu0 %v7351_v43  ;;  %v7941_v43 = vld [vmem:[%s12702_s25 + $0x220] ss:$24 sps:$4 sm:$0xff]  }
  0x92   :  { %1548 = vmatprep.subr.bf16.mxu1 %v7906_v51 }
  0x94   :  { %1620 = vmatpush1.bf16.msra.mxu0 %v7367_v46  ;;  %v7948_v46 = vld [vmem:[%s12702_s25 + $0x1f4] ss:$24 sps:$4 sm:$0xff]  }
  0x95   :  { %1549 = vmatpush2.bf16.msra.mxu1 %v7913_v1  ;;  %1621 = vmatprep.subr.bf16.mxu0 %v7376_v48  ;;  %v7955_v48 = vld [vmem:[%s12702_s25 + $0x1f0] ss:$24 sps:$4 sm:$0xff]  }
  0x96   :  { %1550 = vmatprep.subr.bf16.mxu1 %v7920_v37 }
  0x98   :  { %1622 = vmatpush1.bf16.msra.mxu0 %v7385_v50  ;;  %v7962_v50 = vld [vmem:[%s12702_s25 + $0x1c4] ss:$24 sps:$4 sm:$0xff]  }
  0x99   :  { %1551 = vmatpush2.bf16.msra.mxu1 %v7927_v39  ;;  %1623 = vmatprep.subr.bf16.mxu0 %v7396_v52  ;;  %v7969_v52 = vld [vmem:[%s12702_s25 + $0x1c0] ss:$24 sps:$4 sm:$0xff]  }
  0x9a   :  { %1552 = vmatprep.subr.bf16.mxu1 %v7934_v41 }
  0x9c   :  { %1624 = vmatpush1.bf16.msra.mxu0 %v7412_v55  ;;  %v7976_v55 = vld [vmem:[%s12702_s25 + $0x194] ss:$24 sps:$4 sm:$0xff]  }
  0x9d   :  { %1553 = vmatpush2.bf16.msra.mxu1 %v7941_v43  ;;  %1625 = vmatprep.subr.bf16.mxu0 %v7421_v57  ;;  %v7983_v57 = vld [vmem:[%s12702_s25 + $0x190] ss:$24 sps:$4 sm:$0xff]  }
  0x9e   :  { %1554 = vmatprep.subr.bf16.mxu1 %v7948_v46 }
  0xa0   :  { %1626 = vmatpush1.bf16.msra.mxu0 %v7430_v59  ;;  %v12747_v59 = vld [vmem:[#allocation28_spill] sm:$0xff] }
  0xa1   :  { %1555 = vmatpush2.bf16.msra.mxu1 %v7955_v48  ;;  %1627 = vmatprep.subr.bf16.mxu0 %v7441_v61  ;;  %v12748_v61 = vld [vmem:[#allocation30_spill] sm:$0xff] }
  0xa2   :  { %1556 = vmatprep.subr.bf16.mxu1 %v7962_v50 }
  0xa4   :  { %1628 = vmatpush1.bf16.msra.mxu0 %v7457_v0  ;;  %v12749_v0 = vld [vmem:[#allocation32_spill] sm:$0xff] }
  0xa5   :  { %1557 = vmatpush2.bf16.msra.mxu1 %v7969_v52  ;;  %1629 = vmatprep.subr.bf16.mxu0 %v7466_v3 }
  0xa6   :  { %1558 = vmatprep.subr.bf16.mxu1 %v7976_v55 }
  0xa8   :  { %1630 = vmatpush1.bf16.msra.mxu0 %v7475_v5 }
  0xa9   :  { %1559 = vmatpush2.bf16.msra.mxu1 %v7983_v57  ;;  %1631 = vmatprep.subr.bf16.mxu0 %v7482_v6 }
  0xaa   :  { %1656 = vmatprep.subr.bf16.mxu1 %v7488_v7  ;;  %v12750_v7 = vld [vmem:[#allocation34_spill] sm:$0xff] }
  0xac   :  { %1561 = vmatmul.mubr.bf16.vlgmr.msra.gmra.mxu1 %v12746_v47  ;;  %1632 = vmatpush2.bf16.msra.mxu0 %v7495_v8 }
  0xad   :  { %1657 = vmatpush1.bf16.msra.mxu1 %v7501_v9  ;;  %1633 = vmatprep.subr.bf16.mxu0 %v7506_v10  ;;  %v421_v9 = vlaneseq }
  0xae   :  { %1658 = vmatprep.subr.bf16.mxu1 %v7513_v11  ;;  %v12751_v11 = vld [vmem:[#allocation36_spill] sm:$0xff] }
  0xaf   :  { %v8039_v47 = vshrl.u32 %v421_v9, 7 }
  0xb0   :  { %1634 = vmatpush2.bf16.msra.mxu0 %v7519_v12 }
  0xb1   :  { %1659 = vmatpush1.bf16.msra.mxu1 %v7524_v13  ;;  %1635 = vmatprep.subr.bf16.mxu0 %v7531_v14  ;;  %v12752_v13 = vld [vmem:[#allocation38_spill] sm:$0xff]  ;;  %12753 = vst [vmem:[#allocation44_spill] sm:$0xff] %v8039_v47 }
  0xb2   :  { %1660 = vmatprep.subr.bf16.mxu1 %v7538_v15 }
  0xb4   :  { %1636 = vmatpush2.bf16.msra.mxu0 %v7544_v16 }
  0xb5   :  { %1661 = vmatpush1.bf16.msra.mxu1 %v7551_v17  ;;  %1637 = vmatprep.subr.bf16.mxu0 %v7556_v18 }
  0xb6   :  { %1662 = vmatprep.subr.bf16.mxu1 %v7563_v19 }
  0xb8   :  { %1638 = vmatpush2.bf16.msra.mxu0 %v7568_v20 }
  0xb9   :  { %1663 = vmatpush1.bf16.msra.mxu1 %v7573_v21  ;;  %1639 = vmatprep.subr.bf16.mxu0 %v7581_v22 }
  0xba   :  { %1664 = vmatprep.subr.bf16.mxu1 %v7588_v23 }
  0xbc   :  { %1640 = vmatpush2.bf16.msra.mxu0 %v7594_v24 }
  0xbd   :  { %1665 = vmatpush1.bf16.msra.mxu1 %v7601_v25  ;;  %1641 = vmatprep.subr.bf16.mxu0 %v7606_v26 }
  0xbe   :  { %1666 = vmatprep.subr.bf16.mxu1 %v7613_v27 }
  0xc0   :  { %1642 = vmatpush2.bf16.msra.mxu0 %v7618_v28 }
  0xc1   :  { %1667 = vmatpush1.bf16.msra.mxu1 %v7623_v29  ;;  %1643 = vmatprep.subr.bf16.mxu0 %v7631_v30 }
  0xc2   :  { %1668 = vmatprep.subr.bf16.mxu1 %v7638_v31 }
  0xc4   :  { %1644 = vmatpush2.bf16.msra.mxu0 %v7644_v32 }
  0xc5   :  { %1669 = vmatpush1.bf16.msra.mxu1 %v7651_v33  ;;  %1645 = vmatprep.subr.bf16.mxu0 %v7656_v35 }
  0xc6   :  { %1670 = vmatprep.subr.bf16.mxu1 %v7663_v36 }
  0xc8   :  { %1646 = vmatpush2.bf16.msra.mxu0 %v7668_v38 }
  0xc9   :  { %1671 = vmatpush1.bf16.msra.mxu1 %v7673_v40  ;;  %1697 = vmatprep.subr.bf16.mxu0 %v7688_v44 }
  0xca   :  { %1672 = vmatprep.subr.bf16.mxu1 %v7681_v42 }
  0xcd   :  { %1673 = vmatpush2.bf16.msra.mxu1 %v7694_v45 }
  0xce   :  { %1674 = vmatprep.subr.bf16.mxu1 %v7706_v49 }
  0xd1   :  { %1675 = vmatpush2.bf16.msra.mxu1 %v7721_v53 }
  0xd2   :  { %1676 = vmatprep.subr.bf16.mxu1 %v7733_v56  ;;  %v8074_v56 = vsub.s32 1, %v8039_v47 }
  0xd4   :  { %12756 = vst [vmem:[#allocation47_spill] sm:$0xff] %v8074_v56 }
  0xd5   :  { %1677 = vmatpush2.bf16.msra.mxu1 %v7746_v60 }
  0xd6   :  { %1678 = vmatprep.subr.bf16.mxu1 %v7758_v63  ;;  %v8042_v63 = vsub.s32 0, %v8039_v47 }
  0xd8   :  { %12754 = vst [vmem:[#allocation45_spill] sm:$0xff] %v8042_v63 }
  0xd9   :  { %1679 = vmatpush2.bf16.msra.mxu1 %v7770_v4  ;;  %v12325_v4 = vsub.s32 3, %v8039_v47 }
  0xda   :  { %1680 = vmatprep.subr.bf16.mxu1 %v7782_v58 }
  0xdd   :  { %1681 = vmatpush2.bf16.msra.mxu1 %v12747_v59 }
  0xde   :  { %1682 = vmatprep.subr.bf16.mxu1 %v12748_v61  ;;  %v12322_v61 = vsub.s32 2, %v8039_v47 }
  0xe1   :  { %1683 = vmatpush2.bf16.msra.mxu1 %v12749_v0 }
  0xe2   :  { %1684 = vmatprep.subr.bf16.mxu1 %v12750_v7  ;;  %v8050_v7 = vld [vmem:[%s12244_s5] sm:$0x3f] }
  0xe3   :  { %v8058_v9 = vrot.slane %v8050_v7, %v8042_v63  ;;  %v8086_v40 = vrot.slane %v8050_v7, %v12325_v4 }
  0xe5   :  { %1685 = vmatpush2.bf16.msra.mxu1 %v12751_v11  ;;  %12760 = vst [vmem:[#allocation51_spill] sm:$0xff] %v8086_v40 }
  0xe6   :  { %1686 = vmatprep.subr.bf16.mxu1 %v12752_v13 }
  0xe9   :  { %1687 = vmatpush2.bf16.msra.mxu1 %v7866_v54 }
  0xea   :  { %1784 = vmatprep.subr.bf16.mxu1 %v7309_v34  ;;  %v8067_v34 = vrot.slane %v8050_v7, %v12322_v61 }
  0xeb   :  { %v8054_v11 = vpop.f32.mrf.mxu0 }
  0xec   :  { %v8052_v0 = vpop.f32.mrf.mxu1 }
  0xed   :  { %v8062_v54 = vpop.f32.mrf.mxu0 }
  0xee   :  { %v8060_v13 = vpop.f32.mrf.mxu1 }
  0xef   :  { %v785_v58 = vpop.f32.mrf.mxu0 }
  0xf0   :  { %v858_v59 = vpop.f32.mrf.mxu1  ;;  %v8077_v53 = vadd.f32 %v785_v58, %v8058_v9 }
  0xf1   :  { %v8071_v60 = vadd.f32 %v858_v59, %v8067_v34  ;;  %v8081_v45 = vpop.f32.mrf.mxu0  ;;  %v8090_v59 = vrot.slane %v8050_v7, %v8074_v56 }
  0xf2   :  { %12757 = vst [vmem:[#allocation48_spill] sm:$0xff] %v8077_v53  ;;  %v8079_v49 = vpop.f32.mrf.mxu1  ;;  %12759 = vst [vmem:[#allocation50_spill] sm:$0xff] %v8081_v45 }
  0xf3   :  { %12755 = vst [vmem:[#allocation46_spill] sm:$0xff] %v8071_v60  ;;  %12758 = vst [vmem:[#allocation49_spill] sm:$0xff] %v8079_v49  ;;  %v791_v42 = vpop.f32.mrf.mxu0 }
  0xf4   :  { %v864_v61 = vpop.f32.mrf.mxu1  ;;  %12761 = vst [vmem:[#allocation52_spill] sm:$0xff] %v8090_v59  ;;  %v8093_v60 = vadd.f32 %v791_v42, %v8058_v9 }
  0xf5   :  { %v8096_v58 = vadd.f32 %v864_v61, %v8067_v34  ;;  %v793_v49 = vpop.f32.mrf.mxu0 }
  0xf6   :  { %12762 = vst [vmem:[#allocation53_spill] sm:$0xff] %v8093_v60  ;;  %v866_v53 = vpop.f32.mrf.mxu1  ;;  %v8099_v45 = vadd.f32 %v793_v49, %v8090_v59 }
  0xf7   :  { %12763 = vst [vmem:[#allocation54_spill] sm:$0xff] %v8096_v58  ;;  %v8102_v36 = vadd.f32 %v866_v53, %v8086_v40  ;;  %v795_v4 = vpop.f32.mrf.mxu0 }
  0xf8   :  { %12764 = vst [vmem:[#allocation55_spill] sm:$0xff] %v8099_v45  ;;  %v868_v33 = vpop.f32.mrf.mxu1  ;;  %v8105_v31 = vadd.f32 %v795_v4, %v8058_v9 }
  0xf9   :  { %12765 = vst [vmem:[#allocation56_spill] sm:$0xff] %v8102_v36  ;;  %v8108_v29 = vadd.f32 %v868_v33, %v8067_v34  ;;  %v8110_v42 = vpop.f32.mrf.mxu0 }
  0xfa   :  { %12766 = vst [vmem:[#allocation57_spill] sm:$0xff] %v8105_v31  ;;  %12768 = vst [vmem:[#allocation59_spill] sm:$0xff] %v8110_v42  ;;  %v8112_v61 = vpop.f32.mrf.mxu1 }
  0xfb   :  { %12767 = vst [vmem:[#allocation58_spill] sm:$0xff] %v8108_v29  ;;  %12769 = vst [vmem:[#allocation60_spill] sm:$0xff] %v8112_v61  ;;  %v801_v58 = vpop.f32.mrf.mxu0 }
  0xfc   :  { %v874_v60 = vpop.f32.mrf.mxu1  ;;  %v8115_v49 = vadd.f32 %v801_v58, %v8058_v9 }
  0xfd   :  { %v8118_v53 = vadd.f32 %v874_v60, %v8067_v34  ;;  %v803_v36 = vpop.f32.mrf.mxu0 }
  0xfe   :  { %12770 = vst [vmem:[#allocation61_spill] sm:$0xff] %v8115_v49  ;;  %v876_v45 = vpop.f32.mrf.mxu1  ;;  %v8121_v4 = vadd.f32 %v803_v36, %v8090_v59 }
  0xff   :  { %12771 = vst [vmem:[#allocation62_spill] sm:$0xff] %v8118_v53  ;;  %v8124_v33 = vadd.f32 %v876_v45, %v8086_v40  ;;  %v805_v29 = vpop.f32.mrf.mxu0 }
 0x100   :  { %12772 = vst [vmem:[#allocation63_spill] sm:$0xff] %v8121_v4  ;;  %v878_v31 = vpop.f32.mrf.mxu1  ;;  %v8127_v61 = vadd.f32 %v805_v29, %v8058_v9 }
 0x101   :  { %12773 = vst [vmem:[#allocation64_spill] sm:$0xff] %v8124_v33  ;;  %v8130_v42 = vadd.f32 %v878_v31, %v8067_v34  ;;  %v8132_v58 = vpop.f32.mrf.mxu0 }
 0x102   :  { %12774 = vst [vmem:[#allocation65_spill] sm:$0xff] %v8127_v61  ;;  %12776 = vst [vmem:[#allocation67_spill] sm:$0xff] %v8132_v58  ;;  %v8134_v60 = vpop.f32.mrf.mxu1  ;;  %v12329_v58 = vsub.s32 4, %v8039_v47 }
 0x103   :  { %12775 = vst [vmem:[#allocation66_spill] sm:$0xff] %v8130_v42  ;;  %12777 = vst [vmem:[#allocation68_spill] sm:$0xff] %v8134_v60  ;;  %v811_v53 = vpop.f32.mrf.mxu0 }
 0x104   :  { %v884_v49 = vpop.f32.mrf.mxu1  ;;  %v8137_v36 = vadd.f32 %v811_v53, %v8058_v9 }
 0x105   :  { %v8140_v45 = vadd.f32 %v884_v49, %v8067_v34  ;;  %v813_v33 = vpop.f32.mrf.mxu0 }
 0x106   :  { %12778 = vst [vmem:[#allocation69_spill] sm:$0xff] %v8137_v36  ;;  %v886_v4 = vpop.f32.mrf.mxu1  ;;  %v8143_v29 = vadd.f32 %v813_v33, %v8090_v59  ;;  %v8162_v33 = vrot.slane %v8050_v7, %v12329_v58 }
 0x107   :  { %12779 = vst [vmem:[#allocation70_spill] sm:$0xff] %v8140_v45  ;;  %v8146_v31 = vadd.f32 %v886_v4, %v8086_v40  ;;  %v815_v42 = vpop.f32.mrf.mxu0 }
 0x108   :  { %12780 = vst [vmem:[#allocation71_spill] sm:$0xff] %v8143_v29  ;;  %v888_v61 = vpop.f32.mrf.mxu1  ;;  %v8149_v60 = vadd.f32 %v815_v42, %v8058_v9  ;;  %v12334_v42 = vsub.s32 5, %v8039_v47 }
 0x109   :  { %12781 = vst [vmem:[#allocation72_spill] sm:$0xff] %v8146_v31  ;;  %v8153_v53 = vadd.f32 %v888_v61, %v8067_v34  ;;  %v8155_v49 = vpop.f32.mrf.mxu0 }
 0x10a   :  { %12782 = vst [vmem:[#allocation73_spill] sm:$0xff] %v8149_v60  ;;  %12784 = vst [vmem:[#allocation75_spill] sm:$0xff] %v8155_v49 }
 0x10b   :  { %12783 = vst [vmem:[#allocation74_spill] sm:$0xff] %v8153_v53  ;;  %v8157_v45 = vpop.f32.mrf.mxu0  ;;  %v8175_v53 = vrot.slane %v8050_v7, %v12334_v42 }
 0x10d   :  { %v8164_v4 = vpop.f32.mrf.mxu0  ;;  %12787 = vst [vmem:[#allocation78_spill] sm:$0xff] %v8175_v53 }
 0x10f   :  { %v931_v31 = vpop.f32.mrf.mxu0 }
 0x110   :  { %v8168_v60 = vadd.f32 %v931_v31, %v8162_v33 }
 0x111   :  { %v8170_v29 = vpop.f32.mrf.mxu0 }
 0x112   :  { %12785 = vst [vmem:[#allocation76_spill] sm:$0xff] %v8168_v60  ;;  %12786 = vst [vmem:[#allocation77_spill] sm:$0xff] %v8170_v29 }
 0x113   :  { %v937_v61 = vpop.f32.mrf.mxu0 }
 0x114   :  { %v8178_v49 = vadd.f32 %v937_v61, %v8162_v33 }
 0x115   :  { %v939_v58 = vpop.f32.mrf.mxu0 }
 0x116   :  { %12788 = vst [vmem:[#allocation79_spill] sm:$0xff] %v8178_v49  ;;  %v8181_v36 = vadd.f32 %v939_v58, %v8175_v53 }
 0x117   :  { %v941_v27 = vpop.f32.mrf.mxu0 }
 0x118   :  { %12789 = vst [vmem:[#allocation80_spill] sm:$0xff] %v8181_v36  ;;  %v8184_v25 = vadd.f32 %v941_v27, %v8162_v33 }
 0x119   :  { %v8186_v31 = vpop.f32.mrf.mxu0 }
 0x11a   :  { %12790 = vst [vmem:[#allocation81_spill] sm:$0xff] %v8184_v25  ;;  %12791 = vst [vmem:[#allocation82_spill] sm:$0xff] %v8186_v31 }
 0x11b   :  { %v947_v60 = vpop.f32.mrf.mxu0 }
 0x11c   :  { %v8189_v29 = vadd.f32 %v947_v60, %v8162_v33 }
 0x11d   :  { %v949_v47 = vpop.f32.mrf.mxu0 }
 0x11e   :  { %12792 = vst [vmem:[#allocation83_spill] sm:$0xff] %v8189_v29  ;;  %v8192_v7 = vadd.f32 %v949_v47, %v8175_v53  ;;  %v8208_v47 = vpop.f32.mrf.mxu1 }
 0x11f   :  { %v951_v61 = vpop.f32.mrf.mxu0  ;;  %12799 = vst [vmem:[#allocation90_spill] sm:$0xff] %v8208_v47 }
 0x120   :  { %12793 = vst [vmem:[#allocation84_spill] sm:$0xff] %v8192_v7  ;;  %v8195_v42 = vadd.f32 %v951_v61, %v8162_v33 }
 0x121   :  { %v8197_v58 = vpop.f32.mrf.mxu0 }
 0x122   :  { %12794 = vst [vmem:[#allocation85_spill] sm:$0xff] %v8195_v42  ;;  %12795 = vst [vmem:[#allocation86_spill] sm:$0xff] %v8197_v58  ;;  %v782_v58 = vadd.f32 %v8054_v11, %v8058_v9  ;;  %v857_v11 = vadd.f32 %v8060_v13, %v8086_v40 }
 0x123   :  { %v957_v36 = vpop.f32.mrf.mxu0 }
 0x124   :  { %v8200_v27 = vadd.f32 %v957_v36, %v8162_v33  ;;  %v784_v36 = vadd.f32 %v8062_v54, %v8090_v59 }
 0x125   :  { %v959_v25 = vpop.f32.mrf.mxu0 }
 0x126   :  { %12796 = vst [vmem:[#allocation87_spill] sm:$0xff] %v8200_v27  ;;  %v8203_v31 = vadd.f32 %v959_v25, %v8175_v53 }
 0x127   :  { %v961_v60 = vpop.f32.mrf.mxu0 }
 0x128   :  { %12797 = vst [vmem:[#allocation88_spill] sm:$0xff] %v8203_v31  ;;  %v8206_v29 = vadd.f32 %v961_v60, %v8162_v33 }
 0x129   :  { %v8214_v25 = vpop.f32.mrf.mxu0 }
 0x12a   :  { %12798 = vst [vmem:[#allocation89_spill] sm:$0xff] %v8206_v29  ;;  %12800 = vst [vmem:[#allocation91_spill] sm:$0xff] %v8214_v25  ;;  %v8314_v25 = vld [vmem:[%s12702_s25 + $0x64] ss:$24 sps:$4 sm:$0xff]  }
 0x12c   :  { %v1480_v7 = vpop.f32.mrf.mxu1 }
 0x12d   :  { %v1569_v27 = vadd.f32 %v1480_v7, %v782_v58 }
 0x12e   :  { %v1482_v49 = vpop.f32.mrf.mxu1 }
 0x12f   :  { %v1570_v23 = vadd.f32 %v1482_v49, %v784_v36  ;;  %v5618_v31 = vmul.f32 -1.442695, %v1569_v27 }
 0x130   :  { %v1484_v61 = vpop.f32.mrf.mxu1 }
 0x131   :  { %v5619_v21 = vmul.f32 -1.442695, %v1570_v23  ;;  %6413 = vpow2.f32 %v5618_v31 }
 0x132   :  { %v1485_v42 = vpop.f32.mrf.mxu1 }
 0x133   :  { %6415 = vpow2.f32 %v5619_v21  ;;  %v855_v42 = vadd.f32 %v8052_v0, %v8067_v34  ;;  %v419_v21 = vld [vmem:[%s12245_s6] sm:$0x3] }
 0x134   :  { %v8224_v34 = vrot.slane %v419_v21, %v8042_v63 }
 0x13e   :  { %v6414_v58 = vpop.eup %6413 }
 0x13f   :  { %v1577_v23 = vadd.f32 1.0, %v6414_v58 }
 0x140   :  { %v6416_v27 = vpop.eup %6415 }
 0x141   :  { %v1578_v31 = vadd.f32 1.0, %v6416_v27  ;;  %v930_v27 = vadd.f32 %v8164_v4, %v8175_v53 }
 0x14b   :  { %v1521_v60 = vpop.f32.mrf.mxu0 }
 0x14c   :  { %v1583_v9 = vadd.f32 %v1521_v60, %v855_v42 }
 0x14d   :  { %v1523_v29 = vpop.f32.mrf.mxu0 }
 0x14e   :  { %v1584_v54 = vadd.f32 %v1523_v29, %v857_v11  ;;  %v5620_v7 = vmul.f32 -1.442695, %v1583_v9  ;;  %v928_v9 = vadd.f32 %v8157_v45, %v8162_v33 }
 0x14f   :  { %v1525_v47 = vpop.f32.mrf.mxu0 }
 0x150   :  { %v5621_v49 = vmul.f32 -1.442695, %v1584_v54  ;;  %6417 = vpow2.f32 %v5620_v7  ;;  %v8227_v47 = vrot.slane %v419_v21, %v8074_v56 }
 0x151   :  { %v1526_v61 = vpop.f32.mrf.mxu0 }
 0x152   :  { %6419 = vpow2.f32 %v5621_v49 }
 0x153   :  { %6421 = vrcp.f32 %v1577_v23 }
 0x154   :  { %6423 = vrcp.f32 %v1578_v31 }
 0x15d   :  { %v6418_v0 = vpop.eup %6417 }
 0x15e   :  { %v1591_v29 = vadd.f32 1.0, %v6418_v0 }
 0x15f   :  { %v6420_v13 = vpop.eup %6419 }
 0x160   :  { %v1592_v60 = vadd.f32 1.0, %v6420_v13  ;;  %v6422_v61 = vpop.eup %6421  ;;  %6425 = vrcp.f32 %v1591_v29 }
 0x161   :  { %v6424_v49 = vpop.eup %6423 }
 0x162   :  { %6427 = vrcp.f32 %v1592_v60 }
 0x16c   :  { %v1562_v36 = vpop.f32.mrf.mxu1 }
 0x16d   :  { %v1597_v42 = vadd.f32 %v1562_v36, %v8224_v34  ;;  %v6426_v13 = vpop.eup %6425 }
 0x16e   :  { %v1564_v11 = vpop.f32.mrf.mxu1  ;;  %v1605_v56 = vsub.f32 1.0, %v6426_v13 }
 0x16f   :  { %v1599_v54 = vmul.f32 %v6422_v61, %v1597_v42  ;;  %v1598_v7 = vadd.f32 %v1564_v11, %v8227_v47  ;;  %v6428_v36 = vpop.eup %6427  ;;  %v1609_v42 = vmul.f32 0.0, %v6426_v13  ;;  %v12806_v13 = vld [vmem:[#allocation23_spill] sm:$0xff] }
 0x170   :  { %v1566_v58 = vpop.f32.mrf.mxu1  ;;  %v1606_v33 = vsub.f32 1.0, %v6428_v36 }
 0x171   :  { %v1601_v23 = vadd.f32 %v1599_v54, %v928_v9  ;;  %v1600_v31 = vmul.f32 %v6424_v49, %v1598_v7  ;;  %v1610_v58 = vmul.f32 0.0, %v6428_v36  ;;  %v12802_v54 = vld [vmem:[#allocation15_spill] sm:$0xff]  ;;  %v8258_v49 = vld [vmem:[%s12702_s25 + $0x124] ss:$24 sps:$4 sm:$0xff]  }
 0x172   :  { %v1567_v21 = vpop.f32.mrf.mxu1  ;;  %v8252_v7 = vld [vmem:[%s12702_s25 + $0x150] ss:$24 sps:$4 sm:$0xff]  }
 0x173   :  { %6429 = vtanh.f32 %v1601_v23  ;;  %v1602_v0 = vadd.f32 %v1600_v31, %v930_v27  ;;  %v12803_v27 = vld [vmem:[#allocation17_spill] sm:$0xff]  ;;  %v12804_v23 = vld [vmem:[#allocation19_spill] sm:$0xff] }
 0x174   :  { %v8266_v31 = vld [vmem:[%s12702_s25 + $0x120] ss:$24 sps:$4 sm:$0xff]   ;;  %v8272_v21 = vld [vmem:[%s12702_s25 + $0xf4] ss:$24 sps:$4 sm:$0xff]   ;;  %v8280_v36 = vld [vmem:[%s12702_s25 + $0xf0] ss:$24 sps:$4 sm:$0xff]  }
 0x175   :  { %6431 = vtanh.f32 %v1602_v0  ;;  %v12805_v0 = vld [vmem:[#allocation21_spill] sm:$0xff]  ;;  %12814 = vst [vmem:[#allocation19_spill] sm:$0xff] %v8314_v25 }
 0x180   :  { %v6430_v45 = vpop.eup %6429 }
 0x181   :  { %v1607_v29 = vmul.f32 %v6430_v45, %v1605_v56  ;;  %v12801_v56 = vld [vmem:[#allocation13_spill] sm:$0xff] }
 0x182   :  { %v6432_v61 = vpop.eup %6431  ;;  %v8286_v45 = vld [vmem:[%s12702_s25 + $0xc4] ss:$24 sps:$4 sm:$0xff]  }
 0x183   :  { %v1608_v11 = vmul.f32 %v6432_v61, %v1606_v33  ;;  %v8235_v63 = vadd.f32 %v1609_v42, %v1607_v29  ;;  %v12807_v33 = vld [vmem:[#allocation25_spill] sm:$0xff]  ;;  %v12808_v29 = vld [vmem:[#allocation27_spill] sm:$0xff] }
 0x184   :  { %v8294_v42 = vld [vmem:[%s12702_s25 + $0xc0] ss:$24 sps:$4 sm:$0xff]   ;;  %v8300_v61 = vld [vmem:[%s12702_s25 + $0x94] ss:$24 sps:$4 sm:$0xff]  }
 0x185   :  { %v8237_v4 = vadd.f32 %v1610_v58, %v1608_v11  ;;  %v8243_v9 = vpack.c.bf16 %v8235_v63, %v8235_v63  ;;  %12809 = vst [vmem:[#allocation13_spill] sm:$0xff] %v8294_v42  ;;  %12810 = vst [vmem:[#allocation15_spill] sm:$0xff] %v8300_v61  ;;  %v12811_v11 = vld [vmem:[#allocation29_spill] sm:$0xff]  ;;  %v12812_v58 = vld [vmem:[#allocation31_spill] sm:$0xff] }
 0x187   :  { %v1614_v60 = vpack.c.bf16 %v8237_v4, %v8237_v4 }
 0x189   :  { %1647 = vmatprep.mubr.bf16.mxu0 %v1614_v60  ;;  %1688 = vmatprep.mubr.bf16.mxu1 %v1614_v60 }
 0x18a   :  { %1648 = vmatmul.mubr.bf16.vlgmr.msra.gmra.mxu0 %v8243_v9  ;;  %1689 = vmatmul.mubr.bf16.vlgmr.msra.gmra.mxu1 %v8243_v9 }
 0x18b   :  { %1698 = vmatpush1.bf16.msra.mxu0 %v12801_v56  ;;  %1729 = vmatprep.mubr.bf16.mxu0 %v1614_v60  ;;  %v8308_v60 = vld [vmem:[%s12702_s25 + $0x90] ss:$24 sps:$4 sm:$0xff]  }
 0x18c   :  { %1699 = vmatprep.subr.bf16.mxu0 %v12802_v54  ;;  %1785 = vmatpush1.bf16.msra.mxu1 %v8252_v7  ;;  %12813 = vst [vmem:[#allocation17_spill] sm:$0xff] %v8308_v60 }
 0x18d   :  { %1786 = vmatprep.subr.bf16.mxu1 %v8258_v49 }
 0x18f   :  { %1700 = vmatpush1.bf16.msra.mxu0 %v12803_v27 }
 0x190   :  { %1701 = vmatprep.subr.bf16.mxu0 %v12804_v23  ;;  %1787 = vmatpush1.bf16.msra.mxu1 %v8266_v31 }
 0x191   :  { %1788 = vmatprep.subr.bf16.mxu1 %v8272_v21 }
 0x193   :  { %1702 = vmatpush1.bf16.msra.mxu0 %v12805_v0 }
 0x194   :  { %1703 = vmatprep.subr.bf16.mxu0 %v12806_v13  ;;  %1789 = vmatpush1.bf16.msra.mxu1 %v8280_v36 }
 0x195   :  { %1790 = vmatprep.subr.bf16.mxu1 %v8286_v45 }
 0x197   :  { %1704 = vmatpush1.bf16.msra.mxu0 %v12807_v33 }
 0x198   :  { %1705 = vmatprep.subr.bf16.mxu0 %v12808_v29  ;;  %1791 = vmatpush1.bf16.msra.mxu1 %v8294_v42  ;;  %v12815_v42 = vld [vmem:[#allocation33_spill] sm:$0xff] }
 0x199   :  { %1792 = vmatprep.subr.bf16.mxu1 %v8300_v61  ;;  %v12816_v61 = vld [vmem:[#allocation35_spill] sm:$0xff] }
 0x19b   :  { %1706 = vmatpush1.bf16.msra.mxu0 %v12811_v11  ;;  %v12818_v11 = vld [vmem:[#allocation37_spill] sm:$0xff] }
 0x19c   :  { %1707 = vmatprep.subr.bf16.mxu0 %v12812_v58  ;;  %1793 = vmatpush1.bf16.msra.mxu1 %v8308_v60  ;;  %v8322_v58 = vld [vmem:[%s12702_s25 + $0x60] ss:$24 sps:$4 sm:$0xff]   ;;  %v8328_v60 = vld [vmem:[%s12702_s25 + $0x34] ss:$24 sps:$4 sm:$0xff]  }
 0x19d   :  { %1794 = vmatprep.subr.bf16.mxu1 %v8314_v25  ;;  %12817 = vst [vmem:[#allocation21_spill] sm:$0xff] %v8322_v58  ;;  %v12819_v25 = vld [vmem:[#allocation39_spill] sm:$0xff] }
 0x19f   :  { %1708 = vmatpush1.bf16.msra.mxu0 %v12815_v42  ;;  %v12821_v42 = vld [vmem:[#allocation42_spill] sm:$0xff] }
 0x1a0   :  { %1709 = vmatprep.subr.bf16.mxu0 %v12816_v61  ;;  %1795 = vmatpush1.bf16.msra.mxu1 %v8322_v58  ;;  %v8336_v61 = vld [vmem:[%s12702_s25 + $0x30] ss:$24 sps:$4 sm:$0xff]   ;;  %v12820_v58 = vld [vmem:[#allocation41_spill] sm:$0xff] }
 0x1a1   :  { %1796 = vmatprep.subr.bf16.mxu1 %v8328_v60 }
 0x1a3   :  { %1710 = vmatpush1.bf16.msra.mxu0 %v12818_v11  ;;  %v12822_v11 = vld [vmem:[#allocation43_spill] sm:$0xff] }
 0x1a4   :  { %1711 = vmatprep.subr.bf16.mxu0 %v12819_v25  ;;  %1797 = vmatpush1.bf16.msra.mxu1 %v8336_v61 }
 0x1a5   :  { %1798 = vmatprep.subr.bf16.mxu1 %v7466_v3  ;;  %v8376_v3 = vld [vmem:[%s12702_s25 + $0x15c] ss:$24 sps:$4 sm:$0xff]  }
 0x1a6   :  { %12823 = vst [vmem:[#allocation23_spill] sm:$0xff] %v8376_v3 }
 0x1a7   :  { %1712 = vmatpush1.bf16.msra.mxu0 %v12820_v58 }
 0x1a8   :  { %1713 = vmatprep.subr.bf16.mxu0 %v12821_v42  ;;  %1799 = vmatpush1.bf16.msra.mxu1 %v7475_v5  ;;  %v8385_v5 = vld [vmem:[%s12702_s25 + $0x158] ss:$24 sps:$4 sm:$0xff]  }
 0x1a9   :  { %1800 = vmatprep.subr.bf16.mxu1 %v7482_v6  ;;  %12824 = vst [vmem:[#allocation25_spill] sm:$0xff] %v8385_v5  ;;  %v8391_v6 = vld [vmem:[%s12702_s25 + $0x12c] ss:$24 sps:$4 sm:$0xff]  }
 0x1aa   :  { %12825 = vst [vmem:[#allocation27_spill] sm:$0xff] %v8391_v6 }
 0x1ab   :  { %1714 = vmatpush2.bf16.msra.mxu0 %v12822_v11 }
 0x1ac   :  { %1715 = vmatprep.subr.bf16.mxu0 %v7891_v62  ;;  %1801 = vmatpush2.bf16.msra.mxu1 %v7495_v8  ;;  %v8397_v8 = vld [vmem:[%s12702_s25 + $0x128] ss:$24 sps:$4 sm:$0xff]  }
 0x1ad   :  { %1802 = vmatprep.subr.bf16.mxu1 %v7506_v10  ;;  %12826 = vst [vmem:[#allocation39_spill] sm:$0xff] %v8397_v8  ;;  %v12827_v10 = vld [vmem:[#allocation2_spill] sm:$0xff] }
 0x1af   :  { %1716 = vmatpush2.bf16.msra.mxu0 %v7899_v2 }
 0x1b0   :  { %1717 = vmatprep.subr.bf16.mxu0 %v7906_v51  ;;  %1803 = vmatpush2.bf16.msra.mxu1 %v7519_v12  ;;  %v12828_v12 = vld [vmem:[#allocation3_spill] sm:$0xff] }
 0x1b1   :  { %1804 = vmatprep.subr.bf16.mxu1 %v7531_v14  ;;  %v12829_v14 = vld [vmem:[#allocation4_spill] sm:$0xff] }
 0x1b3   :  { %1718 = vmatpush2.bf16.msra.mxu0 %v7913_v1 }
 0x1b4   :  { %1719 = vmatprep.subr.bf16.mxu0 %v7920_v37  ;;  %1805 = vmatpush2.bf16.msra.mxu1 %v7544_v16  ;;  %v12830_v16 = vld [vmem:[#allocation5_spill] sm:$0xff] }
 0x1b5   :  { %1806 = vmatprep.subr.bf16.mxu1 %v7556_v18  ;;  %v12831_v18 = vld [vmem:[#allocation6_spill] sm:$0xff] }
 0x1b7   :  { %1720 = vmatpush2.bf16.msra.mxu0 %v7927_v39 }
 0x1b8   :  { %1721 = vmatprep.subr.bf16.mxu0 %v7934_v41  ;;  %1807 = vmatpush2.bf16.msra.mxu1 %v7568_v20  ;;  %v12832_v20 = vld [vmem:[#allocation7_spill] sm:$0xff] }
 0x1b9   :  { %1808 = vmatprep.subr.bf16.mxu1 %v7581_v22  ;;  %v12833_v22 = vld [vmem:[#allocation8_spill] sm:$0xff] }
 0x1bb   :  { %1722 = vmatpush2.bf16.msra.mxu0 %v7941_v43 }
 0x1bc   :  { %1723 = vmatprep.subr.bf16.mxu0 %v7948_v46  ;;  %1809 = vmatpush2.bf16.msra.mxu1 %v7594_v24  ;;  %v12834_v24 = vld [vmem:[#allocation9_spill] sm:$0xff] }
 0x1bd   :  { %1810 = vmatprep.subr.bf16.mxu1 %v7606_v26  ;;  %v12838_v26 = vld [vmem:[#allocation14_spill] sm:$0xff] }
 0x1bf   :  { %1724 = vmatpush2.bf16.msra.mxu0 %v7955_v48 }
 0x1c0   :  { %1725 = vmatprep.subr.bf16.mxu0 %v7962_v50  ;;  %1811 = vmatpush2.bf16.msra.mxu1 %v7618_v28  ;;  %v12839_v28 = vld [vmem:[#allocation16_spill] sm:$0xff] }
 0x1c1   :  { %1812 = vmatprep.subr.bf16.mxu1 %v7631_v30  ;;  %v12840_v30 = vld [vmem:[#allocation18_spill] sm:$0xff] }
 0x1c3   :  { %1726 = vmatpush2.bf16.msra.mxu0 %v7969_v52 }
 0x1c4   :  { %1727 = vmatprep.subr.bf16.mxu0 %v7976_v55  ;;  %1813 = vmatpush2.bf16.msra.mxu1 %v7644_v32  ;;  %v12841_v32 = vld [vmem:[#allocation20_spill] sm:$0xff] }
 0x1c5   :  { %1814 = vmatprep.subr.bf16.mxu1 %v7656_v35  ;;  %v12842_v35 = vld [vmem:[#allocation22_spill] sm:$0xff] }
 0x1c7   :  { %1728 = vmatpush2.bf16.msra.mxu0 %v7983_v57 }
 0x1c8   :  { %1825 = vmatprep.subr.bf16.mxu0 %v8376_v3  ;;  %1815 = vmatpush2.bf16.msra.mxu1 %v7668_v38  ;;  %v12843_v38 = vld [vmem:[#allocation24_spill] sm:$0xff] }
 0x1c9   :  { %1866 = vmatprep.subr.bf16.mxu1 %v7688_v44  ;;  %v12844_v44 = vld [vmem:[#allocation26_spill] sm:$0xff] }
 0x1ca   :  { %1730 = vmatmul.mubr.bf16.vlgmr.msra.gmra.mxu0 %v8243_v9  ;;  %v12845_v9 = vld [vmem:[#allocation28_spill] sm:$0xff] }
 0x1cb   :  { %1826 = vmatpush1.bf16.msra.mxu0 %v8385_v5 }
 0x1cc   :  { %1827 = vmatprep.subr.bf16.mxu0 %v8391_v6 }
 0x1cf   :  { %1828 = vmatpush1.bf16.msra.mxu0 %v8397_v8 }
 0x1d0   :  { %1829 = vmatprep.subr.bf16.mxu0 %v7538_v15  ;;  %v12835_v15 = vld [vmem:[#allocation10_spill] sm:$0xff] }
 0x1d3   :  { %1830 = vmatpush1.bf16.msra.mxu0 %v7551_v17  ;;  %v12836_v17 = vld [vmem:[#allocation11_spill] sm:$0xff] }
 0x1d4   :  { %1831 = vmatprep.subr.bf16.mxu0 %v7563_v19  ;;  %v12837_v19 = vld [vmem:[#allocation12_spill] sm:$0xff] }
 0x1d7   :  { %1832 = vmatpush1.bf16.msra.mxu0 %v12827_v10  ;;  %v12846_v10 = vld [vmem:[#allocation30_spill] sm:$0xff] }
 0x1d8   :  { %1833 = vmatprep.subr.bf16.mxu0 %v12828_v12  ;;  %v12847_v12 = vld [vmem:[#allocation32_spill] sm:$0xff] }
 0x1db   :  { %1834 = vmatpush1.bf16.msra.mxu0 %v12829_v14  ;;  %v12848_v14 = vld [vmem:[#allocation34_spill] sm:$0xff] }
 0x1dc   :  { %1835 = vmatprep.subr.bf16.mxu0 %v12830_v16  ;;  %v12849_v16 = vld [vmem:[#allocation36_spill] sm:$0xff] }
 0x1df   :  { %1836 = vmatpush1.bf16.msra.mxu0 %v12831_v18  ;;  %v12850_v18 = vld [vmem:[#allocation38_spill] sm:$0xff] }
 0x1e0   :  { %1837 = vmatprep.subr.bf16.mxu0 %v12832_v20  ;;  %v12851_v20 = vld [vmem:[#allocation40_spill] sm:$0xff] }
 0x1e3   :  { %1838 = vmatpush1.bf16.msra.mxu0 %v12833_v22  ;;  %v8431_v22 = vld [vmem:[%s12702_s25 + $0x154] ss:$24 sps:$4 sm:$0xff]  }
 0x1e4   :  { %1839 = vmatprep.subr.bf16.mxu0 %v12834_v24  ;;  %12852 = vst [vmem:[#allocation41_spill] sm:$0xff] %v8431_v22 }
 0x1e7   :  { %1840 = vmatpush1.bf16.msra.mxu0 %v12835_v15 }
 0x1e8   :  { %1841 = vmatprep.subr.bf16.mxu0 %v12836_v17 }
 0x1eb   :  { %1842 = vmatpush2.bf16.msra.mxu0 %v12837_v19 }
 0x1ec   :  { %1843 = vmatprep.subr.bf16.mxu0 %v12838_v26 }
 0x1ef   :  { %1844 = vmatpush2.bf16.msra.mxu0 %v12839_v28 }
 0x1f0   :  { %1845 = vmatprep.subr.bf16.mxu0 %v12840_v30 }
 0x1f3   :  { %1846 = vmatpush2.bf16.msra.mxu0 %v12841_v32 }
 0x1f4   :  { %1847 = vmatprep.subr.bf16.mxu0 %v12842_v35  ;;  %v12853_v35 = vld [vmem:[#allocation50_spill] sm:$0xff] }
 0x1f7   :  { %1848 = vmatpush2.bf16.msra.mxu0 %v12843_v38  ;;  %v788_v38 = vadd.f32 %v12853_v35, %v8090_v59  ;;  %v8763_v59 = vld [vmem:[%s12702_s25 + $0x1e8] ss:$24 sps:$4 sm:$0xff]  }
 0x1f8   :  { %1849 = vmatprep.subr.bf16.mxu0 %v12844_v44  ;;  %v12854_v44 = vld [vmem:[#allocation48_spill] sm:$0xff] }
 0x1fb   :  { %1850 = vmatpush2.bf16.msra.mxu0 %v12845_v9 }
 0x1fc   :  { %1851 = vmatprep.subr.bf16.mxu0 %v12846_v10 }
 0x1ff   :  { %1852 = vmatpush2.bf16.msra.mxu0 %v12847_v12 }
 0x200   :  { %1853 = vmatprep.subr.bf16.mxu0 %v12848_v14 }
 0x203   :  { %1854 = vmatpush2.bf16.msra.mxu0 %v12849_v16  ;;  %v12855_v16 = vld [vmem:[#allocation49_spill] sm:$0xff] }
 0x204   :  { %1855 = vmatprep.subr.bf16.mxu0 %v12850_v18  ;;  %v861_v18 = vadd.f32 %v12855_v16, %v8086_v40  ;;  %v12857_v16 = vld [vmem:[#allocation77_spill] sm:$0xff]  ;;  %v8757_v40 = vld [vmem:[%s12702_s25 + $0x1ec] ss:$24 sps:$4 sm:$0xff]  }
 0x207   :  { %1856 = vmatpush2.bf16.msra.mxu0 %v12851_v20  ;;  %v12856_v20 = vld [vmem:[#allocation46_spill] sm:$0xff] }
 0x208   :  { %1953 = vmatprep.subr.bf16.mxu0 %v8431_v22 }
 0x24a   :  { %v1649_v24 = vpop.f32.mrf.mxu0  ;;  %v1690_v15 = vpop.f32.mrf.mxu1 }
 0x24b   :  { %v1738_v9 = vadd.f32 %v1649_v24, %v12854_v44  ;;  %v1752_v22 = vadd.f32 %v1690_v15, %v12856_v20 }
 0x24c   :  { %v1651_v17 = vpop.f32.mrf.mxu0  ;;  %v1692_v19 = vpop.f32.mrf.mxu1 }
 0x24d   :  { %v1739_v10 = vadd.f32 %v1651_v17, %v788_v38  ;;  %v5622_v12 = vmul.f32 -1.442695, %v1738_v9  ;;  %v1753_v8 = vadd.f32 %v1692_v19, %v861_v18  ;;  %v934_v18 = vadd.f32 %v12857_v16, %v8175_v53  ;;  %v12867_v16 = vld [vmem:[#allocation21_spill] sm:$0xff] }
 0x24e   :  { %v1653_v26 = vpop.f32.mrf.mxu0  ;;  %v1694_v28 = vpop.f32.mrf.mxu1  ;;  %v8751_v53 = vld [vmem:[%s12702_s25 + $0x218] ss:$24 sps:$4 sm:$0xff]  }
 0x24f   :  { %v5623_v14 = vmul.f32 -1.442695, %v1739_v10  ;;  %6433 = vpow2.f32 %v5622_v12  ;;  %v5624_v26 = vmul.f32 -1.442695, %v1752_v22  ;;  %v5625_v28 = vmul.f32 -1.442695, %v1753_v8 }
 0x250   :  { %v1654_v30 = vpop.f32.mrf.mxu0  ;;  %v1695_v32 = vpop.f32.mrf.mxu1 }
 0x251   :  { %6435 = vpow2.f32 %v5623_v14 }
 0x252   :  { %6437 = vpow2.f32 %v5624_v26 }
 0x253   :  { %6439 = vpow2.f32 %v5625_v28 }
 0x25c   :  { %v6434_v30 = vpop.eup %6433 }
 0x25d   :  { %v1746_v6 = vadd.f32 1.0, %v6434_v30 }
 0x25e   :  { %v6436_v32 = vpop.eup %6435 }
 0x25f   :  { %v1747_v35 = vadd.f32 1.0, %v6436_v32  ;;  %6441 = vrcp.f32 %v1746_v6  ;;  %v6438_v24 = vpop.eup %6437  ;;  %v12858_v6 = vld [vmem:[#allocation76_spill] sm:$0xff] }
 0x260   :  { %v6440_v17 = vpop.eup %6439  ;;  %v1760_v38 = vadd.f32 1.0, %v6438_v24 }
 0x261   :  { %6443 = vrcp.f32 %v1747_v35  ;;  %v1761_v9 = vadd.f32 1.0, %v6440_v17 }
 0x262   :  { %6445 = vrcp.f32 %v1760_v38 }
 0x263   :  { %6447 = vrcp.f32 %v1761_v9 }
 0x26c   :  { %v6442_v12 = vpop.eup %6441 }
 0x26e   :  { %v6444_v19 = vpop.eup %6443 }
 0x26f   :  { %v6446_v32 = vpop.eup %6445 }
 0x270   :  { %v6448_v35 = vpop.eup %6447  ;;  %v1774_v24 = vsub.f32 1.0, %v6446_v32 }
 0x271   :  { %v1775_v38 = vsub.f32 1.0, %v6448_v35 }
 0x28a   :  { %v1731_v44 = vpop.f32.mrf.mxu0 }
 0x28b   :  { %v1766_v10 = vadd.f32 %v1731_v44, %v8224_v34 }
 0x28c   :  { %v1733_v15 = vpop.f32.mrf.mxu0 }
 0x28d   :  { %v1768_v22 = vmul.f32 %v6442_v12, %v1766_v10  ;;  %v1767_v8 = vadd.f32 %v1733_v15, %v8227_v47  ;;  %v1778_v10 = vmul.f32 %v6446_v32, %v8235_v63  ;;  %v12859_v63 = vld [vmem:[#allocation13_spill] sm:$0xff] }
 0x28e   :  { %v1735_v14 = vpop.f32.mrf.mxu0  ;;  %v8649_v32 = vld [vmem:[%s12702_s25 + $0x9c] ss:$24 sps:$4 sm:$0xff]  }
 0x28f   :  { %v1770_v20 = vadd.f32 %v1768_v22, %v12858_v6  ;;  %v1769_v26 = vmul.f32 %v6444_v19, %v1767_v8  ;;  %v1779_v14 = vmul.f32 %v6448_v35, %v8237_v4  ;;  %v12860_v4 = vld [vmem:[#allocation15_spill] sm:$0xff]  ;;  %12889 = vst [vmem:[#allocation24_spill] sm:$0xff] %v8649_v32  ;;  %v8655_v35 = vld [vmem:[%s12702_s25 + $0x98] ss:$24 sps:$4 sm:$0xff]  }
 0x290   :  { %v1736_v28 = vpop.f32.mrf.mxu0  ;;  %v12884_v6 = vld [vmem:[#allocation39_spill] sm:$0xff]  ;;  %12890 = vst [vmem:[#allocation26_spill] sm:$0xff] %v8655_v35 }
 0x291   :  { %6449 = vtanh.f32 %v1770_v20  ;;  %v1771_v30 = vadd.f32 %v1769_v26, %v934_v18  ;;  %v8497_v18 = vld [vmem:[%s12702_s25] ss:$24 sps:$4 sm:$0xff]   ;;  %v8625_v20 = vld [vmem:[%s12702_s25 + $0xfc] ss:$24 sps:$4 sm:$0xff]   ;;  %v8637_v28 = vld [vmem:[%s12702_s25 + $0xcc] ss:$24 sps:$4 sm:$0xff]  }
 0x292   :  { %12885 = vst [vmem:[#allocation16_spill] sm:$0xff] %v8625_v20  ;;  %v8631_v26 = vld [vmem:[%s12702_s25 + $0xf8] ss:$24 sps:$4 sm:$0xff]   ;;  %12887 = vst [vmem:[#allocation20_spill] sm:$0xff] %v8637_v28 }
 0x293   :  { %6451 = vtanh.f32 %v1771_v30  ;;  %12886 = vst [vmem:[#allocation18_spill] sm:$0xff] %v8631_v26  ;;  %v8643_v30 = vld [vmem:[%s12702_s25 + $0xc8] ss:$24 sps:$4 sm:$0xff]  }
 0x294   :  { %12888 = vst [vmem:[#allocation22_spill] sm:$0xff] %v8643_v30 }
 0x29e   :  { %v6450_v17 = vpop.eup %6449 }
 0x29f   :  { %v1776_v44 = vmul.f32 %v6450_v17, %v1774_v24  ;;  %v8661_v24 = vld [vmem:[%s12702_s25 + $0x6c] ss:$24 sps:$4 sm:$0xff]   ;;  %v8667_v17 = vld [vmem:[%s12702_s25 + $0x68] ss:$24 sps:$4 sm:$0xff]  }
 0x2a0   :  { %v6452_v12 = vpop.eup %6451  ;;  %12891 = vst [vmem:[#allocation28_spill] sm:$0xff] %v8661_v24  ;;  %12892 = vst [vmem:[#allocation30_spill] sm:$0xff] %v8667_v17 }
 0x2a1   :  { %v1777_v15 = vmul.f32 %v6452_v12, %v1775_v38  ;;  %v8447_v9 = vadd.f32 %v1778_v10, %v1776_v44  ;;  %v8673_v38 = vld [vmem:[%s12702_s25 + $0x3c] ss:$24 sps:$4 sm:$0xff]   ;;  %v8679_v44 = vld [vmem:[%s12702_s25 + $0x38] ss:$24 sps:$4 sm:$0xff]   ;;  %v8685_v10 = vld [vmem:[%s12702_s25 + $0xc] ss:$24 sps:$4 sm:$0xff]  }
 0x2a2   :  { %12893 = vst [vmem:[#allocation32_spill] sm:$0xff] %v8673_v38  ;;  %12894 = vst [vmem:[#allocation34_spill] sm:$0xff] %v8679_v44  ;;  %v8691_v12 = vld [vmem:[%s12702_s25 + $0x8] ss:$24 sps:$4 sm:$0xff]  }
 0x2a3   :  { %v8449_v22 = vadd.f32 %v1779_v14, %v1777_v15  ;;  %v8455_v19 = vpack.c.bf16 %v8447_v9, %v8447_v9  ;;  %12895 = vst [vmem:[#allocation36_spill] sm:$0xff] %v8685_v10  ;;  %12896 = vst [vmem:[#allocation38_spill] sm:$0xff] %v8691_v12  ;;  %v8697_v15 = vld [vmem:[%s12702_s25 + $0x2dc] ss:$24 sps:$4 sm:$0xff]   ;;  %v8703_v14 = vld [vmem:[%s12702_s25 + $0x2d8] ss:$24 sps:$4 sm:$0xff]  }
 0x2a4   :  { %12897 = vst [vmem:[#allocation40_spill] sm:$0xff] %v8697_v15  ;;  %12898 = vst [vmem:[#allocation50_spill] sm:$0xff] %v8703_v14 }
 0x2a5   :  { %v1783_v8 = vpack.c.bf16 %v8449_v22, %v8449_v22 }
 0x2a7   :  { %1816 = vmatprep.mubr.bf16.mxu1 %v1783_v8  ;;  %1857 = vmatprep.mubr.bf16.mxu0 %v1783_v8 }
 0x2a8   :  { %1817 = vmatmul.mubr.bf16.vlgmr.msra.gmra.mxu1 %v8455_v19  ;;  %1858 = vmatmul.mubr.bf16.vlgmr.msra.gmra.mxu0 %v8455_v19 }
 0x2a9   :  { %1867 = vmatpush1.bf16.msra.mxu1 %v12801_v56  ;;  %1898 = vmatprep.mubr.bf16.mxu1 %v1783_v8  ;;  %v12861_v56 = vld [vmem:[#allocation29_spill] sm:$0xff]  ;;  %v8709_v8 = vld [vmem:[%s12702_s25 + $0x2ac] ss:$24 sps:$4 sm:$0xff]  }
 0x2aa   :  { %1868 = vmatprep.subr.bf16.mxu1 %v12802_v54  ;;  %1954 = vmatpush1.bf16.msra.mxu0 %v8252_v7  ;;  %v12862_v54 = vld [vmem:[#allocation31_spill] sm:$0xff]  ;;  %12899 = vst [vmem:[#allocation48_spill] sm:$0xff] %v8709_v8  ;;  %12906 = vst [vmem:[#allocation29_spill] sm:$0xff] %v8751_v53 }
 0x2ab   :  { %1955 = vmatprep.subr.bf16.mxu0 %v8258_v49  ;;  %12907 = vst [vmem:[#allocation31_spill] sm:$0xff] %v8757_v40 }
 0x2ad   :  { %1869 = vmatpush1.bf16.msra.mxu1 %v12803_v27  ;;  %v12863_v27 = vld [vmem:[#allocation17_spill] sm:$0xff] }
 0x2ae   :  { %1870 = vmatprep.subr.bf16.mxu1 %v12804_v23  ;;  %1956 = vmatpush1.bf16.msra.mxu0 %v8266_v31  ;;  %v12864_v23 = vld [vmem:[#allocation19_spill] sm:$0xff]  ;;  %12908 = vst [vmem:[#allocation17_spill] sm:$0xff] %v8763_v59 }
 0x2af   :  { %1957 = vmatprep.subr.bf16.mxu0 %v8272_v21 }
 0x2b1   :  { %1871 = vmatpush1.bf16.msra.mxu1 %v12805_v0  ;;  %v12865_v0 = vld [vmem:[#allocation33_spill] sm:$0xff] }
 0x2b2   :  { %1872 = vmatprep.subr.bf16.mxu1 %v12806_v13  ;;  %1958 = vmatpush1.bf16.msra.mxu0 %v8280_v36  ;;  %v12866_v13 = vld [vmem:[#allocation35_spill] sm:$0xff] }
 0x2b3   :  { %1959 = vmatprep.subr.bf16.mxu0 %v8286_v45 }
 0x2b5   :  { %1873 = vmatpush1.bf16.msra.mxu1 %v12807_v33  ;;  %v12868_v33 = vld [vmem:[#allocation37_spill] sm:$0xff] }
 0x2b6   :  { %1874 = vmatprep.subr.bf16.mxu1 %v12808_v29  ;;  %1960 = vmatpush1.bf16.msra.mxu0 %v12859_v63  ;;  %v8489_v29 = vld [vmem:[%s12702_s25 + $0x4] ss:$24 sps:$4 sm:$0xff]  }
 0x2b7   :  { %1961 = vmatprep.subr.bf16.mxu0 %v12860_v4 }
 0x2b9   :  { %1875 = vmatpush1.bf16.msra.mxu1 %v12861_v56  ;;  %v8721_v56 = vld [vmem:[%s12702_s25 + $0x27c] ss:$24 sps:$4 sm:$0xff]  }
 0x2ba   :  { %1876 = vmatprep.subr.bf16.mxu1 %v12862_v54  ;;  %1962 = vmatpush1.bf16.msra.mxu0 %v12863_v27  ;;  %12901 = vst [vmem:[#allocation46_spill] sm:$0xff] %v8721_v56  ;;  %v8727_v54 = vld [vmem:[%s12702_s25 + $0x278] ss:$24 sps:$4 sm:$0xff]  }
 0x2bb   :  { %1963 = vmatprep.subr.bf16.mxu0 %v12864_v23  ;;  %12902 = vst [vmem:[#allocation77_spill] sm:$0xff] %v8727_v54 }
 0x2bd   :  { %1877 = vmatpush1.bf16.msra.mxu1 %v12865_v0  ;;  %v8733_v0 = vld [vmem:[%s12702_s25 + $0x24c] ss:$24 sps:$4 sm:$0xff]  }
 0x2be   :  { %1878 = vmatprep.subr.bf16.mxu1 %v12866_v13  ;;  %1964 = vmatpush1.bf16.msra.mxu0 %v12867_v16  ;;  %12903 = vst [vmem:[#allocation76_spill] sm:$0xff] %v8733_v0  ;;  %v8739_v13 = vld [vmem:[%s12702_s25 + $0x248] ss:$24 sps:$4 sm:$0xff]  }
 0x2bf   :  { %1965 = vmatprep.subr.bf16.mxu0 %v8328_v60  ;;  %12904 = vst [vmem:[#allocation13_spill] sm:$0xff] %v8739_v13 }
 0x2c1   :  { %1879 = vmatpush1.bf16.msra.mxu1 %v12868_v33  ;;  %v8745_v33 = vld [vmem:[%s12702_s25 + $0x21c] ss:$24 sps:$4 sm:$0xff]  }
 0x2c2   :  { %1880 = vmatprep.subr.bf16.mxu1 %v12819_v25  ;;  %1966 = vmatpush1.bf16.msra.mxu0 %v8336_v61  ;;  %v8503_v25 = vld [vmem:[%s12702_s25 + $0x2d4] ss:$24 sps:$4 sm:$0xff]   ;;  %12905 = vst [vmem:[#allocation15_spill] sm:$0xff] %v8745_v33 }
 0x2c3   :  { %1967 = vmatprep.subr.bf16.mxu0 %v8489_v29 }
 0x2c5   :  { %1881 = vmatpush1.bf16.msra.mxu1 %v12820_v58  ;;  %v8517_v58 = vld [vmem:[%s12702_s25 + $0x2a4] ss:$24 sps:$4 sm:$0xff]  }
 0x2c6   :  { %1882 = vmatprep.subr.bf16.mxu1 %v12821_v42  ;;  %1968 = vmatpush1.bf16.msra.mxu0 %v8497_v18  ;;  %v8511_v42 = vld [vmem:[%s12702_s25 + $0x2d0] ss:$24 sps:$4 sm:$0xff]   ;;  %12869 = vst [vmem:[#allocation42_spill] sm:$0xff] %v8517_v58 }
 0x2c7   :  { %1969 = vmatprep.subr.bf16.mxu0 %v8503_v25 }
 0x2c9   :  { %1883 = vmatpush2.bf16.msra.mxu1 %v12822_v11  ;;  %v8531_v11 = vld [vmem:[%s12702_s25 + $0x274] ss:$24 sps:$4 sm:$0xff]  }
 0x2ca   :  { %1884 = vmatprep.subr.bf16.mxu1 %v7891_v62  ;;  %1970 = vmatpush2.bf16.msra.mxu0 %v8511_v42  ;;  %v8525_v62 = vld [vmem:[%s12702_s25 + $0x2a0] ss:$24 sps:$4 sm:$0xff]   ;;  %12870 = vst [vmem:[#allocation43_spill] sm:$0xff] %v8531_v11 }
 0x2cb   :  { %1971 = vmatprep.subr.bf16.mxu0 %v8517_v58 }
 0x2cd   :  { %1885 = vmatpush2.bf16.msra.mxu1 %v7899_v2  ;;  %v8545_v2 = vld [vmem:[%s12702_s25 + $0x244] ss:$24 sps:$4 sm:$0xff]  }
 0x2ce   :  { %1886 = vmatprep.subr.bf16.mxu1 %v7906_v51  ;;  %1972 = vmatpush2.bf16.msra.mxu0 %v8525_v62  ;;  %v8539_v51 = vld [vmem:[%s12702_s25 + $0x270] ss:$24 sps:$4 sm:$0xff]   ;;  %12872 = vst [vmem:[#allocation3_spill] sm:$0xff] %v8545_v2 }
 0x2cf   :  { %1973 = vmatprep.subr.bf16.mxu0 %v8531_v11  ;;  %12871 = vst [vmem:[#allocation2_spill] sm:$0xff] %v8539_v51 }
 0x2d1   :  { %1887 = vmatpush2.bf16.msra.mxu1 %v7913_v1  ;;  %v8553_v1 = vld [vmem:[%s12702_s25 + $0x240] ss:$24 sps:$4 sm:$0xff]  }
 0x2d2   :  { %1888 = vmatprep.subr.bf16.mxu1 %v7920_v37  ;;  %1974 = vmatpush2.bf16.msra.mxu0 %v8539_v51  ;;  %12873 = vst [vmem:[#allocation4_spill] sm:$0xff] %v8553_v1  ;;  %v8559_v37 = vld [vmem:[%s12702_s25 + $0x214] ss:$24 sps:$4 sm:$0xff]  }
 0x2d3   :  { %1975 = vmatprep.subr.bf16.mxu0 %v8545_v2  ;;  %12874 = vst [vmem:[#allocation5_spill] sm:$0xff] %v8559_v37 }
 0x2d5   :  { %1889 = vmatpush2.bf16.msra.mxu1 %v7927_v39  ;;  %v8567_v39 = vld [vmem:[%s12702_s25 + $0x210] ss:$24 sps:$4 sm:$0xff]  }
 0x2d6   :  { %1890 = vmatprep.subr.bf16.mxu1 %v7934_v41  ;;  %1976 = vmatpush2.bf16.msra.mxu0 %v8553_v1  ;;  %12875 = vst [vmem:[#allocation6_spill] sm:$0xff] %v8567_v39  ;;  %v8573_v41 = vld [vmem:[%s12702_s25 + $0x1e4] ss:$24 sps:$4 sm:$0xff]  }
 0x2d7   :  { %1977 = vmatprep.subr.bf16.mxu0 %v8559_v37  ;;  %12876 = vst [vmem:[#allocation7_spill] sm:$0xff] %v8573_v41 }
 0x2d9   :  { %1891 = vmatpush2.bf16.msra.mxu1 %v7941_v43  ;;  %v8581_v43 = vld [vmem:[%s12702_s25 + $0x1e0] ss:$24 sps:$4 sm:$0xff]  }
 0x2da   :  { %1892 = vmatprep.subr.bf16.mxu1 %v7948_v46  ;;  %1978 = vmatpush2.bf16.msra.mxu0 %v8567_v39  ;;  %12877 = vst [vmem:[#allocation8_spill] sm:$0xff] %v8581_v43  ;;  %v8587_v46 = vld [vmem:[%s12702_s25 + $0x1b4] ss:$24 sps:$4 sm:$0xff]  }
 0x2db   :  { %1979 = vmatprep.subr.bf16.mxu0 %v8573_v41  ;;  %12878 = vst [vmem:[#allocation9_spill] sm:$0xff] %v8587_v46 }
 0x2dd   :  { %1893 = vmatpush2.bf16.msra.mxu1 %v7955_v48  ;;  %v8595_v48 = vld [vmem:[%s12702_s25 + $0x1b0] ss:$24 sps:$4 sm:$0xff]  }
 0x2de   :  { %1894 = vmatprep.subr.bf16.mxu1 %v7962_v50  ;;  %1980 = vmatpush2.bf16.msra.mxu0 %v8581_v43  ;;  %12879 = vst [vmem:[#allocation10_spill] sm:$0xff] %v8595_v48  ;;  %v8601_v50 = vld [vmem:[%s12702_s25 + $0x184] ss:$24 sps:$4 sm:$0xff]  }
 0x2df   :  { %1981 = vmatprep.subr.bf16.mxu0 %v8587_v46  ;;  %12880 = vst [vmem:[#allocation11_spill] sm:$0xff] %v8601_v50 }
 0x2e1   :  { %1895 = vmatpush2.bf16.msra.mxu1 %v7969_v52  ;;  %v8609_v52 = vld [vmem:[%s12702_s25 + $0x180] ss:$24 sps:$4 sm:$0xff]  }
 0x2e2   :  { %1896 = vmatprep.subr.bf16.mxu1 %v7976_v55  ;;  %1982 = vmatpush2.bf16.msra.mxu0 %v8595_v48  ;;  %12881 = vst [vmem:[#allocation12_spill] sm:$0xff] %v8609_v52  ;;  %v8615_v55 = vld [vmem:[%s12702_s25 + $0x164] ss:$24 sps:$4 sm:$0xff]  }
 0x2e3   :  { %1983 = vmatprep.subr.bf16.mxu0 %v8601_v50  ;;  %12882 = vst [vmem:[#allocation14_spill] sm:$0xff] %v8615_v55 }
 0x2e5   :  { %1897 = vmatpush2.bf16.msra.mxu1 %v7983_v57  ;;  %v12883_v57 = vld [vmem:[#allocation27_spill] sm:$0xff] }
 0x2e6   :  { %1994 = vmatprep.subr.bf16.mxu1 %v8376_v3  ;;  %1984 = vmatpush2.bf16.msra.mxu0 %v8609_v52 }
 0x2e7   :  { %2035 = vmatprep.subr.bf16.mxu0 %v8615_v55 }
 0x2e8   :  { %1899 = vmatmul.mubr.bf16.vlgmr.msra.gmra.mxu1 %v8455_v19  ;;  %v8715_v19 = vld [vmem:[%s12702_s25 + $0x2a8] ss:$24 sps:$4 sm:$0xff]  }
 0x2e9   :  { %1995 = vmatpush1.bf16.msra.mxu1 %v8385_v5  ;;  %12900 = vst [vmem:[#allocation49_spill] sm:$0xff] %v8715_v19 }
 0x2ea   :  { %1996 = vmatprep.subr.bf16.mxu1 %v12883_v57 }
 0x2ed   :  { %1997 = vmatpush1.bf16.msra.mxu1 %v12884_v6 }
 0x2ee   :  { %1998 = vmatprep.subr.bf16.mxu1 %v8625_v20 }
 0x2f1   :  { %1999 = vmatpush1.bf16.msra.mxu1 %v8631_v26 }
 0x2f2   :  { %2000 = vmatprep.subr.bf16.mxu1 %v8637_v28 }
 0x2f5   :  { %2001 = vmatpush1.bf16.msra.mxu1 %v8643_v30 }
 0x2f6   :  { %2002 = vmatprep.subr.bf16.mxu1 %v8649_v32 }
 0x2f9   :  { %2003 = vmatpush1.bf16.msra.mxu1 %v8655_v35 }
 0x2fa   :  { %2004 = vmatprep.subr.bf16.mxu1 %v8661_v24  ;;  %v12917_v24 = vld [vmem:[#allocation56_spill] sm:$0xff] }
 0x2fd   :  { %2005 = vmatpush1.bf16.msra.mxu1 %v8667_v17  ;;  %v12916_v17 = vld [vmem:[#allocation54_spill] sm:$0xff] }
 0x2fe   :  { %2006 = vmatprep.subr.bf16.mxu1 %v8673_v38 }
 0x301   :  { %2007 = vmatpush1.bf16.msra.mxu1 %v8679_v44 }
 0x302   :  { %2008 = vmatprep.subr.bf16.mxu1 %v8685_v10 }
 0x305   :  { %2009 = vmatpush1.bf16.msra.mxu1 %v8691_v12 }
 0x306   :  { %2010 = vmatprep.subr.bf16.mxu1 %v8697_v15  ;;  %v12914_v15 = vld [vmem:[#allocation53_spill] sm:$0xff] }
 0x309   :  { %2011 = vmatpush2.bf16.msra.mxu1 %v8703_v14 }
 0x30a   :  { %2012 = vmatprep.subr.bf16.mxu1 %v8709_v8 }
 0x30d   :  { %2013 = vmatpush2.bf16.msra.mxu1 %v8715_v19 }
 0x30e   :  { %2014 = vmatprep.subr.bf16.mxu1 %v8721_v56 }
 0x311   :  { %2015 = vmatpush2.bf16.msra.mxu1 %v8727_v54 }
 0x312   :  { %2016 = vmatprep.subr.bf16.mxu1 %v8733_v0 }
 0x315   :  { %2017 = vmatpush2.bf16.msra.mxu1 %v8739_v13 }
 0x316   :  { %2018 = vmatprep.subr.bf16.mxu1 %v8745_v33  ;;  %v8769_v33 = vld [vmem:[%s12702_s25 + $0x1bc] ss:$24 sps:$4 sm:$0xff]  }
 0x317   :  { %12909 = vst [vmem:[#allocation19_spill] sm:$0xff] %v8769_v33 }
 0x319   :  { %2019 = vmatpush2.bf16.msra.mxu1 %v8751_v53  ;;  %v8775_v53 = vld [vmem:[%s12702_s25 + $0x1b8] ss:$24 sps:$4 sm:$0xff]  }
 0x31a   :  { %2020 = vmatprep.subr.bf16.mxu1 %v8757_v40  ;;  %12910 = vst [vmem:[#allocation33_spill] sm:$0xff] %v8775_v53  ;;  %v8781_v40 = vld [vmem:[%s12702_s25 + $0x18c] ss:$24 sps:$4 sm:$0xff]  }
 0x31b   :  { %12911 = vst [vmem:[#allocation35_spill] sm:$0xff] %v8781_v40 }
 0x31d   :  { %2021 = vmatpush2.bf16.msra.mxu1 %v8763_v59  ;;  %v8787_v59 = vld [vmem:[%s12702_s25 + $0x188] ss:$24 sps:$4 sm:$0xff]  }
 0x31e   :  { %2022 = vmatprep.subr.bf16.mxu1 %v8769_v33  ;;  %12912 = vst [vmem:[#allocation21_spill] sm:$0xff] %v8787_v59  ;;  %v12913_v33 = vld [vmem:[#allocation41_spill] sm:$0xff] }
 0x321   :  { %2023 = vmatpush2.bf16.msra.mxu1 %v8775_v53 }
 0x322   :  { %2024 = vmatprep.subr.bf16.mxu1 %v8781_v40  ;;  %v12915_v40 = vld [vmem:[#allocation55_spill] sm:$0xff] }
 0x325   :  { %2025 = vmatpush2.bf16.msra.mxu1 %v8787_v59 }
 0x326   :  { %2122 = vmatprep.subr.bf16.mxu1 %v12913_v33 }
 0x368   :  { %v1818_v13 = vpop.f32.mrf.mxu1  ;;  %v1859_v0 = vpop.f32.mrf.mxu0 }
 0x369   :  { %v1907_v12 = vadd.f32 %v1818_v13, %v12914_v15  ;;  %v1921_v59 = vadd.f32 %v1859_v0, %v12916_v17  ;;  %v12919_v13 = vld [vmem:[#allocation80_spill] sm:$0xff] }
 0x36a   :  { %v1820_v54 = vpop.f32.mrf.mxu1  ;;  %v1861_v53 = vpop.f32.mrf.mxu0 }
 0x36b   :  { %v1908_v10 = vadd.f32 %v1820_v54, %v12915_v40  ;;  %v5626_v44 = vmul.f32 -1.442695, %v1907_v12  ;;  %v1922_v33 = vadd.f32 %v1861_v53, %v12917_v24  ;;  %v5628_v35 = vmul.f32 -1.442695, %v1921_v59 }
 0x36c   :  { %v1822_v56 = vpop.f32.mrf.mxu1  ;;  %v1863_v19 = vpop.f32.mrf.mxu0 }
 0x36d   :  { %v5627_v38 = vmul.f32 -1.442695, %v1908_v10  ;;  %6453 = vpow2.f32 %v5626_v44  ;;  %v5629_v32 = vmul.f32 -1.442695, %v1922_v33 }
 0x36e   :  { %v1823_v8 = vpop.f32.mrf.mxu1  ;;  %v1864_v14 = vpop.f32.mrf.mxu0 }
 0x36f   :  { %6455 = vpow2.f32 %v5627_v38 }
 0x370   :  { %6457 = vpow2.f32 %v5628_v35 }
 0x371   :  { %6459 = vpow2.f32 %v5629_v32 }
 0x37a   :  { %v6454_v30 = vpop.eup %6453 }
 0x37b   :  { %v1915_v19 = vadd.f32 1.0, %v6454_v30  ;;  %v12918_v30 = vld [vmem:[#allocation79_spill] sm:$0xff] }
 0x37c   :  { %v6456_v56 = vpop.eup %6455 }
 0x37d   :  { %v1916_v14 = vadd.f32 1.0, %v6456_v56  ;;  %6461 = vrcp.f32 %v1915_v19  ;;  %v6458_v15 = vpop.eup %6457 }
 0x37e   :  { %v6460_v40 = vpop.eup %6459  ;;  %v1929_v12 = vadd.f32 1.0, %v6458_v15 }
 0x37f   :  { %6463 = vrcp.f32 %v1916_v14  ;;  %v1930_v44 = vadd.f32 1.0, %v6460_v40 }
 0x380   :  { %6465 = vrcp.f32 %v1929_v12 }
 0x381   :  { %6467 = vrcp.f32 %v1930_v44 }
 0x38a   :  { %v6462_v17 = vpop.eup %6461 }
 0x38c   :  { %v6464_v35 = vpop.eup %6463 }
 0x38d   :  { %v6466_v56 = vpop.eup %6465 }
 0x38e   :  { %v6468_v19 = vpop.eup %6467  ;;  %v1943_v14 = vsub.f32 1.0, %v6466_v56 }
 0x38f   :  { %v1944_v40 = vsub.f32 1.0, %v6468_v19  ;;  %v1948_v44 = vmul.f32 %v6468_v19, %v8449_v22  ;;  %v8822_v22 = vld [vmem:[%s12702_s25 + $0x134] ss:$24 sps:$4 sm:$0xff]   ;;  %v8886_v19 = vld [vmem:[%s12702_s25 + $0x70] ss:$24 sps:$4 sm:$0xff]  }
 0x3a8   :  { %v1900_v10 = vpop.f32.mrf.mxu1 }
 0x3a9   :  { %v1935_v38 = vadd.f32 %v1900_v10, %v8224_v34  ;;  %v1947_v10 = vmul.f32 %v6466_v56, %v8447_v9  ;;  %v8816_v9 = vld [vmem:[%s12702_s25 + $0x160] ss:$24 sps:$4 sm:$0xff]   ;;  %v8878_v56 = vld [vmem:[%s12702_s25 + $0x74] ss:$24 sps:$4 sm:$0xff]  }
 0x3aa   :  { %v1902_v8 = vpop.f32.mrf.mxu1 }
 0x3ab   :  { %v1937_v59 = vmul.f32 %v6462_v17, %v1935_v38  ;;  %v1936_v53 = vadd.f32 %v1902_v8, %v8227_v47 }
 0x3ac   :  { %v1904_v24 = vpop.f32.mrf.mxu1 }
 0x3ad   :  { %v1939_v32 = vadd.f32 %v1937_v59, %v12918_v30  ;;  %v1938_v54 = vmul.f32 %v6464_v35, %v1936_v53  ;;  %v8830_v24 = vld [vmem:[%s12702_s25 + $0x130] ss:$24 sps:$4 sm:$0xff]   ;;  %v8836_v30 = vld [vmem:[%s12702_s25 + $0x104] ss:$24 sps:$4 sm:$0xff]  }
 0x3ae   :  { %v1905_v0 = vpop.f32.mrf.mxu1 }
 0x3af   :  { %6469 = vtanh.f32 %v1939_v32  ;;  %v1940_v33 = vadd.f32 %v1938_v54, %v12919_v13  ;;  %v8844_v32 = vld [vmem:[%s12702_s25 + $0x100] ss:$24 sps:$4 sm:$0xff]   ;;  %v8850_v54 = vld [vmem:[%s12702_s25 + $0xd4] ss:$24 sps:$4 sm:$0xff]   ;;  %v8858_v0 = vld [vmem:[%s12702_s25 + $0xd0] ss:$24 sps:$4 sm:$0xff]  }
 0x3b0   :  { %v8864_v13 = vld [vmem:[%s12702_s25 + $0xa4] ss:$24 sps:$4 sm:$0xff]  }
 0x3b1   :  { %6471 = vtanh.f32 %v1940_v33  ;;  %v8872_v33 = vld [vmem:[%s12702_s25 + $0xa0] ss:$24 sps:$4 sm:$0xff]  }
 0x3bc   :  { %v6470_v15 = vpop.eup %6469 }
 0x3bd   :  { %v1945_v12 = vmul.f32 %v6470_v15, %v1943_v14  ;;  %v8892_v14 = vld [vmem:[%s12702_s25 + $0x44] ss:$24 sps:$4 sm:$0xff]   ;;  %v8900_v15 = vld [vmem:[%s12702_s25 + $0x40] ss:$24 sps:$4 sm:$0xff]  }
 0x3be   :  { %v6472_v38 = vpop.eup %6471 }
 0x3bf   :  { %v1946_v17 = vmul.f32 %v6472_v38, %v1944_v40  ;;  %v8801_v8 = vadd.f32 %v1947_v10, %v1945_v12  ;;  %v8906_v40 = vld [vmem:[%s12702_s25 + $0x14] ss:$24 sps:$4 sm:$0xff]   ;;  %v8914_v12 = vld [vmem:[%s12702_s25 + $0x10] ss:$24 sps:$4 sm:$0xff]   ;;  %v8920_v10 = vld [vmem:[%s12702_s25 + $0x2e4] ss:$24 sps:$4 sm:$0xff]  }
 0x3c0   :  { %v8928_v38 = vld [vmem:[%s12702_s25 + $0x2e0] ss:$24 sps:$4 sm:$0xff]  }
 0x3c1   :  { %v8803_v59 = vadd.f32 %v1948_v44, %v1946_v17  ;;  %v8809_v35 = vpack.c.bf16 %v8801_v8, %v8801_v8  ;;  %v8934_v17 = vld [vmem:[%s12702_s25 + $0x2b4] ss:$24 sps:$4 sm:$0xff]   ;;  %v8942_v44 = vld [vmem:[%s12702_s25 + $0x2b0] ss:$24 sps:$4 sm:$0xff]  }
 0x3c2   :  { %12920 = vst [vmem:[#allocation37_spill] sm:$0xff] %v8942_v44 }
 0x3c3   :  { %v1952_v53 = vpack.c.bf16 %v8803_v59, %v8803_v59 }
 0x3c5   :  { %1985 = vmatprep.mubr.bf16.mxu0 %v1952_v53  ;;  %2026 = vmatprep.mubr.bf16.mxu1 %v1952_v53 }
 0x3c6   :  { %1986 = vmatmul.mubr.bf16.vlgmr.msra.gmra.mxu0 %v8809_v35  ;;  %2027 = vmatmul.mubr.bf16.vlgmr.msra.gmra.mxu1 %v8809_v35 }
 0x3c7   :  { %2036 = vmatpush1.bf16.msra.mxu0 %v8816_v9  ;;  %2067 = vmatprep.mubr.bf16.mxu0 %v1952_v53  ;;  %v8948_v53 = vld [vmem:[%s12702_s25 + $0x284] ss:$24 sps:$4 sm:$0xff]  }
 0x3c8   :  { %2037 = vmatprep.subr.bf16.mxu0 %v8822_v22  ;;  %2123 = vmatpush1.bf16.msra.mxu1 %v8252_v7 }
 0x3c9   :  { %2124 = vmatprep.subr.bf16.mxu1 %v8258_v49 }
 0x3cb   :  { %2038 = vmatpush1.bf16.msra.mxu0 %v8830_v24 }
 0x3cc   :  { %2039 = vmatprep.subr.bf16.mxu0 %v8836_v30  ;;  %2125 = vmatpush1.bf16.msra.mxu1 %v8266_v31 }
 0x3cd   :  { %2126 = vmatprep.subr.bf16.mxu1 %v8272_v21 }
 0x3cf   :  { %2040 = vmatpush1.bf16.msra.mxu0 %v8844_v32 }
 0x3d0   :  { %2041 = vmatprep.subr.bf16.mxu0 %v8850_v54  ;;  %2127 = vmatpush1.bf16.msra.mxu1 %v8280_v36 }
 0x3d1   :  { %2128 = vmatprep.subr.bf16.mxu1 %v8286_v45 }
 0x3d3   :  { %2042 = vmatpush1.bf16.msra.mxu0 %v8858_v0 }
 0x3d4   :  { %2043 = vmatprep.subr.bf16.mxu0 %v8864_v13  ;;  %2129 = vmatpush1.bf16.msra.mxu1 %v12859_v63 }
 0x3d5   :  { %2130 = vmatprep.subr.bf16.mxu1 %v12860_v4 }
 0x3d7   :  { %2044 = vmatpush1.bf16.msra.mxu0 %v8872_v33 }
 0x3d8   :  { %2045 = vmatprep.subr.bf16.mxu0 %v8878_v56  ;;  %2131 = vmatpush1.bf16.msra.mxu1 %v12863_v27 }
 0x3d9   :  { %2132 = vmatprep.subr.bf16.mxu1 %v12864_v23 }
 0x3db   :  { %2046 = vmatpush1.bf16.msra.mxu0 %v8886_v19 }
 0x3dc   :  { %2047 = vmatprep.subr.bf16.mxu0 %v8892_v14  ;;  %2133 = vmatpush1.bf16.msra.mxu1 %v12867_v16 }
 0x3dd   :  { %2134 = vmatprep.subr.bf16.mxu1 %v8328_v60 }
 0x3df   :  { %2048 = vmatpush1.bf16.msra.mxu0 %v8900_v15 }
 0x3e0   :  { %2049 = vmatprep.subr.bf16.mxu0 %v8906_v40  ;;  %2135 = vmatpush1.bf16.msra.mxu1 %v8336_v61 }
 0x3e1   :  { %2136 = vmatprep.subr.bf16.mxu1 %v8489_v29 }
 0x3e3   :  { %2050 = vmatpush1.bf16.msra.mxu0 %v8914_v12 }
 0x3e4   :  { %2051 = vmatprep.subr.bf16.mxu0 %v8920_v10  ;;  %2137 = vmatpush1.bf16.msra.mxu1 %v8497_v18 }
 0x3e5   :  { %2138 = vmatprep.subr.bf16.mxu1 %v8503_v25 }
 0x3e7   :  { %2052 = vmatpush2.bf16.msra.mxu0 %v8928_v38 }
 0x3e8   :  { %2053 = vmatprep.subr.bf16.mxu0 %v8934_v17  ;;  %2139 = vmatpush2.bf16.msra.mxu1 %v8511_v42 }
 0x3e9   :  { %2140 = vmatprep.subr.bf16.mxu1 %v8517_v58  ;;  %v8956_v58 = vld [vmem:[%s12702_s25 + $0x280] ss:$24 sps:$4 sm:$0xff]  }
 0x3ea   :  { %12921 = vst [vmem:[#allocation53_spill] sm:$0xff] %v8956_v58 }
 0x3eb   :  { %2054 = vmatpush2.bf16.msra.mxu0 %v8942_v44  ;;  %v8962_v44 = vld [vmem:[%s12702_s25 + $0x254] ss:$24 sps:$4 sm:$0xff]  }
 0x3ec   :  { %2055 = vmatprep.subr.bf16.mxu0 %v8948_v53  ;;  %2141 = vmatpush2.bf16.msra.mxu1 %v8525_v62  ;;  %12922 = vst [vmem:[#allocation55_spill] sm:$0xff] %v8962_v44 }
 0x3ed   :  { %2142 = vmatprep.subr.bf16.mxu1 %v8531_v11  ;;  %v8970_v11 = vld [vmem:[%s12702_s25 + $0x250] ss:$24 sps:$4 sm:$0xff]  }
 0x3ee   :  { %12923 = vst [vmem:[#allocation54_spill] sm:$0xff] %v8970_v11 }
 0x3ef   :  { %2056 = vmatpush2.bf16.msra.mxu0 %v8956_v58  ;;  %v8976_v58 = vld [vmem:[%s12702_s25 + $0x224] ss:$24 sps:$4 sm:$0xff]  }
 0x3f0   :  { %2057 = vmatprep.subr.bf16.mxu0 %v8962_v44  ;;  %2143 = vmatpush2.bf16.msra.mxu1 %v8539_v51  ;;  %12924 = vst [vmem:[#allocation56_spill] sm:$0xff] %v8976_v58 }
 0x3f1   :  { %2144 = vmatprep.subr.bf16.mxu1 %v8545_v2  ;;  %v8984_v2 = vld [vmem:[%s12702_s25 + $0x220] ss:$24 sps:$4 sm:$0xff]  }
 0x3f2   :  { %12925 = vst [vmem:[#allocation79_spill] sm:$0xff] %v8984_v2 }
 0x3f3   :  { %2058 = vmatpush2.bf16.msra.mxu0 %v8970_v11  ;;  %v8990_v11 = vld [vmem:[%s12702_s25 + $0x1f4] ss:$24 sps:$4 sm:$0xff]  }
 0x3f4   :  { %2059 = vmatprep.subr.bf16.mxu0 %v8976_v58  ;;  %2145 = vmatpush2.bf16.msra.mxu1 %v8553_v1  ;;  %12926 = vst [vmem:[#allocation80_spill] sm:$0xff] %v8990_v11  ;;  %v12963_v1 = vld [vmem:[#allocation58_spill] sm:$0xff] }
 0x3f5   :  { %2146 = vmatprep.subr.bf16.mxu1 %v8559_v37  ;;  %v8998_v37 = vld [vmem:[%s12702_s25 + $0x1f0] ss:$24 sps:$4 sm:$0xff]  }
 0x3f6   :  { %12927 = vst [vmem:[#allocation92_spill] sm:$0xff] %v8998_v37 }
 0x3f7   :  { %2060 = vmatpush2.bf16.msra.mxu0 %v8984_v2  ;;  %v9004_v2 = vld [vmem:[%s12702_s25 + $0x1c4] ss:$24 sps:$4 sm:$0xff]  }
 0x3f8   :  { %2061 = vmatprep.subr.bf16.mxu0 %v8990_v11  ;;  %2147 = vmatpush2.bf16.msra.mxu1 %v8567_v39  ;;  %12928 = vst [vmem:[#allocation93_spill] sm:$0xff] %v9004_v2 }
 0x3f9   :  { %2148 = vmatprep.subr.bf16.mxu1 %v8573_v41  ;;  %v9012_v41 = vld [vmem:[%s12702_s25 + $0x1c0] ss:$24 sps:$4 sm:$0xff]  }
 0x3fa   :  { %12929 = vst [vmem:[#allocation94_spill] sm:$0xff] %v9012_v41 }
 0x3fb   :  { %2062 = vmatpush2.bf16.msra.mxu0 %v8998_v37  ;;  %v9018_v37 = vld [vmem:[%s12702_s25 + $0x194] ss:$24 sps:$4 sm:$0xff]  }
 0x3fc   :  { %2063 = vmatprep.subr.bf16.mxu0 %v9004_v2  ;;  %2149 = vmatpush2.bf16.msra.mxu1 %v8581_v43  ;;  %12930 = vst [vmem:[#allocation95_spill] sm:$0xff] %v9018_v37 }
 0x3fd   :  { %2150 = vmatprep.subr.bf16.mxu1 %v8587_v46  ;;  %v9026_v46 = vld [vmem:[%s12702_s25 + $0x190] ss:$24 sps:$4 sm:$0xff]  }
 0x3fe   :  { %12931 = vst [vmem:[#allocation96_spill] sm:$0xff] %v9026_v46 }
 0x3ff   :  { %2064 = vmatpush2.bf16.msra.mxu0 %v9012_v41  ;;  %v12958_v41 = vld [vmem:[#allocation52_spill] sm:$0xff] }
 0x400   :  { %2065 = vmatprep.subr.bf16.mxu0 %v9018_v37  ;;  %2151 = vmatpush2.bf16.msra.mxu1 %v8595_v48 }
 0x401   :  { %2152 = vmatprep.subr.bf16.mxu1 %v8601_v50 }
 0x403   :  { %2066 = vmatpush2.bf16.msra.mxu0 %v9026_v46  ;;  %v12932_v46 = vld [vmem:[#allocation22_spill] sm:$0xff] }
 0x404   :  { %2163 = vmatprep.subr.bf16.mxu0 %v8376_v3  ;;  %2153 = vmatpush2.bf16.msra.mxu1 %v8609_v52  ;;  %v12933_v3 = vld [vmem:[#allocation24_spill] sm:$0xff]  ;;  %v12934_v52 = vld [vmem:[#allocation26_spill] sm:$0xff] }
 0x405   :  { %2204 = vmatprep.subr.bf16.mxu1 %v8615_v55  ;;  %v12935_v55 = vld [vmem:[#allocation28_spill] sm:$0xff] }
 0x406   :  { %2068 = vmatmul.mubr.bf16.vlgmr.msra.gmra.mxu0 %v8809_v35  ;;  %v12936_v35 = vld [vmem:[#allocation30_spill] sm:$0xff] }
 0x407   :  { %2164 = vmatpush1.bf16.msra.mxu0 %v8385_v5  ;;  %v12937_v5 = vld [vmem:[#allocation32_spill] sm:$0xff] }
 0x408   :  { %2165 = vmatprep.subr.bf16.mxu0 %v12883_v57  ;;  %v12938_v57 = vld [vmem:[#allocation34_spill] sm:$0xff] }
 0x40b   :  { %2166 = vmatpush1.bf16.msra.mxu0 %v12884_v6  ;;  %v12939_v6 = vld [vmem:[#allocation36_spill] sm:$0xff] }
 0x40c   :  { %2167 = vmatprep.subr.bf16.mxu0 %v8625_v20  ;;  %v12940_v20 = vld [vmem:[#allocation38_spill] sm:$0xff] }
 0x40f   :  { %2168 = vmatpush1.bf16.msra.mxu0 %v8631_v26  ;;  %v12941_v26 = vld [vmem:[#allocation40_spill] sm:$0xff] }
 0x410   :  { %2169 = vmatprep.subr.bf16.mxu0 %v8637_v28  ;;  %v12942_v28 = vld [vmem:[#allocation50_spill] sm:$0xff] }
 0x413   :  { %2170 = vmatpush1.bf16.msra.mxu0 %v12932_v46  ;;  %v12943_v46 = vld [vmem:[#allocation48_spill] sm:$0xff] }
 0x414   :  { %2171 = vmatprep.subr.bf16.mxu0 %v12933_v3  ;;  %v12944_v3 = vld [vmem:[#allocation49_spill] sm:$0xff] }
 0x417   :  { %2172 = vmatpush1.bf16.msra.mxu0 %v12934_v52  ;;  %v12945_v52 = vld [vmem:[#allocation46_spill] sm:$0xff] }
 0x418   :  { %2173 = vmatprep.subr.bf16.mxu0 %v12935_v55  ;;  %v12946_v55 = vld [vmem:[#allocation77_spill] sm:$0xff] }
 0x41b   :  { %2174 = vmatpush1.bf16.msra.mxu0 %v12936_v35  ;;  %v12947_v35 = vld [vmem:[#allocation76_spill] sm:$0xff] }
 0x41c   :  { %2175 = vmatprep.subr.bf16.mxu0 %v12937_v5  ;;  %v12948_v5 = vld [vmem:[#allocation13_spill] sm:$0xff] }
 0x41f   :  { %2176 = vmatpush1.bf16.msra.mxu0 %v12938_v57  ;;  %v12949_v57 = vld [vmem:[#allocation15_spill] sm:$0xff] }
 0x420   :  { %2177 = vmatprep.subr.bf16.mxu0 %v12939_v6  ;;  %v12950_v6 = vld [vmem:[#allocation29_spill] sm:$0xff] }
 0x423   :  { %2178 = vmatpush1.bf16.msra.mxu0 %v12940_v20  ;;  %v12951_v20 = vld [vmem:[#allocation31_spill] sm:$0xff] }
 0x424   :  { %2179 = vmatprep.subr.bf16.mxu0 %v12941_v26  ;;  %v12952_v26 = vld [vmem:[#allocation17_spill] sm:$0xff] }
 0x427   :  { %2180 = vmatpush2.bf16.msra.mxu0 %v12942_v28  ;;  %v12953_v28 = vld [vmem:[#allocation19_spill] sm:$0xff] }
 0x428   :  { %2181 = vmatprep.subr.bf16.mxu0 %v12943_v46  ;;  %v12954_v46 = vld [vmem:[#allocation33_spill] sm:$0xff] }
 0x42b   :  { %2182 = vmatpush2.bf16.msra.mxu0 %v12944_v3  ;;  %v12955_v3 = vld [vmem:[#allocation35_spill] sm:$0xff] }
 0x42c   :  { %2183 = vmatprep.subr.bf16.mxu0 %v12945_v52  ;;  %v12956_v52 = vld [vmem:[#allocation21_spill] sm:$0xff] }
 0x42f   :  { %2184 = vmatpush2.bf16.msra.mxu0 %v12946_v55  ;;  %v12957_v55 = vld [vmem:[#allocation41_spill] sm:$0xff] }
 0x430   :  { %2185 = vmatprep.subr.bf16.mxu0 %v12947_v35 }
 0x433   :  { %2186 = vmatpush2.bf16.msra.mxu0 %v12948_v5 }
 0x434   :  { %2187 = vmatprep.subr.bf16.mxu0 %v12949_v57 }
 0x437   :  { %2188 = vmatpush2.bf16.msra.mxu0 %v12950_v6 }
 0x438   :  { %2189 = vmatprep.subr.bf16.mxu0 %v12951_v20 }
 0x43b   :  { %2190 = vmatpush2.bf16.msra.mxu0 %v12952_v26  ;;  %v12959_v26 = vld [vmem:[#allocation59_spill] sm:$0xff] }
 0x43c   :  { %2191 = vmatprep.subr.bf16.mxu0 %v12953_v28  ;;  %v798_v43 = vadd.f32 %v12959_v26, %v12958_v41  ;;  %v12960_v28 = vld [vmem:[#allocation57_spill] sm:$0xff]  ;;  %v13002_v41 = vld [vmem:[#allocation26_spill] sm:$0xff] }
 0x43f   :  { %2192 = vmatpush2.bf16.msra.mxu0 %v12954_v46 }
 0x440   :  { %2193 = vmatprep.subr.bf16.mxu0 %v12955_v3 }
 0x443   :  { %2194 = vmatpush2.bf16.msra.mxu0 %v12956_v52  ;;  %v12961_v52 = vld [vmem:[#allocation51_spill] sm:$0xff] }
 0x444   :  { %2291 = vmatprep.subr.bf16.mxu0 %v12957_v55  ;;  %v12962_v55 = vld [vmem:[#allocation60_spill] sm:$0xff] }
 0x445   :  { %v871_v11 = vadd.f32 %v12962_v55, %v12961_v52  ;;  %v13000_v52 = vld [vmem:[#allocation22_spill] sm:$0xff] }
 0x486   :  { %v1987_v35 = vpop.f32.mrf.mxu0  ;;  %v2028_v5 = vpop.f32.mrf.mxu1 }
 0x487   :  { %v2076_v2 = vadd.f32 %v1987_v35, %v12960_v28  ;;  %v2090_v58 = vadd.f32 %v2028_v5, %v12963_v1  ;;  %v12965_v28 = vld [vmem:[#allocation82_spill] sm:$0xff] }
 0x488   :  { %v1989_v50 = vpop.f32.mrf.mxu0  ;;  %v2030_v57 = vpop.f32.mrf.mxu1 }
 0x489   :  { %v2077_v46 = vadd.f32 %v1989_v50, %v798_v43  ;;  %v5630_v39 = vmul.f32 -1.442695, %v2076_v2  ;;  %v2091_v51 = vadd.f32 %v2030_v57, %v871_v11  ;;  %v12964_v57 = vld [vmem:[#allocation78_spill] sm:$0xff] }
 0x48a   :  { %v1991_v48 = vpop.f32.mrf.mxu0  ;;  %v2032_v6 = vpop.f32.mrf.mxu1  ;;  %v944_v35 = vadd.f32 %v12965_v28, %v12964_v57  ;;  %v12999_v57 = vld [vmem:[#allocation20_spill] sm:$0xff] }
 0x48b   :  { %v5631_v3 = vmul.f32 -1.442695, %v2077_v46  ;;  %6473 = vpow2.f32 %v5630_v39  ;;  %v5632_v48 = vmul.f32 -1.442695, %v2090_v58  ;;  %v5633_v6 = vmul.f32 -1.442695, %v2091_v51 }
 0x48c   :  { %v1992_v37 = vpop.f32.mrf.mxu0  ;;  %v2033_v20 = vpop.f32.mrf.mxu1 }
 0x48d   :  { %6475 = vpow2.f32 %v5631_v3 }
 0x48e   :  { %6477 = vpow2.f32 %v5632_v48 }
 0x48f   :  { %6479 = vpow2.f32 %v5633_v6 }
 0x498   :  { %v6474_v37 = vpop.eup %6473 }
 0x499   :  { %v2084_v44 = vadd.f32 1.0, %v6474_v37 }
 0x49a   :  { %v6476_v20 = vpop.eup %6475 }
 0x49b   :  { %v2085_v26 = vadd.f32 1.0, %v6476_v20  ;;  %6481 = vrcp.f32 %v2084_v44  ;;  %v6478_v2 = vpop.eup %6477  ;;  %v12966_v44 = vld [vmem:[#allocation81_spill] sm:$0xff] }
 0x49c   :  { %v6480_v43 = vpop.eup %6479  ;;  %v2098_v39 = vadd.f32 1.0, %v6478_v2 }
 0x49d   :  { %6483 = vrcp.f32 %v2085_v26  ;;  %v2099_v46 = vadd.f32 1.0, %v6480_v43 }
 0x49e   :  { %6485 = vrcp.f32 %v2098_v39 }
 0x49f   :  { %6487 = vrcp.f32 %v2099_v46 }
 0x4a8   :  { %v6482_v55 = vpop.eup %6481 }
 0x4aa   :  { %v6484_v51 = vpop.eup %6483 }
 0x4ab   :  { %v6486_v26 = vpop.eup %6485 }
 0x4ac   :  { %v6488_v2 = vpop.eup %6487  ;;  %v2112_v43 = vsub.f32 1.0, %v6486_v26 }
 0x4ad   :  { %v2117_v28 = vmul.f32 %v6488_v2, %v8803_v59  ;;  %v12981_v59 = vld [vmem:[#allocation7_spill] sm:$0xff] }
 0x4c6   :  { %v2069_v3 = vpop.f32.mrf.mxu0 }
 0x4c7   :  { %v2104_v50 = vadd.f32 %v2069_v3, %v8224_v34  ;;  %v2113_v3 = vsub.f32 1.0, %v6488_v2  ;;  %v12989_v2 = vld [vmem:[#allocation11_spill] sm:$0xff] }
 0x4c8   :  { %v2071_v5 = vpop.f32.mrf.mxu0 }
 0x4c9   :  { %v2106_v58 = vmul.f32 %v6482_v55, %v2104_v50  ;;  %v2105_v11 = vadd.f32 %v2071_v5, %v8227_v47  ;;  %v2116_v55 = vmul.f32 %v6486_v26, %v8801_v8  ;;  %v12980_v8 = vld [vmem:[#allocation6_spill] sm:$0xff] }
 0x4ca   :  { %v2073_v1 = vpop.f32.mrf.mxu0  ;;  %v12988_v26 = vld [vmem:[#allocation10_spill] sm:$0xff] }
 0x4cb   :  { %v2108_v48 = vadd.f32 %v2106_v58, %v12966_v44  ;;  %v2107_v6 = vmul.f32 %v6484_v51, %v2105_v11  ;;  %v12983_v44 = vld [vmem:[#allocation93_spill] sm:$0xff] }
 0x4cc   :  { %v2074_v37 = vpop.f32.mrf.mxu0 }
 0x4cd   :  { %6489 = vtanh.f32 %v2108_v48  ;;  %v2109_v20 = vadd.f32 %v2107_v6, %v944_v35  ;;  %v12982_v35 = vld [vmem:[#allocation92_spill] sm:$0xff]  ;;  %v12985_v6 = vld [vmem:[#allocation9_spill] sm:$0xff]  ;;  %v12986_v37 = vld [vmem:[#allocation94_spill] sm:$0xff] }
 0x4ce   :  { %v12984_v48 = vld [vmem:[#allocation8_spill] sm:$0xff] }
 0x4cf   :  { %6491 = vtanh.f32 %v2109_v20  ;;  %v12987_v20 = vld [vmem:[#allocation95_spill] sm:$0xff] }
 0x4da   :  { %v6490_v39 = vpop.eup %6489 }
 0x4db   :  { %v2114_v50 = vmul.f32 %v6490_v39, %v2112_v43  ;;  %v12990_v43 = vld [vmem:[#allocation96_spill] sm:$0xff]  ;;  %v12991_v39 = vld [vmem:[#allocation23_spill] sm:$0xff] }
 0x4dc   :  { %v6492_v5 = vpop.eup %6491 }
 0x4dd   :  { %v2115_v1 = vmul.f32 %v6492_v5, %v2113_v3  ;;  %v9078_v46 = vadd.f32 %v2116_v55, %v2114_v50  ;;  %v12992_v3 = vld [vmem:[#allocation12_spill] sm:$0xff]  ;;  %v12993_v50 = vld [vmem:[#allocation14_spill] sm:$0xff]  ;;  %v12994_v55 = vld [vmem:[#allocation25_spill] sm:$0xff] }
 0x4de   :  { %v12995_v5 = vld [vmem:[#allocation27_spill] sm:$0xff] }
 0x4df   :  { %v9080_v58 = vadd.f32 %v2117_v28, %v2115_v1  ;;  %v9086_v51 = vpack.c.bf16 %v9078_v46, %v9078_v46  ;;  %v12996_v1 = vld [vmem:[#allocation39_spill] sm:$0xff]  ;;  %v12997_v28 = vld [vmem:[#allocation16_spill] sm:$0xff] }
 0x4e1   :  { %v2121_v11 = vpack.c.bf16 %v9080_v58, %v9080_v58 }
 0x4e3   :  { %2154 = vmatprep.mubr.bf16.mxu1 %v2121_v11  ;;  %2195 = vmatprep.mubr.bf16.mxu0 %v2121_v11 }
 0x4e4   :  { %2155 = vmatmul.mubr.bf16.vlgmr.msra.gmra.mxu1 %v9086_v51  ;;  %2196 = vmatmul.mubr.bf16.vlgmr.msra.gmra.mxu0 %v9086_v51 }
 0x4e5   :  { %2205 = vmatpush1.bf16.msra.mxu1 %v8816_v9  ;;  %2236 = vmatprep.mubr.bf16.mxu1 %v2121_v11  ;;  %v12998_v11 = vld [vmem:[#allocation18_spill] sm:$0xff] }
 0x4e6   :  { %2206 = vmatprep.subr.bf16.mxu1 %v8822_v22  ;;  %2292 = vmatpush1.bf16.msra.mxu0 %v8252_v7  ;;  %v12967_v7 = vld [vmem:[#allocation42_spill] sm:$0xff] }
 0x4e7   :  { %2293 = vmatprep.subr.bf16.mxu0 %v8258_v49  ;;  %v12968_v49 = vld [vmem:[#allocation37_spill] sm:$0xff] }
 0x4e9   :  { %2207 = vmatpush1.bf16.msra.mxu1 %v8830_v24 }
 0x4ea   :  { %2208 = vmatprep.subr.bf16.mxu1 %v8836_v30  ;;  %2294 = vmatpush1.bf16.msra.mxu0 %v8266_v31  ;;  %v12969_v31 = vld [vmem:[#allocation43_spill] sm:$0xff] }
 0x4eb   :  { %2295 = vmatprep.subr.bf16.mxu0 %v8272_v21  ;;  %v12970_v21 = vld [vmem:[#allocation53_spill] sm:$0xff] }
 0x4ed   :  { %2209 = vmatpush1.bf16.msra.mxu1 %v8844_v32 }
 0x4ee   :  { %2210 = vmatprep.subr.bf16.mxu1 %v8850_v54  ;;  %2296 = vmatpush1.bf16.msra.mxu0 %v8280_v36  ;;  %v12971_v36 = vld [vmem:[#allocation55_spill] sm:$0xff] }
 0x4ef   :  { %2297 = vmatprep.subr.bf16.mxu0 %v8286_v45  ;;  %v12972_v45 = vld [vmem:[#allocation2_spill] sm:$0xff] }
 0x4f1   :  { %2211 = vmatpush1.bf16.msra.mxu1 %v8858_v0 }
 0x4f2   :  { %2212 = vmatprep.subr.bf16.mxu1 %v8864_v13  ;;  %2298 = vmatpush1.bf16.msra.mxu0 %v12859_v63  ;;  %v12975_v63 = vld [vmem:[#allocation56_spill] sm:$0xff] }
 0x4f3   :  { %2299 = vmatprep.subr.bf16.mxu0 %v12860_v4  ;;  %v12976_v4 = vld [vmem:[#allocation4_spill] sm:$0xff] }
 0x4f5   :  { %2213 = vmatpush1.bf16.msra.mxu1 %v8872_v33 }
 0x4f6   :  { %2214 = vmatprep.subr.bf16.mxu1 %v8878_v56  ;;  %2300 = vmatpush1.bf16.msra.mxu0 %v12863_v27  ;;  %v12977_v27 = vld [vmem:[#allocation5_spill] sm:$0xff] }
 0x4f7   :  { %2301 = vmatprep.subr.bf16.mxu0 %v12864_v23  ;;  %v12978_v23 = vld [vmem:[#allocation79_spill] sm:$0xff] }
 0x4f9   :  { %2215 = vmatpush1.bf16.msra.mxu1 %v8886_v19 }
 0x4fa   :  { %2216 = vmatprep.subr.bf16.mxu1 %v8892_v14  ;;  %2302 = vmatpush1.bf16.msra.mxu0 %v12867_v16  ;;  %v12979_v16 = vld [vmem:[#allocation80_spill] sm:$0xff] }
 0x4fb   :  { %2303 = vmatprep.subr.bf16.mxu0 %v8328_v60  ;;  %v12974_v60 = vld [vmem:[#allocation54_spill] sm:$0xff] }
 0x4fd   :  { %2217 = vmatpush1.bf16.msra.mxu1 %v8900_v15 }
 0x4fe   :  { %2218 = vmatprep.subr.bf16.mxu1 %v8906_v40  ;;  %2304 = vmatpush1.bf16.msra.mxu0 %v8336_v61  ;;  %v12973_v61 = vld [vmem:[#allocation3_spill] sm:$0xff] }
 0x4ff   :  { %2305 = vmatprep.subr.bf16.mxu0 %v8489_v29 }
 0x501   :  { %2219 = vmatpush1.bf16.msra.mxu1 %v8914_v12 }
 0x502   :  { %2220 = vmatprep.subr.bf16.mxu1 %v8920_v10  ;;  %2306 = vmatpush1.bf16.msra.mxu0 %v8497_v18 }
 0x503   :  { %2307 = vmatprep.subr.bf16.mxu0 %v8503_v25 }
 0x505   :  { %2221 = vmatpush2.bf16.msra.mxu1 %v8928_v38 }
 0x506   :  { %2222 = vmatprep.subr.bf16.mxu1 %v8934_v17  ;;  %2308 = vmatpush2.bf16.msra.mxu0 %v8511_v42 }
 0x507   :  { %2309 = vmatprep.subr.bf16.mxu0 %v12967_v7 }
 0x509   :  { %2223 = vmatpush2.bf16.msra.mxu1 %v12968_v49 }
 0x50a   :  { %2224 = vmatprep.subr.bf16.mxu1 %v8948_v53  ;;  %2310 = vmatpush2.bf16.msra.mxu0 %v8525_v62 }
 0x50b   :  { %2311 = vmatprep.subr.bf16.mxu0 %v12969_v31 }
 0x50d   :  { %2225 = vmatpush2.bf16.msra.mxu1 %v12970_v21 }
 0x50e   :  { %2226 = vmatprep.subr.bf16.mxu1 %v12971_v36  ;;  %2312 = vmatpush2.bf16.msra.mxu0 %v12972_v45 }
 0x50f   :  { %2313 = vmatprep.subr.bf16.mxu0 %v12973_v61 }
 0x511   :  { %2227 = vmatpush2.bf16.msra.mxu1 %v12974_v60 }
 0x512   :  { %2228 = vmatprep.subr.bf16.mxu1 %v12975_v63  ;;  %2314 = vmatpush2.bf16.msra.mxu0 %v12976_v4 }
 0x513   :  { %2315 = vmatprep.subr.bf16.mxu0 %v12977_v27 }
 0x515   :  { %2229 = vmatpush2.bf16.msra.mxu1 %v12978_v23 }
 0x516   :  { %2230 = vmatprep.subr.bf16.mxu1 %v12979_v16  ;;  %2316 = vmatpush2.bf16.msra.mxu0 %v12980_v8 }
 0x517   :  { %2317 = vmatprep.subr.bf16.mxu0 %v12981_v59 }
 0x519   :  { %2231 = vmatpush2.bf16.msra.mxu1 %v12982_v35 }
 0x51a   :  { %2232 = vmatprep.subr.bf16.mxu1 %v12983_v44  ;;  %2318 = vmatpush2.bf16.msra.mxu0 %v12984_v48 }
 0x51b   :  { %2319 = vmatprep.subr.bf16.mxu0 %v12985_v6  ;;  %v13029_v6 = vld [vmem:[#allocation64_spill] sm:$0xff] }
 0x51d   :  { %2233 = vmatpush2.bf16.msra.mxu1 %v12986_v37 }
 0x51e   :  { %2234 = vmatprep.subr.bf16.mxu1 %v12987_v20  ;;  %2320 = vmatpush2.bf16.msra.mxu0 %v12988_v26  ;;  %v13026_v26 = vld [vmem:[#allocation61_spill] sm:$0xff]  ;;  %v13027_v20 = vld [vmem:[#allocation63_spill] sm:$0xff] }
 0x51f   :  { %2321 = vmatprep.subr.bf16.mxu0 %v12989_v2 }
 0x521   :  { %2235 = vmatpush2.bf16.msra.mxu1 %v12990_v43 }
 0x522   :  { %2332 = vmatprep.subr.bf16.mxu1 %v12991_v39  ;;  %2322 = vmatpush2.bf16.msra.mxu0 %v12992_v3  ;;  %v13001_v39 = vld [vmem:[#allocation24_spill] sm:$0xff] }
 0x523   :  { %2373 = vmatprep.subr.bf16.mxu0 %v12993_v50  ;;  %v13003_v50 = vld [vmem:[#allocation28_spill] sm:$0xff] }
 0x524   :  { %2237 = vmatmul.mubr.bf16.vlgmr.msra.gmra.mxu1 %v9086_v51  ;;  %v13004_v51 = vld [vmem:[#allocation30_spill] sm:$0xff] }
 0x525   :  { %2333 = vmatpush1.bf16.msra.mxu1 %v12994_v55  ;;  %v13005_v55 = vld [vmem:[#allocation32_spill] sm:$0xff] }
 0x526   :  { %2334 = vmatprep.subr.bf16.mxu1 %v12995_v5  ;;  %v13006_v5 = vld [vmem:[#allocation34_spill] sm:$0xff] }
 0x529   :  { %2335 = vmatpush1.bf16.msra.mxu1 %v12996_v1  ;;  %v13007_v1 = vld [vmem:[#allocation36_spill] sm:$0xff] }
 0x52a   :  { %2336 = vmatprep.subr.bf16.mxu1 %v12997_v28  ;;  %v13008_v28 = vld [vmem:[#allocation38_spill] sm:$0xff] }
 0x52d   :  { %2337 = vmatpush1.bf16.msra.mxu1 %v12998_v11  ;;  %v13009_v11 = vld [vmem:[#allocation40_spill] sm:$0xff] }
 0x52e   :  { %2338 = vmatprep.subr.bf16.mxu1 %v12999_v57  ;;  %v13010_v57 = vld [vmem:[#allocation50_spill] sm:$0xff] }
 0x531   :  { %2339 = vmatpush1.bf16.msra.mxu1 %v13000_v52  ;;  %v13011_v52 = vld [vmem:[#allocation48_spill] sm:$0xff] }
 0x532   :  { %2340 = vmatprep.subr.bf16.mxu1 %v13001_v39  ;;  %v13012_v39 = vld [vmem:[#allocation49_spill] sm:$0xff] }
 0x535   :  { %2341 = vmatpush1.bf16.msra.mxu1 %v13002_v41  ;;  %v13013_v41 = vld [vmem:[#allocation46_spill] sm:$0xff] }
 0x536   :  { %2342 = vmatprep.subr.bf16.mxu1 %v13003_v50  ;;  %v13014_v50 = vld [vmem:[#allocation77_spill] sm:$0xff] }
 0x539   :  { %2343 = vmatpush1.bf16.msra.mxu1 %v13004_v51  ;;  %v13015_v51 = vld [vmem:[#allocation76_spill] sm:$0xff] }
 0x53a   :  { %2344 = vmatprep.subr.bf16.mxu1 %v13005_v55  ;;  %v13016_v55 = vld [vmem:[#allocation13_spill] sm:$0xff] }
 0x53d   :  { %2345 = vmatpush1.bf16.msra.mxu1 %v13006_v5  ;;  %v13017_v5 = vld [vmem:[#allocation15_spill] sm:$0xff] }
 0x53e   :  { %2346 = vmatprep.subr.bf16.mxu1 %v13007_v1  ;;  %v13018_v1 = vld [vmem:[#allocation29_spill] sm:$0xff] }
 0x541   :  { %2347 = vmatpush1.bf16.msra.mxu1 %v13008_v28  ;;  %v13019_v28 = vld [vmem:[#allocation31_spill] sm:$0xff] }
 0x542   :  { %2348 = vmatprep.subr.bf16.mxu1 %v13009_v11  ;;  %v13020_v11 = vld [vmem:[#allocation17_spill] sm:$0xff] }
 0x545   :  { %2349 = vmatpush2.bf16.msra.mxu1 %v13010_v57  ;;  %v13021_v57 = vld [vmem:[#allocation19_spill] sm:$0xff] }
 0x546   :  { %2350 = vmatprep.subr.bf16.mxu1 %v13011_v52  ;;  %v13022_v52 = vld [vmem:[#allocation33_spill] sm:$0xff] }
 0x549   :  { %2351 = vmatpush2.bf16.msra.mxu1 %v13012_v39  ;;  %v13023_v39 = vld [vmem:[#allocation35_spill] sm:$0xff] }
 0x54a   :  { %2352 = vmatprep.subr.bf16.mxu1 %v13013_v41  ;;  %v13024_v41 = vld [vmem:[#allocation21_spill] sm:$0xff] }
 0x54d   :  { %2353 = vmatpush2.bf16.msra.mxu1 %v13014_v50  ;;  %v13025_v50 = vld [vmem:[#allocation41_spill] sm:$0xff] }
 0x54e   :  { %2354 = vmatprep.subr.bf16.mxu1 %v13015_v51 }
 0x551   :  { %2355 = vmatpush2.bf16.msra.mxu1 %v13016_v55 }
 0x552   :  { %2356 = vmatprep.subr.bf16.mxu1 %v13017_v5 }
 0x555   :  { %2357 = vmatpush2.bf16.msra.mxu1 %v13018_v1 }
 0x556   :  { %2358 = vmatprep.subr.bf16.mxu1 %v13019_v28 }
 0x559   :  { %2359 = vmatpush2.bf16.msra.mxu1 %v13020_v11 }
 0x55a   :  { %2360 = vmatprep.subr.bf16.mxu1 %v13021_v57 }
 0x55d   :  { %2361 = vmatpush2.bf16.msra.mxu1 %v13022_v52 }
 0x55e   :  { %2362 = vmatprep.subr.bf16.mxu1 %v13023_v39  ;;  %v13028_v39 = vld [vmem:[#allocation62_spill] sm:$0xff] }
 0x561   :  { %2363 = vmatpush2.bf16.msra.mxu1 %v13024_v41 }
 0x562   :  { %2460 = vmatprep.subr.bf16.mxu1 %v13025_v50 }
 0x5a4   :  { %v2156_v51 = vpop.f32.mrf.mxu1  ;;  %v2197_v55 = vpop.f32.mrf.mxu0 }
 0x5a5   :  { %v2245_v11 = vadd.f32 %v2156_v51, %v13026_v26  ;;  %v2259_v41 = vadd.f32 %v2197_v55, %v13028_v39 }
 0x5a6   :  { %v2158_v3 = vpop.f32.mrf.mxu1  ;;  %v2199_v5 = vpop.f32.mrf.mxu0 }
 0x5a7   :  { %v2246_v57 = vadd.f32 %v2158_v3, %v13027_v20  ;;  %v5634_v37 = vmul.f32 -1.442695, %v2245_v11  ;;  %v2260_v50 = vadd.f32 %v2199_v5, %v13029_v6  ;;  %v5636_v48 = vmul.f32 -1.442695, %v2259_v41  ;;  %v13031_v5 = vld [vmem:[#allocation84_spill] sm:$0xff] }
 0x5a8   :  { %v2160_v43 = vpop.f32.mrf.mxu1  ;;  %v2201_v1 = vpop.f32.mrf.mxu0 }
 0x5a9   :  { %v5635_v52 = vmul.f32 -1.442695, %v2246_v57  ;;  %6493 = vpow2.f32 %v5634_v37  ;;  %v5637_v44 = vmul.f32 -1.442695, %v2260_v50 }
 0x5aa   :  { %v2161_v2 = vpop.f32.mrf.mxu1  ;;  %v2202_v28 = vpop.f32.mrf.mxu0 }
 0x5ab   :  { %6495 = vpow2.f32 %v5635_v52 }
 0x5ac   :  { %6497 = vpow2.f32 %v5636_v48 }
 0x5ad   :  { %6499 = vpow2.f32 %v5637_v44 }
 0x5b6   :  { %v6494_v35 = vpop.eup %6493 }
 0x5b7   :  { %v2253_v1 = vadd.f32 1.0, %v6494_v35  ;;  %v13030_v35 = vld [vmem:[#allocation83_spill] sm:$0xff] }
 0x5b8   :  { %v6496_v43 = vpop.eup %6495 }
 0x5b9   :  { %v2254_v2 = vadd.f32 1.0, %v6496_v43  ;;  %6501 = vrcp.f32 %v2253_v1  ;;  %v6498_v26 = vpop.eup %6497 }
 0x5ba   :  { %v6500_v20 = vpop.eup %6499  ;;  %v2267_v3 = vadd.f32 1.0, %v6498_v26 }
 0x5bb   :  { %6503 = vrcp.f32 %v2254_v2  ;;  %v2268_v37 = vadd.f32 1.0, %v6500_v20 }
 0x5bc   :  { %6505 = vrcp.f32 %v2267_v3 }
 0x5bd   :  { %6507 = vrcp.f32 %v2268_v37 }
 0x5c6   :  { %v6502_v28 = vpop.eup %6501 }
 0x5c8   :  { %v6504_v48 = vpop.eup %6503 }
 0x5c9   :  { %v6506_v43 = vpop.eup %6505 }
 0x5ca   :  { %v6508_v1 = vpop.eup %6507  ;;  %v2281_v2 = vsub.f32 1.0, %v6506_v43 }
 0x5cb   :  { %v2282_v20 = vsub.f32 1.0, %v6508_v1  ;;  %v2286_v37 = vmul.f32 %v6508_v1, %v9080_v58  ;;  %v9220_v58 = vld [vmem:[%s12702_s25 + $0x124] ss:$24 sps:$4 sm:$0xff]   ;;  %v9284_v1 = vld [vmem:[%s12702_s25 + $0x60] ss:$24 sps:$4 sm:$0xff]  }
 0x5e4   :  { %v2238_v57 = vpop.f32.mrf.mxu1 }
 0x5e5   :  { %v2273_v52 = vadd.f32 %v2238_v57, %v8224_v34  ;;  %v2285_v57 = vmul.f32 %v6506_v43, %v9078_v46  ;;  %v9214_v46 = vld [vmem:[%s12702_s25 + $0x150] ss:$24 sps:$4 sm:$0xff]   ;;  %v9276_v43 = vld [vmem:[%s12702_s25 + $0x64] ss:$24 sps:$4 sm:$0xff]  }
 0x5e6   :  { %v2240_v11 = vpop.f32.mrf.mxu1 }
 0x5e7   :  { %v2275_v41 = vmul.f32 %v6502_v28, %v2273_v52  ;;  %v2274_v6 = vadd.f32 %v2240_v11, %v8227_v47 }
 0x5e8   :  { %v2242_v39 = vpop.f32.mrf.mxu1 }
 0x5e9   :  { %v2277_v44 = vadd.f32 %v2275_v41, %v13030_v35  ;;  %v2276_v51 = vmul.f32 %v6504_v48, %v2274_v6  ;;  %v9228_v39 = vld [vmem:[%s12702_s25 + $0x120] ss:$24 sps:$4 sm:$0xff]   ;;  %v9234_v35 = vld [vmem:[%s12702_s25 + $0xf4] ss:$24 sps:$4 sm:$0xff]  }
 0x5ea   :  { %v2243_v55 = vpop.f32.mrf.mxu1 }
 0x5eb   :  { %6509 = vtanh.f32 %v2277_v44  ;;  %v2278_v50 = vadd.f32 %v2276_v51, %v13031_v5  ;;  %v9242_v44 = vld [vmem:[%s12702_s25 + $0xf0] ss:$24 sps:$4 sm:$0xff]   ;;  %v9248_v51 = vld [vmem:[%s12702_s25 + $0xc4] ss:$24 sps:$4 sm:$0xff]   ;;  %v9256_v55 = vld [vmem:[%s12702_s25 + $0xc0] ss:$24 sps:$4 sm:$0xff]  }
 0x5ec   :  { %v9262_v5 = vld [vmem:[%s12702_s25 + $0x94] ss:$24 sps:$4 sm:$0xff]  }
 0x5ed   :  { %6511 = vtanh.f32 %v2278_v50  ;;  %v9270_v50 = vld [vmem:[%s12702_s25 + $0x90] ss:$24 sps:$4 sm:$0xff]  }
 0x5f8   :  { %v6510_v26 = vpop.eup %6509 }
 0x5f9   :  { %v2283_v3 = vmul.f32 %v6510_v26, %v2281_v2  ;;  %v9290_v2 = vld [vmem:[%s12702_s25 + $0x34] ss:$24 sps:$4 sm:$0xff]   ;;  %v9298_v26 = vld [vmem:[%s12702_s25 + $0x30] ss:$24 sps:$4 sm:$0xff]  }
 0x5fa   :  { %v6512_v52 = vpop.eup %6511 }
 0x5fb   :  { %v2284_v28 = vmul.f32 %v6512_v52, %v2282_v20  ;;  %v9197_v11 = vadd.f32 %v2285_v57, %v2283_v3  ;;  %v9353_v20 = vld [vmem:[%s12702_s25 + $0x12c] ss:$24 sps:$4 sm:$0xff]   ;;  %v9359_v3 = vld [vmem:[%s12702_s25 + $0x128] ss:$24 sps:$4 sm:$0xff]   ;;  %v13047_v57 = vld [vmem:[#allocation16_spill] sm:$0xff] }
 0x5fc   :  { %13045 = vst [vmem:[#allocation60_spill] sm:$0xff] %v9353_v20  ;;  %13046 = vst [vmem:[#allocation58_spill] sm:$0xff] %v9359_v3  ;;  %v13048_v52 = vld [vmem:[#allocation18_spill] sm:$0xff] }
 0x5fd   :  { %v9199_v41 = vadd.f32 %v2286_v37, %v2284_v28  ;;  %v9205_v48 = vpack.c.bf16 %v9197_v11, %v9197_v11  ;;  %v13049_v28 = vld [vmem:[#allocation20_spill] sm:$0xff]  ;;  %v13050_v37 = vld [vmem:[#allocation22_spill] sm:$0xff] }
 0x5ff   :  { %v2290_v6 = vpack.c.bf16 %v9199_v41, %v9199_v41 }
 0x601   :  { %2323 = vmatprep.mubr.bf16.mxu0 %v2290_v6  ;;  %2364 = vmatprep.mubr.bf16.mxu1 %v2290_v6 }
 0x602   :  { %2324 = vmatmul.mubr.bf16.vlgmr.msra.gmra.mxu0 %v9205_v48  ;;  %2365 = vmatmul.mubr.bf16.vlgmr.msra.gmra.mxu1 %v9205_v48 }
 0x603   :  { %2374 = vmatpush1.bf16.msra.mxu0 %v8816_v9  ;;  %2405 = vmatprep.mubr.bf16.mxu0 %v2290_v6  ;;  %v13051_v6 = vld [vmem:[#allocation24_spill] sm:$0xff] }
 0x604   :  { %2375 = vmatprep.subr.bf16.mxu0 %v8822_v22  ;;  %2461 = vmatpush1.bf16.msra.mxu1 %v9214_v46 }
 0x605   :  { %2462 = vmatprep.subr.bf16.mxu1 %v9220_v58 }
 0x607   :  { %2376 = vmatpush1.bf16.msra.mxu0 %v8830_v24 }
 0x608   :  { %2377 = vmatprep.subr.bf16.mxu0 %v8836_v30  ;;  %2463 = vmatpush1.bf16.msra.mxu1 %v9228_v39 }
 0x609   :  { %2464 = vmatprep.subr.bf16.mxu1 %v9234_v35 }
 0x60b   :  { %2378 = vmatpush1.bf16.msra.mxu0 %v8844_v32 }
 0x60c   :  { %2379 = vmatprep.subr.bf16.mxu0 %v8850_v54  ;;  %2465 = vmatpush1.bf16.msra.mxu1 %v9242_v44 }
 0x60d   :  { %2466 = vmatprep.subr.bf16.mxu1 %v9248_v51 }
 0x60f   :  { %2380 = vmatpush1.bf16.msra.mxu0 %v8858_v0 }
 0x610   :  { %2381 = vmatprep.subr.bf16.mxu0 %v8864_v13  ;;  %2467 = vmatpush1.bf16.msra.mxu1 %v9256_v55 }
 0x611   :  { %2468 = vmatprep.subr.bf16.mxu1 %v9262_v5 }
 0x613   :  { %2382 = vmatpush1.bf16.msra.mxu0 %v8872_v33 }
 0x614   :  { %2383 = vmatprep.subr.bf16.mxu0 %v8878_v56  ;;  %2469 = vmatpush1.bf16.msra.mxu1 %v9270_v50 }
 0x615   :  { %2470 = vmatprep.subr.bf16.mxu1 %v9276_v43 }
 0x617   :  { %2384 = vmatpush1.bf16.msra.mxu0 %v8886_v19 }
 0x618   :  { %2385 = vmatprep.subr.bf16.mxu0 %v8892_v14  ;;  %2471 = vmatpush1.bf16.msra.mxu1 %v9284_v1 }
 0x619   :  { %2472 = vmatprep.subr.bf16.mxu1 %v9290_v2 }
 0x61b   :  { %2386 = vmatpush1.bf16.msra.mxu0 %v8900_v15 }
 0x61c   :  { %2387 = vmatprep.subr.bf16.mxu0 %v8906_v40  ;;  %2473 = vmatpush1.bf16.msra.mxu1 %v9298_v26 }
 0x61d   :  { %2474 = vmatprep.subr.bf16.mxu1 %v8489_v29  ;;  %v13032_v29 = vld [vmem:[#allocation92_spill] sm:$0xff] }
 0x61f   :  { %2388 = vmatpush1.bf16.msra.mxu0 %v8914_v12 }
 0x620   :  { %2389 = vmatprep.subr.bf16.mxu0 %v8920_v10  ;;  %2475 = vmatpush1.bf16.msra.mxu1 %v8497_v18  ;;  %v13033_v18 = vld [vmem:[#allocation93_spill] sm:$0xff] }
 0x621   :  { %2476 = vmatprep.subr.bf16.mxu1 %v8503_v25  ;;  %v13034_v25 = vld [vmem:[#allocation8_spill] sm:$0xff] }
 0x623   :  { %2390 = vmatpush2.bf16.msra.mxu0 %v8928_v38 }
 0x624   :  { %2391 = vmatprep.subr.bf16.mxu0 %v8934_v17  ;;  %2477 = vmatpush2.bf16.msra.mxu1 %v8511_v42  ;;  %v13035_v42 = vld [vmem:[#allocation9_spill] sm:$0xff] }
 0x625   :  { %2478 = vmatprep.subr.bf16.mxu1 %v12967_v7  ;;  %v13037_v7 = vld [vmem:[#allocation95_spill] sm:$0xff] }
 0x627   :  { %2392 = vmatpush2.bf16.msra.mxu0 %v12968_v49 }
 0x628   :  { %2393 = vmatprep.subr.bf16.mxu0 %v8948_v53  ;;  %2479 = vmatpush2.bf16.msra.mxu1 %v8525_v62  ;;  %v13036_v62 = vld [vmem:[#allocation94_spill] sm:$0xff] }
 0x629   :  { %2480 = vmatprep.subr.bf16.mxu1 %v12969_v31  ;;  %v13038_v31 = vld [vmem:[#allocation10_spill] sm:$0xff] }
 0x62b   :  { %2394 = vmatpush2.bf16.msra.mxu0 %v12970_v21 }
 0x62c   :  { %2395 = vmatprep.subr.bf16.mxu0 %v12971_v36  ;;  %2481 = vmatpush2.bf16.msra.mxu1 %v12972_v45  ;;  %v13039_v45 = vld [vmem:[#allocation11_spill] sm:$0xff] }
 0x62d   :  { %2482 = vmatprep.subr.bf16.mxu1 %v12973_v61  ;;  %v13040_v61 = vld [vmem:[#allocation96_spill] sm:$0xff] }
 0x62f   :  { %2396 = vmatpush2.bf16.msra.mxu0 %v12974_v60 }
 0x630   :  { %2397 = vmatprep.subr.bf16.mxu0 %v12975_v63  ;;  %2483 = vmatpush2.bf16.msra.mxu1 %v12976_v4  ;;  %v9338_v4 = vld [vmem:[%s12702_s25 + $0x15c] ss:$24 sps:$4 sm:$0xff]  }
 0x631   :  { %2484 = vmatprep.subr.bf16.mxu1 %v12977_v27  ;;  %13041 = vst [vmem:[#allocation59_spill] sm:$0xff] %v9338_v4  ;;  %v13042_v27 = vld [vmem:[#allocation12_spill] sm:$0xff] }
 0x633   :  { %2398 = vmatpush2.bf16.msra.mxu0 %v12978_v23 }
 0x634   :  { %2399 = vmatprep.subr.bf16.mxu0 %v12979_v16  ;;  %2485 = vmatpush2.bf16.msra.mxu1 %v12980_v8  ;;  %v13043_v8 = vld [vmem:[#allocation14_spill] sm:$0xff] }
 0x635   :  { %2486 = vmatprep.subr.bf16.mxu1 %v12981_v59  ;;  %v9347_v59 = vld [vmem:[%s12702_s25 + $0x158] ss:$24 sps:$4 sm:$0xff]  }
 0x636   :  { %13044 = vst [vmem:[#allocation57_spill] sm:$0xff] %v9347_v59 }
 0x637   :  { %2400 = vmatpush2.bf16.msra.mxu0 %v13032_v29 }
 0x638   :  { %2401 = vmatprep.subr.bf16.mxu0 %v13033_v18  ;;  %2487 = vmatpush2.bf16.msra.mxu1 %v13034_v25  ;;  %v13053_v25 = vld [vmem:[#allocation28_spill] sm:$0xff]  ;;  %v13080_v18 = vld [vmem:[#allocation66_spill] sm:$0xff] }
 0x639   :  { %2488 = vmatprep.subr.bf16.mxu1 %v13035_v42  ;;  %v13054_v42 = vld [vmem:[#allocation30_spill] sm:$0xff] }
 0x63b   :  { %2402 = vmatpush2.bf16.msra.mxu0 %v13036_v62 }
 0x63c   :  { %2403 = vmatprep.subr.bf16.mxu0 %v13037_v7  ;;  %2489 = vmatpush2.bf16.msra.mxu1 %v13038_v31  ;;  %v13055_v31 = vld [vmem:[#allocation32_spill] sm:$0xff]  ;;  %v13078_v7 = vld [vmem:[#allocation51_spill] sm:$0xff] }
 0x63d   :  { %2490 = vmatprep.subr.bf16.mxu1 %v13039_v45  ;;  %v13056_v45 = vld [vmem:[#allocation34_spill] sm:$0xff] }
 0x63f   :  { %2404 = vmatpush2.bf16.msra.mxu0 %v13040_v61 }
 0x640   :  { %2501 = vmatprep.subr.bf16.mxu0 %v9338_v4  ;;  %2491 = vmatpush2.bf16.msra.mxu1 %v13042_v27  ;;  %v13057_v27 = vld [vmem:[#allocation36_spill] sm:$0xff] }
 0x641   :  { %2542 = vmatprep.subr.bf16.mxu1 %v13043_v8  ;;  %v13058_v8 = vld [vmem:[#allocation38_spill] sm:$0xff] }
 0x642   :  { %2406 = vmatmul.mubr.bf16.vlgmr.msra.gmra.mxu0 %v9205_v48  ;;  %v13052_v48 = vld [vmem:[#allocation26_spill] sm:$0xff] }
 0x643   :  { %2502 = vmatpush1.bf16.msra.mxu0 %v9347_v59  ;;  %v13077_v59 = vld [vmem:[#allocation65_spill] sm:$0xff] }
 0x644   :  { %2503 = vmatprep.subr.bf16.mxu0 %v9353_v20  ;;  %v13076_v20 = vld [vmem:[#allocation67_spill] sm:$0xff] }
 0x647   :  { %2504 = vmatpush1.bf16.msra.mxu0 %v9359_v3 }
 0x648   :  { %2505 = vmatprep.subr.bf16.mxu0 %v13047_v57  ;;  %v13059_v57 = vld [vmem:[#allocation40_spill] sm:$0xff] }
 0x64b   :  { %2506 = vmatpush1.bf16.msra.mxu0 %v13048_v52  ;;  %v13060_v52 = vld [vmem:[#allocation50_spill] sm:$0xff] }
 0x64c   :  { %2507 = vmatprep.subr.bf16.mxu0 %v13049_v28  ;;  %v13061_v28 = vld [vmem:[#allocation48_spill] sm:$0xff] }
 0x64f   :  { %2508 = vmatpush1.bf16.msra.mxu0 %v13050_v37  ;;  %v13062_v37 = vld [vmem:[#allocation49_spill] sm:$0xff] }
 0x650   :  { %2509 = vmatprep.subr.bf16.mxu0 %v13051_v6  ;;  %v13063_v6 = vld [vmem:[#allocation46_spill] sm:$0xff] }
 0x653   :  { %2510 = vmatpush1.bf16.msra.mxu0 %v13052_v48  ;;  %v13064_v48 = vld [vmem:[#allocation77_spill] sm:$0xff] }
 0x654   :  { %2511 = vmatprep.subr.bf16.mxu0 %v13053_v25  ;;  %v13065_v25 = vld [vmem:[#allocation76_spill] sm:$0xff] }
 0x657   :  { %2512 = vmatpush1.bf16.msra.mxu0 %v13054_v42  ;;  %v13066_v42 = vld [vmem:[#allocation13_spill] sm:$0xff] }
 0x658   :  { %2513 = vmatprep.subr.bf16.mxu0 %v13055_v31  ;;  %v13067_v31 = vld [vmem:[#allocation15_spill] sm:$0xff] }
 0x65b   :  { %2514 = vmatpush1.bf16.msra.mxu0 %v13056_v45  ;;  %v13068_v45 = vld [vmem:[#allocation29_spill] sm:$0xff] }
 0x65c   :  { %2515 = vmatprep.subr.bf16.mxu0 %v13057_v27  ;;  %v13069_v27 = vld [vmem:[#allocation31_spill] sm:$0xff] }
 0x65f   :  { %2516 = vmatpush1.bf16.msra.mxu0 %v13058_v8  ;;  %v13070_v8 = vld [vmem:[#allocation17_spill] sm:$0xff] }
 0x660   :  { %2517 = vmatprep.subr.bf16.mxu0 %v13059_v57  ;;  %v13071_v57 = vld [vmem:[#allocation19_spill] sm:$0xff] }
 0x663   :  { %2518 = vmatpush2.bf16.msra.mxu0 %v13060_v52  ;;  %v13072_v52 = vld [vmem:[#allocation33_spill] sm:$0xff] }
 0x664   :  { %2519 = vmatprep.subr.bf16.mxu0 %v13061_v28  ;;  %v13073_v28 = vld [vmem:[#allocation35_spill] sm:$0xff] }
 0x667   :  { %2520 = vmatpush2.bf16.msra.mxu0 %v13062_v37  ;;  %v13074_v37 = vld [vmem:[#allocation21_spill] sm:$0xff] }
 0x668   :  { %2521 = vmatprep.subr.bf16.mxu0 %v13063_v6  ;;  %v6848_v6 = vld [vmem:[%s12702_s25 + $0x154] ss:$24 sps:$4 sm:$0xff]  }
 0x66b   :  { %2522 = vmatpush2.bf16.msra.mxu0 %v13064_v48 }
 0x66c   :  { %2523 = vmatprep.subr.bf16.mxu0 %v13065_v25 }
 0x66f   :  { %2524 = vmatpush2.bf16.msra.mxu0 %v13066_v42 }
 0x670   :  { %2525 = vmatprep.subr.bf16.mxu0 %v13067_v31 }
 0x673   :  { %2526 = vmatpush2.bf16.msra.mxu0 %v13068_v45 }
 0x674   :  { %2527 = vmatprep.subr.bf16.mxu0 %v13069_v27 }
 0x677   :  { %2528 = vmatpush2.bf16.msra.mxu0 %v13070_v8 }
 0x678   :  { %2529 = vmatprep.subr.bf16.mxu0 %v13071_v57  ;;  %v13075_v57 = vld [vmem:[#allocation52_spill] sm:$0xff] }
 0x67b   :  { %2530 = vmatpush2.bf16.msra.mxu0 %v13072_v52  ;;  %v808_v52 = vadd.f32 %v13076_v20, %v13075_v57 }
 0x67c   :  { %2531 = vmatprep.subr.bf16.mxu0 %v13073_v28 }
 0x67f   :  { %2532 = vmatpush2.bf16.msra.mxu0 %v13074_v37 }
 0x680   :  { %2629 = vmatprep.subr.bf16.mxu0 %v6848_v6  ;;  %v13079_v6 = vld [vmem:[#allocation68_spill] sm:$0xff] }
 0x681   :  { %v881_v62 = vadd.f32 %v13079_v6, %v13078_v7 }
 0x6c2   :  { %v2325_v48 = vpop.f32.mrf.mxu0  ;;  %v2366_v25 = vpop.f32.mrf.mxu1 }
 0x6c3   :  { %v2414_v28 = vadd.f32 %v2325_v48, %v13077_v59  ;;  %v2428_v29 = vadd.f32 %v2366_v25, %v13080_v18 }
 0x6c4   :  { %v2327_v42 = vpop.f32.mrf.mxu0  ;;  %v2368_v31 = vpop.f32.mrf.mxu1 }
 0x6c5   :  { %v2415_v4 = vadd.f32 %v2327_v42, %v808_v52  ;;  %v5638_v37 = vmul.f32 -1.442695, %v2414_v28  ;;  %v2429_v16 = vadd.f32 %v2368_v31, %v881_v62  ;;  %v13081_v31 = vld [vmem:[#allocation78_spill] sm:$0xff] }
 0x6c6   :  { %v2329_v45 = vpop.f32.mrf.mxu0  ;;  %v2370_v27 = vpop.f32.mrf.mxu1 }
 0x6c7   :  { %v5639_v61 = vmul.f32 -1.442695, %v2415_v4  ;;  %6513 = vpow2.f32 %v5638_v37  ;;  %v5640_v45 = vmul.f32 -1.442695, %v2428_v29  ;;  %v5641_v27 = vmul.f32 -1.442695, %v2429_v16 }
 0x6c8   :  { %v2330_v8 = vpop.f32.mrf.mxu0  ;;  %v2371_v3 = vpop.f32.mrf.mxu1  ;;  %v13082_v37 = vld [vmem:[#allocation86_spill] sm:$0xff] }
 0x6c9   :  { %6515 = vpow2.f32 %v5639_v61  ;;  %v954_v6 = vadd.f32 %v13082_v37, %v13081_v31 }
 0x6ca   :  { %6517 = vpow2.f32 %v5640_v45 }
 0x6cb   :  { %6519 = vpow2.f32 %v5641_v27 }
 0x6d4   :  { %v6514_v8 = vpop.eup %6513 }
 0x6d5   :  { %v2422_v23 = vadd.f32 1.0, %v6514_v8 }
 0x6d6   :  { %v6516_v3 = vpop.eup %6515 }
 0x6d7   :  { %v2423_v20 = vadd.f32 1.0, %v6516_v3  ;;  %6521 = vrcp.f32 %v2422_v23  ;;  %v6518_v59 = vpop.eup %6517  ;;  %v13083_v23 = vld [vmem:[#allocation85_spill] sm:$0xff] }
 0x6d8   :  { %v6520_v4 = vpop.eup %6519  ;;  %v2436_v48 = vadd.f32 1.0, %v6518_v59 }
 0x6d9   :  { %6523 = vrcp.f32 %v2423_v20  ;;  %v2437_v42 = vadd.f32 1.0, %v6520_v4 }
 0x6da   :  { %6525 = vrcp.f32 %v2436_v48 }
 0x6db   :  { %6527 = vrcp.f32 %v2437_v42 }
 0x6e4   :  { %v6522_v28 = vpop.eup %6521 }
 0x6e6   :  { %v6524_v62 = vpop.eup %6523 }
 0x6e7   :  { %v6526_v20 = vpop.eup %6525 }
 0x6e8   :  { %v6528_v59 = vpop.eup %6527  ;;  %v2450_v4 = vsub.f32 1.0, %v6526_v20 }
 0x6e9   :  { %v2455_v37 = vmul.f32 %v6528_v59, %v9199_v41  ;;  %v6866_v41 = vld [vmem:[%s12702_s25 + $0x180] ss:$24 sps:$4 sm:$0xff]  }
 0x702   :  { %v2407_v61 = vpop.f32.mrf.mxu0 }
 0x703   :  { %v2442_v52 = vadd.f32 %v2407_v61, %v8224_v34  ;;  %v2451_v61 = vsub.f32 1.0, %v6528_v59  ;;  %v6884_v59 = vld [vmem:[%s12702_s25 + $0x27c] ss:$24 sps:$4 sm:$0xff]  }
 0x704   :  { %v2409_v18 = vpop.f32.mrf.mxu0 }
 0x705   :  { %v2444_v29 = vmul.f32 %v6522_v28, %v2442_v52  ;;  %v2443_v16 = vadd.f32 %v2409_v18, %v8227_v47  ;;  %v2454_v28 = vmul.f32 %v6526_v20, %v9197_v11  ;;  %v13091_v11 = vld [vmem:[#allocation59_spill] sm:$0xff] }
 0x706   :  { %v2411_v25 = vpop.f32.mrf.mxu0  ;;  %v6883_v20 = vld [vmem:[%s12702_s25 + $0x2a8] ss:$24 sps:$4 sm:$0xff]  }
 0x707   :  { %v2446_v45 = vadd.f32 %v2444_v29, %v13083_v23  ;;  %v2445_v27 = vmul.f32 %v6524_v62, %v2443_v16  ;;  %v6878_v23 = vld [vmem:[%s12702_s25 + $0xc] ss:$24 sps:$4 sm:$0xff]  }
 0x708   :  { %v2412_v8 = vpop.f32.mrf.mxu0 }
 0x709   :  { %6529 = vtanh.f32 %v2446_v45  ;;  %v2447_v3 = vadd.f32 %v2445_v27, %v954_v6  ;;  %v6877_v6 = vld [vmem:[%s12702_s25 + $0x38] ss:$24 sps:$4 sm:$0xff]   ;;  %v6879_v45 = vld [vmem:[%s12702_s25 + $0x8] ss:$24 sps:$4 sm:$0xff]   ;;  %v6880_v27 = vld [vmem:[%s12702_s25 + $0x2dc] ss:$24 sps:$4 sm:$0xff]  }
 0x70a   :  { %v6881_v8 = vld [vmem:[%s12702_s25 + $0x2d8] ss:$24 sps:$4 sm:$0xff]  }
 0x70b   :  { %6531 = vtanh.f32 %v2447_v3  ;;  %v6882_v3 = vld [vmem:[%s12702_s25 + $0x2ac] ss:$24 sps:$4 sm:$0xff]  }
 0x716   :  { %v6530_v48 = vpop.eup %6529 }
 0x717   :  { %v2452_v52 = vmul.f32 %v6530_v48, %v2450_v4  ;;  %v6885_v4 = vld [vmem:[%s12702_s25 + $0x278] ss:$24 sps:$4 sm:$0xff]   ;;  %v6886_v48 = vld [vmem:[%s12702_s25 + $0x24c] ss:$24 sps:$4 sm:$0xff]  }
 0x718   :  { %v6532_v18 = vpop.eup %6531 }
 0x719   :  { %v2453_v25 = vmul.f32 %v6532_v18, %v2451_v61  ;;  %v9406_v42 = vadd.f32 %v2454_v28, %v2452_v52  ;;  %v6887_v61 = vld [vmem:[%s12702_s25 + $0x248] ss:$24 sps:$4 sm:$0xff]   ;;  %v6888_v52 = vld [vmem:[%s12702_s25 + $0x21c] ss:$24 sps:$4 sm:$0xff]   ;;  %v6889_v28 = vld [vmem:[%s12702_s25 + $0x218] ss:$24 sps:$4 sm:$0xff]  }
 0x71a   :  { %v6890_v18 = vld [vmem:[%s12702_s25 + $0x1ec] ss:$24 sps:$4 sm:$0xff]  }
 0x71b   :  { %v9408_v29 = vadd.f32 %v2455_v37, %v2453_v25  ;;  %v9414_v62 = vpack.c.bf16 %v9406_v42, %v9406_v42  ;;  %v6891_v25 = vld [vmem:[%s12702_s25 + $0x1e8] ss:$24 sps:$4 sm:$0xff]   ;;  %v6892_v37 = vld [vmem:[%s12702_s25 + $0x1bc] ss:$24 sps:$4 sm:$0xff]  }
 0x71d   :  { %v2459_v16 = vpack.c.bf16 %v9408_v29, %v9408_v29 }
 0x71f   :  { %2492 = vmatprep.mubr.bf16.mxu1 %v2459_v16  ;;  %2533 = vmatprep.mubr.bf16.mxu0 %v2459_v16 }
 0x720   :  { %2493 = vmatmul.mubr.bf16.vlgmr.msra.gmra.mxu1 %v9414_v62  ;;  %2534 = vmatmul.mubr.bf16.vlgmr.msra.gmra.mxu0 %v9414_v62 }
 0x721   :  { %2543 = vmatpush1.bf16.msra.mxu1 %v8816_v9  ;;  %2574 = vmatprep.mubr.bf16.mxu1 %v2459_v16  ;;  %v6849_v9 = vld [vmem:[%s12702_s25 + $0x4] ss:$24 sps:$4 sm:$0xff]   ;;  %v6893_v16 = vld [vmem:[%s12702_s25 + $0x1b8] ss:$24 sps:$4 sm:$0xff]  }
 0x722   :  { %2544 = vmatprep.subr.bf16.mxu1 %v8822_v22  ;;  %2630 = vmatpush1.bf16.msra.mxu0 %v9214_v46  ;;  %v6850_v22 = vld [vmem:[%s12702_s25] ss:$24 sps:$4 sm:$0xff]   ;;  %v6867_v46 = vld [vmem:[%s12702_s25 + $0x164] ss:$24 sps:$4 sm:$0xff]  }
 0x723   :  { %2631 = vmatprep.subr.bf16.mxu0 %v9220_v58  ;;  %v13092_v58 = vld [vmem:[#allocation57_spill] sm:$0xff] }
 0x725   :  { %2545 = vmatpush1.bf16.msra.mxu1 %v8830_v24  ;;  %v6851_v24 = vld [vmem:[%s12702_s25 + $0x2d4] ss:$24 sps:$4 sm:$0xff]  }
 0x726   :  { %2546 = vmatprep.subr.bf16.mxu1 %v8836_v30  ;;  %2632 = vmatpush1.bf16.msra.mxu0 %v9228_v39  ;;  %v6852_v30 = vld [vmem:[%s12702_s25 + $0x2d0] ss:$24 sps:$4 sm:$0xff]  }
 0x727   :  { %2633 = vmatprep.subr.bf16.mxu0 %v9234_v35  ;;  %v13093_v39 = vld [vmem:[#allocation60_spill] sm:$0xff]  ;;  %v13094_v35 = vld [vmem:[#allocation58_spill] sm:$0xff] }
 0x729   :  { %2547 = vmatpush1.bf16.msra.mxu1 %v8844_v32  ;;  %v6853_v32 = vld [vmem:[%s12702_s25 + $0x2a4] ss:$24 sps:$4 sm:$0xff]  }
 0x72a   :  { %2548 = vmatprep.subr.bf16.mxu1 %v8850_v54  ;;  %2634 = vmatpush1.bf16.msra.mxu0 %v9242_v44  ;;  %v6854_v54 = vld [vmem:[%s12702_s25 + $0x2a0] ss:$24 sps:$4 sm:$0xff]   ;;  %v6868_v44 = vld [vmem:[%s12702_s25 + $0xfc] ss:$24 sps:$4 sm:$0xff]  }
 0x72b   :  { %2635 = vmatprep.subr.bf16.mxu0 %v9248_v51  ;;  %v6869_v51 = vld [vmem:[%s12702_s25 + $0xf8] ss:$24 sps:$4 sm:$0xff]  }
 0x72d   :  { %2549 = vmatpush1.bf16.msra.mxu1 %v8858_v0  ;;  %v6855_v0 = vld [vmem:[%s12702_s25 + $0x274] ss:$24 sps:$4 sm:$0xff]  }
 0x72e   :  { %2550 = vmatprep.subr.bf16.mxu1 %v8864_v13  ;;  %2636 = vmatpush1.bf16.msra.mxu0 %v9256_v55  ;;  %v6856_v13 = vld [vmem:[%s12702_s25 + $0x270] ss:$24 sps:$4 sm:$0xff]   ;;  %v6870_v55 = vld [vmem:[%s12702_s25 + $0xcc] ss:$24 sps:$4 sm:$0xff]  }
 0x72f   :  { %2637 = vmatprep.subr.bf16.mxu0 %v9262_v5  ;;  %v6871_v5 = vld [vmem:[%s12702_s25 + $0xc8] ss:$24 sps:$4 sm:$0xff]  }
 0x731   :  { %2551 = vmatpush1.bf16.msra.mxu1 %v8872_v33  ;;  %v6857_v33 = vld [vmem:[%s12702_s25 + $0x244] ss:$24 sps:$4 sm:$0xff]  }
 0x732   :  { %2552 = vmatprep.subr.bf16.mxu1 %v8878_v56  ;;  %2638 = vmatpush1.bf16.msra.mxu0 %v9270_v50  ;;  %v6858_v56 = vld [vmem:[%s12702_s25 + $0x240] ss:$24 sps:$4 sm:$0xff]   ;;  %v6872_v50 = vld [vmem:[%s12702_s25 + $0x9c] ss:$24 sps:$4 sm:$0xff]  }
 0x733   :  { %2639 = vmatprep.subr.bf16.mxu0 %v9276_v43  ;;  %v6873_v43 = vld [vmem:[%s12702_s25 + $0x98] ss:$24 sps:$4 sm:$0xff]  }
 0x735   :  { %2553 = vmatpush1.bf16.msra.mxu1 %v8886_v19  ;;  %v6859_v19 = vld [vmem:[%s12702_s25 + $0x214] ss:$24 sps:$4 sm:$0xff]  }
 0x736   :  { %2554 = vmatprep.subr.bf16.mxu1 %v8892_v14  ;;  %2640 = vmatpush1.bf16.msra.mxu0 %v9284_v1  ;;  %v13084_v14 = vld [vmem:[#allocation79_spill] sm:$0xff] }
 0x737   :  { %2641 = vmatprep.subr.bf16.mxu0 %v9290_v2  ;;  %v6874_v1 = vld [vmem:[%s12702_s25 + $0x6c] ss:$24 sps:$4 sm:$0xff]   ;;  %v6875_v2 = vld [vmem:[%s12702_s25 + $0x68] ss:$24 sps:$4 sm:$0xff]  }
 0x739   :  { %2555 = vmatpush1.bf16.msra.mxu1 %v8900_v15  ;;  %v13085_v15 = vld [vmem:[#allocation80_spill] sm:$0xff] }
 0x73a   :  { %2556 = vmatprep.subr.bf16.mxu1 %v8906_v40  ;;  %2642 = vmatpush1.bf16.msra.mxu0 %v9298_v26  ;;  %v6860_v40 = vld [vmem:[%s12702_s25 + $0x210] ss:$24 sps:$4 sm:$0xff]   ;;  %v6876_v26 = vld [vmem:[%s12702_s25 + $0x3c] ss:$24 sps:$4 sm:$0xff]  }
 0x73b   :  { %2643 = vmatprep.subr.bf16.mxu0 %v6849_v9  ;;  %v6895_v9 = vld [vmem:[%s12702_s25 + $0x188] ss:$24 sps:$4 sm:$0xff]  }
 0x73d   :  { %2557 = vmatpush1.bf16.msra.mxu1 %v8914_v12  ;;  %v6861_v12 = vld [vmem:[%s12702_s25 + $0x1e4] ss:$24 sps:$4 sm:$0xff]  }
 0x73e   :  { %2558 = vmatprep.subr.bf16.mxu1 %v8920_v10  ;;  %2644 = vmatpush1.bf16.msra.mxu0 %v6850_v22  ;;  %v13086_v10 = vld [vmem:[#allocation92_spill] sm:$0xff] }
 0x73f   :  { %2645 = vmatprep.subr.bf16.mxu0 %v6851_v24 }
 0x741   :  { %2559 = vmatpush2.bf16.msra.mxu1 %v8928_v38  ;;  %v13087_v38 = vld [vmem:[#allocation93_spill] sm:$0xff] }
 0x742   :  { %2560 = vmatprep.subr.bf16.mxu1 %v8934_v17  ;;  %2646 = vmatpush2.bf16.msra.mxu0 %v6852_v30  ;;  %v6862_v17 = vld [vmem:[%s12702_s25 + $0x1e0] ss:$24 sps:$4 sm:$0xff]  }
 0x743   :  { %2647 = vmatprep.subr.bf16.mxu0 %v6853_v32 }
 0x745   :  { %2561 = vmatpush2.bf16.msra.mxu1 %v12968_v49  ;;  %v13088_v49 = vld [vmem:[#allocation94_spill] sm:$0xff] }
 0x746   :  { %2562 = vmatprep.subr.bf16.mxu1 %v8948_v53  ;;  %2648 = vmatpush2.bf16.msra.mxu0 %v6854_v54  ;;  %v6863_v53 = vld [vmem:[%s12702_s25 + $0x1b4] ss:$24 sps:$4 sm:$0xff]  }
 0x747   :  { %2649 = vmatprep.subr.bf16.mxu0 %v6855_v0 }
 0x749   :  { %2563 = vmatpush2.bf16.msra.mxu1 %v12970_v21  ;;  %v13089_v21 = vld [vmem:[#allocation95_spill] sm:$0xff] }
 0x74a   :  { %2564 = vmatprep.subr.bf16.mxu1 %v12971_v36  ;;  %2650 = vmatpush2.bf16.msra.mxu0 %v6856_v13  ;;  %v6864_v36 = vld [vmem:[%s12702_s25 + $0x1b0] ss:$24 sps:$4 sm:$0xff]  }
 0x74b   :  { %2651 = vmatprep.subr.bf16.mxu0 %v6857_v33 }
 0x74d   :  { %2565 = vmatpush2.bf16.msra.mxu1 %v12974_v60  ;;  %v6865_v60 = vld [vmem:[%s12702_s25 + $0x184] ss:$24 sps:$4 sm:$0xff]  }
 0x74e   :  { %2566 = vmatprep.subr.bf16.mxu1 %v12975_v63  ;;  %2652 = vmatpush2.bf16.msra.mxu0 %v6858_v56  ;;  %v13090_v63 = vld [vmem:[#allocation96_spill] sm:$0xff]  ;;  %v13095_v56 = vld [vmem:[#allocation69_spill] sm:$0xff] }
 0x74f   :  { %2653 = vmatprep.subr.bf16.mxu0 %v6859_v19 }
 0x751   :  { %2567 = vmatpush2.bf16.msra.mxu1 %v13084_v14  ;;  %v13096_v14 = vld [vmem:[#allocation71_spill] sm:$0xff] }
 0x752   :  { %2568 = vmatprep.subr.bf16.mxu1 %v13085_v15  ;;  %2654 = vmatpush2.bf16.msra.mxu0 %v6860_v40 }
 0x753   :  { %2655 = vmatprep.subr.bf16.mxu0 %v6861_v12 }
 0x755   :  { %2569 = vmatpush2.bf16.msra.mxu1 %v13086_v10  ;;  %v13097_v10 = vld [vmem:[#allocation70_spill] sm:$0xff] }
 0x756   :  { %2570 = vmatprep.subr.bf16.mxu1 %v13087_v38  ;;  %2656 = vmatpush2.bf16.msra.mxu0 %v6862_v17  ;;  %v13098_v17 = vld [vmem:[#allocation72_spill] sm:$0xff] }
 0x757   :  { %2657 = vmatprep.subr.bf16.mxu0 %v6863_v53 }
 0x759   :  { %2571 = vmatpush2.bf16.msra.mxu1 %v13088_v49 }
 0x75a   :  { %2572 = vmatprep.subr.bf16.mxu1 %v13089_v21  ;;  %2658 = vmatpush2.bf16.msra.mxu0 %v6864_v36 }
 0x75b   :  { %2659 = vmatprep.subr.bf16.mxu0 %v6865_v60 }
 0x75d   :  { %2573 = vmatpush2.bf16.msra.mxu1 %v13090_v63 }
 0x75e   :  { %2670 = vmatprep.subr.bf16.mxu1 %v13091_v11  ;;  %2660 = vmatpush2.bf16.msra.mxu0 %v6866_v41 }
 0x75f   :  { %2711 = vmatprep.subr.bf16.mxu0 %v6867_v46 }
 0x760   :  { %2575 = vmatmul.mubr.bf16.vlgmr.msra.gmra.mxu1 %v9414_v62  ;;  %v6894_v62 = vld [vmem:[%s12702_s25 + $0x18c] ss:$24 sps:$4 sm:$0xff]  }
 0x761   :  { %2671 = vmatpush1.bf16.msra.mxu1 %v13092_v58 }
 0x762   :  { %2672 = vmatprep.subr.bf16.mxu1 %v13093_v39 }
 0x765   :  { %2673 = vmatpush1.bf16.msra.mxu1 %v13094_v35 }
 0x766   :  { %2674 = vmatprep.subr.bf16.mxu1 %v6868_v44 }
 0x769   :  { %2675 = vmatpush1.bf16.msra.mxu1 %v6869_v51 }
 0x76a   :  { %2676 = vmatprep.subr.bf16.mxu1 %v6870_v55 }
 0x76d   :  { %2677 = vmatpush1.bf16.msra.mxu1 %v6871_v5 }
 0x76e   :  { %2678 = vmatprep.subr.bf16.mxu1 %v6872_v50 }
 0x771   :  { %2679 = vmatpush1.bf16.msra.mxu1 %v6873_v43 }
 0x772   :  { %2680 = vmatprep.subr.bf16.mxu1 %v6874_v1 }
 0x775   :  { %2681 = vmatpush1.bf16.msra.mxu1 %v6875_v2  ;;  %v13099_v2 = vld [vmem:[#allocation87_spill] sm:$0xff] }
 0x776   :  { %2682 = vmatprep.subr.bf16.mxu1 %v6876_v26 }
 0x779   :  { %2683 = vmatpush1.bf16.msra.mxu1 %v6877_v6 }
 0x77a   :  { %2684 = vmatprep.subr.bf16.mxu1 %v6878_v23 }
 0x77d   :  { %2685 = vmatpush1.bf16.msra.mxu1 %v6879_v45  ;;  %v13100_v45 = vld [vmem:[#allocation88_spill] sm:$0xff] }
 0x77e   :  { %2686 = vmatprep.subr.bf16.mxu1 %v6880_v27 }
 0x781   :  { %2687 = vmatpush2.bf16.msra.mxu1 %v6881_v8 }
 0x782   :  { %2688 = vmatprep.subr.bf16.mxu1 %v6882_v3 }
 0x785   :  { %2689 = vmatpush2.bf16.msra.mxu1 %v6883_v20 }
 0x786   :  { %2690 = vmatprep.subr.bf16.mxu1 %v6884_v59 }
 0x789   :  { %2691 = vmatpush2.bf16.msra.mxu1 %v6885_v4 }
 0x78a   :  { %2692 = vmatprep.subr.bf16.mxu1 %v6886_v48 }
 0x78d   :  { %2693 = vmatpush2.bf16.msra.mxu1 %v6887_v61 }
 0x78e   :  { %2694 = vmatprep.subr.bf16.mxu1 %v6888_v52 }
 0x791   :  { %2695 = vmatpush2.bf16.msra.mxu1 %v6889_v28 }
 0x792   :  { %2696 = vmatprep.subr.bf16.mxu1 %v6890_v18 }
 0x795   :  { %2697 = vmatpush2.bf16.msra.mxu1 %v6891_v25 }
 0x796   :  { %2698 = vmatprep.subr.bf16.mxu1 %v6892_v37 }
 0x799   :  { %2699 = vmatpush2.bf16.msra.mxu1 %v6893_v16 }
 0x79a   :  { %2700 = vmatprep.subr.bf16.mxu1 %v6894_v62 }
 0x79d   :  { %2701 = vmatpush2.bf16.msra.mxu1 %v6895_v9  ;;  %v6898_v9 = vld [vmem:[%s12702_s25 + $0x130] ss:$24 sps:$4 sm:$0xff]  }
 0x7e0   :  { %v2494_v22 = vpop.f32.mrf.mxu1  ;;  %v2535_v24 = vpop.f32.mrf.mxu0 }
 0x7e1   :  { %v2583_v19 = vadd.f32 %v2494_v22, %v13095_v56  ;;  %v2597_v38 = vadd.f32 %v2535_v24, %v13097_v10  ;;  %v6899_v22 = vld [vmem:[%s12702_s25 + $0x104] ss:$24 sps:$4 sm:$0xff]   ;;  %v6900_v24 = vld [vmem:[%s12702_s25 + $0x100] ss:$24 sps:$4 sm:$0xff]   ;;  %v6913_v10 = vld [vmem:[%s12702_s25 + $0x2b4] ss:$24 sps:$4 sm:$0xff]  }
 0x7e2   :  { %v2496_v30 = vpop.f32.mrf.mxu1  ;;  %v2537_v32 = vpop.f32.mrf.mxu0  ;;  %v6907_v56 = vld [vmem:[%s12702_s25 + $0x44] ss:$24 sps:$4 sm:$0xff]  }
 0x7e3   :  { %v2584_v15 = vadd.f32 %v2496_v30, %v13096_v14  ;;  %v5642_v40 = vmul.f32 -1.442695, %v2583_v19  ;;  %v2598_v53 = vadd.f32 %v2537_v32, %v13098_v17  ;;  %v5644_v49 = vmul.f32 -1.442695, %v2597_v38  ;;  %v6901_v30 = vld [vmem:[%s12702_s25 + $0xd4] ss:$24 sps:$4 sm:$0xff]  }
 0x7e4   :  { %v2498_v54 = vpop.f32.mrf.mxu1  ;;  %v2539_v0 = vpop.f32.mrf.mxu0  ;;  %v6902_v32 = vld [vmem:[%s12702_s25 + $0xd0] ss:$24 sps:$4 sm:$0xff]   ;;  %v6908_v19 = vld [vmem:[%s12702_s25 + $0x40] ss:$24 sps:$4 sm:$0xff]   ;;  %v6909_v14 = vld [vmem:[%s12702_s25 + $0x14] ss:$24 sps:$4 sm:$0xff]  }
 0x7e5   :  { %v5643_v12 = vmul.f32 -1.442695, %v2584_v15  ;;  %6533 = vpow2.f32 %v5642_v40  ;;  %v5645_v21 = vmul.f32 -1.442695, %v2598_v53  ;;  %v6903_v54 = vld [vmem:[%s12702_s25 + $0xa4] ss:$24 sps:$4 sm:$0xff]  }
 0x7e6   :  { %v2499_v13 = vpop.f32.mrf.mxu1  ;;  %v2540_v33 = vpop.f32.mrf.mxu0  ;;  %v6904_v0 = vld [vmem:[%s12702_s25 + $0xa0] ss:$24 sps:$4 sm:$0xff]   ;;  %v6910_v15 = vld [vmem:[%s12702_s25 + $0x10] ss:$24 sps:$4 sm:$0xff]   ;;  %v6911_v40 = vld [vmem:[%s12702_s25 + $0x2e4] ss:$24 sps:$4 sm:$0xff]  }
 0x7e7   :  { %6535 = vpow2.f32 %v5643_v12  ;;  %v6905_v13 = vld [vmem:[%s12702_s25 + $0x74] ss:$24 sps:$4 sm:$0xff]   ;;  %v6906_v33 = vld [vmem:[%s12702_s25 + $0x70] ss:$24 sps:$4 sm:$0xff]   ;;  %v6912_v12 = vld [vmem:[%s12702_s25 + $0x2e0] ss:$24 sps:$4 sm:$0xff]  }
 0x7e8   :  { %6537 = vpow2.f32 %v5644_v49  ;;  %v6914_v38 = vld [vmem:[%s12702_s25 + $0x2b0] ss:$24 sps:$4 sm:$0xff]   ;;  %v6915_v17 = vld [vmem:[%s12702_s25 + $0x284] ss:$24 sps:$4 sm:$0xff]   ;;  %v6916_v53 = vld [vmem:[%s12702_s25 + $0x280] ss:$24 sps:$4 sm:$0xff]  }
 0x7e9   :  { %6539 = vpow2.f32 %v5645_v21  ;;  %v6917_v49 = vld [vmem:[%s12702_s25 + $0x254] ss:$24 sps:$4 sm:$0xff]   ;;  %v6918_v21 = vld [vmem:[%s12702_s25 + $0x250] ss:$24 sps:$4 sm:$0xff]  }
 0x7f2   :  { %v6534_v36 = vpop.eup %6533 }
 0x7f3   :  { %v2591_v63 = vadd.f32 1.0, %v6534_v36  ;;  %v6919_v36 = vld [vmem:[%s12702_s25 + $0x224] ss:$24 sps:$4 sm:$0xff]  }
 0x7f4   :  { %v6536_v60 = vpop.eup %6535 }
 0x7f5   :  { %v2592_v11 = vadd.f32 1.0, %v6536_v60  ;;  %6541 = vrcp.f32 %v2591_v63  ;;  %v6538_v41 = vpop.eup %6537  ;;  %v6920_v60 = vld [vmem:[%s12702_s25 + $0x220] ss:$24 sps:$4 sm:$0xff]   ;;  %v6921_v63 = vld [vmem:[%s12702_s25 + $0x1f4] ss:$24 sps:$4 sm:$0xff]  }
 0x7f6   :  { %v6540_v46 = vpop.eup %6539  ;;  %v2605_v58 = vadd.f32 1.0, %v6538_v41  ;;  %v6923_v41 = vld [vmem:[%s12702_s25 + $0x1c4] ss:$24 sps:$4 sm:$0xff]  }
 0x7f7   :  { %6543 = vrcp.f32 %v2592_v11  ;;  %v2606_v35 = vadd.f32 1.0, %v6540_v46  ;;  %v6922_v11 = vld [vmem:[%s12702_s25 + $0x1f0] ss:$24 sps:$4 sm:$0xff]   ;;  %v6924_v46 = vld [vmem:[%s12702_s25 + $0x1c0] ss:$24 sps:$4 sm:$0xff]  }
 0x7f8   :  { %6545 = vrcp.f32 %v2605_v58  ;;  %v6925_v58 = vld [vmem:[%s12702_s25 + $0x194] ss:$24 sps:$4 sm:$0xff]  }
 0x7f9   :  { %6547 = vrcp.f32 %v2606_v35  ;;  %v13101_v35 = vmov 0  }
 0x802   :  { %v6542_v51 = vpop.eup %6541 }
 0x804   :  { %v6544_v43 = vpop.eup %6543 }
 0x805   :  { %v6546_v8 = vpop.eup %6545 }
 0x806   :  { %v6548_v3 = vpop.eup %6547  ;;  %v2619_v20 = vsub.f32 1.0, %v6546_v8  ;;  %v2623_v61 = vmul.f32 %v6546_v8, %v9406_v42  ;;  %v6896_v42 = vld [vmem:[%s12702_s25 + $0x160] ss:$24 sps:$4 sm:$0xff]   ;;  %v6166_v8 = vld [vmem:[%s12246_s7 + $0x8] sm:$0xff]  }
 0x807   :  { %v2620_v4 = vsub.f32 1.0, %v6548_v3  ;;  %v2624_v18 = vmul.f32 %v6548_v3, %v9408_v29  ;;  %v6897_v29 = vld [vmem:[%s12702_s25 + $0x134] ss:$24 sps:$4 sm:$0xff]   ;;  %v6167_v3 = vld [vmem:[%s12246_s7 + $0x40] sm:$0xff]  }
 0x820   :  { %v2576_v39 = vpop.f32.mrf.mxu1 }
 0x821   :  { %v2611_v44 = vadd.f32 %v2576_v39, %v8224_v34  ;;  %v6926_v39 = vld [vmem:[%s12702_s25 + $0x190] ss:$24 sps:$4 sm:$0xff]  }
 0x822   :  { %v2578_v55 = vpop.f32.mrf.mxu1 }
 0x823   :  { %v2613_v5 = vmul.f32 %v6542_v51, %v2611_v44  ;;  %v2612_v50 = vadd.f32 %v2578_v55, %v8227_v47  ;;  %v6153_v44 = vld [vmem:[%s12246_s7 + $0x78] sm:$0xff]   ;;  %v6155_v55 = vld [vmem:[%s12246_s7 + $0x70] sm:$0xff]  }
 0x824   :  { %v2580_v1 = vpop.f32.mrf.mxu1  ;;  %v6154_v51 = vld [vmem:[%s12246_s7 + $0x38] sm:$0xff]   ;;  %5869 = vmatprep.subr.bf16.mxu1 %v6153_v44 }
 0x825   :  { %v2615_v26 = vadd.f32 %v2613_v5, %v13099_v2  ;;  %v2614_v6 = vmul.f32 %v6544_v43, %v2612_v50  ;;  %v6156_v5 = vld [vmem:[%s12246_s7 + $0x30] sm:$0xff]   ;;  %v6157_v50 = vld [vmem:[%s12246_s7 + $0x68] sm:$0xff]   ;;  %v6159_v1 = vld [vmem:[%s12246_s7 + $0x60] sm:$0xff]  }
 0x826   :  { %v2581_v23 = vpop.f32.mrf.mxu1  ;;  %v6158_v43 = vld [vmem:[%s12246_s7 + $0x28] sm:$0xff]   ;;  %v6160_v2 = vld [vmem:[%s12246_s7 + $0x20] sm:$0xff]  }
 0x827   :  { %6549 = vtanh.f32 %v2615_v26  ;;  %v2616_v27 = vadd.f32 %v2614_v6, %v13100_v45  ;;  %v6161_v26 = vld [vmem:[%s12246_s7 + $0x58] sm:$0xff]   ;;  %v6163_v23 = vld [vmem:[%s12246_s7 + $0x50] sm:$0xff]  }
 0x828   :  { %v6162_v6 = vld [vmem:[%s12246_s7 + $0x18] sm:$0xff]   ;;  %v6164_v45 = vld [vmem:[%s12246_s7 + $0x10] sm:$0xff]  }
 0x829   :  { %6551 = vtanh.f32 %v2616_v27  ;;  %v6165_v27 = vld [vmem:[%s12246_s7 + $0x48] sm:$0xff]  }
 0x834   :  { %v6550_v59 = vpop.eup %6549 }
 0x835   :  { %v2621_v48 = vmul.f32 %v6550_v59, %v2619_v20  ;;  %v6168_v20 = vld [vmem:[%s12246_s7] sm:$0xff]  }
 0x836   :  { %v6552_v52 = vpop.eup %6551 }
 0x837   :  { %v2622_v28 = vmul.f32 %v6552_v52, %v2620_v4  ;;  %v9618_v25 = vadd.f32 %v2623_v61, %v2621_v48 }
 0x839   :  { %v9620_v37 = vadd.f32 %v2624_v18, %v2622_v28  ;;  %v9626_v62 = vpack.c.bf16 %v9618_v25, %v9618_v25 }
 0x83b   :  { %v2628_v16 = vpack.c.bf16 %v9620_v37, %v9620_v37 }
 0x83d   :  { %2661 = vmatprep.mubr.bf16.mxu0 %v2628_v16  ;;  %2702 = vmatprep.mubr.bf16.mxu1 %v2628_v16 }
 0x83e   :  { %2662 = vmatmul.mubr.bf16.vlgmr.msra.gmra.mxu0 %v9626_v62  ;;  %2703 = vmatmul.mubr.bf16.vlgmr.msra.gmra.mxu1 %v9626_v62 }
 0x83f   :  { %2712 = vmatpush1.bf16.msra.mxu0 %v6896_v42  ;;  %2743 = vmatprep.mubr.bf16.mxu0 %v2628_v16 }
 0x840   :  { %2713 = vmatprep.subr.bf16.mxu0 %v6897_v29  ;;  %5870 = vmatpush3.bf16.msra.mxu1 %v6154_v51  ;;  %v13103_v29 = vld [vmem:[#allocation73_spill] sm:$0xff] }
 0x841   :  { %5871 = vmatprep.subr.bf16.mxu1 %v6155_v55 }
 0x843   :  { %2714 = vmatpush1.bf16.msra.mxu0 %v6898_v9 }
 0x844   :  { %2715 = vmatprep.subr.bf16.mxu0 %v6899_v22  ;;  %5872 = vmatpush3.bf16.msra.mxu1 %v6156_v5 }
 0x845   :  { %5873 = vmatprep.subr.bf16.mxu1 %v6157_v50 }
 0x847   :  { %2716 = vmatpush1.bf16.msra.mxu0 %v6900_v24 }
 0x848   :  { %2717 = vmatprep.subr.bf16.mxu0 %v6901_v30  ;;  %5874 = vmatpush3.bf16.msra.mxu1 %v6158_v43 }
 0x849   :  { %5875 = vmatprep.subr.bf16.mxu1 %v6159_v1 }
 0x84b   :  { %2718 = vmatpush1.bf16.msra.mxu0 %v6902_v32  ;;  %v13104_v32 = vld [vmem:[#allocation90_spill] sm:$0xff] }
 0x84c   :  { %2719 = vmatprep.subr.bf16.mxu0 %v6903_v54  ;;  %5876 = vmatpush3.bf16.msra.mxu1 %v6160_v2  ;;  %v891_v54 = vadd.f32 %v13104_v32, %v13078_v7  ;;  %v6202_v32 = vld [vmem:[%s12250_s11 + $0x158] ss:$24 sps:$4 sm:$0xff]  }
 0x84d   :  { %5877 = vmatprep.subr.bf16.mxu1 %v6161_v26 }
 0x84f   :  { %2720 = vmatpush1.bf16.msra.mxu0 %v6904_v0  ;;  %v13105_v0 = vld [vmem:[#allocation74_spill] sm:$0xff] }
 0x850   :  { %2721 = vmatprep.subr.bf16.mxu0 %v6905_v13  ;;  %5878 = vmatpush3.bf16.msra.mxu1 %v6162_v6 }
 0x851   :  { %5879 = vmatprep.subr.bf16.mxu1 %v6163_v23 }
 0x853   :  { %2722 = vmatpush1.bf16.msra.mxu0 %v6906_v33 }
 0x854   :  { %2723 = vmatprep.subr.bf16.mxu0 %v6907_v56  ;;  %5880 = vmatpush3.bf16.msra.mxu1 %v6164_v45 }
 0x855   :  { %5881 = vmatprep.subr.bf16.mxu1 %v6165_v27 }
 0x857   :  { %2724 = vmatpush1.bf16.msra.mxu0 %v6908_v19 }
 0x858   :  { %2725 = vmatprep.subr.bf16.mxu0 %v6909_v14  ;;  %5882 = vmatpush3.bf16.msra.mxu1 %v6166_v8 }
 0x859   :  { %5883 = vmatprep.subr.bf16.mxu1 %v6167_v3  ;;  %v6169_v3 = vld [vmem:[%s12247_s9 + $0x30] ss:$8 sps:$4 sm:$0xff]  }
 0x85b   :  { %2726 = vmatpush1.bf16.msra.mxu0 %v6910_v15 }
 0x85c   :  { %2727 = vmatprep.subr.bf16.mxu0 %v6911_v40  ;;  %5884 = vmatpush3.bf16.msra.mxu1 %v6168_v20  ;;  %v6172_v20 = vld [vmem:[%s12247_s9 + $0x20] ss:$8 sps:$4 sm:$0xff]  }
 0x85f   :  { %2728 = vmatpush2.bf16.msra.mxu0 %v6912_v12 }
 0x860   :  { %2729 = vmatprep.subr.bf16.mxu0 %v6913_v10 }
 0x863   :  { %2730 = vmatpush2.bf16.msra.mxu0 %v6914_v38 }
 0x864   :  { %2731 = vmatprep.subr.bf16.mxu0 %v6915_v17 }
 0x867   :  { %2732 = vmatpush2.bf16.msra.mxu0 %v6916_v53 }
 0x868   :  { %2733 = vmatprep.subr.bf16.mxu0 %v6917_v49 }
 0x86b   :  { %2734 = vmatpush2.bf16.msra.mxu0 %v6918_v21 }
 0x86c   :  { %2735 = vmatprep.subr.bf16.mxu0 %v6919_v36 }
 0x86f   :  { %2736 = vmatpush2.bf16.msra.mxu0 %v6920_v60 }
 0x870   :  { %2737 = vmatprep.subr.bf16.mxu0 %v6921_v63 }
 0x873   :  { %2738 = vmatpush2.bf16.msra.mxu0 %v6922_v11 }
 0x874   :  { %2739 = vmatprep.subr.bf16.mxu0 %v6923_v41  ;;  %v13106_v41 = vld [vmem:[#allocation91_spill] sm:$0xff] }
 0x877   :  { %2740 = vmatpush2.bf16.msra.mxu0 %v6924_v46  ;;  %v964_v46 = vadd.f32 %v13106_v41, %v13081_v31  ;;  %v9917_v41 = vld [vmem:[%s12252_s12 + $0xc4] ss:$24 sps:$4 sm:$0xff]  }
 0x878   :  { %2741 = vmatprep.subr.bf16.mxu0 %v6925_v58  ;;  %v13107_v58 = vld [vmem:[#allocation89_spill] sm:$0xff] }
 0x87b   :  { %2742 = vmatpush2.bf16.msra.mxu0 %v6926_v39 }
 0x87e   :  { %2744 = vmatmul.mubr.bf16.vlgmr.msra.gmra.mxu0 %v9626_v62  ;;  %v13102_v62 = vld [vmem:[#allocation75_spill] sm:$0xff] }
 0x87f   :  { %3396 = vmatprep.mubr.bf16.mxu0 %v13101_v35  ;;  %v818_v42 = vadd.f32 %v13102_v62, %v13075_v57 }
 0x8fe   :  { %v2663_v59 = vpop.f32.mrf.mxu0  ;;  %v2704_v4 = vpop.f32.mrf.mxu1 }
 0x8ff   :  { %v2752_v9 = vadd.f32 %v2663_v59, %v13103_v29  ;;  %v2766_v13 = vadd.f32 %v2704_v4, %v13105_v0  ;;  %v6177_v59 = vld [vmem:[%s12247_s9 + $0x14] ss:$8 sps:$4 sm:$0xff]   ;;  %v6175_v4 = vld [vmem:[%s12247_s9 + $0x10] ss:$8 sps:$4 sm:$0xff]   ;;  %v6208_v0 = vld [vmem:[%s12250_s11 + $0x128] ss:$24 sps:$4 sm:$0xff]  }
 0x900   :  { %v2665_v48 = vpop.f32.mrf.mxu0  ;;  %v2706_v61 = vpop.f32.mrf.mxu1 }
 0x901   :  { %v2753_v22 = vadd.f32 %v2665_v48, %v818_v42  ;;  %v5646_v24 = vmul.f32 -1.442695, %v2752_v9  ;;  %v2767_v33 = vadd.f32 %v2706_v61, %v891_v54  ;;  %v5648_v56 = vmul.f32 -1.442695, %v2766_v13  ;;  %v5650_v61 = vld [vmem:[%s12248_s8] ss:$0 sm:$0xff] }
 0x902   :  { %v2667_v52 = vpop.f32.mrf.mxu0  ;;  %v2708_v28 = vpop.f32.mrf.mxu1  ;;  %v6180_v9 = vld [vmem:[%s12247_s9 + $0x4] ss:$8 sps:$4 sm:$0xff]   ;;  %v6204_v54 = vld [vmem:[%s12250_s11 + $0x15c] ss:$24 sps:$4 sm:$0xff]  }
 0x903   :  { %v5647_v30 = vmul.f32 -1.442695, %v2753_v22  ;;  %6553 = vpow2.f32 %v5646_v24  ;;  %v5649_v19 = vmul.f32 -1.442695, %v2767_v33  ;;  %v6178_v22 = vld [vmem:[%s12247_s9] ss:$8 sps:$4 sm:$0xff]   ;;  %3364 = vmatprep.subr.bf16.mxu0 %v6204_v54 }
 0x904   :  { %v2668_v18 = vpop.f32.mrf.mxu0  ;;  %v2709_v16 = vpop.f32.mrf.mxu1  ;;  %v6183_v24 = vld [vmem:[%s12250_s11 + $0x154] ss:$24 sps:$4 sm:$0xff]   ;;  %3365 = vmatpush1.bf16.msra.mxu0 %v6202_v32  ;;  %v6214_v33 = vld [vmem:[%s12250_s11 + $0xf8] ss:$24 sps:$4 sm:$0xff]   ;;  %v6207_v54 = vld [vmem:[%s12250_s11 + $0x4] ss:$24 sps:$4 sm:$0xff]  }
 0x905   :  { %6555 = vpow2.f32 %v5647_v30  ;;  %v6210_v13 = vld [vmem:[%s12250_s11 + $0x12c] ss:$24 sps:$4 sm:$0xff]   ;;  %v6199_v32 = vld [vmem:[%s12250_s11 + $0x30] ss:$24 sps:$4 sm:$0xff]  }
 0x906   :  { %6557 = vpow2.f32 %v5648_v56  ;;  %3366 = vmatprep.subr.bf16.mxu0 %v6210_v13  ;;  %v6216_v56 = vld [vmem:[%s12250_s11 + $0xfc] ss:$24 sps:$4 sm:$0xff]  }
 0x907   :  { %6559 = vpow2.f32 %v5649_v19  ;;  %v6220_v19 = vld [vmem:[%s12250_s11 + $0xc8] ss:$24 sps:$4 sm:$0xff]   ;;  %v6213_v13 = vld [vmem:[%s12250_s11 + $0x164] ss:$24 sps:$4 sm:$0xff]  }
 0x908   :  { %3367 = vmatpush1.bf16.msra.mxu0 %v6208_v0  ;;  %v6205_v0 = vld [vmem:[%s12250_s11] ss:$24 sps:$4 sm:$0xff]  }
 0x909   :  { %3368 = vmatprep.subr.bf16.mxu0 %v6216_v56  ;;  %v6219_v56 = vld [vmem:[%s12250_s11 + $0x134] ss:$24 sps:$4 sm:$0xff]  }
 0x90c   :  { %3369 = vmatpush1.bf16.msra.mxu0 %v6214_v33  ;;  %v6211_v33 = vld [vmem:[%s12250_s11 + $0x160] ss:$24 sps:$4 sm:$0xff]  }
 0x910   :  { %v6554_v14 = vpop.eup %6553 }
 0x911   :  { %v2760_v40 = vadd.f32 1.0, %v6554_v14  ;;  %v6222_v14 = vld [vmem:[%s12250_s11 + $0xcc] ss:$24 sps:$4 sm:$0xff]  }
 0x912   :  { %v6556_v15 = vpop.eup %6555  ;;  %3370 = vmatprep.subr.bf16.mxu0 %v6222_v14  ;;  %v6225_v14 = vld [vmem:[%s12250_s11 + $0x104] ss:$24 sps:$4 sm:$0xff]  }
 0x913   :  { %v2761_v57 = vadd.f32 1.0, %v6556_v15  ;;  %6561 = vrcp.f32 %v2760_v40  ;;  %v6558_v12 = vpop.eup %6557  ;;  %3371 = vmatpush1.bf16.msra.mxu0 %v6220_v19  ;;  %v6226_v15 = vld [vmem:[%s12250_s11 + $0x98] ss:$24 sps:$4 sm:$0xff]   ;;  %v6228_v40 = vld [vmem:[%s12250_s11 + $0x9c] ss:$24 sps:$4 sm:$0xff]  }
 0x914   :  { %v6560_v10 = vpop.eup %6559  ;;  %v2774_v38 = vadd.f32 1.0, %v6558_v12  ;;  %3372 = vmatprep.subr.bf16.mxu0 %v6228_v40  ;;  %v6234_v12 = vld [vmem:[%s12250_s11 + $0x6c] ss:$24 sps:$4 sm:$0xff]   ;;  %v6217_v19 = vld [vmem:[%s12250_s11 + $0x130] ss:$24 sps:$4 sm:$0xff]  }
 0x915   :  { %6563 = vrcp.f32 %v2761_v57  ;;  %v2775_v53 = vadd.f32 1.0, %v6560_v10  ;;  %v6232_v57 = vld [vmem:[%s12250_s11 + $0x68] ss:$24 sps:$4 sm:$0xff]   ;;  %v6238_v10 = vld [vmem:[%s12250_s11 + $0x38] ss:$24 sps:$4 sm:$0xff]  }
 0x916   :  { %6565 = vrcp.f32 %v2774_v38  ;;  %v6240_v38 = vld [vmem:[%s12250_s11 + $0x3c] ss:$24 sps:$4 sm:$0xff]  }
 0x917   :  { %6567 = vrcp.f32 %v2775_v53  ;;  %3373 = vmatpush1.bf16.msra.mxu0 %v6226_v15  ;;  %v6246_v53 = vld [vmem:[%s12250_s11 + $0xc] ss:$24 sps:$4 sm:$0xff]   ;;  %v6223_v15 = vld [vmem:[%s12250_s11 + $0x100] ss:$24 sps:$4 sm:$0xff]  }
 0x918   :  { %3374 = vmatprep.subr.bf16.mxu0 %v6234_v12  ;;  %v6231_v40 = vld [vmem:[%s12250_s11 + $0xd4] ss:$24 sps:$4 sm:$0xff]   ;;  %v6235_v12 = vld [vmem:[%s12250_s11 + $0xa0] ss:$24 sps:$4 sm:$0xff]  }
 0x91b   :  { %3375 = vmatpush1.bf16.msra.mxu0 %v6232_v57  ;;  %v6237_v57 = vld [vmem:[%s12250_s11 + $0xa4] ss:$24 sps:$4 sm:$0xff]  }
 0x91c   :  { %3376 = vmatprep.subr.bf16.mxu0 %v6240_v38  ;;  %v6241_v38 = vld [vmem:[%s12250_s11 + $0x70] ss:$24 sps:$4 sm:$0xff]  }
 0x91f   :  { %3377 = vmatpush1.bf16.msra.mxu0 %v6238_v10  ;;  %v6243_v10 = vld [vmem:[%s12250_s11 + $0x74] ss:$24 sps:$4 sm:$0xff]  }
 0x920   :  { %v6562_v49 = vpop.eup %6561  ;;  %3378 = vmatprep.subr.bf16.mxu0 %v6246_v53  ;;  %v6247_v53 = vld [vmem:[%s12250_s11 + $0x40] ss:$24 sps:$4 sm:$0xff]  }
 0x922   :  { %v6564_v63 = vpop.eup %6563 }
 0x93e   :  { %v2745_v17 = vpop.f32.mrf.mxu0 }
 0x93f   :  { %v2780_v7 = vadd.f32 %v2745_v17, %v8224_v34  ;;  %v6566_v34 = vpop.eup %6565  ;;  %v6244_v17 = vld [vmem:[%s12250_s11 + $0x8] ss:$24 sps:$4 sm:$0xff]  }
 0x940   :  { %v2747_v21 = vpop.f32.mrf.mxu0  ;;  %v6568_v5 = vpop.eup %6567  ;;  %v2788_v50 = vsub.f32 1.0, %v6566_v34  ;;  %3379 = vmatpush1.bf16.msra.mxu0 %v6244_v17  ;;  %v6249_v17 = vld [vmem:[%s12250_s11 + $0x44] ss:$24 sps:$4 sm:$0xff]  }
 0x941   :  { %v2782_v36 = vmul.f32 %v6562_v49, %v2780_v7  ;;  %v2781_v60 = vadd.f32 %v2747_v21, %v8227_v47  ;;  %v2789_v1 = vsub.f32 1.0, %v6568_v5  ;;  %v2792_v47 = vmul.f32 %v6566_v34, %v9618_v25  ;;  %v6171_v25 = vld [vmem:[%s12247_s9 + $0x34] ss:$8 sps:$4 sm:$0xff]   ;;  %v9875_v7 = vld [vmem:[%s12251_s2] sm:$0xf] }
 0x942   :  { %v2749_v11 = vpop.f32.mrf.mxu0  ;;  %v2793_v31 = vmul.f32 %v6568_v5, %v9620_v37  ;;  %v6174_v37 = vld [vmem:[%s12247_s9 + $0x24] ss:$8 sps:$4 sm:$0xff]   ;;  %3017 = vmatprep.subr.bf16.mxu1 %v6171_v25  ;;  %v9886_v21 = vld [vmem:[%s12252_s12 + $0x150] ss:$24 sps:$4 sm:$0xff]  }
 0x943   :  { %v2784_v39 = vadd.f32 %v2782_v36, %v13107_v58  ;;  %v2783_v44 = vmul.f32 %v6564_v63, %v2781_v60  ;;  %3397 = vmatmul.mubr.bf16.vlgmr.msra.gmra.mxu0 %v9875_v7  ;;  %v9881_v49 = vld [vmem:[%s12252_s12 + $0x154] ss:$24 sps:$4 sm:$0xff]   ;;  %v9893_v36 = vld [vmem:[%s12252_s12 + $0x124] ss:$24 sps:$4 sm:$0xff]   ;;  %v9898_v60 = vld [vmem:[%s12252_s12 + $0x120] ss:$24 sps:$4 sm:$0xff]  }
 0x944   :  { %v2750_v51 = vpop.f32.mrf.mxu0  ;;  %13108 = vst [vmem:[#allocation82_spill] sm:$0xff] %v9881_v49  ;;  %3928 = vmatprep.subr.bf16.mxu0 %v9881_v49  ;;  %v9905_v63 = vld [vmem:[%s12252_s12 + $0xf4] ss:$24 sps:$4 sm:$0xff]   ;;  %v9910_v11 = vld [vmem:[%s12252_s12 + $0xf0] ss:$24 sps:$4 sm:$0xff]  }
 0x945   :  { %6569 = vtanh.f32 %v2784_v39  ;;  %v2785_v55 = vadd.f32 %v2783_v44, %v964_v46  ;;  %3929 = vmatpush1.bf16.msra.mxu0 %v9886_v21  ;;  %v9922_v46 = vld [vmem:[%s12252_s12 + $0xc0] ss:$24 sps:$4 sm:$0xff]   ;;  %v9929_v58 = vld [vmem:[%s12252_s12 + $0x94] ss:$24 sps:$4 sm:$0xff]   ;;  %v9934_v39 = vld [vmem:[%s12252_s12 + $0x90] ss:$24 sps:$4 sm:$0xff]  }
 0x946   :  { %3930 = vmatprep.subr.bf16.mxu0 %v9893_v36  ;;  %v9941_v44 = vld [vmem:[%s12252_s12 + $0x64] ss:$24 sps:$4 sm:$0xff]   ;;  %v9946_v51 = vld [vmem:[%s12252_s12 + $0x60] ss:$24 sps:$4 sm:$0xff]   ;;  %v9958_v34 = vld [vmem:[%s12252_s12 + $0x30] ss:$24 sps:$4 sm:$0xff]  }
 0x947   :  { %6571 = vtanh.f32 %v2785_v55  ;;  %13109 = vst [vmem:[#allocation81_spill] sm:$0xff] %v9946_v51  ;;  %v9953_v55 = vld [vmem:[%s12252_s12 + $0x34] ss:$24 sps:$4 sm:$0xff]   ;;  %v9965_v5 = vld [vmem:[%s12252_s12 + $0x4] ss:$24 sps:$4 sm:$0xff]  }
 0x948   :  { %13110 = vst [vmem:[#allocation42_spill] sm:$0xff] %v9953_v55  ;;  %v10049_v25 = vld [vmem:[%s12252_s12 + $0x1b4] ss:$24 sps:$4 sm:$0xff]  }
 0x949   :  { %3931 = vmatpush1.bf16.msra.mxu0 %v9898_v60  ;;  %13113 = vst [vmem:[#allocation53_spill] sm:$0xff] %v10049_v25 }
 0x94a   :  { %3932 = vmatprep.subr.bf16.mxu0 %v9905_v63 }
 0x94d   :  { %3933 = vmatpush1.bf16.msra.mxu0 %v9910_v11 }
 0x94e   :  { %3934 = vmatprep.subr.bf16.mxu0 %v9917_v41 }
 0x951   :  { %3935 = vmatpush1.bf16.msra.mxu0 %v9922_v46 }
 0x952   :  { %v6570_v43 = vpop.eup %6569  ;;  %3936 = vmatprep.subr.bf16.mxu0 %v9929_v58 }
 0x953   :  { %v2790_v2 = vmul.f32 %v6570_v43, %v2788_v50  ;;  %v9970_v50 = vld [vmem:[%s12252_s12] ss:$24 sps:$4 sm:$0xff]   ;;  %v9977_v43 = vld [vmem:[%s12252_s12 + $0x2d4] ss:$24 sps:$4 sm:$0xff]  }
 0x954   :  { %v6572_v26 = vpop.eup %6571 }
 0x955   :  { %v2791_v6 = vmul.f32 %v6572_v26, %v2789_v1  ;;  %v2794_v23 = vadd.f32 %v2792_v47, %v2790_v2  ;;  %3937 = vmatpush1.bf16.msra.mxu0 %v9934_v39  ;;  %v9982_v1 = vld [vmem:[%s12252_s12 + $0x2d0] ss:$24 sps:$4 sm:$0xff]   ;;  %v9989_v2 = vld [vmem:[%s12252_s12 + $0x2a4] ss:$24 sps:$4 sm:$0xff]   ;;  %v9994_v47 = vld [vmem:[%s12252_s12 + $0x2a0] ss:$24 sps:$4 sm:$0xff]  }
 0x956   :  { %3938 = vmatprep.subr.bf16.mxu0 %v9941_v44  ;;  %v10001_v26 = vld [vmem:[%s12252_s12 + $0x274] ss:$24 sps:$4 sm:$0xff]  }
 0x957   :  { %v2795_v45 = vadd.f32 %v2793_v31, %v2791_v6  ;;  %v2796_v8 = vpack.c.bf16 %v2794_v23, %v2794_v23  ;;  %v10006_v6 = vld [vmem:[%s12252_s12 + $0x270] ss:$24 sps:$4 sm:$0xff]   ;;  %v10013_v31 = vld [vmem:[%s12252_s12 + $0x244] ss:$24 sps:$4 sm:$0xff]   ;;  %v10018_v23 = vld [vmem:[%s12252_s12 + $0x240] ss:$24 sps:$4 sm:$0xff]  }
 0x959   :  { %v2797_v27 = vpack.c.bf16 %v2795_v45, %v2795_v45  ;;  %3939 = vmatpush1.bf16.msra.mxu0 %v9946_v51  ;;  %v10025_v45 = vld [vmem:[%s12252_s12 + $0x214] ss:$24 sps:$4 sm:$0xff]  }
 0x95a   :  { %3940 = vmatprep.subr.bf16.mxu0 %v9953_v55 }
 0x95b   :  { %2933 = vmatprep.mubr.bf16.mxu1 %v2797_v27  ;;  %v10030_v27 = vld [vmem:[%s12252_s12 + $0x210] ss:$24 sps:$4 sm:$0xff]  }
 0x95c   :  { %2934 = vmatmul.mubr.bf16.vlgmr.msra.gmra.mxu1 %v2796_v8  ;;  %13111 = vst [vmem:[#allocation37_spill] sm:$0xff] %v10030_v27  ;;  %v10037_v8 = vld [vmem:[%s12252_s12 + $0x1e4] ss:$24 sps:$4 sm:$0xff]  }
 0x95d   :  { %3041 = vmatprep.mubr.bf16.mxu1 %v13101_v35  ;;  %3018 = vmatpush1.bf16.msra.mxu1 %v6169_v3  ;;  %v10042_v3 = vld [vmem:[%s12252_s12 + $0x1e0] ss:$24 sps:$4 sm:$0xff]  }
 0x95e   :  { %3019 = vmatprep.subr.bf16.mxu1 %v6174_v37  ;;  %3941 = vmatpush1.bf16.msra.mxu0 %v9958_v34  ;;  %13112 = vst [vmem:[#allocation43_spill] sm:$0xff] %v10042_v3  ;;  %v2942_v37 = vld [vmem:[%s12253_s1] sm:$0xff] }
 0x95f   :  { %3942 = vmatprep.subr.bf16.mxu0 %v9965_v5 }
 0x961   :  { %3020 = vmatpush1.bf16.msra.mxu1 %v6172_v20 }
 0x962   :  { %3021 = vmatprep.subr.bf16.mxu1 %v6177_v59  ;;  %3943 = vmatpush1.bf16.msra.mxu0 %v9970_v50 }
 0x963   :  { %3944 = vmatprep.subr.bf16.mxu0 %v9977_v43 }
 0x965   :  { %3022 = vmatpush1.bf16.msra.mxu1 %v6175_v4 }
 0x966   :  { %3023 = vmatprep.subr.bf16.mxu1 %v6180_v9  ;;  %3945 = vmatpush2.bf16.msra.mxu0 %v9982_v1  ;;  %v6193_v9 = vld [vmem:[%s12250_s11 + $0x90] ss:$24 sps:$4 sm:$0xff]  }
 0x967   :  { %3946 = vmatprep.subr.bf16.mxu0 %v9989_v2 }
 0x969   :  { %3024 = vmatpush1.bf16.msra.mxu1 %v6178_v22  ;;  %v6198_v22 = vld [vmem:[%s12250_s11 + $0x64] ss:$24 sps:$4 sm:$0xff]  }
 0x96a   :  { %3323 = vmatprep.subr.bf16.mxu1 %v6183_v24  ;;  %3947 = vmatpush2.bf16.msra.mxu0 %v9994_v47  ;;  %v6196_v24 = vld [vmem:[%s12250_s11 + $0x60] ss:$24 sps:$4 sm:$0xff]  }
 0x96b   :  { %3948 = vmatprep.subr.bf16.mxu0 %v10001_v26 }
 0x96e   :  { %3949 = vmatpush2.bf16.msra.mxu0 %v10006_v6 }
 0x96f   :  { %3950 = vmatprep.subr.bf16.mxu0 %v10013_v31 }
 0x972   :  { %3951 = vmatpush2.bf16.msra.mxu0 %v10018_v23 }
 0x973   :  { %3952 = vmatprep.subr.bf16.mxu0 %v10025_v45 }
 0x976   :  { %3953 = vmatpush2.bf16.msra.mxu0 %v10030_v27 }
 0x977   :  { %3954 = vmatprep.subr.bf16.mxu0 %v10037_v8 }
 0x97a   :  { %3955 = vmatpush2.bf16.msra.mxu0 %v10042_v3 }
 0x97b   :  { %3956 = vmatprep.subr.bf16.mxu0 %v10049_v25 }
 0xa1c   :  { %v5885_v48 = vpop.f32.mrf.mxu1 }
 0xa1e   :  { %v5886_v52 = vpop.f32.mrf.mxu1 }
 0xa1f   :  { %v5887_v28 = vadd.f32 %v5886_v52, %v5885_v48  ;;  %v6181_v48 = vld [vmem:[%s12250_s11 + $0x150] ss:$24 sps:$4 sm:$0xff]   ;;  %v6186_v52 = vld [vmem:[%s12250_s11 + $0x124] ss:$24 sps:$4 sm:$0xff]  }
 0xa20   :  { %v5888_v18 = vpop.f32.mrf.mxu1 }
 0xa21   :  { %v9808_v16 = vadd.f32 %v5887_v28, %v5650_v61  ;;  %v6184_v28 = vld [vmem:[%s12250_s11 + $0x120] ss:$24 sps:$4 sm:$0xff]   ;;  %v6189_v18 = vld [vmem:[%s12250_s11 + $0xf4] ss:$24 sps:$4 sm:$0xff]  }
 0xa22   :  { %v5889_v62 = vpop.f32.mrf.mxu1 }
 0xa23   :  { %2941 = vst [vmem:[%s12249_s18] sm:$0xff] %v9808_v16  ;;  %v2943_v42 = vmul.f32 0.5, %v9808_v16  ;;  %s7109_s18 = smov 64   ;;  %v6192_v62 = vld [vmem:[%s12250_s11 + $0xc4] ss:$24 sps:$4 sm:$0xff]  }
 0xa25   :  { %v2944_v29 = vmul.f32 1.442695, %v2943_v42  ;;  %v6190_v42 = vld [vmem:[%s12250_s11 + $0xc0] ss:$24 sps:$4 sm:$0xff]  }
 0xa27   :  { %6573 = vpow2.f32 %v2944_v29  ;;  %v6195_v29 = vld [vmem:[%s12250_s11 + $0x94] ss:$24 sps:$4 sm:$0xff]  }
 0xa34   :  { %v6574_v30 = vpop.eup %6573 }
 0xa35   :  { %2947 = vrot.lane.b32.xlu0 %v6574_v30, %s7109_s18  ;;  %v6201_v30 = vld [vmem:[%s12250_s11 + $0x34] ss:$24 sps:$4 sm:$0xff]  }
 0xaa7   :  { %v2948_v20 = vpop.permute.xlu0 %2947 }
 0xaa8   :  { %v2950_v59 = vmul.f32 %v2948_v20, %v2942_v37  ;;  %v6252_v37 = vld [vmem:[%s12250_s11 + $0x14] ss:$24 sps:$4 sm:$0xff]   ;;  %v6250_v20 = vld [vmem:[%s12250_s11 + $0x10] ss:$24 sps:$4 sm:$0xff]  }
 0xaaa   :  { %v2951_v4 = vadd.f32 %v2950_v59, %v9808_v16  ;;  %v6187_v16 = vld [vmem:[%s12250_s11 + $0xf0] ss:$24 sps:$4 sm:$0xff]   ;;  %v10155_v59 = vld [vmem:[%s12252_s12 + $0x15c] ss:$24 sps:$4 sm:$0xff]  }
 0xaac   :  { %v2952_v61 = vpack.c.bf16 %v2951_v4, %v2951_v4  ;;  %v10160_v4 = vld [vmem:[%s12252_s12 + $0x158] ss:$24 sps:$4 sm:$0xff]  }
 0xaae   :  { %5675 = vmatmul.mubr.msk.bf16.vlgmr.msra.gmra.mxu1 %vm3005_vm0, %v2952_v61  ;;  %v10171_v61 = vld [vmem:[%s12252_s12 + $0x1b0] ss:$24 sps:$4 sm:$0xff]  }
 0xaaf   :  { %3324 = vmatpush1.bf16.msra.mxu1 %v6181_v48  ;;  %3355 = vmatprep.mubr.bf16.mxu1 %v13101_v35  ;;  %v10166_v48 = vld [vmem:[%s12252_s12 + $0x12c] ss:$24 sps:$4 sm:$0xff]  }
 0xab0   :  { %3325 = vmatprep.subr.bf16.mxu1 %v6186_v52  ;;  %3957 = vmatpush2.bf16.msra.mxu0 %v10171_v61  ;;  %v10179_v52 = vld [vmem:[%s12252_s12 + $0x128] ss:$24 sps:$4 sm:$0xff]  }
 0xab1   :  { %13114 = vst [vmem:[#allocation55_spill] sm:$0xff] %v10179_v52 }
 0xab3   :  { %3326 = vmatpush1.bf16.msra.mxu1 %v6184_v28  ;;  %v10184_v28 = vld [vmem:[%s12252_s12 + $0x184] ss:$24 sps:$4 sm:$0xff]  }
 0xab4   :  { %3327 = vmatprep.subr.bf16.mxu1 %v6189_v18  ;;  %v10195_v18 = vld [vmem:[%s12252_s12 + $0x180] ss:$24 sps:$4 sm:$0xff]   ;;  %3958 = vmatprep.subr.bf16.mxu0 %v10184_v28 }
 0xab5   :  { %3959 = vmatpush2.bf16.msra.mxu0 %v10195_v18 }
 0xab7   :  { %3328 = vmatpush1.bf16.msra.mxu1 %v6187_v16  ;;  %v10203_v16 = vld [vmem:[%s12252_s12 + $0xf8] ss:$24 sps:$4 sm:$0xff]  }
 0xab8   :  { %3329 = vmatprep.subr.bf16.mxu1 %v6192_v62  ;;  %13116 = vst [vmem:[#allocation3_spill] sm:$0xff] %v10203_v16  ;;  %v10208_v62 = vld [vmem:[%s12252_s12 + $0x164] ss:$24 sps:$4 sm:$0xff]  }
 0xab9   :  { %4010 = vmatprep.subr.bf16.mxu0 %v10208_v62 }
 0xabb   :  { %3330 = vmatpush1.bf16.msra.mxu1 %v6190_v42  ;;  %v10214_v42 = vld [vmem:[%s12252_s12 + $0xcc] ss:$24 sps:$4 sm:$0xff]  }
 0xabc   :  { %3331 = vmatprep.subr.bf16.mxu1 %v6195_v29  ;;  %13117 = vst [vmem:[#allocation54_spill] sm:$0xff] %v10214_v42  ;;  %v10221_v29 = vld [vmem:[%s12252_s12 + $0xc8] ss:$24 sps:$4 sm:$0xff]  }
 0xabd   :  { %13118 = vst [vmem:[#allocation56_spill] sm:$0xff] %v10221_v29 }
 0xabf   :  { %3332 = vmatpush1.bf16.msra.mxu1 %v6193_v9  ;;  %v10227_v9 = vld [vmem:[%s12252_s12 + $0x9c] ss:$24 sps:$4 sm:$0xff]  }
 0xac0   :  { %3333 = vmatprep.subr.bf16.mxu1 %v6198_v22  ;;  %13119 = vst [vmem:[#allocation4_spill] sm:$0xff] %v10227_v9  ;;  %v10233_v22 = vld [vmem:[%s12252_s12 + $0x98] ss:$24 sps:$4 sm:$0xff]  }
 0xac1   :  { %13120 = vst [vmem:[#allocation5_spill] sm:$0xff] %v10233_v22 }
 0xac3   :  { %3334 = vmatpush1.bf16.msra.mxu1 %v6196_v24  ;;  %v10239_v24 = vld [vmem:[%s12252_s12 + $0x6c] ss:$24 sps:$4 sm:$0xff]  }
 0xac4   :  { %3335 = vmatprep.subr.bf16.mxu1 %v6201_v30  ;;  %13121 = vst [vmem:[#allocation6_spill] sm:$0xff] %v10239_v24  ;;  %v10245_v30 = vld [vmem:[%s12252_s12 + $0x68] ss:$24 sps:$4 sm:$0xff]  }
 0xac5   :  { %13122 = vst [vmem:[#allocation7_spill] sm:$0xff] %v10245_v30 }
 0xac7   :  { %3336 = vmatpush1.bf16.msra.mxu1 %v6199_v32  ;;  %v10251_v32 = vld [vmem:[%s12252_s12 + $0x3c] ss:$24 sps:$4 sm:$0xff]  }
 0xac8   :  { %3337 = vmatprep.subr.bf16.mxu1 %v6207_v54  ;;  %13123 = vst [vmem:[#allocation23_spill] sm:$0xff] %v10251_v32  ;;  %v10257_v54 = vld [vmem:[%s12252_s12 + $0x38] ss:$24 sps:$4 sm:$0xff]  }
 0xac9   :  { %13124 = vst [vmem:[#allocation25_spill] sm:$0xff] %v10257_v54 }
 0xacb   :  { %3338 = vmatpush1.bf16.msra.mxu1 %v6205_v0  ;;  %v10263_v0 = vld [vmem:[%s12252_s12 + $0xc] ss:$24 sps:$4 sm:$0xff]  }
 0xacc   :  { %3405 = vmatprep.subr.bf16.mxu1 %v6213_v13  ;;  %13125 = vst [vmem:[#allocation27_spill] sm:$0xff] %v10263_v0  ;;  %v10269_v13 = vld [vmem:[%s12252_s12 + $0x8] ss:$24 sps:$4 sm:$0xff]  }
 0xacd   :  { %13126 = vst [vmem:[#allocation39_spill] sm:$0xff] %v10269_v13 }
 0xace   :  { %3356 = vmatmul.mubr.bf16.vlgmr.msra.gmra.mxu1 %v9875_v7 }
 0xacf   :  { %3406 = vmatpush1.bf16.msra.mxu1 %v6211_v33  ;;  %3437 = vmatprep.mubr.bf16.mxu1 %v13101_v35  ;;  %v6229_v35 = vld [vmem:[%s12250_s11 + $0xd0] ss:$24 sps:$4 sm:$0xff]   ;;  %v10275_v33 = vld [vmem:[%s12252_s12 + $0x2dc] ss:$24 sps:$4 sm:$0xff]  }
 0xad0   :  { %3407 = vmatprep.subr.bf16.mxu1 %v6219_v56  ;;  %13127 = vst [vmem:[#allocation41_spill] sm:$0xff] %v10275_v33  ;;  %v10281_v56 = vld [vmem:[%s12252_s12 + $0x2d8] ss:$24 sps:$4 sm:$0xff]  }
 0xad1   :  { %13128 = vst [vmem:[#allocation61_spill] sm:$0xff] %v10281_v56 }
 0xad3   :  { %3408 = vmatpush1.bf16.msra.mxu1 %v6217_v19  ;;  %v10287_v19 = vld [vmem:[%s12252_s12 + $0x2ac] ss:$24 sps:$4 sm:$0xff]  }
 0xad4   :  { %3409 = vmatprep.subr.bf16.mxu1 %v6225_v14  ;;  %13129 = vst [vmem:[#allocation63_spill] sm:$0xff] %v10287_v19  ;;  %v10293_v14 = vld [vmem:[%s12252_s12 + $0x2a8] ss:$24 sps:$4 sm:$0xff]  }
 0xad5   :  { %13130 = vst [vmem:[#allocation62_spill] sm:$0xff] %v10293_v14 }
 0xad7   :  { %3410 = vmatpush1.bf16.msra.mxu1 %v6223_v15  ;;  %v10299_v15 = vld [vmem:[%s12252_s12 + $0x27c] ss:$24 sps:$4 sm:$0xff]  }
 0xad8   :  { %3411 = vmatprep.subr.bf16.mxu1 %v6231_v40  ;;  %13131 = vst [vmem:[#allocation64_spill] sm:$0xff] %v10299_v15  ;;  %v10305_v40 = vld [vmem:[%s12252_s12 + $0x278] ss:$24 sps:$4 sm:$0xff]  }
 0xad9   :  { %13132 = vst [vmem:[#allocation83_spill] sm:$0xff] %v10305_v40 }
 0xadb   :  { %3412 = vmatpush1.bf16.msra.mxu1 %v6229_v35  ;;  %v10311_v35 = vld [vmem:[%s12252_s12 + $0x24c] ss:$24 sps:$4 sm:$0xff]  }
 0xadc   :  { %3413 = vmatprep.subr.bf16.mxu1 %v6237_v57  ;;  %13133 = vst [vmem:[#allocation84_spill] sm:$0xff] %v10311_v35  ;;  %v10317_v57 = vld [vmem:[%s12252_s12 + $0x248] ss:$24 sps:$4 sm:$0xff]  }
 0xadd   :  { %13134 = vst [vmem:[#allocation8_spill] sm:$0xff] %v10317_v57 }
 0xadf   :  { %3414 = vmatpush1.bf16.msra.mxu1 %v6235_v12  ;;  %v10323_v12 = vld [vmem:[%s12252_s12 + $0x21c] ss:$24 sps:$4 sm:$0xff]  }
 0xae0   :  { %3415 = vmatprep.subr.bf16.mxu1 %v6243_v10  ;;  %13135 = vst [vmem:[#allocation9_spill] sm:$0xff] %v10323_v12  ;;  %v10329_v10 = vld [vmem:[%s12252_s12 + $0x218] ss:$24 sps:$4 sm:$0xff]  }
 0xae1   :  { %13136 = vst [vmem:[#allocation10_spill] sm:$0xff] %v10329_v10 }
 0xae3   :  { %3416 = vmatpush1.bf16.msra.mxu1 %v6241_v38  ;;  %v10335_v38 = vld [vmem:[%s12252_s12 + $0x1ec] ss:$24 sps:$4 sm:$0xff]  }
 0xae4   :  { %3417 = vmatprep.subr.bf16.mxu1 %v6249_v17  ;;  %13137 = vst [vmem:[#allocation11_spill] sm:$0xff] %v10335_v38  ;;  %v10341_v17 = vld [vmem:[%s12252_s12 + $0x1e8] ss:$24 sps:$4 sm:$0xff]  }
 0xae5   :  { %13138 = vst [vmem:[#allocation12_spill] sm:$0xff] %v10341_v17 }
 0xae7   :  { %3418 = vmatpush1.bf16.msra.mxu1 %v6247_v53  ;;  %v10347_v53 = vld [vmem:[%s12252_s12 + $0x1bc] ss:$24 sps:$4 sm:$0xff]  }
 0xae8   :  { %3419 = vmatprep.subr.bf16.mxu1 %v6252_v37  ;;  %13139 = vst [vmem:[#allocation14_spill] sm:$0xff] %v10347_v53  ;;  %v10353_v37 = vld [vmem:[%s12252_s12 + $0x1b8] ss:$24 sps:$4 sm:$0xff]  }
 0xae9   :  { %13140 = vst [vmem:[#allocation16_spill] sm:$0xff] %v10353_v37 }
 0xaeb   :  { %3420 = vmatpush1.bf16.msra.mxu1 %v6250_v20  ;;  %v10359_v20 = vld [vmem:[%s12252_s12 + $0x18c] ss:$24 sps:$4 sm:$0xff]  }
 0xaec   :  { %3969 = vmatprep.subr.bf16.mxu1 %v10155_v59  ;;  %13141 = vst [vmem:[#allocation18_spill] sm:$0xff] %v10359_v20 }
 0xaee   :  { %3438 = vmatmul.mubr.bf16.vlgmr.msra.gmra.mxu1 %v9875_v7  ;;  %v10190_v7 = vld [vmem:[%s12252_s12 + $0xfc] ss:$24 sps:$4 sm:$0xff]  }
 0xaef   :  { %3970 = vmatpush1.bf16.msra.mxu1 %v10160_v4  ;;  %13115 = vst [vmem:[#allocation2_spill] sm:$0xff] %v10190_v7 }
 0xaf0   :  { %3971 = vmatprep.subr.bf16.mxu1 %v10166_v48 }
 0xaf3   :  { %3972 = vmatpush1.bf16.msra.mxu1 %v10179_v52 }
 0xaf4   :  { %3973 = vmatprep.subr.bf16.mxu1 %v10190_v7 }
 0xaf7   :  { %3974 = vmatpush1.bf16.msra.mxu1 %v10203_v16 }
 0xaf8   :  { %3975 = vmatprep.subr.bf16.mxu1 %v10214_v42 }
 0xafb   :  { %3976 = vmatpush1.bf16.msra.mxu1 %v10221_v29 }
 0xafc   :  { %3977 = vmatprep.subr.bf16.mxu1 %v10227_v9 }
 0xaff   :  { %3978 = vmatpush1.bf16.msra.mxu1 %v10233_v22 }
 0xb00   :  { %3979 = vmatprep.subr.bf16.mxu1 %v10239_v24 }
 0xb03   :  { %3980 = vmatpush1.bf16.msra.mxu1 %v10245_v30 }
 0xb04   :  { %3981 = vmatprep.subr.bf16.mxu1 %v10251_v32 }
 0xb07   :  { %3982 = vmatpush1.bf16.msra.mxu1 %v10257_v54 }
 0xb08   :  { %3983 = vmatprep.subr.bf16.mxu1 %v10263_v0 }
 0xb0b   :  { %3984 = vmatpush1.bf16.msra.mxu1 %v10269_v13 }
 0xb0c   :  { %3985 = vmatprep.subr.bf16.mxu1 %v10275_v33 }
 0xb0f   :  { %3986 = vmatpush2.bf16.msra.mxu1 %v10281_v56 }
 0xb10   :  { %3987 = vmatprep.subr.bf16.mxu1 %v10287_v19 }
 0xb13   :  { %3988 = vmatpush2.bf16.msra.mxu1 %v10293_v14 }
 0xb14   :  { %3989 = vmatprep.subr.bf16.mxu1 %v10299_v15 }
 0xb17   :  { %3990 = vmatpush2.bf16.msra.mxu1 %v10305_v40  ;;  %v13145_v40 = vld [vmem:[#allocation47_spill] sm:$0xff] }
 0xb18   :  { %3991 = vmatprep.subr.bf16.mxu1 %v10311_v35 }
 0xb1b   :  { %3992 = vmatpush2.bf16.msra.mxu1 %v10317_v57  ;;  %v13144_v57 = vld [vmem:[#allocation45_spill] sm:$0xff] }
 0xb1c   :  { %3993 = vmatprep.subr.bf16.mxu1 %v10323_v12 }
 0xb1f   :  { %3994 = vmatpush2.bf16.msra.mxu1 %v10329_v10 }
 0xb20   :  { %3995 = vmatprep.subr.bf16.mxu1 %v10335_v38  ;;  %v10365_v38 = vld [vmem:[%s12252_s12 + $0x188] ss:$24 sps:$4 sm:$0xff]  }
 0xb21   :  { %13142 = vst [vmem:[#allocation20_spill] sm:$0xff] %v10365_v38 }
 0xb23   :  { %3996 = vmatpush2.bf16.msra.mxu1 %v10341_v17  ;;  %v10370_v17 = vpop.f32.mrf.mxu0 }
 0xb24   :  { %3997 = vmatprep.subr.bf16.mxu1 %v10347_v53 }
 0xb25   :  { %v10372_v53 = vpop.f32.mrf.mxu0 }
 0xb26   :  { %13143 = vst [vmem:[#allocation22_spill] sm:$0xff] %v10372_v53 }
 0xb27   :  { %3998 = vmatpush2.bf16.msra.mxu1 %v10353_v37  ;;  %v3402_v10 = vpop.f32.mrf.mxu0  ;;  %v2953_v37 = vld [vmem:[%s12254_s10] sm:$0x3] }
 0xb28   :  { %3999 = vmatprep.subr.bf16.mxu1 %v10359_v20  ;;  %v2958_v35 = vrot.slane %v2953_v37, %v13144_v57  ;;  %v2962_v15 = vrot.slane %v2953_v37, %v13145_v40 }
 0xb29   :  { %v3403_v12 = vpop.f32.mrf.mxu0 }
 0xb2a   :  { %v10388_v12 = vld [vmem:[%s12252_s12 + $0x160] ss:$24 sps:$4 sm:$0xff]  }
 0xb2b   :  { %4000 = vmatpush2.bf16.msra.mxu1 %v10365_v38 }
 0xb2c   :  { %4097 = vmatprep.subr.bf16.mxu1 %v9881_v49 }
 0xb6e   :  { %v3043_v14 = vpop.f32.mrf.mxu1 }
 0xb6f   :  { %v10379_v20 = vadd.f32 %v3043_v14, %v2958_v35  ;;  %v10397_v14 = vld [vmem:[%s12252_s12 + $0x134] ss:$24 sps:$4 sm:$0xff]   ;;  %v10419_v35 = vld [vmem:[%s12252_s12 + $0x100] ss:$24 sps:$4 sm:$0xff]  }
 0xb70   :  { %v3045_v38 = vpop.f32.mrf.mxu1 }
 0xb71   :  { %v10381_v19 = vadd.f32 %v3045_v38, %v2962_v15  ;;  %v10392_v10 = vpack.c.bf16 %v10379_v20, %v10379_v20  ;;  %v10411_v15 = vld [vmem:[%s12252_s12 + $0x104] ss:$24 sps:$4 sm:$0xff]   ;;  %v10425_v38 = vld [vmem:[%s12252_s12 + $0xd4] ss:$24 sps:$4 sm:$0xff]  }
 0xb72   :  { %v3047_v49 = vpop.f32.mrf.mxu1 }
 0xb73   :  { %v3447_v53 = vpack.c.bf16 %v10381_v19, %v10381_v19  ;;  %v10405_v49 = vld [vmem:[%s12252_s12 + $0x130] ss:$24 sps:$4 sm:$0xff]  }
 0xb74   :  { %v3048_v37 = vpop.f32.mrf.mxu1 }
 0xb75   :  { %3960 = vmatprep.mubr.bf16.mxu0 %v3447_v53  ;;  %4001 = vmatprep.mubr.bf16.mxu1 %v3447_v53  ;;  %v10491_v37 = vld [vmem:[%s12252_s12 + $0x10] ss:$24 sps:$4 sm:$0xff]  }
 0xb76   :  { %3961 = vmatmul.mubr.bf16.vlgmr.msra.gmra.mxu0 %v10392_v10  ;;  %4002 = vmatmul.mubr.bf16.vlgmr.msra.gmra.mxu1 %v10392_v10 }
 0xb77   :  { %4011 = vmatpush1.bf16.msra.mxu0 %v10388_v12  ;;  %4042 = vmatprep.mubr.bf16.mxu0 %v3447_v53  ;;  %v10481_v53 = vld [vmem:[%s12252_s12 + $0x14] ss:$24 sps:$4 sm:$0xff]  }
 0xb78   :  { %4012 = vmatprep.subr.bf16.mxu0 %v10397_v14  ;;  %4098 = vmatpush1.bf16.msra.mxu1 %v9886_v21  ;;  %v10433_v21 = vld [vmem:[%s12252_s12 + $0xd0] ss:$24 sps:$4 sm:$0xff]   ;;  %13149 = vst [vmem:[#allocation30_spill] sm:$0xff] %v10481_v53 }
 0xb79   :  { %4099 = vmatprep.subr.bf16.mxu1 %v9893_v36  ;;  %v10439_v36 = vld [vmem:[%s12252_s12 + $0xa4] ss:$24 sps:$4 sm:$0xff]  }
 0xb7b   :  { %4013 = vmatpush1.bf16.msra.mxu0 %v10405_v49 }
 0xb7c   :  { %4014 = vmatprep.subr.bf16.mxu0 %v10411_v15  ;;  %4100 = vmatpush1.bf16.msra.mxu1 %v9898_v60  ;;  %v10447_v60 = vld [vmem:[%s12252_s12 + $0xa0] ss:$24 sps:$4 sm:$0xff]  }
 0xb7d   :  { %4101 = vmatprep.subr.bf16.mxu1 %v9905_v63  ;;  %v10453_v63 = vld [vmem:[%s12252_s12 + $0x74] ss:$24 sps:$4 sm:$0xff]  }
 0xb7f   :  { %4015 = vmatpush1.bf16.msra.mxu0 %v10419_v35 }
 0xb80   :  { %4016 = vmatprep.subr.bf16.mxu0 %v10425_v38  ;;  %4102 = vmatpush1.bf16.msra.mxu1 %v9910_v11  ;;  %v10461_v11 = vld [vmem:[%s12252_s12 + $0x70] ss:$24 sps:$4 sm:$0xff]  }
 0xb81   :  { %4103 = vmatprep.subr.bf16.mxu1 %v9917_v41  ;;  %13146 = vst [vmem:[#allocation24_spill] sm:$0xff] %v10461_v11  ;;  %v10467_v41 = vld [vmem:[%s12252_s12 + $0x44] ss:$24 sps:$4 sm:$0xff]  }
 0xb82   :  { %13147 = vst [vmem:[#allocation26_spill] sm:$0xff] %v10467_v41 }
 0xb83   :  { %4017 = vmatpush1.bf16.msra.mxu0 %v10433_v21 }
 0xb84   :  { %4018 = vmatprep.subr.bf16.mxu0 %v10439_v36  ;;  %4104 = vmatpush1.bf16.msra.mxu1 %v9922_v46  ;;  %v10475_v46 = vld [vmem:[%s12252_s12 + $0x40] ss:$24 sps:$4 sm:$0xff]  }
 0xb85   :  { %4105 = vmatprep.subr.bf16.mxu1 %v9929_v58  ;;  %13148 = vst [vmem:[#allocation28_spill] sm:$0xff] %v10475_v46 }
 0xb87   :  { %4019 = vmatpush1.bf16.msra.mxu0 %v10447_v60 }
 0xb88   :  { %4020 = vmatprep.subr.bf16.mxu0 %v10453_v63  ;;  %4106 = vmatpush1.bf16.msra.mxu1 %v9934_v39 }
 0xb89   :  { %4107 = vmatprep.subr.bf16.mxu1 %v9941_v44 }
 0xb8b   :  { %4021 = vmatpush1.bf16.msra.mxu0 %v10461_v11 }
 0xb8c   :  { %4022 = vmatprep.subr.bf16.mxu0 %v10467_v41  ;;  %4108 = vmatpush1.bf16.msra.mxu1 %v9946_v51  ;;  %v10497_v41 = vld [vmem:[%s12252_s12 + $0x2e4] ss:$24 sps:$4 sm:$0xff]  }
 0xb8d   :  { %4109 = vmatprep.subr.bf16.mxu1 %v9953_v55  ;;  %13150 = vst [vmem:[#allocation32_spill] sm:$0xff] %v10497_v41 }
 0xb8e   :  { %v10485_v39 = vpop.f32.mrf.mxu1 }
 0xb8f   :  { %4023 = vmatpush1.bf16.msra.mxu0 %v10475_v46  ;;  %v10507_v46 = vld [vmem:[%s12252_s12 + $0x2e0] ss:$24 sps:$4 sm:$0xff]  }
 0xb90   :  { %4024 = vmatprep.subr.bf16.mxu0 %v10481_v53  ;;  %v10499_v11 = vpop.f32.mrf.mxu1  ;;  %4110 = vmatpush1.bf16.msra.mxu1 %v9958_v34  ;;  %v10513_v53 = vld [vmem:[%s12252_s12 + $0x2b4] ss:$24 sps:$4 sm:$0xff]  }
 0xb91   :  { %4111 = vmatprep.subr.bf16.mxu1 %v9965_v5  ;;  %13151 = vst [vmem:[#allocation34_spill] sm:$0xff] %v10513_v53 }
 0xb92   :  { %v3361_v55 = vpop.f32.mrf.mxu1 }
 0xb93   :  { %4025 = vmatpush1.bf16.msra.mxu0 %v10491_v37  ;;  %v10521_v55 = vld [vmem:[%s12252_s12 + $0x2b0] ss:$24 sps:$4 sm:$0xff]  }
 0xb94   :  { %4026 = vmatprep.subr.bf16.mxu0 %v10497_v41  ;;  %v3362_v51 = vpop.f32.mrf.mxu1  ;;  %4112 = vmatpush1.bf16.msra.mxu1 %v9970_v50  ;;  %13152 = vst [vmem:[#allocation36_spill] sm:$0xff] %v10521_v55  ;;  %v10527_v41 = vld [vmem:[%s12252_s12 + $0x284] ss:$24 sps:$4 sm:$0xff]  }
 0xb95   :  { %4113 = vmatprep.subr.bf16.mxu1 %v9977_v43  ;;  %13153 = vst [vmem:[#allocation38_spill] sm:$0xff] %v10527_v41  ;;  %v10535_v51 = vld [vmem:[%s12252_s12 + $0x280] ss:$24 sps:$4 sm:$0xff]  }
 0xb96   :  { %13154 = vst [vmem:[#allocation40_spill] sm:$0xff] %v10535_v51 }
 0xb97   :  { %4027 = vmatpush2.bf16.msra.mxu0 %v10507_v46 }
 0xb98   :  { %4028 = vmatprep.subr.bf16.mxu0 %v10513_v53  ;;  %4114 = vmatpush2.bf16.msra.mxu1 %v9982_v1  ;;  %v10541_v53 = vld [vmem:[%s12252_s12 + $0x254] ss:$24 sps:$4 sm:$0xff]  }
 0xb99   :  { %4115 = vmatprep.subr.bf16.mxu1 %v9989_v2  ;;  %13155 = vst [vmem:[#allocation50_spill] sm:$0xff] %v10541_v53 }
 0xb9b   :  { %4029 = vmatpush2.bf16.msra.mxu0 %v10521_v55  ;;  %v10549_v55 = vld [vmem:[%s12252_s12 + $0x250] ss:$24 sps:$4 sm:$0xff]  }
 0xb9c   :  { %4030 = vmatprep.subr.bf16.mxu0 %v10527_v41  ;;  %4116 = vmatpush2.bf16.msra.mxu1 %v9994_v47  ;;  %13156 = vst [vmem:[#allocation48_spill] sm:$0xff] %v10549_v55  ;;  %v10555_v41 = vld [vmem:[%s12252_s12 + $0x224] ss:$24 sps:$4 sm:$0xff]  }
 0xb9d   :  { %4117 = vmatprep.subr.bf16.mxu1 %v10001_v26  ;;  %13157 = vst [vmem:[#allocation49_spill] sm:$0xff] %v10555_v41 }
 0xb9f   :  { %4031 = vmatpush2.bf16.msra.mxu0 %v10535_v51  ;;  %v10563_v51 = vld [vmem:[%s12252_s12 + $0x220] ss:$24 sps:$4 sm:$0xff]  }
 0xba0   :  { %4032 = vmatprep.subr.bf16.mxu0 %v10541_v53  ;;  %4118 = vmatpush2.bf16.msra.mxu1 %v10006_v6  ;;  %13158 = vst [vmem:[#allocation46_spill] sm:$0xff] %v10563_v51  ;;  %v10569_v53 = vld [vmem:[%s12252_s12 + $0x1f4] ss:$24 sps:$4 sm:$0xff]  }
 0xba1   :  { %4119 = vmatprep.subr.bf16.mxu1 %v10013_v31  ;;  %13159 = vst [vmem:[#allocation77_spill] sm:$0xff] %v10569_v53 }
 0xba3   :  { %4033 = vmatpush2.bf16.msra.mxu0 %v10549_v55  ;;  %v10577_v55 = vld [vmem:[%s12252_s12 + $0x1f0] ss:$24 sps:$4 sm:$0xff]  }
 0xba4   :  { %4034 = vmatprep.subr.bf16.mxu0 %v10555_v41  ;;  %4120 = vmatpush2.bf16.msra.mxu1 %v10018_v23  ;;  %13160 = vst [vmem:[#allocation76_spill] sm:$0xff] %v10577_v55  ;;  %v10583_v41 = vld [vmem:[%s12252_s12 + $0x1c4] ss:$24 sps:$4 sm:$0xff]  }
 0xba5   :  { %4121 = vmatprep.subr.bf16.mxu1 %v10025_v45  ;;  %13161 = vst [vmem:[#allocation13_spill] sm:$0xff] %v10583_v41 }
 0xba7   :  { %4035 = vmatpush2.bf16.msra.mxu0 %v10563_v51  ;;  %v10591_v51 = vld [vmem:[%s12252_s12 + $0x1c0] ss:$24 sps:$4 sm:$0xff]  }
 0xba8   :  { %4036 = vmatprep.subr.bf16.mxu0 %v10569_v53  ;;  %4122 = vmatpush2.bf16.msra.mxu1 %v10030_v27  ;;  %v10597_v53 = vld [vmem:[%s12252_s12 + $0x194] ss:$24 sps:$4 sm:$0xff]  }
 0xba9   :  { %4123 = vmatprep.subr.bf16.mxu1 %v10037_v8  ;;  %13162 = vst [vmem:[#allocation15_spill] sm:$0xff] %v10597_v53 }
 0xbab   :  { %4037 = vmatpush2.bf16.msra.mxu0 %v10577_v55  ;;  %v10607_v55 = vld [vmem:[%s12252_s12 + $0x190] ss:$24 sps:$4 sm:$0xff]  }
 0xbac   :  { %4038 = vmatprep.subr.bf16.mxu0 %v10583_v41  ;;  %4124 = vmatpush2.bf16.msra.mxu1 %v10042_v3  ;;  %13163 = vst [vmem:[#allocation29_spill] sm:$0xff] %v10607_v55 }
 0xbad   :  { %4125 = vmatprep.subr.bf16.mxu1 %v10049_v25 }
 0xbae   :  { %v10601_v27 = vpop.f32.mrf.mxu1 }
 0xbaf   :  { %4039 = vmatpush2.bf16.msra.mxu0 %v10591_v51 }
 0xbb0   :  { %4040 = vmatprep.subr.bf16.mxu0 %v10597_v53  ;;  %v10610_v41 = vpop.f32.mrf.mxu1  ;;  %4126 = vmatpush2.bf16.msra.mxu1 %v10171_v61 }
 0xbb1   :  { %4127 = vmatprep.subr.bf16.mxu1 %v10184_v28 }
 0xbb2   :  { %v3443_v3 = vpop.f32.mrf.mxu1 }
 0xbb3   :  { %4041 = vmatpush2.bf16.msra.mxu0 %v10607_v55  ;;  %v13164_v3 = vld [vmem:[#allocation63_spill] sm:$0xff] }
 0xbb4   :  { %v3444_v25 = vpop.f32.mrf.mxu1  ;;  %4138 = vmatprep.subr.bf16.mxu0 %v10155_v59  ;;  %4128 = vmatpush2.bf16.msra.mxu1 %v10195_v18 }
 0xbb5   :  { %4179 = vmatprep.subr.bf16.mxu1 %v10208_v62  ;;  %v13165_v25 = vld [vmem:[#allocation62_spill] sm:$0xff] }
 0xbb6   :  { %4043 = vmatmul.mubr.bf16.vlgmr.msra.gmra.mxu0 %v10392_v10  ;;  %v13166_v10 = vld [vmem:[#allocation64_spill] sm:$0xff] }
 0xbb7   :  { %4139 = vmatpush1.bf16.msra.mxu0 %v10160_v4 }
 0xbb8   :  { %4140 = vmatprep.subr.bf16.mxu0 %v10166_v48 }
 0xbbb   :  { %4141 = vmatpush1.bf16.msra.mxu0 %v10179_v52 }
 0xbbc   :  { %4142 = vmatprep.subr.bf16.mxu0 %v10190_v7 }
 0xbbf   :  { %4143 = vmatpush1.bf16.msra.mxu0 %v10203_v16 }
 0xbc0   :  { %4144 = vmatprep.subr.bf16.mxu0 %v10214_v42 }
 0xbc3   :  { %4145 = vmatpush1.bf16.msra.mxu0 %v10221_v29 }
 0xbc4   :  { %4146 = vmatprep.subr.bf16.mxu0 %v10227_v9 }
 0xbc7   :  { %4147 = vmatpush1.bf16.msra.mxu0 %v10233_v22 }
 0xbc8   :  { %4148 = vmatprep.subr.bf16.mxu0 %v10239_v24  ;;  %v13167_v24 = vld [vmem:[#allocation83_spill] sm:$0xff] }
 0xbcb   :  { %4149 = vmatpush1.bf16.msra.mxu0 %v10245_v30  ;;  %v13168_v30 = vld [vmem:[#allocation84_spill] sm:$0xff] }
 0xbcc   :  { %4150 = vmatprep.subr.bf16.mxu0 %v10251_v32  ;;  %v13169_v32 = vld [vmem:[#allocation8_spill] sm:$0xff] }
 0xbcf   :  { %4151 = vmatpush1.bf16.msra.mxu0 %v10257_v54  ;;  %v13170_v54 = vld [vmem:[#allocation9_spill] sm:$0xff] }
 0xbd0   :  { %4152 = vmatprep.subr.bf16.mxu0 %v10263_v0  ;;  %v13171_v0 = vld [vmem:[#allocation10_spill] sm:$0xff] }
 0xbd3   :  { %4153 = vmatpush1.bf16.msra.mxu0 %v10269_v13  ;;  %v13172_v13 = vld [vmem:[#allocation11_spill] sm:$0xff] }
 0xbd4   :  { %4154 = vmatprep.subr.bf16.mxu0 %v10275_v33  ;;  %v13173_v33 = vld [vmem:[#allocation12_spill] sm:$0xff] }
 0xbd7   :  { %4155 = vmatpush2.bf16.msra.mxu0 %v10281_v56  ;;  %v13174_v56 = vld [vmem:[#allocation14_spill] sm:$0xff] }
 0xbd8   :  { %4156 = vmatprep.subr.bf16.mxu0 %v13164_v3  ;;  %v13175_v3 = vld [vmem:[#allocation16_spill] sm:$0xff] }
 0xbdb   :  { %4157 = vmatpush2.bf16.msra.mxu0 %v13165_v25  ;;  %v13176_v25 = vld [vmem:[#allocation18_spill] sm:$0xff] }
 0xbdc   :  { %4158 = vmatprep.subr.bf16.mxu0 %v13166_v10  ;;  %v13177_v10 = vld [vmem:[#allocation20_spill] sm:$0xff] }
 0xbdf   :  { %4159 = vmatpush2.bf16.msra.mxu0 %v13167_v24  ;;  %v13178_v24 = vld [vmem:[#allocation82_spill] sm:$0xff] }
 0xbe0   :  { %4160 = vmatprep.subr.bf16.mxu0 %v13168_v30 }
 0xbe3   :  { %4161 = vmatpush2.bf16.msra.mxu0 %v13169_v32 }
 0xbe4   :  { %4162 = vmatprep.subr.bf16.mxu0 %v13170_v54 }
 0xbe7   :  { %4163 = vmatpush2.bf16.msra.mxu0 %v13171_v0 }
 0xbe8   :  { %4164 = vmatprep.subr.bf16.mxu0 %v13172_v13 }
 0xbeb   :  { %4165 = vmatpush2.bf16.msra.mxu0 %v13173_v33 }
 0xbec   :  { %4166 = vmatprep.subr.bf16.mxu0 %v13174_v56  ;;  %v3051_v56 = vld [vmem:[%s12255_s13] sm:$0x3f] }
 0xbef   :  { %4167 = vmatpush2.bf16.msra.mxu0 %v13175_v3  ;;  %v3056_v3 = vrot.slane %v3051_v56, %v13144_v57 }
 0xbf0   :  { %4168 = vmatprep.subr.bf16.mxu0 %v13176_v25  ;;  %v3060_v25 = vrot.slane %v3051_v56, %v13145_v40 }
 0xbf3   :  { %4169 = vmatpush2.bf16.msra.mxu0 %v13177_v10  ;;  %v10657_v10 = vadd.f32 %v10485_v39, %v3056_v3  ;;  %v13184_v3 = vld [vmem:[#allocation22_spill] sm:$0xff] }
 0xbf4   :  { %4266 = vmatprep.subr.bf16.mxu0 %v13178_v24  ;;  %v10660_v24 = vadd.f32 %v10499_v11, %v3060_v25 }
 0xbf6   :  { %13179 = vst [vmem:[#allocation31_spill] sm:$0xff] %v10660_v24 }
 0xc36   :  { %v3962_v30 = vpop.f32.mrf.mxu0  ;;  %v4003_v32 = vpop.f32.mrf.mxu1 }
 0xc37   :  { %v4051_v33 = vadd.f32 %v3962_v30, %v10657_v10 }
 0xc38   :  { %v3964_v22 = vpop.f32.mrf.mxu0  ;;  %v4005_v54 = vpop.f32.mrf.mxu1 }
 0xc3a   :  { %v3966_v9 = vpop.f32.mrf.mxu0  ;;  %v4007_v0 = vpop.f32.mrf.mxu1 }
 0xc3b   :  { %v4052_v9 = vadd.f32 %v3964_v22, %v10660_v24 }
 0xc3c   :  { %v3967_v29 = vpop.f32.mrf.mxu0  ;;  %v4008_v13 = vpop.f32.mrf.mxu1 }
 0xc3d   :  { %v5820_v29 = vmul.f32 -1.442695, %v4051_v33  ;;  %v5821_v0 = vmul.f32 -1.442695, %v4052_v9  ;;  %v13180_v13 = vld [vmem:[#allocation44_spill] sm:$0xff] }
 0xc3e   :  { %v13181_v42 = vsub.s32 2, %v13180_v13  ;;  %v13182_v7 = vsub.s32 3, %v13180_v13 }
 0xc3f   :  { %6575 = vpow2.f32 %v5820_v29 }
 0xc40   :  { %v3064_v16 = vrot.slane %v3051_v56, %v13181_v42  ;;  %v3068_v52 = vrot.slane %v3051_v56, %v13182_v7  ;;  %6577 = vpow2.f32 %v5821_v0  ;;  %v431_v7 = vld [vmem:[%s12256_s14] sm:$0x3] }
 0xc42   :  { %v10669_v39 = vadd.f32 %v10370_v17, %v3064_v16  ;;  %v10672_v11 = vadd.f32 %v13184_v3, %v3068_v52  ;;  %v10680_v16 = vrot.slane %v431_v7, %v13144_v57  ;;  %v10685_v3 = vrot.slane %v431_v7, %v13145_v40 }
 0xc44   :  { %13183 = vst [vmem:[#allocation17_spill] sm:$0xff] %v10669_v39  ;;  %13185 = vst [vmem:[#allocation19_spill] sm:$0xff] %v10672_v11  ;;  %v4065_v30 = vadd.f32 %v4003_v32, %v10669_v39  ;;  %v4066_v22 = vadd.f32 %v4005_v54, %v10672_v11  ;;  %v13187_v54 = vsub.s32 4, %v13180_v13 }
 0xc45   :  { %13186 = vst [vmem:[#allocation33_spill] sm:$0xff] %v10680_v16 }
 0xc46   :  { %v5822_v33 = vmul.f32 -1.442695, %v4065_v30  ;;  %v5823_v25 = vmul.f32 -1.442695, %v4066_v22  ;;  %v3072_v17 = vrot.slane %v3051_v56, %v13187_v54  ;;  %v13188_v22 = vsub.s32 5, %v13180_v13 }
 0xc48   :  { %6579 = vpow2.f32 %v5822_v33  ;;  %v10691_v57 = vadd.f32 %v10601_v27, %v3072_v17 }
 0xc49   :  { %6581 = vpow2.f32 %v5823_v25 }
 0xc4c   :  { %v6576_v9 = vpop.eup %6575 }
 0xc4d   :  { %v6578_v42 = vpop.eup %6577  ;;  %v4059_v29 = vadd.f32 1.0, %v6576_v9 }
 0xc4e   :  { %v4060_v24 = vadd.f32 1.0, %v6578_v42 }
 0xc4f   :  { %6583 = vrcp.f32 %v4059_v29 }
 0xc50   :  { %6585 = vrcp.f32 %v4060_v24  ;;  %v3076_v24 = vrot.slane %v3051_v56, %v13188_v22 }
 0xc52   :  { %v10695_v40 = vadd.f32 %v10610_v41, %v3076_v24 }
 0xc55   :  { %v6580_v52 = vpop.eup %6579 }
 0xc56   :  { %v6582_v32 = vpop.eup %6581  ;;  %v4073_v0 = vadd.f32 1.0, %v6580_v52 }
 0xc57   :  { %v4074_v33 = vadd.f32 1.0, %v6582_v32 }
 0xc58   :  { %6587 = vrcp.f32 %v4073_v0 }
 0xc59   :  { %6589 = vrcp.f32 %v4074_v33 }
 0xc5c   :  { %v6584_v9 = vpop.eup %6583 }
 0xc5d   :  { %v6586_v52 = vpop.eup %6585 }
 0xc65   :  { %v6588_v27 = vpop.eup %6587 }
 0xc66   :  { %v6590_v17 = vpop.eup %6589  ;;  %v4087_v0 = vsub.f32 1.0, %v6588_v27 }
 0xc67   :  { %v4088_v22 = vsub.f32 1.0, %v6590_v17  ;;  %v4092_v24 = vmul.f32 %v6590_v17, %v10381_v19  ;;  %v10718_v19 = vld [vmem:[%s12252_s12 + $0x150] ss:$24 sps:$4 sm:$0xff]  }
 0xc68   :  { %v13191_v17 = vld [vmem:[#allocation24_spill] sm:$0xff] }
 0xc76   :  { %v4044_v30 = vpop.f32.mrf.mxu0 }
 0xc77   :  { %v4079_v25 = vadd.f32 %v4044_v30, %v10680_v16 }
 0xc78   :  { %v4046_v42 = vpop.f32.mrf.mxu0 }
 0xc79   :  { %v4081_v29 = vmul.f32 %v6584_v9, %v4079_v25  ;;  %v4080_v54 = vadd.f32 %v4046_v42, %v10685_v3 }
 0xc7a   :  { %v4048_v11 = vpop.f32.mrf.mxu0 }
 0xc7b   :  { %v4083_v56 = vadd.f32 %v4081_v29, %v10691_v57  ;;  %v4082_v13 = vmul.f32 %v6586_v52, %v4080_v54  ;;  %v4091_v11 = vmul.f32 %v6588_v27, %v10379_v20  ;;  %v10724_v20 = vld [vmem:[%s12252_s12 + $0x124] ss:$24 sps:$4 sm:$0xff]   ;;  %v10732_v52 = vld [vmem:[%s12252_s12 + $0x120] ss:$24 sps:$4 sm:$0xff]   ;;  %v10769_v27 = vld [vmem:[%s12252_s12 + $0x90] ss:$24 sps:$4 sm:$0xff]  }
 0xc7c   :  { %v4049_v7 = vpop.f32.mrf.mxu0 }
 0xc7d   :  { %6591 = vtanh.f32 %v4083_v56  ;;  %v4084_v32 = vadd.f32 %v4082_v13, %v10695_v40  ;;  %v10738_v56 = vld [vmem:[%s12252_s12 + $0xf4] ss:$24 sps:$4 sm:$0xff]   ;;  %v10746_v13 = vld [vmem:[%s12252_s12 + $0xf0] ss:$24 sps:$4 sm:$0xff]   ;;  %v10752_v7 = vld [vmem:[%s12252_s12 + $0xc4] ss:$24 sps:$4 sm:$0xff]  }
 0xc7f   :  { %6593 = vtanh.f32 %v4084_v32  ;;  %v10760_v32 = vld [vmem:[%s12252_s12 + $0xc0] ss:$24 sps:$4 sm:$0xff]  }
 0xc8a   :  { %v6592_v30 = vpop.eup %6591 }
 0xc8b   :  { %v4089_v25 = vmul.f32 %v6592_v30, %v4087_v0  ;;  %v13192_v0 = vld [vmem:[#allocation26_spill] sm:$0xff]  ;;  %v13193_v30 = vld [vmem:[#allocation81_spill] sm:$0xff] }
 0xc8c   :  { %v6594_v9 = vpop.eup %6593 }
 0xc8d   :  { %v4090_v41 = vmul.f32 %v6594_v9, %v4088_v22  ;;  %v10701_v33 = vadd.f32 %v4091_v11, %v4089_v25  ;;  %v13195_v22 = vld [vmem:[#allocation28_spill] sm:$0xff]  ;;  %v13196_v25 = vld [vmem:[#allocation30_spill] sm:$0xff] }
 0xc8e   :  { %v13197_v9 = vld [vmem:[#allocation32_spill] sm:$0xff] }
 0xc8f   :  { %13189 = vst [vmem:[#allocation35_spill] sm:$0xff] %v10701_v33  ;;  %v10703_v42 = vadd.f32 %v4092_v24, %v4090_v41  ;;  %v10709_v54 = vpack.c.bf16 %v10701_v33, %v10701_v33  ;;  %v13199_v11 = vld [vmem:[#allocation36_spill] sm:$0xff]  ;;  %v13211_v24 = vld [vmem:[#allocation53_spill] sm:$0xff] }
 0xc90   :  { %v13208_v41 = vld [vmem:[#allocation76_spill] sm:$0xff] }
 0xc91   :  { %13190 = vst [vmem:[#allocation21_spill] sm:$0xff] %v10703_v42  ;;  %v4096_v29 = vpack.c.bf16 %v10703_v42, %v10703_v42 }
 0xc93   :  { %4129 = vmatprep.mubr.bf16.mxu1 %v4096_v29  ;;  %4170 = vmatprep.mubr.bf16.mxu0 %v4096_v29 }
 0xc94   :  { %4130 = vmatmul.mubr.bf16.vlgmr.msra.gmra.mxu1 %v10709_v54  ;;  %4171 = vmatmul.mubr.bf16.vlgmr.msra.gmra.mxu0 %v10709_v54 }
 0xc95   :  { %4180 = vmatpush1.bf16.msra.mxu1 %v10388_v12  ;;  %4211 = vmatprep.mubr.bf16.mxu1 %v4096_v29  ;;  %v13220_v29 = vld [vmem:[#allocation7_spill] sm:$0xff] }
 0xc96   :  { %4181 = vmatprep.subr.bf16.mxu1 %v10397_v14  ;;  %4267 = vmatpush1.bf16.msra.mxu0 %v10718_v19 }
 0xc97   :  { %4268 = vmatprep.subr.bf16.mxu0 %v10724_v20 }
 0xc99   :  { %4182 = vmatpush1.bf16.msra.mxu1 %v10405_v49 }
 0xc9a   :  { %4183 = vmatprep.subr.bf16.mxu1 %v10411_v15  ;;  %4269 = vmatpush1.bf16.msra.mxu0 %v10732_v52 }
 0xc9b   :  { %4270 = vmatprep.subr.bf16.mxu0 %v10738_v56 }
 0xc9d   :  { %4184 = vmatpush1.bf16.msra.mxu1 %v10419_v35 }
 0xc9e   :  { %4185 = vmatprep.subr.bf16.mxu1 %v10425_v38  ;;  %4271 = vmatpush1.bf16.msra.mxu0 %v10746_v13 }
 0xc9f   :  { %4272 = vmatprep.subr.bf16.mxu0 %v10752_v7 }
 0xca1   :  { %4186 = vmatpush1.bf16.msra.mxu1 %v10433_v21 }
 0xca2   :  { %4187 = vmatprep.subr.bf16.mxu1 %v10439_v36  ;;  %4273 = vmatpush1.bf16.msra.mxu0 %v10760_v32 }
 0xca3   :  { %4274 = vmatprep.subr.bf16.mxu0 %v9929_v58  ;;  %v13194_v58 = vld [vmem:[#allocation42_spill] sm:$0xff] }
 0xca5   :  { %4188 = vmatpush1.bf16.msra.mxu1 %v10447_v60 }
 0xca6   :  { %4189 = vmatprep.subr.bf16.mxu1 %v10453_v63  ;;  %4275 = vmatpush1.bf16.msra.mxu0 %v10769_v27 }
 0xca7   :  { %4276 = vmatprep.subr.bf16.mxu0 %v9941_v44  ;;  %v13198_v44 = vld [vmem:[#allocation34_spill] sm:$0xff] }
 0xca9   :  { %4190 = vmatpush1.bf16.msra.mxu1 %v13191_v17 }
 0xcaa   :  { %4191 = vmatprep.subr.bf16.mxu1 %v13192_v0  ;;  %4277 = vmatpush1.bf16.msra.mxu0 %v13193_v30  ;;  %v13224_v30 = vld [vmem:[#allocation39_spill] sm:$0xff] }
 0xcab   :  { %4278 = vmatprep.subr.bf16.mxu0 %v13194_v58  ;;  %v13225_v58 = vld [vmem:[#allocation41_spill] sm:$0xff] }
 0xcad   :  { %4192 = vmatpush1.bf16.msra.mxu1 %v13195_v22 }
 0xcae   :  { %4193 = vmatprep.subr.bf16.mxu1 %v13196_v25  ;;  %4279 = vmatpush1.bf16.msra.mxu0 %v9958_v34  ;;  %v13200_v34 = vld [vmem:[#allocation38_spill] sm:$0xff] }
 0xcaf   :  { %4280 = vmatprep.subr.bf16.mxu0 %v9965_v5  ;;  %v13201_v5 = vld [vmem:[#allocation40_spill] sm:$0xff] }
 0xcb1   :  { %4194 = vmatpush1.bf16.msra.mxu1 %v10491_v37 }
 0xcb2   :  { %4195 = vmatprep.subr.bf16.mxu1 %v13197_v9  ;;  %4281 = vmatpush1.bf16.msra.mxu0 %v9970_v50  ;;  %v13202_v50 = vld [vmem:[#allocation50_spill] sm:$0xff] }
 0xcb3   :  { %4282 = vmatprep.subr.bf16.mxu0 %v9977_v43  ;;  %v13203_v43 = vld [vmem:[#allocation48_spill] sm:$0xff] }
 0xcb5   :  { %4196 = vmatpush2.bf16.msra.mxu1 %v10507_v46 }
 0xcb6   :  { %4197 = vmatprep.subr.bf16.mxu1 %v13198_v44  ;;  %4283 = vmatpush2.bf16.msra.mxu0 %v9982_v1  ;;  %v13204_v1 = vld [vmem:[#allocation49_spill] sm:$0xff] }
 0xcb7   :  { %4284 = vmatprep.subr.bf16.mxu0 %v9989_v2  ;;  %v13205_v2 = vld [vmem:[#allocation46_spill] sm:$0xff] }
 0xcb9   :  { %4198 = vmatpush2.bf16.msra.mxu1 %v13199_v11 }
 0xcba   :  { %4199 = vmatprep.subr.bf16.mxu1 %v13200_v34  ;;  %4285 = vmatpush2.bf16.msra.mxu0 %v9994_v47  ;;  %v13206_v47 = vld [vmem:[#allocation77_spill] sm:$0xff] }
 0xcbb   :  { %4286 = vmatprep.subr.bf16.mxu0 %v10001_v26  ;;  %v13207_v26 = vld [vmem:[#allocation37_spill] sm:$0xff] }
 0xcbd   :  { %4200 = vmatpush2.bf16.msra.mxu1 %v13201_v5 }
 0xcbe   :  { %4201 = vmatprep.subr.bf16.mxu1 %v13202_v50  ;;  %4287 = vmatpush2.bf16.msra.mxu0 %v10006_v6  ;;  %v13209_v6 = vld [vmem:[#allocation13_spill] sm:$0xff] }
 0xcbf   :  { %4288 = vmatprep.subr.bf16.mxu0 %v10013_v31  ;;  %v13210_v31 = vld [vmem:[#allocation43_spill] sm:$0xff] }
 0xcc1   :  { %4202 = vmatpush2.bf16.msra.mxu1 %v13203_v43 }
 0xcc2   :  { %4203 = vmatprep.subr.bf16.mxu1 %v13204_v1  ;;  %4289 = vmatpush2.bf16.msra.mxu0 %v10018_v23  ;;  %v13212_v23 = vld [vmem:[#allocation55_spill] sm:$0xff] }
 0xcc3   :  { %4290 = vmatprep.subr.bf16.mxu0 %v10025_v45  ;;  %v13213_v45 = vld [vmem:[#allocation2_spill] sm:$0xff] }
 0xcc5   :  { %4204 = vmatpush2.bf16.msra.mxu1 %v13205_v2 }
 0xcc6   :  { %4205 = vmatprep.subr.bf16.mxu1 %v13206_v47  ;;  %4291 = vmatpush2.bf16.msra.mxu0 %v13207_v26  ;;  %v13226_v26 = vld [vmem:[#allocation61_spill] sm:$0xff] }
 0xcc7   :  { %4292 = vmatprep.subr.bf16.mxu0 %v10037_v8  ;;  %v13214_v8 = vld [vmem:[#allocation3_spill] sm:$0xff] }
 0xcc9   :  { %4206 = vmatpush2.bf16.msra.mxu1 %v13208_v41 }
 0xcca   :  { %4207 = vmatprep.subr.bf16.mxu1 %v13209_v6  ;;  %4293 = vmatpush2.bf16.msra.mxu0 %v13210_v31  ;;  %v13227_v31 = vld [vmem:[#allocation63_spill] sm:$0xff] }
 0xccb   :  { %4294 = vmatprep.subr.bf16.mxu0 %v13211_v24  ;;  %v13228_v24 = vld [vmem:[#allocation62_spill] sm:$0xff] }
 0xccd   :  { %4208 = vmatpush2.bf16.msra.mxu1 %v10591_v51 }
 0xcce   :  { %4209 = vmatprep.subr.bf16.mxu1 %v10597_v53  ;;  %4295 = vmatpush2.bf16.msra.mxu0 %v10171_v61  ;;  %v13215_v61 = vld [vmem:[#allocation54_spill] sm:$0xff] }
 0xccf   :  { %4296 = vmatprep.subr.bf16.mxu0 %v10184_v28  ;;  %v13216_v28 = vld [vmem:[#allocation56_spill] sm:$0xff] }
 0xcd1   :  { %4210 = vmatpush2.bf16.msra.mxu1 %v10607_v55 }
 0xcd2   :  { %4307 = vmatprep.subr.bf16.mxu1 %v10155_v59  ;;  %4297 = vmatpush2.bf16.msra.mxu0 %v10195_v18  ;;  %v13217_v59 = vld [vmem:[#allocation4_spill] sm:$0xff]  ;;  %v13218_v18 = vld [vmem:[#allocation5_spill] sm:$0xff] }
 0xcd3   :  { %4348 = vmatprep.subr.bf16.mxu0 %v10208_v62  ;;  %v13219_v62 = vld [vmem:[#allocation6_spill] sm:$0xff] }
 0xcd4   :  { %4212 = vmatmul.mubr.bf16.vlgmr.msra.gmra.mxu1 %v10709_v54  ;;  %v13223_v54 = vld [vmem:[#allocation27_spill] sm:$0xff] }
 0xcd5   :  { %4308 = vmatpush1.bf16.msra.mxu1 %v10160_v4  ;;  %v13221_v4 = vld [vmem:[#allocation23_spill] sm:$0xff] }
 0xcd6   :  { %4309 = vmatprep.subr.bf16.mxu1 %v10166_v48  ;;  %v13222_v48 = vld [vmem:[#allocation25_spill] sm:$0xff] }
 0xcd9   :  { %4310 = vmatpush1.bf16.msra.mxu1 %v13212_v23  ;;  %v13229_v23 = vld [vmem:[#allocation64_spill] sm:$0xff] }
 0xcda   :  { %4311 = vmatprep.subr.bf16.mxu1 %v13213_v45  ;;  %v13230_v45 = vld [vmem:[#allocation83_spill] sm:$0xff] }
 0xcdd   :  { %4312 = vmatpush1.bf16.msra.mxu1 %v13214_v8  ;;  %v13231_v8 = vld [vmem:[#allocation84_spill] sm:$0xff] }
 0xcde   :  { %4313 = vmatprep.subr.bf16.mxu1 %v13215_v61  ;;  %v13232_v61 = vld [vmem:[#allocation8_spill] sm:$0xff] }
 0xce1   :  { %4314 = vmatpush1.bf16.msra.mxu1 %v13216_v28  ;;  %v13233_v28 = vld [vmem:[#allocation9_spill] sm:$0xff] }
 0xce2   :  { %4315 = vmatprep.subr.bf16.mxu1 %v13217_v59  ;;  %v13234_v59 = vld [vmem:[#allocation10_spill] sm:$0xff] }
 0xce5   :  { %4316 = vmatpush1.bf16.msra.mxu1 %v13218_v18  ;;  %v13235_v18 = vld [vmem:[#allocation11_spill] sm:$0xff] }
 0xce6   :  { %4317 = vmatprep.subr.bf16.mxu1 %v13219_v62  ;;  %v13236_v62 = vld [vmem:[#allocation12_spill] sm:$0xff] }
 0xce9   :  { %4318 = vmatpush1.bf16.msra.mxu1 %v13220_v29  ;;  %v13237_v29 = vld [vmem:[#allocation14_spill] sm:$0xff] }
 0xcea   :  { %4319 = vmatprep.subr.bf16.mxu1 %v13221_v4  ;;  %v13238_v4 = vld [vmem:[#allocation16_spill] sm:$0xff] }
 0xced   :  { %4320 = vmatpush1.bf16.msra.mxu1 %v13222_v48  ;;  %v13239_v48 = vld [vmem:[#allocation18_spill] sm:$0xff] }
 0xcee   :  { %4321 = vmatprep.subr.bf16.mxu1 %v13223_v54  ;;  %v13240_v54 = vld [vmem:[#allocation20_spill] sm:$0xff] }
 0xcf1   :  { %4322 = vmatpush1.bf16.msra.mxu1 %v13224_v30  ;;  %v10852_v30 = vld [vmem:[%s12252_s12 + $0x154] ss:$24 sps:$4 sm:$0xff]  }
 0xcf2   :  { %4323 = vmatprep.subr.bf16.mxu1 %v13225_v58  ;;  %13241 = vst [vmem:[#allocation52_spill] sm:$0xff] %v10852_v30 }
 0xcf5   :  { %4324 = vmatpush2.bf16.msra.mxu1 %v13226_v26 }
 0xcf6   :  { %4325 = vmatprep.subr.bf16.mxu1 %v13227_v31 }
 0xcf9   :  { %4326 = vmatpush2.bf16.msra.mxu1 %v13228_v24 }
 0xcfa   :  { %4327 = vmatprep.subr.bf16.mxu1 %v13229_v23 }
 0xcfd   :  { %4328 = vmatpush2.bf16.msra.mxu1 %v13230_v45 }
 0xcfe   :  { %4329 = vmatprep.subr.bf16.mxu1 %v13231_v8  ;;  %v13243_v8 = vld [vmem:[#allocation19_spill] sm:$0xff] }
 0xd01   :  { %4330 = vmatpush2.bf16.msra.mxu1 %v13232_v61 }
 0xd02   :  { %4331 = vmatprep.subr.bf16.mxu1 %v13233_v28 }
 0xd05   :  { %4332 = vmatpush2.bf16.msra.mxu1 %v13234_v59 }
 0xd06   :  { %4333 = vmatprep.subr.bf16.mxu1 %v13235_v18 }
 0xd09   :  { %4334 = vmatpush2.bf16.msra.mxu1 %v13236_v62 }
 0xd0a   :  { %4335 = vmatprep.subr.bf16.mxu1 %v13237_v29 }
 0xd0d   :  { %4336 = vmatpush2.bf16.msra.mxu1 %v13238_v4 }
 0xd0e   :  { %4337 = vmatprep.subr.bf16.mxu1 %v13239_v48  ;;  %v13242_v48 = vld [vmem:[#allocation31_spill] sm:$0xff] }
 0xd11   :  { %4338 = vmatpush2.bf16.msra.mxu1 %v13240_v54 }
 0xd12   :  { %4435 = vmatprep.subr.bf16.mxu1 %v10852_v30 }
 0xd54   :  { %v4131_v58 = vpop.f32.mrf.mxu1  ;;  %v4172_v26 = vpop.f32.mrf.mxu0 }
 0xd55   :  { %v4220_v4 = vadd.f32 %v4131_v58, %v10657_v10  ;;  %v4234_v61 = vadd.f32 %v4172_v26, %v10669_v39 }
 0xd56   :  { %v4133_v31 = vpop.f32.mrf.mxu1  ;;  %v4174_v24 = vpop.f32.mrf.mxu0 }
 0xd57   :  { %v4221_v59 = vadd.f32 %v4133_v31, %v13242_v48  ;;  %v5824_v54 = vmul.f32 -1.442695, %v4220_v4  ;;  %v4235_v30 = vadd.f32 %v4174_v24, %v13243_v8  ;;  %v5826_v45 = vmul.f32 -1.442695, %v4234_v61 }
 0xd58   :  { %v4135_v23 = vpop.f32.mrf.mxu1  ;;  %v4176_v62 = vpop.f32.mrf.mxu0 }
 0xd59   :  { %v5825_v28 = vmul.f32 -1.442695, %v4221_v59  ;;  %6595 = vpow2.f32 %v5824_v54  ;;  %v5827_v55 = vmul.f32 -1.442695, %v4235_v30 }
 0xd5a   :  { %v4136_v29 = vpop.f32.mrf.mxu1  ;;  %v4177_v18 = vpop.f32.mrf.mxu0 }
 0xd5b   :  { %6597 = vpow2.f32 %v5825_v28 }
 0xd5c   :  { %6599 = vpow2.f32 %v5826_v45 }
 0xd5d   :  { %6601 = vpow2.f32 %v5827_v55 }
 0xd66   :  { %v6596_v53 = vpop.eup %6595 }
 0xd67   :  { %v4228_v62 = vadd.f32 1.0, %v6596_v53 }
 0xd68   :  { %v6598_v23 = vpop.eup %6597 }
 0xd69   :  { %v4229_v18 = vadd.f32 1.0, %v6598_v23  ;;  %6603 = vrcp.f32 %v4228_v62  ;;  %v6600_v29 = vpop.eup %6599 }
 0xd6a   :  { %v6602_v58 = vpop.eup %6601  ;;  %v4242_v4 = vadd.f32 1.0, %v6600_v29 }
 0xd6b   :  { %6605 = vrcp.f32 %v4229_v18  ;;  %v4243_v54 = vadd.f32 1.0, %v6602_v58 }
 0xd6c   :  { %6607 = vrcp.f32 %v4242_v4 }
 0xd6d   :  { %6609 = vrcp.f32 %v4243_v54 }
 0xd76   :  { %v6604_v26 = vpop.eup %6603 }
 0xd78   :  { %v6606_v45 = vpop.eup %6605 }
 0xd79   :  { %v6608_v18 = vpop.eup %6607 }
 0xd7a   :  { %v6610_v29 = vpop.eup %6609  ;;  %v4256_v58 = vsub.f32 1.0, %v6608_v18 }
 0xd7b   :  { %v4261_v54 = vmul.f32 %v6610_v29, %v10703_v42  ;;  %v13283_v42 = vld [vmem:[#allocation83_spill] sm:$0xff] }
 0xd94   :  { %v4213_v59 = vpop.f32.mrf.mxu1 }
 0xd95   :  { %v4248_v28 = vadd.f32 %v4213_v59, %v10680_v16  ;;  %v4257_v16 = vsub.f32 1.0, %v6610_v29  ;;  %v11118_v29 = vld [vmem:[%s12252_s12 + $0x98] ss:$24 sps:$4 sm:$0xff]  }
 0xd96   :  { %v4215_v31 = vpop.f32.mrf.mxu1  ;;  %13271 = vst [vmem:[#allocation75_spill] sm:$0xff] %v11118_v29 }
 0xd97   :  { %v4250_v61 = vmul.f32 %v6604_v26, %v4248_v28  ;;  %v4249_v30 = vadd.f32 %v4215_v31, %v10685_v3  ;;  %v4260_v26 = vmul.f32 %v6608_v18, %v10701_v33  ;;  %v11112_v18 = vld [vmem:[%s12252_s12 + $0x9c] ss:$24 sps:$4 sm:$0xff]  }
 0xd98   :  { %v4217_v24 = vpop.f32.mrf.mxu1  ;;  %13270 = vst [vmem:[#allocation88_spill] sm:$0xff] %v11112_v18  ;;  %v11184_v33 = vld [vmem:[%s12252_s12 + $0x27c] ss:$24 sps:$4 sm:$0xff]  }
 0xd99   :  { %v4252_v53 = vadd.f32 %v4250_v61, %v10691_v57  ;;  %v4251_v55 = vmul.f32 %v6606_v45, %v4249_v30  ;;  %13282 = vst [vmem:[#allocation24_spill] sm:$0xff] %v11184_v33 }
 0xd9a   :  { %v4218_v23 = vpop.f32.mrf.mxu1 }
 0xd9b   :  { %6611 = vtanh.f32 %v4252_v53  ;;  %v4253_v62 = vadd.f32 %v4251_v55, %v10695_v40  ;;  %v11088_v53 = vld [vmem:[%s12252_s12 + $0xfc] ss:$24 sps:$4 sm:$0xff]   ;;  %v11094_v55 = vld [vmem:[%s12252_s12 + $0xf8] ss:$24 sps:$4 sm:$0xff]   ;;  %v11100_v23 = vld [vmem:[%s12252_s12 + $0xcc] ss:$24 sps:$4 sm:$0xff]  }
 0xd9c   :  { %13266 = vst [vmem:[#allocation71_spill] sm:$0xff] %v11088_v53  ;;  %13267 = vst [vmem:[#allocation70_spill] sm:$0xff] %v11094_v55 }
 0xd9d   :  { %6613 = vtanh.f32 %v4253_v62  ;;  %13268 = vst [vmem:[#allocation72_spill] sm:$0xff] %v11100_v23  ;;  %v11106_v62 = vld [vmem:[%s12252_s12 + $0xc8] ss:$24 sps:$4 sm:$0xff]  }
 0xd9e   :  { %13269 = vst [vmem:[#allocation87_spill] sm:$0xff] %v11106_v62 }
 0xda8   :  { %v6612_v59 = vpop.eup %6611 }
 0xda9   :  { %v4258_v4 = vmul.f32 %v6612_v59, %v4256_v58  ;;  %v11124_v58 = vld [vmem:[%s12252_s12 + $0x6c] ss:$24 sps:$4 sm:$0xff]   ;;  %v11130_v59 = vld [vmem:[%s12252_s12 + $0x68] ss:$24 sps:$4 sm:$0xff]  }
 0xdaa   :  { %v6614_v28 = vpop.eup %6613  ;;  %13272 = vst [vmem:[#allocation73_spill] sm:$0xff] %v11124_v58  ;;  %13273 = vst [vmem:[#allocation90_spill] sm:$0xff] %v11130_v59 }
 0xdab   :  { %v4259_v31 = vmul.f32 %v6614_v28, %v4257_v16  ;;  %v10865_v24 = vadd.f32 %v4260_v26, %v4258_v4  ;;  %v10982_v16 = vld [vmem:[%s12252_s12 + $0x270] ss:$24 sps:$4 sm:$0xff]   ;;  %v11136_v4 = vld [vmem:[%s12252_s12 + $0x3c] ss:$24 sps:$4 sm:$0xff]   ;;  %v11148_v26 = vld [vmem:[%s12252_s12 + $0xc] ss:$24 sps:$4 sm:$0xff]  }
 0xdac   :  { %13274 = vst [vmem:[#allocation74_spill] sm:$0xff] %v11136_v4  ;;  %v11142_v28 = vld [vmem:[%s12252_s12 + $0x38] ss:$24 sps:$4 sm:$0xff]   ;;  %13276 = vst [vmem:[#allocation89_spill] sm:$0xff] %v11148_v26 }
 0xdad   :  { %13244 = vst [vmem:[#allocation67_spill] sm:$0xff] %v10865_v24  ;;  %v10867_v61 = vadd.f32 %v4261_v54, %v4259_v31  ;;  %v10873_v45 = vpack.c.bf16 %v10865_v24, %v10865_v24  ;;  %13275 = vst [vmem:[#allocation91_spill] sm:$0xff] %v11142_v28  ;;  %v11154_v31 = vld [vmem:[%s12252_s12 + $0x8] ss:$24 sps:$4 sm:$0xff]   ;;  %v11160_v54 = vld [vmem:[%s12252_s12 + $0x2dc] ss:$24 sps:$4 sm:$0xff]  }
 0xdae   :  { %13277 = vst [vmem:[#allocation45_spill] sm:$0xff] %v11154_v31  ;;  %13278 = vst [vmem:[#allocation47_spill] sm:$0xff] %v11160_v54 }
 0xdaf   :  { %13245 = vst [vmem:[#allocation65_spill] sm:$0xff] %v10867_v61  ;;  %v4265_v30 = vpack.c.bf16 %v10867_v61, %v10867_v61 }
 0xdb1   :  { %4298 = vmatprep.mubr.bf16.mxu0 %v4265_v30  ;;  %4339 = vmatprep.mubr.bf16.mxu1 %v4265_v30 }
 0xdb2   :  { %4299 = vmatmul.mubr.bf16.vlgmr.msra.gmra.mxu0 %v10873_v45  ;;  %4340 = vmatmul.mubr.bf16.vlgmr.msra.gmra.mxu1 %v10873_v45 }
 0xdb3   :  { %4349 = vmatpush1.bf16.msra.mxu0 %v10388_v12  ;;  %4380 = vmatprep.mubr.bf16.mxu0 %v4265_v30  ;;  %v10895_v12 = vld [vmem:[%s12252_s12 + $0x94] ss:$24 sps:$4 sm:$0xff]   ;;  %v11166_v30 = vld [vmem:[%s12252_s12 + $0x2d8] ss:$24 sps:$4 sm:$0xff]  }
 0xdb4   :  { %4350 = vmatprep.subr.bf16.mxu0 %v10397_v14  ;;  %4436 = vmatpush1.bf16.msra.mxu1 %v10718_v19  ;;  %v10904_v14 = vld [vmem:[%s12252_s12 + $0x64] ss:$24 sps:$4 sm:$0xff]   ;;  %13279 = vst [vmem:[#allocation82_spill] sm:$0xff] %v11166_v30 }
 0xdb5   :  { %4437 = vmatprep.subr.bf16.mxu1 %v10724_v20 }
 0xdb7   :  { %4351 = vmatpush1.bf16.msra.mxu0 %v10405_v49  ;;  %v10912_v49 = vld [vmem:[%s12252_s12 + $0x60] ss:$24 sps:$4 sm:$0xff]  }
 0xdb8   :  { %4352 = vmatprep.subr.bf16.mxu0 %v10411_v15  ;;  %4438 = vmatpush1.bf16.msra.mxu1 %v10732_v52  ;;  %v10918_v15 = vld [vmem:[%s12252_s12 + $0x34] ss:$24 sps:$4 sm:$0xff]  }
 0xdb9   :  { %4439 = vmatprep.subr.bf16.mxu1 %v10738_v56 }
 0xdbb   :  { %4353 = vmatpush1.bf16.msra.mxu0 %v10419_v35  ;;  %v10926_v35 = vld [vmem:[%s12252_s12 + $0x30] ss:$24 sps:$4 sm:$0xff]  }
 0xdbc   :  { %4354 = vmatprep.subr.bf16.mxu0 %v10425_v38  ;;  %4440 = vmatpush1.bf16.msra.mxu1 %v10746_v13  ;;  %v10932_v38 = vld [vmem:[%s12252_s12 + $0x4] ss:$24 sps:$4 sm:$0xff]  }
 0xdbd   :  { %4441 = vmatprep.subr.bf16.mxu1 %v10752_v7 }
 0xdbf   :  { %4355 = vmatpush1.bf16.msra.mxu0 %v10433_v21  ;;  %v10940_v21 = vld [vmem:[%s12252_s12] ss:$24 sps:$4 sm:$0xff]  }
 0xdc0   :  { %4356 = vmatprep.subr.bf16.mxu0 %v10439_v36  ;;  %4442 = vmatpush1.bf16.msra.mxu1 %v10760_v32  ;;  %v10946_v36 = vld [vmem:[%s12252_s12 + $0x2d4] ss:$24 sps:$4 sm:$0xff]  }
 0xdc1   :  { %4443 = vmatprep.subr.bf16.mxu1 %v10895_v12  ;;  %13246 = vst [vmem:[#allocation51_spill] sm:$0xff] %v10946_v36 }
 0xdc3   :  { %4357 = vmatpush1.bf16.msra.mxu0 %v10447_v60  ;;  %v10954_v60 = vld [vmem:[%s12252_s12 + $0x2d0] ss:$24 sps:$4 sm:$0xff]  }
 0xdc4   :  { %4358 = vmatprep.subr.bf16.mxu0 %v10453_v63  ;;  %4444 = vmatpush1.bf16.msra.mxu1 %v10769_v27  ;;  %v10960_v63 = vld [vmem:[%s12252_s12 + $0x2a4] ss:$24 sps:$4 sm:$0xff]  }
 0xdc5   :  { %4445 = vmatprep.subr.bf16.mxu1 %v10904_v14  ;;  %13247 = vst [vmem:[#allocation68_spill] sm:$0xff] %v10960_v63 }
 0xdc7   :  { %4359 = vmatpush1.bf16.msra.mxu0 %v13191_v17  ;;  %v10988_v17 = vld [vmem:[%s12252_s12 + $0x244] ss:$24 sps:$4 sm:$0xff]  }
 0xdc8   :  { %4360 = vmatprep.subr.bf16.mxu0 %v13192_v0  ;;  %4446 = vmatpush1.bf16.msra.mxu1 %v10912_v49  ;;  %13249 = vst [vmem:[#allocation78_spill] sm:$0xff] %v10988_v17  ;;  %v10996_v0 = vld [vmem:[%s12252_s12 + $0x240] ss:$24 sps:$4 sm:$0xff]  }
 0xdc9   :  { %4447 = vmatprep.subr.bf16.mxu1 %v10918_v15  ;;  %13250 = vst [vmem:[#allocation86_spill] sm:$0xff] %v10996_v0 }
 0xdcb   :  { %4361 = vmatpush1.bf16.msra.mxu0 %v13195_v22  ;;  %v11002_v22 = vld [vmem:[%s12252_s12 + $0x214] ss:$24 sps:$4 sm:$0xff]  }
 0xdcc   :  { %4362 = vmatprep.subr.bf16.mxu0 %v13196_v25  ;;  %4448 = vmatpush1.bf16.msra.mxu1 %v10926_v35  ;;  %13251 = vst [vmem:[#allocation85_spill] sm:$0xff] %v11002_v22  ;;  %v11010_v25 = vld [vmem:[%s12252_s12 + $0x210] ss:$24 sps:$4 sm:$0xff]  }
 0xdcd   :  { %4449 = vmatprep.subr.bf16.mxu1 %v10932_v38  ;;  %13252 = vst [vmem:[#allocation79_spill] sm:$0xff] %v11010_v25 }
 0xdcf   :  { %4363 = vmatpush1.bf16.msra.mxu0 %v10491_v37  ;;  %v10974_v37 = vld [vmem:[%s12252_s12 + $0x274] ss:$24 sps:$4 sm:$0xff]  }
 0xdd0   :  { %4364 = vmatprep.subr.bf16.mxu0 %v13197_v9  ;;  %4450 = vmatpush1.bf16.msra.mxu1 %v10940_v21  ;;  %13248 = vst [vmem:[#allocation66_spill] sm:$0xff] %v10974_v37  ;;  %v11016_v9 = vld [vmem:[%s12252_s12 + $0x1e4] ss:$24 sps:$4 sm:$0xff]  }
 0xdd1   :  { %4451 = vmatprep.subr.bf16.mxu1 %v10946_v36  ;;  %13253 = vst [vmem:[#allocation80_spill] sm:$0xff] %v11016_v9 }
 0xdd3   :  { %4365 = vmatpush2.bf16.msra.mxu0 %v10507_v46  ;;  %v10968_v46 = vld [vmem:[%s12252_s12 + $0x2a0] ss:$24 sps:$4 sm:$0xff]  }
 0xdd4   :  { %4366 = vmatprep.subr.bf16.mxu0 %v13198_v44  ;;  %4452 = vmatpush2.bf16.msra.mxu1 %v10954_v60  ;;  %v11024_v44 = vld [vmem:[%s12252_s12 + $0x1e0] ss:$24 sps:$4 sm:$0xff]  }
 0xdd5   :  { %4453 = vmatprep.subr.bf16.mxu1 %v10960_v63  ;;  %13254 = vst [vmem:[#allocation92_spill] sm:$0xff] %v11024_v44 }
 0xdd7   :  { %4367 = vmatpush2.bf16.msra.mxu0 %v13199_v11  ;;  %v11030_v11 = vld [vmem:[%s12252_s12 + $0x1b4] ss:$24 sps:$4 sm:$0xff]  }
 0xdd8   :  { %4368 = vmatprep.subr.bf16.mxu0 %v13200_v34  ;;  %4454 = vmatpush2.bf16.msra.mxu1 %v10968_v46  ;;  %13255 = vst [vmem:[#allocation93_spill] sm:$0xff] %v11030_v11  ;;  %v13256_v34 = vld [vmem:[#allocation15_spill] sm:$0xff] }
 0xdd9   :  { %4455 = vmatprep.subr.bf16.mxu1 %v10974_v37 }
 0xddb   :  { %4369 = vmatpush2.bf16.msra.mxu0 %v13201_v5  ;;  %v11038_v5 = vld [vmem:[%s12252_s12 + $0x1b0] ss:$24 sps:$4 sm:$0xff]  }
 0xddc   :  { %4370 = vmatprep.subr.bf16.mxu0 %v13202_v50  ;;  %4456 = vmatpush2.bf16.msra.mxu1 %v10982_v16  ;;  %13257 = vst [vmem:[#allocation94_spill] sm:$0xff] %v11038_v5  ;;  %v11044_v50 = vld [vmem:[%s12252_s12 + $0x184] ss:$24 sps:$4 sm:$0xff]  }
 0xddd   :  { %4457 = vmatprep.subr.bf16.mxu1 %v10988_v17  ;;  %13258 = vst [vmem:[#allocation95_spill] sm:$0xff] %v11044_v50 }
 0xddf   :  { %4371 = vmatpush2.bf16.msra.mxu0 %v13203_v43  ;;  %v13259_v43 = vld [vmem:[#allocation29_spill] sm:$0xff] }
 0xde0   :  { %4372 = vmatprep.subr.bf16.mxu0 %v13204_v1  ;;  %4458 = vmatpush2.bf16.msra.mxu1 %v10996_v0  ;;  %v11057_v1 = vld [vmem:[%s12252_s12 + $0x180] ss:$24 sps:$4 sm:$0xff]  }
 0xde1   :  { %4459 = vmatprep.subr.bf16.mxu1 %v11002_v22  ;;  %13261 = vst [vmem:[#allocation59_spill] sm:$0xff] %v11057_v1 }
 0xde3   :  { %4373 = vmatpush2.bf16.msra.mxu0 %v13205_v2  ;;  %v11063_v2 = vld [vmem:[%s12252_s12 + $0x164] ss:$24 sps:$4 sm:$0xff]  }
 0xde4   :  { %4374 = vmatprep.subr.bf16.mxu0 %v13206_v47  ;;  %4460 = vmatpush2.bf16.msra.mxu1 %v11010_v25  ;;  %13262 = vst [vmem:[#allocation57_spill] sm:$0xff] %v11063_v2  ;;  %v11070_v47 = vld [vmem:[%s12252_s12 + $0x158] ss:$24 sps:$4 sm:$0xff]  }
 0xde5   :  { %4461 = vmatprep.subr.bf16.mxu1 %v11016_v9  ;;  %13263 = vst [vmem:[#allocation60_spill] sm:$0xff] %v11070_v47 }
 0xde7   :  { %4375 = vmatpush2.bf16.msra.mxu0 %v13208_v41  ;;  %v11076_v41 = vld [vmem:[%s12252_s12 + $0x12c] ss:$24 sps:$4 sm:$0xff]  }
 0xde8   :  { %4376 = vmatprep.subr.bf16.mxu0 %v13209_v6  ;;  %4462 = vmatpush2.bf16.msra.mxu1 %v11024_v44  ;;  %13264 = vst [vmem:[#allocation58_spill] sm:$0xff] %v11076_v41  ;;  %v11082_v6 = vld [vmem:[%s12252_s12 + $0x128] ss:$24 sps:$4 sm:$0xff]  }
 0xde9   :  { %4463 = vmatprep.subr.bf16.mxu1 %v11030_v11  ;;  %13265 = vst [vmem:[#allocation69_spill] sm:$0xff] %v11082_v6 }
 0xdeb   :  { %4377 = vmatpush2.bf16.msra.mxu0 %v10591_v51  ;;  %v11051_v51 = vld [vmem:[%s12252_s12 + $0x15c] ss:$24 sps:$4 sm:$0xff]  }
 0xdec   :  { %4378 = vmatprep.subr.bf16.mxu0 %v13256_v34  ;;  %4464 = vmatpush2.bf16.msra.mxu1 %v11038_v5  ;;  %13260 = vst [vmem:[#allocation96_spill] sm:$0xff] %v11051_v51  ;;  %v11178_v34 = vld [vmem:[%s12252_s12 + $0x2a8] ss:$24 sps:$4 sm:$0xff]  }
 0xded   :  { %4465 = vmatprep.subr.bf16.mxu1 %v11044_v50  ;;  %13281 = vst [vmem:[#allocation22_spill] sm:$0xff] %v11178_v34 }
 0xdef   :  { %4379 = vmatpush2.bf16.msra.mxu0 %v13259_v43 }
 0xdf0   :  { %4476 = vmatprep.subr.bf16.mxu0 %v11051_v51  ;;  %4466 = vmatpush2.bf16.msra.mxu1 %v11057_v1 }
 0xdf1   :  { %4517 = vmatprep.subr.bf16.mxu1 %v11063_v2 }
 0xdf2   :  { %4381 = vmatmul.mubr.bf16.vlgmr.msra.gmra.mxu0 %v10873_v45  ;;  %v11172_v45 = vld [vmem:[%s12252_s12 + $0x2ac] ss:$24 sps:$4 sm:$0xff]  }
 0xdf3   :  { %4477 = vmatpush1.bf16.msra.mxu0 %v11070_v47  ;;  %13280 = vst [vmem:[#allocation44_spill] sm:$0xff] %v11172_v45 }
 0xdf4   :  { %4478 = vmatprep.subr.bf16.mxu0 %v11076_v41 }
 0xdf7   :  { %4479 = vmatpush1.bf16.msra.mxu0 %v11082_v6 }
 0xdf8   :  { %4480 = vmatprep.subr.bf16.mxu0 %v11088_v53 }
 0xdfb   :  { %4481 = vmatpush1.bf16.msra.mxu0 %v11094_v55 }
 0xdfc   :  { %4482 = vmatprep.subr.bf16.mxu0 %v11100_v23 }
 0xdff   :  { %4483 = vmatpush1.bf16.msra.mxu0 %v11106_v62 }
 0xe00   :  { %4484 = vmatprep.subr.bf16.mxu0 %v11112_v18 }
 0xe03   :  { %4485 = vmatpush1.bf16.msra.mxu0 %v11118_v29 }
 0xe04   :  { %4486 = vmatprep.subr.bf16.mxu0 %v11124_v58 }
 0xe07   :  { %4487 = vmatpush1.bf16.msra.mxu0 %v11130_v59  ;;  %v13292_v59 = vld [vmem:[#allocation18_spill] sm:$0xff] }
 0xe08   :  { %4488 = vmatprep.subr.bf16.mxu0 %v11136_v4  ;;  %v13291_v4 = vld [vmem:[#allocation16_spill] sm:$0xff] }
 0xe0b   :  { %4489 = vmatpush1.bf16.msra.mxu0 %v11142_v28  ;;  %v13290_v28 = vld [vmem:[#allocation14_spill] sm:$0xff] }
 0xe0c   :  { %4490 = vmatprep.subr.bf16.mxu0 %v11148_v26  ;;  %v13288_v26 = vld [vmem:[#allocation11_spill] sm:$0xff] }
 0xe0f   :  { %4491 = vmatpush1.bf16.msra.mxu0 %v11154_v31  ;;  %v13287_v31 = vld [vmem:[#allocation10_spill] sm:$0xff] }
 0xe10   :  { %4492 = vmatprep.subr.bf16.mxu0 %v11160_v54  ;;  %v13285_v54 = vld [vmem:[#allocation8_spill] sm:$0xff] }
 0xe13   :  { %4493 = vmatpush2.bf16.msra.mxu0 %v11166_v30  ;;  %v13284_v30 = vld [vmem:[#allocation84_spill] sm:$0xff] }
 0xe14   :  { %4494 = vmatprep.subr.bf16.mxu0 %v11172_v45  ;;  %v13286_v45 = vld [vmem:[#allocation9_spill] sm:$0xff] }
 0xe17   :  { %4495 = vmatpush2.bf16.msra.mxu0 %v11178_v34  ;;  %v13289_v34 = vld [vmem:[#allocation12_spill] sm:$0xff] }
 0xe18   :  { %4496 = vmatprep.subr.bf16.mxu0 %v11184_v33  ;;  %v13293_v33 = vld [vmem:[#allocation20_spill] sm:$0xff] }
 0xe1b   :  { %4497 = vmatpush2.bf16.msra.mxu0 %v13283_v42  ;;  %v13294_v42 = vld [vmem:[#allocation52_spill] sm:$0xff] }
 0xe1c   :  { %4498 = vmatprep.subr.bf16.mxu0 %v13284_v30 }
 0xe1f   :  { %4499 = vmatpush2.bf16.msra.mxu0 %v13285_v54 }
 0xe20   :  { %4500 = vmatprep.subr.bf16.mxu0 %v13286_v45 }
 0xe23   :  { %4501 = vmatpush2.bf16.msra.mxu0 %v13287_v31 }
 0xe24   :  { %4502 = vmatprep.subr.bf16.mxu0 %v13288_v26 }
 0xe27   :  { %4503 = vmatpush2.bf16.msra.mxu0 %v13289_v34 }
 0xe28   :  { %4504 = vmatprep.subr.bf16.mxu0 %v13290_v28 }
 0xe2b   :  { %4505 = vmatpush2.bf16.msra.mxu0 %v13291_v4 }
 0xe2c   :  { %4506 = vmatprep.subr.bf16.mxu0 %v13292_v59 }
 0xe2f   :  { %4507 = vmatpush2.bf16.msra.mxu0 %v13293_v33 }
 0xe30   :  { %4604 = vmatprep.subr.bf16.mxu0 %v13294_v42 }
 0xe72   :  { %v4300_v30 = vpop.f32.mrf.mxu0  ;;  %v4341_v54 = vpop.f32.mrf.mxu1 }
 0xe73   :  { %v4389_v34 = vadd.f32 %v4300_v30, %v10657_v10  ;;  %v4403_v33 = vadd.f32 %v4341_v54, %v10669_v39 }
 0xe74   :  { %v4302_v58 = vpop.f32.mrf.mxu0  ;;  %v4343_v45 = vpop.f32.mrf.mxu1 }
 0xe75   :  { %v4390_v28 = vadd.f32 %v4302_v58, %v13242_v48  ;;  %v5828_v62 = vmul.f32 -1.442695, %v4389_v34  ;;  %v4404_v59 = vadd.f32 %v4343_v45, %v13243_v8  ;;  %v5830_v42 = vmul.f32 -1.442695, %v4403_v33 }
 0xe76   :  { %v4304_v29 = vpop.f32.mrf.mxu0  ;;  %v4345_v31 = vpop.f32.mrf.mxu1 }
 0xe77   :  { %v5829_v4 = vmul.f32 -1.442695, %v4390_v28  ;;  %6615 = vpow2.f32 %v5828_v62  ;;  %v5831_v23 = vmul.f32 -1.442695, %v4404_v59  ;;  %v13295_v28 = vld [vmem:[#allocation33_spill] sm:$0xff] }
 0xe78   :  { %v4305_v18 = vpop.f32.mrf.mxu0  ;;  %v4346_v26 = vpop.f32.mrf.mxu1 }
 0xe79   :  { %6617 = vpow2.f32 %v5829_v4 }
 0xe7a   :  { %6619 = vpow2.f32 %v5830_v42 }
 0xe7b   :  { %6621 = vpow2.f32 %v5831_v23 }
 0xe84   :  { %v6616_v55 = vpop.eup %6615 }
 0xe85   :  { %v4397_v31 = vadd.f32 1.0, %v6616_v55 }
 0xe86   :  { %v6618_v29 = vpop.eup %6617 }
 0xe87   :  { %v4398_v18 = vadd.f32 1.0, %v6618_v29  ;;  %6623 = vrcp.f32 %v4397_v31  ;;  %v6620_v30 = vpop.eup %6619 }
 0xe88   :  { %v6622_v58 = vpop.eup %6621  ;;  %v4411_v26 = vadd.f32 1.0, %v6620_v30 }
 0xe89   :  { %6625 = vrcp.f32 %v4398_v18  ;;  %v4412_v62 = vadd.f32 1.0, %v6622_v58 }
 0xe8a   :  { %6627 = vrcp.f32 %v4411_v26 }
 0xe8b   :  { %6629 = vrcp.f32 %v4412_v62 }
 0xe94   :  { %v6624_v54 = vpop.eup %6623 }
 0xe96   :  { %v6626_v42 = vpop.eup %6625 }
 0xe97   :  { %v6628_v18 = vpop.eup %6627 }
 0xe98   :  { %v6630_v30 = vpop.eup %6629  ;;  %v4425_v58 = vsub.f32 1.0, %v6628_v18 }
 0xe99   :  { %v4430_v62 = vmul.f32 %v6630_v30, %v10867_v61  ;;  %v11336_v61 = vld [vmem:[%s12252_s12 + $0x2e0] ss:$24 sps:$4 sm:$0xff]  }
 0xe9a   :  { %13299 = vst [vmem:[#allocation28_spill] sm:$0xff] %v11336_v61 }
 0xeb2   :  { %v4382_v34 = vpop.f32.mrf.mxu0 }
 0xeb3   :  { %v4417_v4 = vadd.f32 %v4382_v34, %v13295_v28  ;;  %v4426_v28 = vsub.f32 1.0, %v6630_v30  ;;  %v11266_v30 = vld [vmem:[%s12252_s12 + $0xd0] ss:$24 sps:$4 sm:$0xff]  }
 0xeb4   :  { %v4384_v39 = vpop.f32.mrf.mxu0 }
 0xeb5   :  { %v4419_v45 = vmul.f32 %v6624_v54, %v4417_v4  ;;  %v4418_v33 = vadd.f32 %v4384_v39, %v10685_v3  ;;  %v4429_v39 = vmul.f32 %v6628_v18, %v10865_v24  ;;  %v11258_v18 = vld [vmem:[%s12252_s12 + $0xd4] ss:$24 sps:$4 sm:$0xff]   ;;  %v11328_v24 = vld [vmem:[%s12252_s12 + $0x2e4] ss:$24 sps:$4 sm:$0xff]  }
 0xeb6   :  { %v4386_v59 = vpop.f32.mrf.mxu0 }
 0xeb7   :  { %v4421_v55 = vadd.f32 %v4419_v45, %v10691_v57  ;;  %v4420_v23 = vmul.f32 %v6626_v42, %v4418_v33 }
 0xeb8   :  { %v4387_v29 = vpop.f32.mrf.mxu0 }
 0xeb9   :  { %6631 = vtanh.f32 %v4421_v55  ;;  %v4422_v31 = vadd.f32 %v4420_v23, %v10695_v40  ;;  %v11230_v55 = vld [vmem:[%s12252_s12 + $0x134] ss:$24 sps:$4 sm:$0xff]   ;;  %v11238_v23 = vld [vmem:[%s12252_s12 + $0x130] ss:$24 sps:$4 sm:$0xff]   ;;  %v11244_v29 = vld [vmem:[%s12252_s12 + $0x104] ss:$24 sps:$4 sm:$0xff]  }
 0xebb   :  { %6633 = vtanh.f32 %v4422_v31  ;;  %v11252_v31 = vld [vmem:[%s12252_s12 + $0x100] ss:$24 sps:$4 sm:$0xff]  }
 0xec6   :  { %v6632_v34 = vpop.eup %6631 }
 0xec7   :  { %v4427_v26 = vmul.f32 %v6632_v34, %v4425_v58  ;;  %v11272_v58 = vld [vmem:[%s12252_s12 + $0xa4] ss:$24 sps:$4 sm:$0xff]   ;;  %v11280_v34 = vld [vmem:[%s12252_s12 + $0xa0] ss:$24 sps:$4 sm:$0xff]  }
 0xec8   :  { %v6634_v4 = vpop.eup %6633 }
 0xec9   :  { %v4428_v54 = vmul.f32 %v6634_v4, %v4426_v28  ;;  %v11209_v59 = vadd.f32 %v4429_v39, %v4427_v26  ;;  %v11224_v28 = vld [vmem:[%s12252_s12 + $0x160] ss:$24 sps:$4 sm:$0xff]   ;;  %v11286_v26 = vld [vmem:[%s12252_s12 + $0x74] ss:$24 sps:$4 sm:$0xff]   ;;  %v11294_v4 = vld [vmem:[%s12252_s12 + $0x70] ss:$24 sps:$4 sm:$0xff]  }
 0xeca   :  { %v11300_v39 = vld [vmem:[%s12252_s12 + $0x44] ss:$24 sps:$4 sm:$0xff]  }
 0xecb   :  { %13296 = vst [vmem:[#allocation26_spill] sm:$0xff] %v11209_v59  ;;  %v11211_v45 = vadd.f32 %v4430_v62, %v4428_v54  ;;  %v11217_v42 = vpack.c.bf16 %v11209_v59, %v11209_v59  ;;  %v11308_v54 = vld [vmem:[%s12252_s12 + $0x40] ss:$24 sps:$4 sm:$0xff]   ;;  %v11314_v62 = vld [vmem:[%s12252_s12 + $0x14] ss:$24 sps:$4 sm:$0xff]  }
 0xecd   :  { %13297 = vst [vmem:[#allocation81_spill] sm:$0xff] %v11211_v45  ;;  %v4434_v33 = vpack.c.bf16 %v11211_v45, %v11211_v45 }
 0xecf   :  { %4467 = vmatprep.mubr.bf16.mxu1 %v4434_v33  ;;  %4508 = vmatprep.mubr.bf16.mxu0 %v4434_v33 }
 0xed0   :  { %4468 = vmatmul.mubr.bf16.vlgmr.msra.gmra.mxu1 %v11217_v42  ;;  %4509 = vmatmul.mubr.bf16.vlgmr.msra.gmra.mxu0 %v11217_v42 }
 0xed1   :  { %4518 = vmatpush1.bf16.msra.mxu1 %v11224_v28  ;;  %4549 = vmatprep.mubr.bf16.mxu1 %v4434_v33  ;;  %v11322_v33 = vld [vmem:[%s12252_s12 + $0x10] ss:$24 sps:$4 sm:$0xff]  }
 0xed2   :  { %4519 = vmatprep.subr.bf16.mxu1 %v11230_v55  ;;  %4605 = vmatpush1.bf16.msra.mxu0 %v10718_v19  ;;  %13298 = vst [vmem:[#allocation42_spill] sm:$0xff] %v11322_v33 }
 0xed3   :  { %4606 = vmatprep.subr.bf16.mxu0 %v10724_v20 }
 0xed5   :  { %4520 = vmatpush1.bf16.msra.mxu1 %v11238_v23 }
 0xed6   :  { %4521 = vmatprep.subr.bf16.mxu1 %v11244_v29  ;;  %4607 = vmatpush1.bf16.msra.mxu0 %v10732_v52 }
 0xed7   :  { %4608 = vmatprep.subr.bf16.mxu0 %v10738_v56 }
 0xed9   :  { %4522 = vmatpush1.bf16.msra.mxu1 %v11252_v31 }
 0xeda   :  { %4523 = vmatprep.subr.bf16.mxu1 %v11258_v18  ;;  %4609 = vmatpush1.bf16.msra.mxu0 %v10746_v13 }
 0xedb   :  { %4610 = vmatprep.subr.bf16.mxu0 %v10752_v7 }
 0xedd   :  { %4524 = vmatpush1.bf16.msra.mxu1 %v11266_v30 }
 0xede   :  { %4525 = vmatprep.subr.bf16.mxu1 %v11272_v58  ;;  %4611 = vmatpush1.bf16.msra.mxu0 %v10760_v32 }
 0xedf   :  { %4612 = vmatprep.subr.bf16.mxu0 %v10895_v12 }
 0xee1   :  { %4526 = vmatpush1.bf16.msra.mxu1 %v11280_v34 }
 0xee2   :  { %4527 = vmatprep.subr.bf16.mxu1 %v11286_v26  ;;  %4613 = vmatpush1.bf16.msra.mxu0 %v10769_v27 }
 0xee3   :  { %4614 = vmatprep.subr.bf16.mxu0 %v10904_v14 }
 0xee5   :  { %4528 = vmatpush1.bf16.msra.mxu1 %v11294_v4 }
 0xee6   :  { %4529 = vmatprep.subr.bf16.mxu1 %v11300_v39  ;;  %4615 = vmatpush1.bf16.msra.mxu0 %v10912_v49 }
 0xee7   :  { %4616 = vmatprep.subr.bf16.mxu0 %v10918_v15 }
 0xee9   :  { %4530 = vmatpush1.bf16.msra.mxu1 %v11308_v54 }
 0xeea   :  { %4531 = vmatprep.subr.bf16.mxu1 %v11314_v62  ;;  %4617 = vmatpush1.bf16.msra.mxu0 %v10926_v35 }
 0xeeb   :  { %4618 = vmatprep.subr.bf16.mxu0 %v10932_v38 }
 0xeed   :  { %4532 = vmatpush1.bf16.msra.mxu1 %v11322_v33  ;;  %v11342_v33 = vld [vmem:[%s12252_s12 + $0x2b4] ss:$24 sps:$4 sm:$0xff]  }
 0xeee   :  { %4533 = vmatprep.subr.bf16.mxu1 %v11328_v24  ;;  %4619 = vmatpush1.bf16.msra.mxu0 %v10940_v21 }
 0xeef   :  { %4620 = vmatprep.subr.bf16.mxu0 %v10946_v36  ;;  %v11350_v36 = vld [vmem:[%s12252_s12 + $0x2b0] ss:$24 sps:$4 sm:$0xff]  }
 0xef0   :  { %13300 = vst [vmem:[#allocation30_spill] sm:$0xff] %v11350_v36 }
 0xef1   :  { %4534 = vmatpush2.bf16.msra.mxu1 %v11336_v61  ;;  %v11356_v61 = vld [vmem:[%s12252_s12 + $0x284] ss:$24 sps:$4 sm:$0xff]  }
 0xef2   :  { %4535 = vmatprep.subr.bf16.mxu1 %v11342_v33  ;;  %4621 = vmatpush2.bf16.msra.mxu0 %v10954_v60 }
 0xef3   :  { %4622 = vmatprep.subr.bf16.mxu0 %v10960_v63  ;;  %v11364_v63 = vld [vmem:[%s12252_s12 + $0x280] ss:$24 sps:$4 sm:$0xff]  }
 0xef4   :  { %13301 = vst [vmem:[#allocation32_spill] sm:$0xff] %v11364_v63 }
 0xef5   :  { %4536 = vmatpush2.bf16.msra.mxu1 %v11350_v36  ;;  %v11370_v36 = vld [vmem:[%s12252_s12 + $0x254] ss:$24 sps:$4 sm:$0xff]  }
 0xef6   :  { %4537 = vmatprep.subr.bf16.mxu1 %v11356_v61  ;;  %4623 = vmatpush2.bf16.msra.mxu0 %v10968_v46 }
 0xef7   :  { %4624 = vmatprep.subr.bf16.mxu0 %v10974_v37  ;;  %v11378_v37 = vld [vmem:[%s12252_s12 + $0x250] ss:$24 sps:$4 sm:$0xff]  }
 0xef8   :  { %13302 = vst [vmem:[#allocation34_spill] sm:$0xff] %v11378_v37 }
 0xef9   :  { %4538 = vmatpush2.bf16.msra.mxu1 %v11364_v63  ;;  %v11384_v63 = vld [vmem:[%s12252_s12 + $0x224] ss:$24 sps:$4 sm:$0xff]  }
 0xefa   :  { %4539 = vmatprep.subr.bf16.mxu1 %v11370_v36  ;;  %4625 = vmatpush2.bf16.msra.mxu0 %v10982_v16 }
 0xefb   :  { %4626 = vmatprep.subr.bf16.mxu0 %v10988_v17  ;;  %v11392_v17 = vld [vmem:[%s12252_s12 + $0x220] ss:$24 sps:$4 sm:$0xff]  }
 0xefc   :  { %13303 = vst [vmem:[#allocation36_spill] sm:$0xff] %v11392_v17 }
 0xefd   :  { %4540 = vmatpush2.bf16.msra.mxu1 %v11378_v37  ;;  %v11398_v37 = vld [vmem:[%s12252_s12 + $0x1f4] ss:$24 sps:$4 sm:$0xff]  }
 0xefe   :  { %4541 = vmatprep.subr.bf16.mxu1 %v11384_v63  ;;  %4627 = vmatpush2.bf16.msra.mxu0 %v10996_v0  ;;  %13304 = vst [vmem:[#allocation38_spill] sm:$0xff] %v11398_v37 }
 0xeff   :  { %4628 = vmatprep.subr.bf16.mxu0 %v11002_v22  ;;  %v11406_v22 = vld [vmem:[%s12252_s12 + $0x1f0] ss:$24 sps:$4 sm:$0xff]  }
 0xf00   :  { %13305 = vst [vmem:[#allocation40_spill] sm:$0xff] %v11406_v22 }
 0xf01   :  { %4542 = vmatpush2.bf16.msra.mxu1 %v11392_v17  ;;  %v11412_v17 = vld [vmem:[%s12252_s12 + $0x1c4] ss:$24 sps:$4 sm:$0xff]  }
 0xf02   :  { %4543 = vmatprep.subr.bf16.mxu1 %v11398_v37  ;;  %4629 = vmatpush2.bf16.msra.mxu0 %v11010_v25  ;;  %13306 = vst [vmem:[#allocation50_spill] sm:$0xff] %v11412_v17 }
 0xf03   :  { %4630 = vmatprep.subr.bf16.mxu0 %v11016_v9  ;;  %v11420_v9 = vld [vmem:[%s12252_s12 + $0x1c0] ss:$24 sps:$4 sm:$0xff]  }
 0xf04   :  { %13307 = vst [vmem:[#allocation48_spill] sm:$0xff] %v11420_v9 }
 0xf05   :  { %4544 = vmatpush2.bf16.msra.mxu1 %v11406_v22  ;;  %v11426_v22 = vld [vmem:[%s12252_s12 + $0x194] ss:$24 sps:$4 sm:$0xff]  }
 0xf06   :  { %4545 = vmatprep.subr.bf16.mxu1 %v11412_v17  ;;  %4631 = vmatpush2.bf16.msra.mxu0 %v11024_v44  ;;  %13308 = vst [vmem:[#allocation49_spill] sm:$0xff] %v11426_v22  ;;  %v13337_v44 = vld [vmem:[#allocation17_spill] sm:$0xff] }
 0xf07   :  { %4632 = vmatprep.subr.bf16.mxu0 %v11030_v11 }
 0xf09   :  { %4546 = vmatpush2.bf16.msra.mxu1 %v11420_v9 }
 0xf0a   :  { %4547 = vmatprep.subr.bf16.mxu1 %v11426_v22  ;;  %4633 = vmatpush2.bf16.msra.mxu0 %v11038_v5  ;;  %v13309_v5 = vld [vmem:[#allocation70_spill] sm:$0xff] }
 0xf0b   :  { %4634 = vmatprep.subr.bf16.mxu0 %v11044_v50  ;;  %v13310_v50 = vld [vmem:[#allocation72_spill] sm:$0xff] }
 0xf0d   :  { %4548 = vmatpush2.bf16.msra.mxu1 %v13259_v43  ;;  %v13311_v43 = vld [vmem:[#allocation87_spill] sm:$0xff] }
 0xf0e   :  { %4645 = vmatprep.subr.bf16.mxu1 %v11051_v51  ;;  %4635 = vmatpush2.bf16.msra.mxu0 %v11057_v1  ;;  %v13312_v51 = vld [vmem:[#allocation88_spill] sm:$0xff]  ;;  %v13313_v1 = vld [vmem:[#allocation75_spill] sm:$0xff] }
 0xf0f   :  { %4686 = vmatprep.subr.bf16.mxu0 %v11063_v2  ;;  %v13314_v2 = vld [vmem:[#allocation73_spill] sm:$0xff] }
 0xf10   :  { %4550 = vmatmul.mubr.bf16.vlgmr.msra.gmra.mxu1 %v11217_v42  ;;  %v13315_v42 = vld [vmem:[#allocation90_spill] sm:$0xff] }
 0xf11   :  { %4646 = vmatpush1.bf16.msra.mxu1 %v11070_v47  ;;  %v13316_v47 = vld [vmem:[#allocation74_spill] sm:$0xff] }
 0xf12   :  { %4647 = vmatprep.subr.bf16.mxu1 %v11076_v41  ;;  %v13317_v41 = vld [vmem:[#allocation91_spill] sm:$0xff] }
 0xf15   :  { %4648 = vmatpush1.bf16.msra.mxu1 %v11082_v6  ;;  %v13318_v6 = vld [vmem:[#allocation89_spill] sm:$0xff] }
 0xf16   :  { %4649 = vmatprep.subr.bf16.mxu1 %v11088_v53  ;;  %v13319_v53 = vld [vmem:[#allocation45_spill] sm:$0xff] }
 0xf19   :  { %4650 = vmatpush1.bf16.msra.mxu1 %v13309_v5  ;;  %v13320_v5 = vld [vmem:[#allocation47_spill] sm:$0xff] }
 0xf1a   :  { %4651 = vmatprep.subr.bf16.mxu1 %v13310_v50  ;;  %v13321_v50 = vld [vmem:[#allocation82_spill] sm:$0xff] }
 0xf1d   :  { %4652 = vmatpush1.bf16.msra.mxu1 %v13311_v43  ;;  %v13322_v43 = vld [vmem:[#allocation44_spill] sm:$0xff] }
 0xf1e   :  { %4653 = vmatprep.subr.bf16.mxu1 %v13312_v51  ;;  %v13323_v51 = vld [vmem:[#allocation22_spill] sm:$0xff] }
 0xf21   :  { %4654 = vmatpush1.bf16.msra.mxu1 %v13313_v1  ;;  %v13324_v1 = vld [vmem:[#allocation24_spill] sm:$0xff] }
 0xf22   :  { %4655 = vmatprep.subr.bf16.mxu1 %v13314_v2 }
 0xf25   :  { %4656 = vmatpush1.bf16.msra.mxu1 %v13315_v42 }
 0xf26   :  { %4657 = vmatprep.subr.bf16.mxu1 %v13316_v47  ;;  %v11459_v47 = vld [vmem:[%s12252_s12 + $0x278] ss:$24 sps:$4 sm:$0xff]  }
 0xf27   :  { %13325 = vst [vmem:[#allocation46_spill] sm:$0xff] %v11459_v47 }
 0xf29   :  { %4658 = vmatpush1.bf16.msra.mxu1 %v13317_v41 }
 0xf2a   :  { %4659 = vmatprep.subr.bf16.mxu1 %v13318_v6 }
 0xf2d   :  { %4660 = vmatpush1.bf16.msra.mxu1 %v13319_v53  ;;  %v11465_v53 = vld [vmem:[%s12252_s12 + $0x24c] ss:$24 sps:$4 sm:$0xff]  }
 0xf2e   :  { %4661 = vmatprep.subr.bf16.mxu1 %v13320_v5  ;;  %13326 = vst [vmem:[#allocation77_spill] sm:$0xff] %v11465_v53 }
 0xf31   :  { %4662 = vmatpush2.bf16.msra.mxu1 %v13321_v50 }
 0xf32   :  { %4663 = vmatprep.subr.bf16.mxu1 %v13322_v43 }
 0xf35   :  { %4664 = vmatpush2.bf16.msra.mxu1 %v13323_v51  ;;  %v11471_v51 = vld [vmem:[%s12252_s12 + $0x248] ss:$24 sps:$4 sm:$0xff]  }
 0xf36   :  { %4665 = vmatprep.subr.bf16.mxu1 %v13324_v1  ;;  %13327 = vst [vmem:[#allocation37_spill] sm:$0xff] %v11471_v51  ;;  %v11477_v1 = vld [vmem:[%s12252_s12 + $0x21c] ss:$24 sps:$4 sm:$0xff]  }
 0xf37   :  { %13328 = vst [vmem:[#allocation76_spill] sm:$0xff] %v11477_v1 }
 0xf39   :  { %4666 = vmatpush2.bf16.msra.mxu1 %v11459_v47  ;;  %v11483_v47 = vld [vmem:[%s12252_s12 + $0x218] ss:$24 sps:$4 sm:$0xff]  }
 0xf3a   :  { %4667 = vmatprep.subr.bf16.mxu1 %v11465_v53  ;;  %13329 = vst [vmem:[#allocation13_spill] sm:$0xff] %v11483_v47  ;;  %v11489_v53 = vld [vmem:[%s12252_s12 + $0x1ec] ss:$24 sps:$4 sm:$0xff]  }
 0xf3b   :  { %13330 = vst [vmem:[#allocation43_spill] sm:$0xff] %v11489_v53 }
 0xf3d   :  { %4668 = vmatpush2.bf16.msra.mxu1 %v11471_v51  ;;  %v11495_v51 = vld [vmem:[%s12252_s12 + $0x1e8] ss:$24 sps:$4 sm:$0xff]  }
 0xf3e   :  { %4669 = vmatprep.subr.bf16.mxu1 %v11477_v1  ;;  %13331 = vst [vmem:[#allocation53_spill] sm:$0xff] %v11495_v51  ;;  %v11501_v1 = vld [vmem:[%s12252_s12 + $0x1bc] ss:$24 sps:$4 sm:$0xff]  }
 0xf3f   :  { %13332 = vst [vmem:[#allocation55_spill] sm:$0xff] %v11501_v1 }
 0xf41   :  { %4670 = vmatpush2.bf16.msra.mxu1 %v11483_v47  ;;  %v11507_v47 = vld [vmem:[%s12252_s12 + $0x1b8] ss:$24 sps:$4 sm:$0xff]  }
 0xf42   :  { %4671 = vmatprep.subr.bf16.mxu1 %v11489_v53  ;;  %13333 = vst [vmem:[#allocation2_spill] sm:$0xff] %v11507_v47  ;;  %v11513_v53 = vld [vmem:[%s12252_s12 + $0x18c] ss:$24 sps:$4 sm:$0xff]  }
 0xf43   :  { %13334 = vst [vmem:[#allocation3_spill] sm:$0xff] %v11513_v53 }
 0xf45   :  { %4672 = vmatpush2.bf16.msra.mxu1 %v11495_v51  ;;  %v11519_v51 = vld [vmem:[%s12252_s12 + $0x188] ss:$24 sps:$4 sm:$0xff]  }
 0xf46   :  { %4673 = vmatprep.subr.bf16.mxu1 %v11501_v1  ;;  %13335 = vst [vmem:[#allocation54_spill] sm:$0xff] %v11519_v51  ;;  %v13336_v1 = vld [vmem:[#allocation52_spill] sm:$0xff] }
 0xf49   :  { %4674 = vmatpush2.bf16.msra.mxu1 %v11507_v47 }
 0xf4a   :  { %4675 = vmatprep.subr.bf16.mxu1 %v11513_v53 }
 0xf4d   :  { %4676 = vmatpush2.bf16.msra.mxu1 %v11519_v51 }
 0xf4e   :  { %4773 = vmatprep.subr.bf16.mxu1 %v13336_v1 }
 0xf90   :  { %v4469_v43 = vpop.f32.mrf.mxu1  ;;  %v4510_v50 = vpop.f32.mrf.mxu0 }
 0xf91   :  { %v4558_v22 = vadd.f32 %v4469_v43, %v10657_v10  ;;  %v4572_v51 = vadd.f32 %v4510_v50, %v13337_v44 }
 0xf92   :  { %v4471_v5 = vpop.f32.mrf.mxu1  ;;  %v4512_v47 = vpop.f32.mrf.mxu0 }
 0xf93   :  { %v4559_v53 = vadd.f32 %v4471_v5, %v13242_v48  ;;  %v5832_v9 = vmul.f32 -1.442695, %v4558_v22  ;;  %v4573_v1 = vadd.f32 %v4512_v47, %v13243_v8  ;;  %v5834_v17 = vmul.f32 -1.442695, %v4572_v51 }
 0xf94   :  { %v4473_v6 = vpop.f32.mrf.mxu1  ;;  %v4514_v41 = vpop.f32.mrf.mxu0 }
 0xf95   :  { %v5833_v11 = vmul.f32 -1.442695, %v4559_v53  ;;  %6635 = vpow2.f32 %v5832_v9  ;;  %v5835_v25 = vmul.f32 -1.442695, %v4573_v1 }
 0xf96   :  { %v4474_v42 = vpop.f32.mrf.mxu1  ;;  %v4515_v2 = vpop.f32.mrf.mxu0 }
 0xf97   :  { %6637 = vpow2.f32 %v5833_v11  ;;  %v13338_v11 = vld [vmem:[#allocation33_spill] sm:$0xff] }
 0xf98   :  { %6639 = vpow2.f32 %v5834_v17 }
 0xf99   :  { %6641 = vpow2.f32 %v5835_v25 }
 0xfa2   :  { %v6636_v37 = vpop.eup %6635 }
 0xfa3   :  { %v4566_v41 = vadd.f32 1.0, %v6636_v37 }
 0xfa4   :  { %v6638_v6 = vpop.eup %6637 }
 0xfa5   :  { %v4567_v2 = vadd.f32 1.0, %v6638_v6  ;;  %6643 = vrcp.f32 %v4566_v41  ;;  %v6640_v43 = vpop.eup %6639 }
 0xfa6   :  { %v6642_v5 = vpop.eup %6641  ;;  %v4580_v22 = vadd.f32 1.0, %v6640_v43 }
 0xfa7   :  { %6645 = vrcp.f32 %v4567_v2  ;;  %v4581_v9 = vadd.f32 1.0, %v6642_v5 }
 0xfa8   :  { %6647 = vrcp.f32 %v4580_v22 }
 0xfa9   :  { %6649 = vrcp.f32 %v4581_v9 }
 0xfb2   :  { %v6644_v50 = vpop.eup %6643 }
 0xfb4   :  { %v6646_v17 = vpop.eup %6645 }
 0xfb5   :  { %v6648_v2 = vpop.eup %6647 }
 0xfb6   :  { %v6650_v43 = vpop.eup %6649  ;;  %v4594_v5 = vsub.f32 1.0, %v6648_v2 }
 0xfb7   :  { %v4599_v9 = vmul.f32 %v6650_v43, %v11211_v45  ;;  %v13365_v45 = vld [vmem:[#allocation59_spill] sm:$0xff] }
 0xfd0   :  { %v4551_v53 = vpop.f32.mrf.mxu1 }
 0xfd1   :  { %v4586_v42 = vadd.f32 %v4551_v53, %v13338_v11  ;;  %v4595_v11 = vsub.f32 1.0, %v6650_v43  ;;  %v13355_v43 = vld [vmem:[#allocation40_spill] sm:$0xff] }
 0xfd2   :  { %v4553_v44 = vpop.f32.mrf.mxu1 }
 0xfd3   :  { %v4588_v51 = vmul.f32 %v6644_v50, %v4586_v42  ;;  %v4587_v1 = vadd.f32 %v4553_v44, %v10685_v3  ;;  %v4598_v44 = vmul.f32 %v6648_v2, %v11209_v59  ;;  %v13354_v2 = vld [vmem:[#allocation80_spill] sm:$0xff] }
 0xfd4   :  { %v4555_v47 = vpop.f32.mrf.mxu1  ;;  %v13364_v59 = vld [vmem:[#allocation96_spill] sm:$0xff] }
 0xfd5   :  { %v4590_v37 = vadd.f32 %v4588_v51, %v10691_v57  ;;  %v4589_v25 = vmul.f32 %v6646_v17, %v4587_v1 }
 0xfd6   :  { %v4556_v6 = vpop.f32.mrf.mxu1 }
 0xfd7   :  { %6651 = vtanh.f32 %v4590_v37  ;;  %v4591_v41 = vadd.f32 %v4589_v25, %v10695_v40  ;;  %v13350_v37 = vld [vmem:[#allocation85_spill] sm:$0xff]  ;;  %v13351_v25 = vld [vmem:[#allocation36_spill] sm:$0xff]  ;;  %v13352_v6 = vld [vmem:[#allocation38_spill] sm:$0xff] }
 0xfd9   :  { %6653 = vtanh.f32 %v4591_v41  ;;  %v13353_v41 = vld [vmem:[#allocation79_spill] sm:$0xff] }
 0xfe4   :  { %v6652_v53 = vpop.eup %6651 }
 0xfe5   :  { %v4596_v22 = vmul.f32 %v6652_v53, %v4594_v5  ;;  %v13356_v5 = vld [vmem:[#allocation50_spill] sm:$0xff]  ;;  %v13357_v53 = vld [vmem:[#allocation92_spill] sm:$0xff] }
 0xfe6   :  { %v6654_v42 = vpop.eup %6653 }
 0xfe7   :  { %v4597_v50 = vmul.f32 %v6654_v42, %v4595_v11  ;;  %v11533_v47 = vadd.f32 %v4598_v44, %v4596_v22  ;;  %v13349_v11 = vld [vmem:[#allocation34_spill] sm:$0xff]  ;;  %v13358_v22 = vld [vmem:[#allocation93_spill] sm:$0xff]  ;;  %v13359_v42 = vld [vmem:[#allocation48_spill] sm:$0xff] }
 0xfe8   :  { %v13360_v44 = vld [vmem:[#allocation49_spill] sm:$0xff] }
 0xfe9   :  { %13339 = vst [vmem:[#allocation56_spill] sm:$0xff] %v11533_v47  ;;  %v11535_v51 = vadd.f32 %v4599_v9, %v4597_v50  ;;  %v11541_v17 = vpack.c.bf16 %v11533_v47, %v11533_v47  ;;  %v13361_v50 = vld [vmem:[#allocation94_spill] sm:$0xff]  ;;  %v13362_v9 = vld [vmem:[#allocation95_spill] sm:$0xff] }
 0xfeb   :  { %13340 = vst [vmem:[#allocation4_spill] sm:$0xff] %v11535_v51  ;;  %v4603_v1 = vpack.c.bf16 %v11535_v51, %v11535_v51 }
 0xfed   :  { %4636 = vmatprep.mubr.bf16.mxu0 %v4603_v1  ;;  %4677 = vmatprep.mubr.bf16.mxu1 %v4603_v1 }
 0xfee   :  { %4637 = vmatmul.mubr.bf16.vlgmr.msra.gmra.mxu0 %v11541_v17  ;;  %4678 = vmatmul.mubr.bf16.vlgmr.msra.gmra.mxu1 %v11541_v17 }
 0xfef   :  { %4687 = vmatpush1.bf16.msra.mxu0 %v11224_v28  ;;  %4718 = vmatprep.mubr.bf16.mxu0 %v4603_v1  ;;  %v11608_v1 = vld [vmem:[%s12252_s12 + $0x190] ss:$24 sps:$4 sm:$0xff]  }
 0xff0   :  { %4688 = vmatprep.subr.bf16.mxu0 %v11230_v55  ;;  %4774 = vmatpush1.bf16.msra.mxu1 %v10718_v19  ;;  %v13341_v19 = vld [vmem:[#allocation42_spill] sm:$0xff]  ;;  %13363 = vst [vmem:[#allocation5_spill] sm:$0xff] %v11608_v1 }
 0xff1   :  { %4775 = vmatprep.subr.bf16.mxu1 %v10724_v20  ;;  %v13342_v20 = vld [vmem:[#allocation51_spill] sm:$0xff] }
 0xff3   :  { %4689 = vmatpush1.bf16.msra.mxu0 %v11238_v23 }
 0xff4   :  { %4690 = vmatprep.subr.bf16.mxu0 %v11244_v29  ;;  %4776 = vmatpush1.bf16.msra.mxu1 %v10732_v52  ;;  %v13343_v52 = vld [vmem:[#allocation28_spill] sm:$0xff] }
 0xff5   :  { %4777 = vmatprep.subr.bf16.mxu1 %v10738_v56  ;;  %v13344_v56 = vld [vmem:[#allocation68_spill] sm:$0xff] }
 0xff7   :  { %4691 = vmatpush1.bf16.msra.mxu0 %v11252_v31 }
 0xff8   :  { %4692 = vmatprep.subr.bf16.mxu0 %v11258_v18  ;;  %4778 = vmatpush1.bf16.msra.mxu1 %v10746_v13  ;;  %v13345_v13 = vld [vmem:[#allocation30_spill] sm:$0xff] }
 0xff9   :  { %4779 = vmatprep.subr.bf16.mxu1 %v10752_v7  ;;  %v13346_v7 = vld [vmem:[#allocation66_spill] sm:$0xff] }
 0xffb   :  { %4693 = vmatpush1.bf16.msra.mxu0 %v11266_v30 }
 0xffc   :  { %4694 = vmatprep.subr.bf16.mxu0 %v11272_v58  ;;  %4780 = vmatpush1.bf16.msra.mxu1 %v10760_v32  ;;  %v13347_v32 = vld [vmem:[#allocation32_spill] sm:$0xff] }
 0xffd   :  { %4781 = vmatprep.subr.bf16.mxu1 %v10895_v12 }
 0xfff   :  { %4695 = vmatpush1.bf16.msra.mxu0 %v11280_v34 }
0x1000   :  { %4696 = vmatprep.subr.bf16.mxu0 %v11286_v26  ;;  %4782 = vmatpush1.bf16.msra.mxu1 %v10769_v27  ;;  %v13348_v27 = vld [vmem:[#allocation78_spill] sm:$0xff] }
0x1001   :  { %4783 = vmatprep.subr.bf16.mxu1 %v10904_v14 }
0x1003   :  { %4697 = vmatpush1.bf16.msra.mxu0 %v11294_v4 }
0x1004   :  { %4698 = vmatprep.subr.bf16.mxu0 %v11300_v39  ;;  %4784 = vmatpush1.bf16.msra.mxu1 %v10912_v49 }
0x1005   :  { %4785 = vmatprep.subr.bf16.mxu1 %v10918_v15 }
0x1007   :  { %4699 = vmatpush1.bf16.msra.mxu0 %v11308_v54 }
0x1008   :  { %4700 = vmatprep.subr.bf16.mxu0 %v11314_v62  ;;  %4786 = vmatpush1.bf16.msra.mxu1 %v10926_v35 }
0x1009   :  { %4787 = vmatprep.subr.bf16.mxu1 %v10932_v38 }
0x100b   :  { %4701 = vmatpush1.bf16.msra.mxu0 %v13341_v19 }
0x100c   :  { %4702 = vmatprep.subr.bf16.mxu0 %v11328_v24  ;;  %4788 = vmatpush1.bf16.msra.mxu1 %v10940_v21 }
0x100d   :  { %4789 = vmatprep.subr.bf16.mxu1 %v13342_v20 }
0x100f   :  { %4703 = vmatpush2.bf16.msra.mxu0 %v13343_v52 }
0x1010   :  { %4704 = vmatprep.subr.bf16.mxu0 %v11342_v33  ;;  %4790 = vmatpush2.bf16.msra.mxu1 %v10954_v60 }
0x1011   :  { %4791 = vmatprep.subr.bf16.mxu1 %v13344_v56 }
0x1013   :  { %4705 = vmatpush2.bf16.msra.mxu0 %v13345_v13 }
0x1014   :  { %4706 = vmatprep.subr.bf16.mxu0 %v11356_v61  ;;  %4792 = vmatpush2.bf16.msra.mxu1 %v10968_v46 }
0x1015   :  { %4793 = vmatprep.subr.bf16.mxu1 %v13346_v7 }
0x1017   :  { %4707 = vmatpush2.bf16.msra.mxu0 %v13347_v32 }
0x1018   :  { %4708 = vmatprep.subr.bf16.mxu0 %v11370_v36  ;;  %4794 = vmatpush2.bf16.msra.mxu1 %v10982_v16 }
0x1019   :  { %4795 = vmatprep.subr.bf16.mxu1 %v13348_v27 }
0x101b   :  { %4709 = vmatpush2.bf16.msra.mxu0 %v13349_v11 }
0x101c   :  { %4710 = vmatprep.subr.bf16.mxu0 %v11384_v63  ;;  %4796 = vmatpush2.bf16.msra.mxu1 %v10996_v0 }
0x101d   :  { %4797 = vmatprep.subr.bf16.mxu1 %v13350_v37 }
0x101f   :  { %4711 = vmatpush2.bf16.msra.mxu0 %v13351_v25 }
0x1020   :  { %4712 = vmatprep.subr.bf16.mxu0 %v13352_v6  ;;  %4798 = vmatpush2.bf16.msra.mxu1 %v13353_v41 }
0x1021   :  { %4799 = vmatprep.subr.bf16.mxu1 %v13354_v2 }
0x1023   :  { %4713 = vmatpush2.bf16.msra.mxu0 %v13355_v43 }
0x1024   :  { %4714 = vmatprep.subr.bf16.mxu0 %v13356_v5  ;;  %4800 = vmatpush2.bf16.msra.mxu1 %v13357_v53  ;;  %v13371_v53 = vld [vmem:[#allocation70_spill] sm:$0xff]  ;;  %v13372_v5 = vld [vmem:[#allocation72_spill] sm:$0xff] }
0x1025   :  { %4801 = vmatprep.subr.bf16.mxu1 %v13358_v22  ;;  %v13366_v22 = vld [vmem:[#allocation57_spill] sm:$0xff] }
0x1027   :  { %4715 = vmatpush2.bf16.msra.mxu0 %v13359_v42  ;;  %v13370_v42 = vld [vmem:[#allocation71_spill] sm:$0xff] }
0x1028   :  { %4716 = vmatprep.subr.bf16.mxu0 %v13360_v44  ;;  %4802 = vmatpush2.bf16.msra.mxu1 %v13361_v50  ;;  %v13367_v44 = vld [vmem:[#allocation60_spill] sm:$0xff]  ;;  %v13368_v50 = vld [vmem:[#allocation58_spill] sm:$0xff] }
0x1029   :  { %4803 = vmatprep.subr.bf16.mxu1 %v13362_v9  ;;  %v13369_v9 = vld [vmem:[#allocation69_spill] sm:$0xff] }
0x102b   :  { %4717 = vmatpush2.bf16.msra.mxu0 %v11608_v1  ;;  %v13373_v1 = vld [vmem:[#allocation87_spill] sm:$0xff] }
0x102c   :  { %4814 = vmatprep.subr.bf16.mxu0 %v13364_v59  ;;  %4804 = vmatpush2.bf16.msra.mxu1 %v13365_v45  ;;  %v13374_v59 = vld [vmem:[#allocation88_spill] sm:$0xff]  ;;  %v13375_v45 = vld [vmem:[#allocation75_spill] sm:$0xff] }
0x102d   :  { %4855 = vmatprep.subr.bf16.mxu1 %v13366_v22  ;;  %v13376_v22 = vld [vmem:[#allocation73_spill] sm:$0xff] }
0x102e   :  { %4719 = vmatmul.mubr.bf16.vlgmr.msra.gmra.mxu0 %v11541_v17  ;;  %v13377_v17 = vld [vmem:[#allocation90_spill] sm:$0xff] }
0x102f   :  { %4815 = vmatpush1.bf16.msra.mxu0 %v13367_v44  ;;  %v13378_v44 = vld [vmem:[#allocation74_spill] sm:$0xff] }
0x1030   :  { %4816 = vmatprep.subr.bf16.mxu0 %v13368_v50  ;;  %v13379_v50 = vld [vmem:[#allocation91_spill] sm:$0xff] }
0x1033   :  { %4817 = vmatpush1.bf16.msra.mxu0 %v13369_v9  ;;  %v13380_v9 = vld [vmem:[#allocation89_spill] sm:$0xff] }
0x1034   :  { %4818 = vmatprep.subr.bf16.mxu0 %v13370_v42  ;;  %v13381_v42 = vld [vmem:[#allocation45_spill] sm:$0xff] }
0x1037   :  { %4819 = vmatpush1.bf16.msra.mxu0 %v13371_v53  ;;  %v13382_v53 = vld [vmem:[#allocation47_spill] sm:$0xff] }
0x1038   :  { %4820 = vmatprep.subr.bf16.mxu0 %v13372_v5  ;;  %v13383_v5 = vld [vmem:[#allocation82_spill] sm:$0xff] }
0x103b   :  { %4821 = vmatpush1.bf16.msra.mxu0 %v13373_v1  ;;  %v13384_v1 = vld [vmem:[#allocation44_spill] sm:$0xff] }
0x103c   :  { %4822 = vmatprep.subr.bf16.mxu0 %v13374_v59  ;;  %v13385_v59 = vld [vmem:[#allocation22_spill] sm:$0xff] }
0x103f   :  { %4823 = vmatpush1.bf16.msra.mxu0 %v13375_v45  ;;  %v13386_v45 = vld [vmem:[#allocation24_spill] sm:$0xff] }
0x1040   :  { %4824 = vmatprep.subr.bf16.mxu0 %v13376_v22  ;;  %v13387_v22 = vld [vmem:[#allocation46_spill] sm:$0xff] }
0x1043   :  { %4825 = vmatpush1.bf16.msra.mxu0 %v13377_v17  ;;  %v13388_v17 = vld [vmem:[#allocation77_spill] sm:$0xff] }
0x1044   :  { %4826 = vmatprep.subr.bf16.mxu0 %v13378_v44  ;;  %v13389_v44 = vld [vmem:[#allocation37_spill] sm:$0xff] }
0x1047   :  { %4827 = vmatpush1.bf16.msra.mxu0 %v13379_v50  ;;  %v13390_v50 = vld [vmem:[#allocation76_spill] sm:$0xff] }
0x1048   :  { %4828 = vmatprep.subr.bf16.mxu0 %v13380_v9  ;;  %v13391_v9 = vld [vmem:[#allocation13_spill] sm:$0xff] }
0x104b   :  { %4829 = vmatpush1.bf16.msra.mxu0 %v13381_v42  ;;  %v13392_v42 = vld [vmem:[#allocation43_spill] sm:$0xff] }
0x104c   :  { %4830 = vmatprep.subr.bf16.mxu0 %v13382_v53  ;;  %v13393_v53 = vld [vmem:[#allocation53_spill] sm:$0xff] }
0x104f   :  { %4831 = vmatpush2.bf16.msra.mxu0 %v13383_v5  ;;  %v13394_v5 = vld [vmem:[#allocation55_spill] sm:$0xff] }
0x1050   :  { %4832 = vmatprep.subr.bf16.mxu0 %v13384_v1  ;;  %v13395_v1 = vld [vmem:[#allocation2_spill] sm:$0xff] }
0x1053   :  { %4833 = vmatpush2.bf16.msra.mxu0 %v13385_v59  ;;  %v13396_v59 = vld [vmem:[#allocation3_spill] sm:$0xff] }
0x1054   :  { %4834 = vmatprep.subr.bf16.mxu0 %v13386_v45  ;;  %v13397_v45 = vld [vmem:[#allocation54_spill] sm:$0xff] }
0x1057   :  { %4835 = vmatpush2.bf16.msra.mxu0 %v13387_v22  ;;  %v13398_v22 = vld [vmem:[#allocation52_spill] sm:$0xff] }
0x1058   :  { %4836 = vmatprep.subr.bf16.mxu0 %v13388_v17 }
0x105b   :  { %4837 = vmatpush2.bf16.msra.mxu0 %v13389_v44 }
0x105c   :  { %4838 = vmatprep.subr.bf16.mxu0 %v13390_v50 }
0x105f   :  { %4839 = vmatpush2.bf16.msra.mxu0 %v13391_v9 }
0x1060   :  { %4840 = vmatprep.subr.bf16.mxu0 %v13392_v42 }
0x1063   :  { %4841 = vmatpush2.bf16.msra.mxu0 %v13393_v53 }
0x1064   :  { %4842 = vmatprep.subr.bf16.mxu0 %v13394_v5 }
0x1067   :  { %4843 = vmatpush2.bf16.msra.mxu0 %v13395_v1 }
0x1068   :  { %4844 = vmatprep.subr.bf16.mxu0 %v13396_v59  ;;  %v13399_v59 = vld [vmem:[#allocation17_spill] sm:$0xff] }
0x106b   :  { %4845 = vmatpush2.bf16.msra.mxu0 %v13397_v45 }
0x106c   :  { %4942 = vmatprep.subr.bf16.mxu0 %v13398_v22 }
0x10ae   :  { %v4638_v17 = vpop.f32.mrf.mxu0  ;;  %v4679_v44 = vpop.f32.mrf.mxu1 }
0x10af   :  { %v4727_v53 = vadd.f32 %v4638_v17, %v10657_v10  ;;  %v4741_v45 = vadd.f32 %v4679_v44, %v13399_v59 }
0x10b0   :  { %v4640_v43 = vpop.f32.mrf.mxu0  ;;  %v4681_v50 = vpop.f32.mrf.mxu1 }
0x10b1   :  { %v4728_v5 = vadd.f32 %v4640_v43, %v13242_v48  ;;  %v5836_v6 = vmul.f32 -1.442695, %v4727_v53  ;;  %v4742_v22 = vadd.f32 %v4681_v50, %v13243_v8  ;;  %v5838_v25 = vmul.f32 -1.442695, %v4741_v45 }
0x10b2   :  { %v4642_v2 = vpop.f32.mrf.mxu0  ;;  %v4683_v9 = vpop.f32.mrf.mxu1 }
0x10b3   :  { %v5837_v1 = vmul.f32 -1.442695, %v4728_v5  ;;  %6655 = vpow2.f32 %v5836_v6  ;;  %v5839_v37 = vmul.f32 -1.442695, %v4742_v22 }
0x10b4   :  { %v4643_v41 = vpop.f32.mrf.mxu0  ;;  %v4684_v42 = vpop.f32.mrf.mxu1 }
0x10b5   :  { %6657 = vpow2.f32 %v5837_v1  ;;  %v13400_v1 = vld [vmem:[#allocation33_spill] sm:$0xff] }
0x10b6   :  { %6659 = vpow2.f32 %v5838_v25 }
0x10b7   :  { %6661 = vpow2.f32 %v5839_v37 }
0x10c0   :  { %v6656_v0 = vpop.eup %6655 }
0x10c1   :  { %v4735_v9 = vadd.f32 1.0, %v6656_v0 }
0x10c2   :  { %v6658_v2 = vpop.eup %6657 }
0x10c3   :  { %v4736_v41 = vadd.f32 1.0, %v6658_v2  ;;  %6663 = vrcp.f32 %v4735_v9  ;;  %v6660_v42 = vpop.eup %6659 }
0x10c4   :  { %v6662_v43 = vpop.eup %6661  ;;  %v4749_v53 = vadd.f32 1.0, %v6660_v42 }
0x10c5   :  { %6665 = vrcp.f32 %v4736_v41  ;;  %v4750_v6 = vadd.f32 1.0, %v6662_v43 }
0x10c6   :  { %6667 = vrcp.f32 %v4749_v53 }
0x10c7   :  { %6669 = vrcp.f32 %v4750_v6 }
0x10d0   :  { %v6664_v44 = vpop.eup %6663 }
0x10d2   :  { %v6666_v25 = vpop.eup %6665 }
0x10d3   :  { %v6668_v41 = vpop.eup %6667 }
0x10d4   :  { %v6670_v42 = vpop.eup %6669  ;;  %v4763_v43 = vsub.f32 1.0, %v6668_v41 }
0x10d5   :  { %v4768_v6 = vmul.f32 %v6670_v42, %v11535_v51 }
0x10ee   :  { %v4720_v5 = vpop.f32.mrf.mxu0 }
0x10ef   :  { %v4755_v17 = vadd.f32 %v4720_v5, %v13400_v1  ;;  %v4764_v1 = vsub.f32 1.0, %v6670_v42  ;;  %v11716_v42 = vld [vmem:[%s12252_s12 + $0xc0] ss:$24 sps:$4 sm:$0xff]  }
0x10f0   :  { %v4722_v59 = vpop.f32.mrf.mxu0 }
0x10f1   :  { %v4757_v45 = vmul.f32 %v6664_v44, %v4755_v17  ;;  %v4756_v50 = vadd.f32 %v4722_v59, %v10685_v3  ;;  %v4767_v59 = vmul.f32 %v6668_v41, %v11533_v47  ;;  %v11708_v41 = vld [vmem:[%s12252_s12 + $0xc4] ss:$24 sps:$4 sm:$0xff]  }
0x10f2   :  { %v4724_v22 = vpop.f32.mrf.mxu0 }
0x10f3   :  { %v4759_v0 = vadd.f32 %v4757_v45, %v10691_v57  ;;  %v4758_v37 = vmul.f32 %v6666_v25, %v4756_v50 }
0x10f4   :  { %v4725_v2 = vpop.f32.mrf.mxu0 }
0x10f5   :  { %6671 = vtanh.f32 %v4759_v0  ;;  %v4760_v9 = vadd.f32 %v4758_v37, %v10695_v40  ;;  %v11680_v0 = vld [vmem:[%s12252_s12 + $0x124] ss:$24 sps:$4 sm:$0xff]   ;;  %v11688_v37 = vld [vmem:[%s12252_s12 + $0x120] ss:$24 sps:$4 sm:$0xff]   ;;  %v11694_v2 = vld [vmem:[%s12252_s12 + $0xf4] ss:$24 sps:$4 sm:$0xff]  }
0x10f7   :  { %6673 = vtanh.f32 %v4760_v9  ;;  %v11702_v9 = vld [vmem:[%s12252_s12 + $0xf0] ss:$24 sps:$4 sm:$0xff]  }
0x1102   :  { %v6672_v5 = vpop.eup %6671 }
0x1103   :  { %v4765_v53 = vmul.f32 %v6672_v5, %v4763_v43  ;;  %v11725_v43 = vld [vmem:[%s12252_s12 + $0x90] ss:$24 sps:$4 sm:$0xff]   ;;  %v13415_v5 = vld [vmem:[#allocation5_spill] sm:$0xff] }
0x1104   :  { %v6674_v17 = vpop.eup %6673 }
0x1105   :  { %v4766_v44 = vmul.f32 %v6674_v17, %v4764_v1  ;;  %v11657_v22 = vadd.f32 %v4767_v59, %v4765_v53  ;;  %v11674_v1 = vld [vmem:[%s12252_s12 + $0x150] ss:$24 sps:$4 sm:$0xff]   ;;  %v13418_v59 = vld [vmem:[#allocation57_spill] sm:$0xff] }
0x1106   :  { %v13416_v53 = vld [vmem:[#allocation96_spill] sm:$0xff]  ;;  %v13417_v17 = vld [vmem:[#allocation59_spill] sm:$0xff] }
0x1107   :  { %v11659_v45 = vadd.f32 %v4768_v6, %v4766_v44  ;;  %v11665_v25 = vpack.c.bf16 %v11657_v22, %v11657_v22  ;;  %v13419_v44 = vld [vmem:[#allocation60_spill] sm:$0xff]  ;;  %v13420_v6 = vld [vmem:[#allocation58_spill] sm:$0xff] }
0x1109   :  { %v4772_v50 = vpack.c.bf16 %v11659_v45, %v11659_v45 }
0x110b   :  { %4805 = vmatprep.mubr.bf16.mxu1 %v4772_v50  ;;  %4846 = vmatprep.mubr.bf16.mxu0 %v4772_v50 }
0x110c   :  { %4806 = vmatmul.mubr.bf16.vlgmr.msra.gmra.mxu1 %v11665_v25  ;;  %4847 = vmatmul.mubr.bf16.vlgmr.msra.gmra.mxu0 %v11665_v25 }
0x110d   :  { %4856 = vmatpush1.bf16.msra.mxu1 %v11224_v28  ;;  %4887 = vmatprep.mubr.bf16.mxu1 %v4772_v50  ;;  %v13421_v50 = vld [vmem:[#allocation69_spill] sm:$0xff] }
0x110e   :  { %4857 = vmatprep.subr.bf16.mxu1 %v11230_v55  ;;  %4943 = vmatpush1.bf16.msra.mxu0 %v11674_v1 }
0x110f   :  { %4944 = vmatprep.subr.bf16.mxu0 %v11680_v0 }
0x1111   :  { %4858 = vmatpush1.bf16.msra.mxu1 %v11238_v23 }
0x1112   :  { %4859 = vmatprep.subr.bf16.mxu1 %v11244_v29  ;;  %4945 = vmatpush1.bf16.msra.mxu0 %v11688_v37 }
0x1113   :  { %4946 = vmatprep.subr.bf16.mxu0 %v11694_v2 }
0x1115   :  { %4860 = vmatpush1.bf16.msra.mxu1 %v11252_v31 }
0x1116   :  { %4861 = vmatprep.subr.bf16.mxu1 %v11258_v18  ;;  %4947 = vmatpush1.bf16.msra.mxu0 %v11702_v9 }
0x1117   :  { %4948 = vmatprep.subr.bf16.mxu0 %v11708_v41 }
0x1119   :  { %4862 = vmatpush1.bf16.msra.mxu1 %v11266_v30 }
0x111a   :  { %4863 = vmatprep.subr.bf16.mxu1 %v11272_v58  ;;  %4949 = vmatpush1.bf16.msra.mxu0 %v11716_v42 }
0x111b   :  { %4950 = vmatprep.subr.bf16.mxu0 %v10895_v12  ;;  %v13401_v12 = vld [vmem:[#allocation86_spill] sm:$0xff] }
0x111d   :  { %4864 = vmatpush1.bf16.msra.mxu1 %v11280_v34 }
0x111e   :  { %4865 = vmatprep.subr.bf16.mxu1 %v11286_v26  ;;  %4951 = vmatpush1.bf16.msra.mxu0 %v11725_v43 }
0x111f   :  { %4952 = vmatprep.subr.bf16.mxu0 %v10904_v14  ;;  %v13402_v14 = vld [vmem:[#allocation85_spill] sm:$0xff] }
0x1121   :  { %4866 = vmatpush1.bf16.msra.mxu1 %v11294_v4 }
0x1122   :  { %4867 = vmatprep.subr.bf16.mxu1 %v11300_v39  ;;  %4953 = vmatpush1.bf16.msra.mxu0 %v10912_v49  ;;  %v13403_v49 = vld [vmem:[#allocation36_spill] sm:$0xff] }
0x1123   :  { %4954 = vmatprep.subr.bf16.mxu0 %v10918_v15  ;;  %v13404_v15 = vld [vmem:[#allocation38_spill] sm:$0xff] }
0x1125   :  { %4868 = vmatpush1.bf16.msra.mxu1 %v11308_v54 }
0x1126   :  { %4869 = vmatprep.subr.bf16.mxu1 %v11314_v62  ;;  %4955 = vmatpush1.bf16.msra.mxu0 %v10926_v35  ;;  %v13405_v35 = vld [vmem:[#allocation79_spill] sm:$0xff] }
0x1127   :  { %4956 = vmatprep.subr.bf16.mxu0 %v10932_v38  ;;  %v13406_v38 = vld [vmem:[#allocation80_spill] sm:$0xff] }
0x1129   :  { %4870 = vmatpush1.bf16.msra.mxu1 %v13341_v19 }
0x112a   :  { %4871 = vmatprep.subr.bf16.mxu1 %v11328_v24  ;;  %4957 = vmatpush1.bf16.msra.mxu0 %v10940_v21  ;;  %v13407_v21 = vld [vmem:[#allocation40_spill] sm:$0xff] }
0x112b   :  { %4958 = vmatprep.subr.bf16.mxu0 %v13342_v20  ;;  %v13411_v20 = vld [vmem:[#allocation48_spill] sm:$0xff] }
0x112d   :  { %4872 = vmatpush2.bf16.msra.mxu1 %v13343_v52 }
0x112e   :  { %4873 = vmatprep.subr.bf16.mxu1 %v11342_v33  ;;  %4959 = vmatpush2.bf16.msra.mxu0 %v10954_v60  ;;  %v13408_v60 = vld [vmem:[#allocation50_spill] sm:$0xff] }
0x112f   :  { %4960 = vmatprep.subr.bf16.mxu0 %v13344_v56  ;;  %v13412_v56 = vld [vmem:[#allocation49_spill] sm:$0xff] }
0x1131   :  { %4874 = vmatpush2.bf16.msra.mxu1 %v13345_v13 }
0x1132   :  { %4875 = vmatprep.subr.bf16.mxu1 %v11356_v61  ;;  %4961 = vmatpush2.bf16.msra.mxu0 %v10968_v46  ;;  %v13409_v46 = vld [vmem:[#allocation92_spill] sm:$0xff] }
0x1133   :  { %4962 = vmatprep.subr.bf16.mxu0 %v13346_v7  ;;  %v13413_v7 = vld [vmem:[#allocation94_spill] sm:$0xff] }
0x1135   :  { %4876 = vmatpush2.bf16.msra.mxu1 %v13347_v32 }
0x1136   :  { %4877 = vmatprep.subr.bf16.mxu1 %v11370_v36  ;;  %4963 = vmatpush2.bf16.msra.mxu0 %v10982_v16  ;;  %v13410_v16 = vld [vmem:[#allocation93_spill] sm:$0xff] }
0x1137   :  { %4964 = vmatprep.subr.bf16.mxu0 %v13348_v27  ;;  %v13414_v27 = vld [vmem:[#allocation95_spill] sm:$0xff] }
0x1139   :  { %4878 = vmatpush2.bf16.msra.mxu1 %v13349_v11 }
0x113a   :  { %4879 = vmatprep.subr.bf16.mxu1 %v11384_v63  ;;  %4965 = vmatpush2.bf16.msra.mxu0 %v13401_v12  ;;  %v13422_v12 = vld [vmem:[#allocation71_spill] sm:$0xff] }
0x113b   :  { %4966 = vmatprep.subr.bf16.mxu0 %v13402_v14  ;;  %v13423_v14 = vld [vmem:[#allocation70_spill] sm:$0xff] }
0x113d   :  { %4880 = vmatpush2.bf16.msra.mxu1 %v13403_v49 }
0x113e   :  { %4881 = vmatprep.subr.bf16.mxu1 %v13404_v15  ;;  %4967 = vmatpush2.bf16.msra.mxu0 %v13405_v35  ;;  %v13424_v35 = vld [vmem:[#allocation72_spill] sm:$0xff] }
0x113f   :  { %4968 = vmatprep.subr.bf16.mxu0 %v13406_v38  ;;  %v13425_v38 = vld [vmem:[#allocation87_spill] sm:$0xff] }
0x1141   :  { %4882 = vmatpush2.bf16.msra.mxu1 %v13407_v21 }
0x1142   :  { %4883 = vmatprep.subr.bf16.mxu1 %v13408_v60  ;;  %4969 = vmatpush2.bf16.msra.mxu0 %v13409_v46  ;;  %v13426_v46 = vld [vmem:[#allocation88_spill] sm:$0xff] }
0x1143   :  { %4970 = vmatprep.subr.bf16.mxu0 %v13410_v16  ;;  %v13427_v16 = vld [vmem:[#allocation75_spill] sm:$0xff] }
0x1145   :  { %4884 = vmatpush2.bf16.msra.mxu1 %v13411_v20 }
0x1146   :  { %4885 = vmatprep.subr.bf16.mxu1 %v13412_v56  ;;  %4971 = vmatpush2.bf16.msra.mxu0 %v13413_v7  ;;  %v13428_v7 = vld [vmem:[#allocation73_spill] sm:$0xff] }
0x1147   :  { %4972 = vmatprep.subr.bf16.mxu0 %v13414_v27  ;;  %v13430_v27 = vld [vmem:[#allocation74_spill] sm:$0xff] }
0x1149   :  { %4886 = vmatpush2.bf16.msra.mxu1 %v13415_v5 }
0x114a   :  { %4983 = vmatprep.subr.bf16.mxu1 %v13416_v53  ;;  %4973 = vmatpush2.bf16.msra.mxu0 %v13417_v17  ;;  %v13431_v53 = vld [vmem:[#allocation91_spill] sm:$0xff]  ;;  %v13432_v17 = vld [vmem:[#allocation89_spill] sm:$0xff] }
0x114b   :  { %5024 = vmatprep.subr.bf16.mxu0 %v13418_v59  ;;  %v13433_v59 = vld [vmem:[#allocation45_spill] sm:$0xff] }
0x114c   :  { %4888 = vmatmul.mubr.bf16.vlgmr.msra.gmra.mxu1 %v11665_v25  ;;  %v13429_v25 = vld [vmem:[#allocation90_spill] sm:$0xff] }
0x114d   :  { %4984 = vmatpush1.bf16.msra.mxu1 %v13419_v44  ;;  %v13434_v44 = vld [vmem:[#allocation47_spill] sm:$0xff] }
0x114e   :  { %4985 = vmatprep.subr.bf16.mxu1 %v13420_v6  ;;  %v13435_v6 = vld [vmem:[#allocation82_spill] sm:$0xff] }
0x1151   :  { %4986 = vmatpush1.bf16.msra.mxu1 %v13421_v50  ;;  %v13436_v50 = vld [vmem:[#allocation44_spill] sm:$0xff] }
0x1152   :  { %4987 = vmatprep.subr.bf16.mxu1 %v13422_v12  ;;  %v13437_v12 = vld [vmem:[#allocation22_spill] sm:$0xff] }
0x1155   :  { %4988 = vmatpush1.bf16.msra.mxu1 %v13423_v14  ;;  %v13438_v14 = vld [vmem:[#allocation24_spill] sm:$0xff] }
0x1156   :  { %4989 = vmatprep.subr.bf16.mxu1 %v13424_v35  ;;  %v13439_v35 = vld [vmem:[#allocation46_spill] sm:$0xff] }
0x1159   :  { %4990 = vmatpush1.bf16.msra.mxu1 %v13425_v38  ;;  %v13440_v38 = vld [vmem:[#allocation77_spill] sm:$0xff] }
0x115a   :  { %4991 = vmatprep.subr.bf16.mxu1 %v13426_v46  ;;  %v13441_v46 = vld [vmem:[#allocation37_spill] sm:$0xff] }
0x115d   :  { %4992 = vmatpush1.bf16.msra.mxu1 %v13427_v16  ;;  %v13442_v16 = vld [vmem:[#allocation76_spill] sm:$0xff] }
0x115e   :  { %4993 = vmatprep.subr.bf16.mxu1 %v13428_v7  ;;  %v13443_v7 = vld [vmem:[#allocation13_spill] sm:$0xff] }
0x1161   :  { %4994 = vmatpush1.bf16.msra.mxu1 %v13429_v25  ;;  %v13444_v25 = vld [vmem:[#allocation43_spill] sm:$0xff] }
0x1162   :  { %4995 = vmatprep.subr.bf16.mxu1 %v13430_v27  ;;  %v13445_v27 = vld [vmem:[#allocation53_spill] sm:$0xff] }
0x1165   :  { %4996 = vmatpush1.bf16.msra.mxu1 %v13431_v53  ;;  %v13446_v53 = vld [vmem:[#allocation55_spill] sm:$0xff] }
0x1166   :  { %4997 = vmatprep.subr.bf16.mxu1 %v13432_v17  ;;  %v13447_v17 = vld [vmem:[#allocation2_spill] sm:$0xff] }
0x1169   :  { %4998 = vmatpush1.bf16.msra.mxu1 %v13433_v59  ;;  %v13448_v59 = vld [vmem:[#allocation3_spill] sm:$0xff] }
0x116a   :  { %4999 = vmatprep.subr.bf16.mxu1 %v13434_v44  ;;  %v13449_v44 = vld [vmem:[#allocation54_spill] sm:$0xff] }
0x116d   :  { %5000 = vmatpush2.bf16.msra.mxu1 %v13435_v6  ;;  %v7031_v6 = vld [vmem:[%s12252_s12 + $0x154] ss:$24 sps:$4 sm:$0xff]  }
0x116e   :  { %5001 = vmatprep.subr.bf16.mxu1 %v13436_v50 }
0x1171   :  { %5002 = vmatpush2.bf16.msra.mxu1 %v13437_v12 }
0x1172   :  { %5003 = vmatprep.subr.bf16.mxu1 %v13438_v14 }
0x1175   :  { %5004 = vmatpush2.bf16.msra.mxu1 %v13439_v35 }
0x1176   :  { %5005 = vmatprep.subr.bf16.mxu1 %v13440_v38 }
0x1179   :  { %5006 = vmatpush2.bf16.msra.mxu1 %v13441_v46 }
0x117a   :  { %5007 = vmatprep.subr.bf16.mxu1 %v13442_v16 }
0x117d   :  { %5008 = vmatpush2.bf16.msra.mxu1 %v13443_v7 }
0x117e   :  { %5009 = vmatprep.subr.bf16.mxu1 %v13444_v25 }
0x1181   :  { %5010 = vmatpush2.bf16.msra.mxu1 %v13445_v27 }
0x1182   :  { %5011 = vmatprep.subr.bf16.mxu1 %v13446_v53 }
0x1185   :  { %5012 = vmatpush2.bf16.msra.mxu1 %v13447_v17 }
0x1186   :  { %5013 = vmatprep.subr.bf16.mxu1 %v13448_v59 }
0x1189   :  { %5014 = vmatpush2.bf16.msra.mxu1 %v13449_v44  ;;  %v13450_v44 = vld [vmem:[#allocation17_spill] sm:$0xff] }
0x118a   :  { %5111 = vmatprep.subr.bf16.mxu1 %v7031_v6 }
0x11cc   :  { %v4807_v50 = vpop.f32.mrf.mxu1  ;;  %v4848_v12 = vpop.f32.mrf.mxu0 }
0x11cd   :  { %v4896_v53 = vadd.f32 %v4807_v50, %v10657_v10  ;;  %v4910_v46 = vadd.f32 %v4848_v12, %v13450_v44 }
0x11ce   :  { %v4809_v14 = vpop.f32.mrf.mxu1  ;;  %v4850_v47 = vpop.f32.mrf.mxu0 }
0x11cf   :  { %v4897_v17 = vadd.f32 %v4809_v14, %v13242_v48  ;;  %v5840_v59 = vmul.f32 -1.442695, %v4896_v53  ;;  %v4911_v6 = vadd.f32 %v4850_v47, %v13243_v8  ;;  %v5842_v38 = vmul.f32 -1.442695, %v4910_v46 }
0x11d0   :  { %v4811_v51 = vpop.f32.mrf.mxu1  ;;  %v4852_v25 = vpop.f32.mrf.mxu0 }
0x11d1   :  { %v5841_v16 = vmul.f32 -1.442695, %v4897_v17  ;;  %6675 = vpow2.f32 %v5840_v59  ;;  %v5843_v35 = vmul.f32 -1.442695, %v4911_v6 }
0x11d2   :  { %v4812_v27 = vpop.f32.mrf.mxu1  ;;  %v4853_v7 = vpop.f32.mrf.mxu0 }
0x11d3   :  { %6677 = vpow2.f32 %v5841_v16  ;;  %v13451_v16 = vld [vmem:[#allocation33_spill] sm:$0xff] }
0x11d4   :  { %6679 = vpow2.f32 %v5842_v38 }
0x11d5   :  { %6681 = vpow2.f32 %v5843_v35 }
0x11de   :  { %v6676_v5 = vpop.eup %6675 }
0x11df   :  { %v4904_v25 = vadd.f32 1.0, %v6676_v5 }
0x11e0   :  { %v6678_v51 = vpop.eup %6677 }
0x11e1   :  { %v4905_v7 = vadd.f32 1.0, %v6678_v51  ;;  %6683 = vrcp.f32 %v4904_v25  ;;  %v6680_v27 = vpop.eup %6679 }
0x11e2   :  { %v6682_v50 = vpop.eup %6681  ;;  %v4918_v53 = vadd.f32 1.0, %v6680_v27 }
0x11e3   :  { %6685 = vrcp.f32 %v4905_v7  ;;  %v4919_v59 = vadd.f32 1.0, %v6682_v50 }
0x11e4   :  { %6687 = vrcp.f32 %v4918_v53 }
0x11e5   :  { %6689 = vrcp.f32 %v4919_v59 }
0x11ee   :  { %v6684_v12 = vpop.eup %6683 }
0x11f0   :  { %v6686_v38 = vpop.eup %6685 }
0x11f1   :  { %v6688_v7 = vpop.eup %6687 }
0x11f2   :  { %v6690_v27 = vpop.eup %6689  ;;  %v4932_v50 = vsub.f32 1.0, %v6688_v7 }
0x11f3   :  { %v4937_v59 = vmul.f32 %v6690_v27, %v11659_v45 }
0x120c   :  { %v4889_v17 = vpop.f32.mrf.mxu1 }
0x120d   :  { %v4924_v14 = vadd.f32 %v4889_v17, %v13451_v16  ;;  %v4933_v16 = vsub.f32 1.0, %v6690_v27  ;;  %v7075_v27 = vld [vmem:[%s12252_s12 + $0x2a8] ss:$24 sps:$4 sm:$0xff]  }
0x120e   :  { %v4891_v44 = vpop.f32.mrf.mxu1 }
0x120f   :  { %v4926_v47 = vmul.f32 %v6684_v12, %v4924_v14  ;;  %v4925_v46 = vadd.f32 %v4891_v44, %v10685_v3  ;;  %v4936_v44 = vmul.f32 %v6688_v7, %v11657_v22  ;;  %v7074_v7 = vld [vmem:[%s12252_s12 + $0x2ac] ss:$24 sps:$4 sm:$0xff]  }
0x1210   :  { %v4893_v6 = vpop.f32.mrf.mxu1 }
0x1211   :  { %v4928_v5 = vadd.f32 %v4926_v47, %v10691_v57  ;;  %v4927_v35 = vmul.f32 %v6686_v38, %v4925_v46 }
0x1212   :  { %v4894_v51 = vpop.f32.mrf.mxu1 }
0x1213   :  { %6691 = vtanh.f32 %v4928_v5  ;;  %v4929_v25 = vadd.f32 %v4927_v35, %v10695_v40  ;;  %v7070_v5 = vld [vmem:[%s12252_s12 + $0xc] ss:$24 sps:$4 sm:$0xff]   ;;  %v7071_v35 = vld [vmem:[%s12252_s12 + $0x8] ss:$24 sps:$4 sm:$0xff]   ;;  %v7072_v51 = vld [vmem:[%s12252_s12 + $0x2dc] ss:$24 sps:$4 sm:$0xff]  }
0x1215   :  { %6693 = vtanh.f32 %v4929_v25  ;;  %v7073_v25 = vld [vmem:[%s12252_s12 + $0x2d8] ss:$24 sps:$4 sm:$0xff]  }
0x1220   :  { %v6692_v17 = vpop.eup %6691 }
0x1221   :  { %v4934_v53 = vmul.f32 %v6692_v17, %v4932_v50  ;;  %v7076_v50 = vld [vmem:[%s12252_s12 + $0x27c] ss:$24 sps:$4 sm:$0xff]   ;;  %v13453_v17 = vld [vmem:[#allocation46_spill] sm:$0xff] }
0x1222   :  { %v6694_v14 = vpop.eup %6693 }
0x1223   :  { %v4935_v12 = vmul.f32 %v6694_v14, %v4933_v16  ;;  %v11818_v6 = vadd.f32 %v4936_v44, %v4934_v53  ;;  %v7069_v16 = vld [vmem:[%s12252_s12 + $0x38] ss:$24 sps:$4 sm:$0xff]  }
0x1224   :  { %v13454_v53 = vld [vmem:[#allocation77_spill] sm:$0xff]  ;;  %v13456_v44 = vld [vmem:[#allocation76_spill] sm:$0xff] }
0x1225   :  { %v11820_v47 = vadd.f32 %v4937_v59, %v4935_v12  ;;  %v11826_v38 = vpack.c.bf16 %v11818_v6, %v11818_v6  ;;  %v13455_v14 = vld [vmem:[#allocation37_spill] sm:$0xff]  ;;  %v13458_v59 = vld [vmem:[#allocation43_spill] sm:$0xff] }
0x1226   :  { %v13457_v12 = vld [vmem:[#allocation13_spill] sm:$0xff] }
0x1227   :  { %v4941_v46 = vpack.c.bf16 %v11820_v47, %v11820_v47 }
0x1229   :  { %4974 = vmatprep.mubr.bf16.mxu0 %v4941_v46  ;;  %5015 = vmatprep.mubr.bf16.mxu1 %v4941_v46 }
0x122a   :  { %4975 = vmatmul.mubr.bf16.vlgmr.msra.gmra.mxu0 %v11826_v38  ;;  %5016 = vmatmul.mubr.bf16.vlgmr.msra.gmra.mxu1 %v11826_v38 }
0x122b   :  { %5025 = vmatpush1.bf16.msra.mxu0 %v11224_v28  ;;  %5056 = vmatprep.mubr.bf16.mxu0 %v4941_v46  ;;  %v7032_v28 = vld [vmem:[%s12252_s12 + $0x94] ss:$24 sps:$4 sm:$0xff]   ;;  %v13459_v46 = vld [vmem:[#allocation53_spill] sm:$0xff] }
0x122c   :  { %5026 = vmatprep.subr.bf16.mxu0 %v11230_v55  ;;  %5112 = vmatpush1.bf16.msra.mxu1 %v11674_v1  ;;  %v7033_v55 = vld [vmem:[%s12252_s12 + $0x64] ss:$24 sps:$4 sm:$0xff]   ;;  %v7055_v1 = vld [vmem:[%s12252_s12 + $0x180] ss:$24 sps:$4 sm:$0xff]  }
0x122d   :  { %5113 = vmatprep.subr.bf16.mxu1 %v11680_v0  ;;  %v7056_v0 = vld [vmem:[%s12252_s12 + $0x164] ss:$24 sps:$4 sm:$0xff]  }
0x122f   :  { %5027 = vmatpush1.bf16.msra.mxu0 %v11238_v23  ;;  %v7034_v23 = vld [vmem:[%s12252_s12 + $0x60] ss:$24 sps:$4 sm:$0xff]  }
0x1230   :  { %5028 = vmatprep.subr.bf16.mxu0 %v11244_v29  ;;  %5114 = vmatpush1.bf16.msra.mxu1 %v11688_v37  ;;  %v7035_v29 = vld [vmem:[%s12252_s12 + $0x34] ss:$24 sps:$4 sm:$0xff]   ;;  %v7057_v37 = vld [vmem:[%s12252_s12 + $0x158] ss:$24 sps:$4 sm:$0xff]  }
0x1231   :  { %5115 = vmatprep.subr.bf16.mxu1 %v11694_v2  ;;  %v7058_v2 = vld [vmem:[%s12252_s12 + $0x12c] ss:$24 sps:$4 sm:$0xff]  }
0x1233   :  { %5029 = vmatpush1.bf16.msra.mxu0 %v11252_v31  ;;  %v7036_v31 = vld [vmem:[%s12252_s12 + $0x30] ss:$24 sps:$4 sm:$0xff]  }
0x1234   :  { %5030 = vmatprep.subr.bf16.mxu0 %v11258_v18  ;;  %5116 = vmatpush1.bf16.msra.mxu1 %v11702_v9  ;;  %v7037_v18 = vld [vmem:[%s12252_s12 + $0x4] ss:$24 sps:$4 sm:$0xff]   ;;  %v7059_v9 = vld [vmem:[%s12252_s12 + $0x128] ss:$24 sps:$4 sm:$0xff]  }
0x1235   :  { %5117 = vmatprep.subr.bf16.mxu1 %v11708_v41  ;;  %v7060_v41 = vld [vmem:[%s12252_s12 + $0xfc] ss:$24 sps:$4 sm:$0xff]  }
0x1237   :  { %5031 = vmatpush1.bf16.msra.mxu0 %v11266_v30  ;;  %v7038_v30 = vld [vmem:[%s12252_s12] ss:$24 sps:$4 sm:$0xff]  }
0x1238   :  { %5032 = vmatprep.subr.bf16.mxu0 %v11272_v58  ;;  %5118 = vmatpush1.bf16.msra.mxu1 %v11716_v42  ;;  %v7039_v58 = vld [vmem:[%s12252_s12 + $0x2d4] ss:$24 sps:$4 sm:$0xff]   ;;  %v7061_v42 = vld [vmem:[%s12252_s12 + $0xf8] ss:$24 sps:$4 sm:$0xff]  }
0x1239   :  { %5119 = vmatprep.subr.bf16.mxu1 %v7032_v28  ;;  %v13461_v28 = vld [vmem:[#allocation2_spill] sm:$0xff] }
0x123b   :  { %5033 = vmatpush1.bf16.msra.mxu0 %v11280_v34  ;;  %v7040_v34 = vld [vmem:[%s12252_s12 + $0x2d0] ss:$24 sps:$4 sm:$0xff]  }
0x123c   :  { %5034 = vmatprep.subr.bf16.mxu0 %v11286_v26  ;;  %5120 = vmatpush1.bf16.msra.mxu1 %v11725_v43  ;;  %v7042_v26 = vld [vmem:[%s12252_s12 + $0x2a0] ss:$24 sps:$4 sm:$0xff]   ;;  %v7062_v43 = vld [vmem:[%s12252_s12 + $0xcc] ss:$24 sps:$4 sm:$0xff]  }
0x123d   :  { %5121 = vmatprep.subr.bf16.mxu1 %v7033_v55  ;;  %v13462_v55 = vld [vmem:[#allocation3_spill] sm:$0xff] }
0x123f   :  { %5035 = vmatpush1.bf16.msra.mxu0 %v11294_v4  ;;  %v7043_v4 = vld [vmem:[%s12252_s12 + $0x274] ss:$24 sps:$4 sm:$0xff]  }
0x1240   :  { %5036 = vmatprep.subr.bf16.mxu0 %v11300_v39  ;;  %5122 = vmatpush1.bf16.msra.mxu1 %v7034_v23  ;;  %v7044_v39 = vld [vmem:[%s12252_s12 + $0x270] ss:$24 sps:$4 sm:$0xff]   ;;  %v13463_v23 = vld [vmem:[#allocation54_spill] sm:$0xff] }
0x1241   :  { %5123 = vmatprep.subr.bf16.mxu1 %v7035_v29  ;;  %v6397_v29 = vld [vmem:[%s12257_s15 + $0x78] sm:$0xff]  }
0x1243   :  { %5037 = vmatpush1.bf16.msra.mxu0 %v11308_v54  ;;  %v7046_v54 = vld [vmem:[%s12252_s12 + $0x240] ss:$24 sps:$4 sm:$0xff]  }
0x1244   :  { %5038 = vmatprep.subr.bf16.mxu0 %v11314_v62  ;;  %5124 = vmatpush1.bf16.msra.mxu1 %v7036_v31  ;;  %v7048_v62 = vld [vmem:[%s12252_s12 + $0x210] ss:$24 sps:$4 sm:$0xff]  }
0x1245   :  { %5125 = vmatprep.subr.bf16.mxu1 %v7037_v18 }
0x1247   :  { %5039 = vmatpush1.bf16.msra.mxu0 %v13341_v19  ;;  %v7051_v19 = vld [vmem:[%s12252_s12 + $0x1b4] ss:$24 sps:$4 sm:$0xff]  }
0x1248   :  { %5040 = vmatprep.subr.bf16.mxu0 %v11328_v24  ;;  %5126 = vmatpush1.bf16.msra.mxu1 %v7038_v30  ;;  %v7041_v24 = vld [vmem:[%s12252_s12 + $0x2a4] ss:$24 sps:$4 sm:$0xff]  }
0x1249   :  { %5127 = vmatprep.subr.bf16.mxu1 %v7039_v58 }
0x124b   :  { %5041 = vmatpush2.bf16.msra.mxu0 %v13343_v52  ;;  %v7052_v52 = vld [vmem:[%s12252_s12 + $0x1b0] ss:$24 sps:$4 sm:$0xff]  }
0x124c   :  { %5042 = vmatprep.subr.bf16.mxu0 %v11342_v33  ;;  %5128 = vmatpush2.bf16.msra.mxu1 %v7040_v34  ;;  %v7050_v33 = vld [vmem:[%s12252_s12 + $0x1e0] ss:$24 sps:$4 sm:$0xff]  }
0x124d   :  { %5129 = vmatprep.subr.bf16.mxu1 %v7041_v24 }
0x124f   :  { %5043 = vmatpush2.bf16.msra.mxu0 %v13345_v13  ;;  %v7053_v13 = vld [vmem:[%s12252_s12 + $0x184] ss:$24 sps:$4 sm:$0xff]  }
0x1250   :  { %5044 = vmatprep.subr.bf16.mxu0 %v11356_v61  ;;  %5130 = vmatpush2.bf16.msra.mxu1 %v7042_v26  ;;  %v7045_v61 = vld [vmem:[%s12252_s12 + $0x244] ss:$24 sps:$4 sm:$0xff]  }
0x1251   :  { %5131 = vmatprep.subr.bf16.mxu1 %v7043_v4 }
0x1253   :  { %5045 = vmatpush2.bf16.msra.mxu0 %v13347_v32  ;;  %v13452_v32 = vld [vmem:[#allocation5_spill] sm:$0xff] }
0x1254   :  { %5046 = vmatprep.subr.bf16.mxu0 %v11370_v36  ;;  %5132 = vmatpush2.bf16.msra.mxu1 %v7044_v39  ;;  %v7047_v36 = vld [vmem:[%s12252_s12 + $0x214] ss:$24 sps:$4 sm:$0xff]  }
0x1255   :  { %5133 = vmatprep.subr.bf16.mxu1 %v7045_v61 }
0x1257   :  { %5047 = vmatpush2.bf16.msra.mxu0 %v13349_v11  ;;  %v7054_v11 = vld [vmem:[%s12252_s12 + $0x15c] ss:$24 sps:$4 sm:$0xff]  }
0x1258   :  { %5048 = vmatprep.subr.bf16.mxu0 %v11384_v63  ;;  %5134 = vmatpush2.bf16.msra.mxu1 %v7046_v54  ;;  %v7049_v63 = vld [vmem:[%s12252_s12 + $0x1e4] ss:$24 sps:$4 sm:$0xff]  }
0x1259   :  { %5135 = vmatprep.subr.bf16.mxu1 %v7047_v36 }
0x125b   :  { %5049 = vmatpush2.bf16.msra.mxu0 %v13403_v49  ;;  %v7063_v49 = vld [vmem:[%s12252_s12 + $0xc8] ss:$24 sps:$4 sm:$0xff]  }
0x125c   :  { %5050 = vmatprep.subr.bf16.mxu0 %v13404_v15  ;;  %5136 = vmatpush2.bf16.msra.mxu1 %v7048_v62  ;;  %v7064_v15 = vld [vmem:[%s12252_s12 + $0x9c] ss:$24 sps:$4 sm:$0xff]  }
0x125d   :  { %5137 = vmatprep.subr.bf16.mxu1 %v7049_v63  ;;  %v13464_v62 = vld [vmem:[#allocation17_spill] sm:$0xff] }
0x125f   :  { %5051 = vmatpush2.bf16.msra.mxu0 %v13407_v21  ;;  %v7065_v21 = vld [vmem:[%s12252_s12 + $0x98] ss:$24 sps:$4 sm:$0xff]  }
0x1260   :  { %5052 = vmatprep.subr.bf16.mxu0 %v13408_v60  ;;  %5138 = vmatpush2.bf16.msra.mxu1 %v7050_v33  ;;  %v7066_v60 = vld [vmem:[%s12252_s12 + $0x6c] ss:$24 sps:$4 sm:$0xff]  }
0x1261   :  { %5139 = vmatprep.subr.bf16.mxu1 %v7051_v19 }
0x1263   :  { %5053 = vmatpush2.bf16.msra.mxu0 %v13411_v20  ;;  %v7067_v20 = vld [vmem:[%s12252_s12 + $0x68] ss:$24 sps:$4 sm:$0xff]  }
0x1264   :  { %5054 = vmatprep.subr.bf16.mxu0 %v13412_v56  ;;  %5140 = vmatpush2.bf16.msra.mxu1 %v7052_v52  ;;  %v7068_v56 = vld [vmem:[%s12252_s12 + $0x3c] ss:$24 sps:$4 sm:$0xff]  }
0x1265   :  { %5141 = vmatprep.subr.bf16.mxu1 %v7053_v13 }
0x1267   :  { %5055 = vmatpush2.bf16.msra.mxu0 %v13452_v32 }
0x1268   :  { %5152 = vmatprep.subr.bf16.mxu0 %v7054_v11  ;;  %5142 = vmatpush2.bf16.msra.mxu1 %v7055_v1 }
0x1269   :  { %5193 = vmatprep.subr.bf16.mxu1 %v7056_v0 }
0x126a   :  { %5057 = vmatmul.mubr.bf16.vlgmr.msra.gmra.mxu0 %v11826_v38  ;;  %v13460_v38 = vld [vmem:[#allocation55_spill] sm:$0xff] }
0x126b   :  { %5153 = vmatpush1.bf16.msra.mxu0 %v7057_v37 }
0x126c   :  { %5154 = vmatprep.subr.bf16.mxu0 %v7058_v2 }
0x126f   :  { %5155 = vmatpush1.bf16.msra.mxu0 %v7059_v9 }
0x1270   :  { %5156 = vmatprep.subr.bf16.mxu0 %v7060_v41 }
0x1273   :  { %5157 = vmatpush1.bf16.msra.mxu0 %v7061_v42  ;;  %v13465_v42 = vld [vmem:[#allocation33_spill] sm:$0xff] }
0x1274   :  { %5158 = vmatprep.subr.bf16.mxu0 %v7062_v43 }
0x1277   :  { %5159 = vmatpush1.bf16.msra.mxu0 %v7063_v49 }
0x1278   :  { %5160 = vmatprep.subr.bf16.mxu0 %v7064_v15 }
0x127b   :  { %5161 = vmatpush1.bf16.msra.mxu0 %v7065_v21 }
0x127c   :  { %5162 = vmatprep.subr.bf16.mxu0 %v7066_v60 }
0x127f   :  { %5163 = vmatpush1.bf16.msra.mxu0 %v7067_v20 }
0x1280   :  { %5164 = vmatprep.subr.bf16.mxu0 %v7068_v56 }
0x1283   :  { %5165 = vmatpush1.bf16.msra.mxu0 %v7069_v16 }
0x1284   :  { %5166 = vmatprep.subr.bf16.mxu0 %v7070_v5 }
0x1287   :  { %5167 = vmatpush1.bf16.msra.mxu0 %v7071_v35 }
0x1288   :  { %5168 = vmatprep.subr.bf16.mxu0 %v7072_v51 }
0x128b   :  { %5169 = vmatpush2.bf16.msra.mxu0 %v7073_v25 }
0x128c   :  { %5170 = vmatprep.subr.bf16.mxu0 %v7074_v7 }
0x128f   :  { %5171 = vmatpush2.bf16.msra.mxu0 %v7075_v27 }
0x1290   :  { %5172 = vmatprep.subr.bf16.mxu0 %v7076_v50 }
0x1293   :  { %5173 = vmatpush2.bf16.msra.mxu0 %v13453_v17 }
0x1294   :  { %5174 = vmatprep.subr.bf16.mxu0 %v13454_v53 }
0x1297   :  { %5175 = vmatpush2.bf16.msra.mxu0 %v13455_v14 }
0x1298   :  { %5176 = vmatprep.subr.bf16.mxu0 %v13456_v44 }
0x129b   :  { %5177 = vmatpush2.bf16.msra.mxu0 %v13457_v12 }
0x129c   :  { %5178 = vmatprep.subr.bf16.mxu0 %v13458_v59 }
0x129f   :  { %5179 = vmatpush2.bf16.msra.mxu0 %v13459_v46 }
0x12a0   :  { %5180 = vmatprep.subr.bf16.mxu0 %v13460_v38 }
0x12a3   :  { %5181 = vmatpush2.bf16.msra.mxu0 %v13461_v28 }
0x12a4   :  { %5182 = vmatprep.subr.bf16.mxu0 %v13462_v55  ;;  %v6398_v55 = vld [vmem:[%s12257_s15 + $0x38] sm:$0xff]  }
0x12a7   :  { %5183 = vmatpush2.bf16.msra.mxu0 %v13463_v23 }
0x12a8   :  { %5891 = vmatprep.subr.bf16.mxu0 %v6397_v29  ;;  %v6399_v29 = vld [vmem:[%s12257_s15 + $0x70] sm:$0xff]  }
0x12ea   :  { %v4976_v31 = vpop.f32.mrf.mxu0  ;;  %v5017_v18 = vpop.f32.mrf.mxu1 }
0x12eb   :  { %v5065_v39 = vadd.f32 %v4976_v31, %v10657_v10  ;;  %v5079_v63 = vadd.f32 %v5017_v18, %v13464_v62  ;;  %v13466_v31 = vld [vmem:[#allocation21_spill] sm:$0xff] }
0x12ec   :  { %v4978_v30 = vpop.f32.mrf.mxu0  ;;  %v5019_v58 = vpop.f32.mrf.mxu1  ;;  %v13467_v18 = vld [vmem:[#allocation65_spill] sm:$0xff] }
0x12ed   :  { %v5066_v61 = vadd.f32 %v4978_v30, %v13242_v48  ;;  %v5844_v54 = vmul.f32 -1.442695, %v5065_v39  ;;  %v5080_v33 = vadd.f32 %v5019_v58, %v13243_v8  ;;  %v5846_v19 = vmul.f32 -1.442695, %v5079_v63  ;;  %v7077_v58 = vld [vmem:[%s12252_s12 + $0x160] ss:$24 sps:$4 sm:$0xff]  }
0x12ee   :  { %v4980_v34 = vpop.f32.mrf.mxu0  ;;  %v5021_v24 = vpop.f32.mrf.mxu1  ;;  %v5279_v30 = vpack.c.bf16 %v13467_v18, %v13466_v31  ;;  %v6402_v39 = vld [vmem:[%s12257_s15 + $0x28] sm:$0xff]   ;;  %v6404_v63 = vld [vmem:[%s12257_s15 + $0x20] sm:$0xff]  }
0x12ef   :  { %v5845_v36 = vmul.f32 -1.442695, %v5066_v61  ;;  %6695 = vpow2.f32 %v5844_v54  ;;  %v5847_v52 = vmul.f32 -1.442695, %v5080_v33  ;;  %v6400_v34 = vld [vmem:[%s12257_s15 + $0x30] sm:$0xff]   ;;  %v6401_v24 = vld [vmem:[%s12257_s15 + $0x68] sm:$0xff]  }
0x12f0   :  { %v4981_v26 = vpop.f32.mrf.mxu0  ;;  %v5022_v4 = vpop.f32.mrf.mxu1  ;;  %v7080_v61 = vld [vmem:[%s12252_s12 + $0x104] ss:$24 sps:$4 sm:$0xff]   ;;  %v7082_v33 = vld [vmem:[%s12252_s12 + $0xd4] ss:$24 sps:$4 sm:$0xff]   ;;  %v7101_v31 = vld [vmem:[%s12252_s12 + $0x220] ss:$24 sps:$4 sm:$0xff]  }
0x12f1   :  { %6697 = vpow2.f32 %v5845_v36  ;;  %v7078_v26 = vld [vmem:[%s12252_s12 + $0x134] ss:$24 sps:$4 sm:$0xff]   ;;  %v7079_v4 = vld [vmem:[%s12252_s12 + $0x130] ss:$24 sps:$4 sm:$0xff]   ;;  %v6403_v54 = vld [vmem:[%s12257_s15 + $0x60] sm:$0xff]  }
0x12f2   :  { %6699 = vpow2.f32 %v5846_v19  ;;  %v7081_v36 = vld [vmem:[%s12252_s12 + $0x100] ss:$24 sps:$4 sm:$0xff]   ;;  %v7102_v18 = vld [vmem:[%s12252_s12 + $0x1f4] ss:$24 sps:$4 sm:$0xff]  }
0x12f3   :  { %6701 = vpow2.f32 %v5847_v52  ;;  %v6405_v19 = vld [vmem:[%s12257_s15 + $0x58] sm:$0xff]   ;;  %v7083_v52 = vld [vmem:[%s12252_s12 + $0xd0] ss:$24 sps:$4 sm:$0xff]  }
0x12fc   :  { %v6696_v13 = vpop.eup %6695 }
0x12fd   :  { %v5073_v11 = vadd.f32 1.0, %v6696_v13  ;;  %v6406_v13 = vld [vmem:[%s12257_s15 + $0x18] sm:$0xff]  }
0x12fe   :  { %v6698_v32 = vpop.eup %6697 }
0x12ff   :  { %v5074_v1 = vadd.f32 1.0, %v6698_v32  ;;  %6703 = vrcp.f32 %v5073_v11  ;;  %v6700_v0 = vpop.eup %6699  ;;  %v7084_v32 = vld [vmem:[%s12252_s12 + $0xa4] ss:$24 sps:$4 sm:$0xff]   ;;  %v6407_v11 = vld [vmem:[%s12257_s15 + $0x50] sm:$0xff]  }
0x1300   :  { %v6702_v37 = vpop.eup %6701  ;;  %v5087_v2 = vadd.f32 1.0, %v6700_v0  ;;  %v6408_v0 = vld [vmem:[%s12257_s15 + $0x10] sm:$0xff]  }
0x1301   :  { %6705 = vrcp.f32 %v5074_v1  ;;  %v5088_v41 = vadd.f32 1.0, %v6702_v37  ;;  %v7085_v1 = vld [vmem:[%s12252_s12 + $0xa0] ss:$24 sps:$4 sm:$0xff]   ;;  %v7086_v37 = vld [vmem:[%s12252_s12 + $0x74] ss:$24 sps:$4 sm:$0xff]  }
0x1302   :  { %6707 = vrcp.f32 %v5087_v2  ;;  %v6409_v2 = vld [vmem:[%s12257_s15 + $0x48] sm:$0xff]  }
0x1303   :  { %6709 = vrcp.f32 %v5088_v41  ;;  %v6410_v41 = vld [vmem:[%s12257_s15 + $0x8] sm:$0xff]  }
0x130c   :  { %v6704_v49 = vpop.eup %6703 }
0x130e   :  { %v6706_v20 = vpop.eup %6705 }
0x130f   :  { %v6708_v25 = vpop.eup %6707 }
0x1310   :  { %v6710_v7 = vpop.eup %6709  ;;  %v5101_v27 = vsub.f32 1.0, %v6708_v25  ;;  %v5105_v44 = vmul.f32 %v6708_v25, %v11818_v6  ;;  %v13471_v25 = vld [vmem:[#allocation4_spill] sm:$0xff] }
0x1311   :  { %v5102_v17 = vsub.f32 1.0, %v6710_v7  ;;  %v5106_v59 = vmul.f32 %v6710_v7, %v11820_v47 }
0x132a   :  { %v5058_v9 = vpop.f32.mrf.mxu0 }
0x132b   :  { %v5093_v43 = vadd.f32 %v5058_v9, %v13465_v42  ;;  %v7087_v9 = vld [vmem:[%s12252_s12 + $0x70] ss:$24 sps:$4 sm:$0xff]  }
0x132c   :  { %v5060_v15 = vpop.f32.mrf.mxu0 }
0x132d   :  { %v5095_v21 = vmul.f32 %v6704_v49, %v5093_v43  ;;  %v5094_v60 = vadd.f32 %v5060_v15, %v10685_v3  ;;  %v7088_v43 = vld [vmem:[%s12252_s12 + $0x44] ss:$24 sps:$4 sm:$0xff]   ;;  %v7089_v15 = vld [vmem:[%s12252_s12 + $0x40] ss:$24 sps:$4 sm:$0xff]  }
0x132e   :  { %v5062_v56 = vpop.f32.mrf.mxu0  ;;  %v6411_v49 = vld [vmem:[%s12257_s15 + $0x40] sm:$0xff]  }
0x132f   :  { %v5097_v16 = vadd.f32 %v5095_v21, %v10691_v57  ;;  %v5096_v5 = vmul.f32 %v6706_v20, %v5094_v60  ;;  %v6412_v21 = vld [vmem:[%s12257_s15] sm:$0xff]   ;;  %v7090_v60 = vld [vmem:[%s12252_s12 + $0x14] ss:$24 sps:$4 sm:$0xff]   ;;  %v7091_v20 = vld [vmem:[%s12252_s12 + $0x10] ss:$24 sps:$4 sm:$0xff]  }
0x1330   :  { %v5063_v35 = vpop.f32.mrf.mxu0  ;;  %v7092_v56 = vld [vmem:[%s12252_s12 + $0x2e4] ss:$24 sps:$4 sm:$0xff]  }
0x1331   :  { %6711 = vtanh.f32 %v5097_v16  ;;  %v5098_v51 = vadd.f32 %v5096_v5, %v10695_v40  ;;  %v13468_v16 = vld [vmem:[#allocation35_spill] sm:$0xff] }
0x1332   :  { %v13469_v5 = vld [vmem:[#allocation67_spill] sm:$0xff] }
0x1333   :  { %6713 = vtanh.f32 %v5098_v51  ;;  %v5278_v35 = vpack.c.bf16 %v13469_v5, %v13468_v16  ;;  %v13470_v51 = vld [vmem:[#allocation81_spill] sm:$0xff] }
0x1334   :  { %v5281_v7 = vpack.c.bf16 %v13471_v25, %v13470_v51 }
0x133e   :  { %v6712_v50 = vpop.eup %6711 }
0x133f   :  { %v5103_v53 = vmul.f32 %v6712_v50, %v5101_v27  ;;  %v7093_v27 = vld [vmem:[%s12252_s12 + $0x2e0] ss:$24 sps:$4 sm:$0xff]   ;;  %v7094_v50 = vld [vmem:[%s12252_s12 + $0x2b4] ss:$24 sps:$4 sm:$0xff]  }
0x1340   :  { %v6714_v14 = vpop.eup %6713 }
0x1341   :  { %v5104_v12 = vmul.f32 %v6714_v14, %v5102_v17  ;;  %v12029_v46 = vadd.f32 %v5105_v44, %v5103_v53  ;;  %v7095_v17 = vld [vmem:[%s12252_s12 + $0x2b0] ss:$24 sps:$4 sm:$0xff]   ;;  %v7096_v53 = vld [vmem:[%s12252_s12 + $0x284] ss:$24 sps:$4 sm:$0xff]  }
0x1342   :  { %v13472_v14 = vld [vmem:[#allocation26_spill] sm:$0xff]  ;;  %v13473_v44 = vld [vmem:[#allocation56_spill] sm:$0xff] }
0x1343   :  { %v12031_v38 = vadd.f32 %v5106_v59, %v5104_v12  ;;  %v12040_v23 = vpack.c.bf16 %v12029_v46, %v12029_v46  ;;  %v5280_v12 = vpack.c.bf16 %v13473_v44, %v13472_v14  ;;  %v5283_v59 = vpack.c.bf16 %v11820_v47, %v11659_v45  ;;  %v7100_v45 = vld [vmem:[%s12252_s12 + $0x224] ss:$24 sps:$4 sm:$0xff]  }
0x1344   :  { %v5282_v47 = vpack.c.bf16 %v11818_v6, %v11657_v22  ;;  %v7104_v22 = vld [vmem:[%s12252_s12 + $0x1c4] ss:$24 sps:$4 sm:$0xff]   ;;  %v7105_v6 = vld [vmem:[%s12252_s12 + $0x1c0] ss:$24 sps:$4 sm:$0xff]  }
0x1345   :  { %v5110_v28 = vpack.c.bf16 %v12031_v38, %v12031_v38 }
0x1347   :  { %5143 = vmatprep.mubr.bf16.mxu1 %v5110_v28  ;;  %5184 = vmatprep.mubr.bf16.mxu0 %v5110_v28 }
0x1348   :  { %5144 = vmatmul.mubr.bf16.vlgmr.msra.gmra.mxu1 %v12040_v23  ;;  %5185 = vmatmul.mubr.bf16.vlgmr.msra.gmra.mxu0 %v12040_v23 }
0x1349   :  { %5194 = vmatpush1.bf16.msra.mxu1 %v7077_v58  ;;  %5892 = vmatpush3.bf16.msra.mxu0 %v6398_v55  ;;  %v7098_v55 = vld [vmem:[%s12252_s12 + $0x254] ss:$24 sps:$4 sm:$0xff]  }
0x134a   :  { %5225 = vmatprep.mubr.bf16.mxu1 %v5110_v28  ;;  %5421 = vmatprep.mubr.bf16.mxu0 %v5279_v30  ;;  %v7097_v28 = vld [vmem:[%s12252_s12 + $0x280] ss:$24 sps:$4 sm:$0xff]   ;;  %v7103_v30 = vld [vmem:[%s12252_s12 + $0x1f0] ss:$24 sps:$4 sm:$0xff]   ;;  %v7106_v58 = vld [vmem:[%s12252_s12 + $0x194] ss:$24 sps:$4 sm:$0xff]  }
0x134b   :  { %5195 = vmatprep.subr.bf16.mxu1 %v7078_v26  ;;  %5893 = vmatprep.subr.bf16.mxu0 %v6399_v29  ;;  %v7099_v29 = vld [vmem:[%s12252_s12 + $0x250] ss:$24 sps:$4 sm:$0xff]  }
0x134d   :  { %5196 = vmatpush1.bf16.msra.mxu1 %v7079_v4  ;;  %5894 = vmatpush3.bf16.msra.mxu0 %v6400_v34  ;;  %v7107_v34 = vld [vmem:[%s12252_s12 + $0x190] ss:$24 sps:$4 sm:$0xff]  }
0x134e   :  { %5197 = vmatprep.subr.bf16.mxu1 %v7080_v61  ;;  %5895 = vmatprep.subr.bf16.mxu0 %v6401_v24 }
0x1351   :  { %5198 = vmatpush1.bf16.msra.mxu1 %v7081_v36  ;;  %5896 = vmatpush3.bf16.msra.mxu0 %v6402_v39 }
0x1352   :  { %5199 = vmatprep.subr.bf16.mxu1 %v7082_v33  ;;  %5897 = vmatprep.subr.bf16.mxu0 %v6403_v54 }
0x1355   :  { %5200 = vmatpush1.bf16.msra.mxu1 %v7083_v52  ;;  %5898 = vmatpush3.bf16.msra.mxu0 %v6404_v63 }
0x1356   :  { %5201 = vmatprep.subr.bf16.mxu1 %v7084_v32  ;;  %5899 = vmatprep.subr.bf16.mxu0 %v6405_v19 }
0x1359   :  { %5202 = vmatpush1.bf16.msra.mxu1 %v7085_v1  ;;  %5900 = vmatpush3.bf16.msra.mxu0 %v6406_v13 }
0x135a   :  { %5203 = vmatprep.subr.bf16.mxu1 %v7086_v37  ;;  %5901 = vmatprep.subr.bf16.mxu0 %v6407_v11 }
0x135d   :  { %5204 = vmatpush1.bf16.msra.mxu1 %v7087_v9  ;;  %5902 = vmatpush3.bf16.msra.mxu0 %v6408_v0 }
0x135e   :  { %5205 = vmatprep.subr.bf16.mxu1 %v7088_v43  ;;  %5903 = vmatprep.subr.bf16.mxu0 %v6409_v2 }
0x1361   :  { %5206 = vmatpush1.bf16.msra.mxu1 %v7089_v15  ;;  %5904 = vmatpush3.bf16.msra.mxu0 %v6410_v41 }
0x1362   :  { %5207 = vmatprep.subr.bf16.mxu1 %v7090_v60  ;;  %5905 = vmatprep.subr.bf16.mxu0 %v6411_v49 }
0x1365   :  { %5208 = vmatpush1.bf16.msra.mxu1 %v7091_v20  ;;  %5906 = vmatpush3.bf16.msra.mxu0 %v6412_v21 }
0x1366   :  { %5209 = vmatprep.subr.bf16.mxu1 %v7092_v56 }
0x1368   :  { %5422 = vmatmul.mubr.bf16.vlgmr.msra.gmra.mxu0 %v5278_v35 }
0x1369   :  { %5210 = vmatpush2.bf16.msra.mxu1 %v7093_v27  ;;  %5429 = vmatprep.mubr.bf16.mxu0 %v5281_v7 }
0x136a   :  { %5211 = vmatprep.subr.bf16.mxu1 %v7094_v50 }
0x136d   :  { %5212 = vmatpush2.bf16.msra.mxu1 %v7095_v17 }
0x136e   :  { %5213 = vmatprep.subr.bf16.mxu1 %v7096_v53 }
0x1370   :  { %5430 = vmatmul.mubr.bf16.gmra.mxu0 %v5280_v12 }
0x1371   :  { %5214 = vmatpush2.bf16.msra.mxu1 %v7097_v28  ;;  %5437 = vmatprep.mubr.bf16.mxu0 %v5283_v59 }
0x1372   :  { %5215 = vmatprep.subr.bf16.mxu1 %v7098_v55 }
0x1375   :  { %5216 = vmatpush2.bf16.msra.mxu1 %v7099_v29 }
0x1376   :  { %5217 = vmatprep.subr.bf16.mxu1 %v7100_v45 }
0x1378   :  { %5438 = vmatmul.mubr.bf16.gmra.mxu0 %v5282_v47 }
0x1379   :  { %5218 = vmatpush2.bf16.msra.mxu1 %v7101_v31 }
0x137a   :  { %5219 = vmatprep.subr.bf16.mxu1 %v7102_v18 }
0x137d   :  { %5220 = vmatpush2.bf16.msra.mxu1 %v7103_v30 }
0x137e   :  { %5221 = vmatprep.subr.bf16.mxu1 %v7104_v22 }
0x1381   :  { %5222 = vmatpush2.bf16.msra.mxu1 %v7105_v6 }
0x1382   :  { %5223 = vmatprep.subr.bf16.mxu1 %v7106_v58 }
0x1385   :  { %5224 = vmatpush2.bf16.msra.mxu1 %v7107_v34 }
0x1388   :  { %5226 = vmatmul.mubr.bf16.vlgmr.msra.gmra.mxu1 %v12040_v23  ;;  %v12197_v23 = vld [vmem:[%s12258_s16] ss:$0 sm:$0xff] }
0x1408   :  { %v5145_v24 = vpop.f32.mrf.mxu1  ;;  %v5186_v26 = vpop.f32.mrf.mxu0 }
0x1409   :  { %v5234_v33 = vadd.f32 %v5145_v24, %v10657_v10  ;;  %v5248_v10 = vadd.f32 %v5186_v26, %v13464_v62 }
0x140a   :  { %v5147_v4 = vpop.f32.mrf.mxu1  ;;  %v5188_v39 = vpop.f32.mrf.mxu0 }
0x140b   :  { %v5235_v19 = vadd.f32 %v5147_v4, %v13242_v48  ;;  %v5848_v52 = vmul.f32 -1.442695, %v5234_v33  ;;  %v5249_v41 = vadd.f32 %v5188_v39, %v13243_v8  ;;  %v5850_v15 = vmul.f32 -1.442695, %v5248_v10 }
0x140c   :  { %v5149_v61 = vpop.f32.mrf.mxu1  ;;  %v5190_v54 = vpop.f32.mrf.mxu0 }
0x140d   :  { %v5849_v13 = vmul.f32 -1.442695, %v5235_v19  ;;  %6715 = vpow2.f32 %v5848_v52  ;;  %v5851_v20 = vmul.f32 -1.442695, %v5249_v41 }
0x140e   :  { %v5150_v36 = vpop.f32.mrf.mxu1  ;;  %v5191_v63 = vpop.f32.mrf.mxu0 }
0x140f   :  { %6717 = vpow2.f32 %v5849_v13 }
0x1410   :  { %6719 = vpow2.f32 %v5850_v15 }
0x1411   :  { %6721 = vpow2.f32 %v5851_v20 }
0x141a   :  { %v6716_v56 = vpop.eup %6715 }
0x141b   :  { %v5242_v51 = vadd.f32 1.0, %v6716_v56 }
0x141c   :  { %v6718_v5 = vpop.eup %6717 }
0x141d   :  { %v5243_v27 = vadd.f32 1.0, %v6718_v5  ;;  %6723 = vrcp.f32 %v5242_v51  ;;  %v6720_v59 = vpop.eup %6719 }
0x141e   :  { %v6722_v28 = vpop.eup %6721  ;;  %v5256_v55 = vadd.f32 1.0, %v6720_v59 }
0x141f   :  { %6725 = vrcp.f32 %v5243_v27  ;;  %v5257_v45 = vadd.f32 1.0, %v6722_v28 }
0x1420   :  { %6727 = vrcp.f32 %v5256_v55 }
0x1421   :  { %6729 = vrcp.f32 %v5257_v45 }
0x1428   :  { %v5907_v32 = vpop.f32.mrf.mxu0 }
0x142a   :  { %v5908_v11 = vpop.f32.mrf.mxu0  ;;  %v6724_v31 = vpop.eup %6723 }
0x142b   :  { %v5909_v1 = vadd.f32 %v5908_v11, %v5907_v32 }
0x142c   :  { %v5910_v0 = vpop.f32.mrf.mxu0  ;;  %v6726_v6 = vpop.eup %6725 }
0x142d   :  { %v5424_v37 = vadd.f32 %v5909_v1, %v12197_v23  ;;  %v6728_v39 = vpop.eup %6727 }
0x142e   :  { %v5911_v2 = vpop.f32.mrf.mxu0  ;;  %v6730_v61 = vpop.eup %6729 }
0x142f   :  { %5454 = vst [vmem:[%s12259_s17] sm:$0xff] %v5424_v37  ;;  %v5912_v48 = vadd.f32 %v5911_v2, %v5910_v0  ;;  %v5271_v36 = vsub.f32 1.0, %v6730_v61  ;;  %v5275_v52 = vmul.f32 %v6730_v61, %v12031_v38 }
0x1430   :  { %v5913_v9 = vpop.f32.mrf.mxu0 }
0x1431   :  { %v5427_v43 = vadd.f32 %v5912_v48, %v12197_v23 }
0x1432   :  { %v5914_v49 = vpop.f32.mrf.mxu0 }
0x1433   :  { %5455 = vst [vmem:[%s12259_s17 + $0x8] sm:$0xff] %v5427_v43  ;;  %v5915_v21 = vadd.f32 %v5914_v49, %v5913_v9 }
0x1434   :  { %v5916_v60 = vpop.f32.mrf.mxu0 }
0x1435   :  { %v5432_v62 = vadd.f32 %v5915_v21, %v12197_v23 }
0x1436   :  { %v5917_v16 = vpop.f32.mrf.mxu0 }
0x1437   :  { %5456 = vst [vmem:[%s12259_s17 + $0x10] sm:$0xff] %v5432_v62  ;;  %v5918_v8 = vadd.f32 %v5917_v16, %v5916_v60 }
0x1438   :  { %v5919_v35 = vpop.f32.mrf.mxu0 }
0x1439   :  { %v5435_v25 = vadd.f32 %v5918_v8, %v12197_v23 }
0x143a   :  { %v5920_v7 = vpop.f32.mrf.mxu0 }
0x143b   :  { %5457 = vst [vmem:[%s12259_s17 + $0x18] sm:$0xff] %v5435_v25  ;;  %v5921_v50 = vadd.f32 %v5920_v7, %v5919_v35 }
0x143c   :  { %v5922_v17 = vpop.f32.mrf.mxu0 }
0x143d   :  { %v5440_v53 = vadd.f32 %v5921_v50, %v12197_v23 }
0x143e   :  { %v5923_v14 = vpop.f32.mrf.mxu0 }
0x143f   :  { %5458 = vst [vmem:[%s12259_s17 + $0x20] sm:$0xff] %v5440_v53  ;;  %v5924_v44 = vadd.f32 %v5923_v14, %v5922_v17 }
0x1441   :  { %v5443_v12 = vadd.f32 %v5924_v44, %v12197_v23 }
0x1443   :  { %5459 = vst [vmem:[%s12259_s17 + $0x28] sm:$0xff] %v5443_v12 }
0x1448   :  { %v5227_v29 = vpop.f32.mrf.mxu1 }
0x1449   :  { %v5262_v47 = vadd.f32 %v5227_v29, %v13465_v42  ;;  %v5270_v42 = vsub.f32 1.0, %v6728_v39 }
0x144a   :  { %v5229_v18 = vpop.f32.mrf.mxu1 }
0x144b   :  { %v5264_v30 = vmul.f32 %v6724_v31, %v5262_v47  ;;  %v5263_v22 = vadd.f32 %v5229_v18, %v10685_v3  ;;  %v5274_v3 = vmul.f32 %v6728_v39, %v12029_v46 }
0x144c   :  { %v5231_v58 = vpop.f32.mrf.mxu1 }
0x144d   :  { %v5266_v34 = vadd.f32 %v5264_v30, %v10691_v57  ;;  %v5265_v24 = vmul.f32 %v6726_v6, %v5263_v22 }
0x144e   :  { %v5232_v26 = vpop.f32.mrf.mxu1 }
0x144f   :  { %6731 = vtanh.f32 %v5266_v34  ;;  %v5267_v4 = vadd.f32 %v5265_v24, %v10695_v40 }
0x1451   :  { %6733 = vtanh.f32 %v5267_v4 }
0x145c   :  { %v6732_v54 = vpop.eup %6731 }
0x145d   :  { %v5272_v63 = vmul.f32 %v6732_v54, %v5270_v42 }
0x145e   :  { %v6734_v33 = vpop.eup %6733 }
0x145f   :  { %v5273_v19 = vmul.f32 %v6734_v33, %v5271_v36  ;;  %v5276_v13 = vadd.f32 %v5274_v3, %v5272_v63 }
0x1461   :  { %v5277_v57 = vadd.f32 %v5275_v52, %v5273_v19  ;;  %v5284_v11 = vpack.c.bf16 %v5276_v13, %v12029_v46 }
0x1463   :  { %v5285_v32 = vpack.c.bf16 %v5277_v57, %v12031_v38 }
0x1465   :  { %5445 = vmatprep.mubr.bf16.mxu0 %v5285_v32 }
0x1466   :  { %5446 = vmatmul.mubr.bf16.gmra.mxu0 %v5284_v11 }
0x1526   :  { %v5925_v40 = vpop.f32.mrf.mxu0 }
0x1528   :  { %v5926_v1 = vpop.f32.mrf.mxu0 }
0x1529   :  { %v5927_v0 = vadd.f32 %v5926_v1, %v5925_v40 }
0x152a   :  { %v5928_v37 = vpop.f32.mrf.mxu0 }
0x152b   :  { %v5448_v2 = vadd.f32 %v5927_v0, %v12197_v23 }
0x152c   :  { %v5929_v10 = vpop.f32.mrf.mxu0 }
0x152d   :  { %5460 = vst [vmem:[%s12259_s17 + $0x30] sm:$0xff] %v5448_v2  ;;  %v5930_v48 = vadd.f32 %v5929_v10, %v5928_v37 }
0x152f   :  { %v5451_v9 = vadd.f32 %v5930_v48, %v12197_v23 }
0x1531   :  { %5461 = vst [vmem:[%s12259_s17 + $0x38] sm:$0xff] %v5451_v9 }

</bundles_post_ra>
